<compile_context>
chip_gen: v5e
topology: v5e:2x2
jax: 0.10.0
libtpu: 0.0.40
codegen_flags: <defaults>
</compile_context>

<pallas_src>
import math

import jax
import jax.numpy as jnp
from jax.experimental import pallas as pl
from jax.experimental.pallas import tpu as pltpu


def cond_embed_kernel(t_ref, y_ref, freqs_ref, emb_ref,
                      w1s_ref, w1c_ref, b1_ref,
                      w2q_hbm, s2_ref, b2_ref,
                      w3tq_hbm, s3t_ref, w3l_hbm, b3_ref,
                      w4_hbm, b4_ref,
                      out_ref,
                      w2q_v, w3tq_v, w3l_v, w4_v, dma_sem):
    bf16 = jnp.bfloat16
    f32 = jnp.float32

    # ---- kick off the manual weight streams ASAP (overlap with layer-1 work) ----
    cp_w2 = pltpu.make_async_copy(w2q_hbm, w2q_v, dma_sem.at[0])
    cp_w3t = pltpu.make_async_copy(w3tq_hbm, w3tq_v, dma_sem.at[1])
    cp_w3l = pltpu.make_async_copy(w3l_hbm, w3l_v, dma_sem.at[2])
    cp_w4 = pltpu.make_async_copy(w4_hbm, w4_v, dma_sem.at[3])
    cp_w2.start()
    cp_w3t.start()
    cp_w3l.start()
    cp_w4.start()

    # ---- sinusoidal embedding (f32 elementwise on VPU/EUP) ----
    # e = t[:, None] * freqs[None, :]  computed in-kernel, lane-dense [B, half].
    e = t_ref[...] * freqs_ref[...]
    sin_e = jnp.sin(e)
    cos_e = jnp.cos(e)

    # ---- label embedding gather (resident f32 table, SMEM scalar indices) ----
    # Scalar reads happen before any DMA .wait() (keeps sst->sld forwarding).
    B = t_ref.shape[0]
    rows = [emb_ref[pl.ds(y_ref[i], 1), :] for i in range(B)]   # each [1, label_dim]
    l_emb = jnp.concatenate(rows, axis=0).astype(bf16)          # [B, label_dim]

    # ---- time_embed: Linear(256,1024) -> SiLU -> Linear(1024,1024) ----
    # concat([sin, cos]) @ W1  ==  sin @ W1_sin + cos @ W1_cos
    h1 = (jnp.dot(sin_e.astype(bf16), w1s_ref[...], preferred_element_type=f32)
          + jnp.dot(cos_e.astype(bf16), w1c_ref[...], preferred_element_type=f32)
          + b1_ref[...])
    h1 = h1 * jax.nn.sigmoid(h1)        # SiLU in f32

    # w2 is int8 with per-output-channel scales: dequant at the MXU boundary,
    # scale applied to the f32 accumulate (exact w.r.t. dequantized weights).
    cp_w2.wait()
    h2 = (jnp.dot(h1.astype(bf16), w2q_v[...].astype(bf16),
                  preferred_element_type=f32) * s2_ref[...]
          + b2_ref[...])

    # ---- fusion: Linear(1024+128, 512) -> SiLU -> Linear(512, 256) ----
    # concat([t_emb, l_emb]) @ W3  ==  t_emb @ W3_t + l_emb @ W3_l
    cp_w3t.wait()
    cp_w3l.wait()
    h3 = (jnp.dot(h2.astype(bf16), w3tq_v[...].astype(bf16),
                  preferred_element_type=f32) * s3t_ref[...]
          + jnp.dot(l_emb, w3l_v[...], preferred_element_type=f32)
          + b3_ref[...])
    h3 = h3 * jax.nn.sigmoid(h3)        # SiLU in f32

    cp_w4.wait()
    out_ref[...] = (jnp.dot(h3.astype(bf16), w4_v[...], preferred_element_type=f32)
                    + b4_ref[...])


def conditional_embedding(t, y, kparams, *, time_dim=256):
    """Pallas-backed forward of ConditionalEmbedding. Returns [B, time_dim] f32."""
    assert time_dim % 2 == 0  # TODO(synk): odd-dim F.pad path not implemented
    B = t.shape[0]
    hid = kparams["w2_q"].shape[0]
    fuse_hid = kparams["w3t_q"].shape[1]
    label_dim = kparams["w3_l"].shape[0]

    t2 = t.astype(jnp.float32).reshape(B, 1)       # [B, 1]
    y1 = y.reshape(B).astype(jnp.int32)            # [B] (torch .squeeze(1))

    ins = (t2, y1, kparams["freqs"], kparams["emb_table"],
           kparams["w1_sin"], kparams["w1_cos"], kparams["b1"],
           kparams["w2_q"], kparams["w2_scale"], kparams["b2"],
           kparams["w3t_q"], kparams["w3t_scale"], kparams["w3_l"], kparams["b3"],
           kparams["w4"], kparams["b4"])

    vmem = pl.BlockSpec(memory_space=pltpu.MemorySpace.VMEM)
    smem = pl.BlockSpec(memory_space=pltpu.MemorySpace.SMEM)
    hbm = pl.BlockSpec(memory_space=pl.ANY)
    in_specs = [vmem, smem, vmem, vmem,             # t, y, freqs, emb_table
                vmem, vmem, vmem,                   # w1_sin, w1_cos, b1
                hbm, vmem, vmem,                    # w2_q (manual DMA), scale, b2
                hbm, vmem, hbm, vmem,               # w3t_q, scale, w3_l, b3
                hbm, vmem]                          # w4, b4

    return pl.pallas_call(
        cond_embed_kernel,
        out_shape=jax.ShapeDtypeStruct((B, time_dim), jnp.float32),
        in_specs=in_specs,
        out_specs=vmem,
        scratch_shapes=[
            pltpu.VMEM((hid, hid), jnp.int8),              # w2 staging
            pltpu.VMEM((hid, fuse_hid), jnp.int8),         # w3_t staging
            pltpu.VMEM((label_dim, fuse_hid), jnp.bfloat16),  # w3_l staging
            pltpu.VMEM((fuse_hid, time_dim), jnp.bfloat16),   # w4 staging
            pltpu.SemaphoreType.DMA((4,)),
        ],
        compiler_params=pltpu.CompilerParams(vmem_limit_bytes=10 * 1024 * 1024),
    )(*ins)


# ------------------------------ parameter prep ------------------------------

def quantize_int8_per_channel(w):
    """w: [in, out] f32 -> (int8 [in, out], f32 scales [1, out])."""
    amax = jnp.max(jnp.abs(w), axis=0, keepdims=True)
    scale = jnp.maximum(amax, 1e-8) / 127.0
    q = jnp.clip(jnp.round(w / scale), -127.0, 127.0).astype(jnp.int8)
    return q, scale.astype(jnp.float32)


def init_params(key, *, num_classes, time_dim=256, label_dim=128):
    """Full-precision f32 params mirroring the PyTorch module (weights as [in,out])."""
    hid = time_dim * 4          # 1024
    fuse_hid = time_dim * 2     # 512
    ks = jax.random.split(key, 10)
    s = 0.02

    def w(k, shape):
        return s * jax.random.normal(k, shape, jnp.float32)

    return {
        # time_embed[0]: Linear(time_dim, 4*time_dim), weight split over the
        # torch.cat([sin, cos]) order.
        "w1_sin": w(ks[0], (time_dim // 2, hid)),
        "w1_cos": w(ks[1], (time_dim // 2, hid)),
        "b1": w(ks[2], (1, hid)),
        # time_embed[2]: Linear(4*time_dim, 4*time_dim)
        "w2": w(ks[3], (hid, hid)),
        "b2": w(ks[4], (1, hid)),
        # label_embed: Embedding(num_classes, label_dim)
        "emb_table": w(ks[5], (num_classes, label_dim)),
        # fusion[0]: Linear(4*time_dim + label_dim, 2*time_dim), split over the
        # torch.cat([t_emb, l_emb]) order.
        "w3_t": w(ks[6], (hid, fuse_hid)),
        "w3_l": w(ks[7], (label_dim, fuse_hid)),
        "b3": w(ks[8], (1, fuse_hid)),
        # fusion[2]: Linear(2*time_dim, time_dim)
        "w4": w(ks[9], (fuse_hid, time_dim)),
        "b4": jnp.zeros((1, time_dim), jnp.float32),
    }


def prepare_kernel_params(params, *, time_dim=256):
    """Pack params for the kernel: bf16 streaming weights, int8 w2/w3_t, freqs row."""
    half = time_dim // 2
    emb_scale = math.log(10000.0) / (half - 1)
    freqs = jnp.exp(jnp.arange(half, dtype=jnp.float32) * (-emb_scale)).reshape(1, half)
    w2_q, w2_s = quantize_int8_per_channel(params["w2"])
    w3t_q, w3t_s = quantize_int8_per_channel(params["w3_t"])
    return {
        "freqs": freqs,
        "emb_table": params["emb_table"].astype(jnp.float32),
        "w1_sin": params["w1_sin"].astype(jnp.bfloat16),
        "w1_cos": params["w1_cos"].astype(jnp.bfloat16),
        "b1": params["b1"],
        "w2_q": w2_q, "w2_scale": w2_s, "b2": params["b2"],
        "w3t_q": w3t_q, "w3t_scale": w3t_s,
        "w3_l": params["w3_l"].astype(jnp.bfloat16), "b3": params["b3"],
        "w4": params["w4"].astype(jnp.bfloat16), "b4": params["b4"],
    }


# -------------------------------- references ---------------------------------

def reference_quant(t, y, kp, *, time_dim=256):
    """Pure-JAX reference mirroring the kernel's bf16/int8 quantization exactly."""
    bf16, f32 = jnp.bfloat16, jnp.float32
    e = t.astype(f32)[:, None] * kp["freqs"]
    sin_e, cos_e = jnp.sin(e), jnp.cos(e)
    h1 = (jnp.dot(sin_e.astype(bf16), kp["w1_sin"], preferred_element_type=f32)
          + jnp.dot(cos_e.astype(bf16), kp["w1_cos"], preferred_element_type=f32)
          + kp["b1"])
    h1 = h1 * jax.nn.sigmoid(h1)
    h2 = (jnp.dot(h1.astype(bf16), kp["w2_q"].astype(bf16),
                  preferred_element_type=f32) * kp["w2_scale"] + kp["b2"])
    l_emb = kp["emb_table"][y[:, 0]].astype(bf16)
    h3 = (jnp.dot(h2.astype(bf16), kp["w3t_q"].astype(bf16),
                  preferred_element_type=f32) * kp["w3t_scale"]
          + jnp.dot(l_emb, kp["w3_l"], preferred_element_type=f32)
          + kp["b3"])
    h3 = h3 * jax.nn.sigmoid(h3)
    return (jnp.dot(h3.astype(bf16), kp["w4"], preferred_element_type=f32)
            + kp["b4"])


def reference_f32(t, y, params, *, time_dim=256):
    """True f32 PyTorch-semantics reference (no quantization)."""
    hi = jax.lax.Precision.HIGHEST
    half = time_dim // 2
    emb_scale = math.log(10000.0) / (half - 1)
    freqs = jnp.exp(jnp.arange(half, dtype=jnp.float32) * (-emb_scale))
    e = t.astype(jnp.float32)[:, None] * freqs[None, :]
    sin_e, cos_e = jnp.sin(e), jnp.cos(e)
    h1 = (jnp.dot(sin_e, params["w1_sin"], precision=hi)
          + jnp.dot(cos_e, params["w1_cos"], precision=hi) + params["b1"])
    h1 = h1 * jax.nn.sigmoid(h1)
    h2 = jnp.dot(h1, params["w2"], precision=hi) + params["b2"]
    l_emb = params["emb_table"][y[:, 0]]
    h3 = (jnp.dot(h2, params["w3_t"], precision=hi)
          + jnp.dot(l_emb, params["w3_l"], precision=hi) + params["b3"])
    h3 = h3 * jax.nn.sigmoid(h3)
    return jnp.dot(h3, params["w4"], precision=hi) + params["b4"]


if __name__ == "__main__":
    B = 8
    num_classes = 4
    time_dim = 256
    label_dim = 128

    key = jax.random.PRNGKey(0)
    k_params, k_t, k_y = jax.random.split(key, 3)
    params = init_params(k_params, num_classes=num_classes,
                         time_dim=time_dim, label_dim=label_dim)
    kparams = prepare_kernel_params(params, time_dim=time_dim)

    t_in = jax.random.uniform(k_t, (B,), jnp.float32)                  # timesteps in [0,1]
    y_in = jax.random.randint(k_y, (B, 1), 0, num_classes, jnp.int32)  # labels [B,1]

    out = jax.block_until_ready(
        conditional_embedding(t_in, y_in, kparams, time_dim=time_dim))
    ref_q = jax.block_until_ready(
        reference_quant(t_in, y_in, kparams, time_dim=time_dim))
    ref_f = jax.block_until_ready(
        reference_f32(t_in, y_in, params, time_dim=time_dim))

    assert out.shape == (B, time_dim), out.shape
    # Tight check vs. the exact quantization-mirroring reference.
    assert jnp.allclose(out, ref_q, rtol=1e-2, atol=1e-3), \
        f"quant-mirror max abs err {float(jnp.max(jnp.abs(out - ref_q)))}"
    # Loose check vs. true f32 semantics (quantization fidelity).
    assert jnp.allclose(out, ref_f, rtol=5e-2, atol=5e-3), \
        f"f32-reference max abs err {float(jnp.max(jnp.abs(out - ref_f)))}"

    print("KERNEL_OK")
</pallas_src>

<mosaic_0001>
module attributes {stable_mosaic.version = 11 : i64} {
  func.func @cond_embed_kernel(%arg0: memref<8x1xf32, #tpu.memory_space<vmem>>, %arg1: memref<8xi32, #tpu.memory_space<smem>>, %arg2: memref<1x128xf32, #tpu.memory_space<vmem>>, %arg3: memref<4x128xf32, #tpu.memory_space<vmem>>, %arg4: memref<128x1024xbf16, #tpu.memory_space<vmem>>, %arg5: memref<128x1024xbf16, #tpu.memory_space<vmem>>, %arg6: memref<1x1024xf32, #tpu.memory_space<vmem>>, %arg7: memref<1024x1024xi8, #tpu.memory_space<any>>, %arg8: memref<1x1024xf32, #tpu.memory_space<vmem>>, %arg9: memref<1x1024xf32, #tpu.memory_space<vmem>>, %arg10: memref<1024x512xi8, #tpu.memory_space<any>>, %arg11: memref<1x512xf32, #tpu.memory_space<vmem>>, %arg12: memref<128x512xbf16, #tpu.memory_space<any>>, %arg13: memref<1x512xf32, #tpu.memory_space<vmem>>, %arg14: memref<512x256xbf16, #tpu.memory_space<any>>, %arg15: memref<1x256xf32, #tpu.memory_space<vmem>>, %arg16: memref<8x256xf32, #tpu.memory_space<vmem>>, %arg17: memref<1024x1024xi8, #tpu.memory_space<vmem>>, %arg18: memref<1024x512xi8, #tpu.memory_space<vmem>>, %arg19: memref<128x512xbf16, #tpu.memory_space<vmem>>, %arg20: memref<512x256xbf16, #tpu.memory_space<vmem>>, %arg21: memref<4x!tpu.dma_semaphore, #tpu.memory_space<semaphore_mem>>) attributes {dimension_semantics = [], scalar_prefetch = 0 : i64, scratch_operands = 5 : i64, tpu.core_type = #tpu.core_type<tc>} {
    %c0_i32 = arith.constant 0 : i32
    %0 = tpu.memref_slice %arg21[%c0_i32] : memref<4x!tpu.dma_semaphore, #tpu.memory_space<semaphore_mem>> -> memref<1x!tpu.dma_semaphore, #tpu.memory_space<semaphore_mem>>
    %1 = tpu.memref_squeeze %0 : memref<1x!tpu.dma_semaphore, #tpu.memory_space<semaphore_mem>> -> memref<!tpu.dma_semaphore, #tpu.memory_space<semaphore_mem>>
    tpu.enqueue_dma source(%arg7 : memref<1024x1024xi8, #tpu.memory_space<any>>) target(%arg17 : memref<1024x1024xi8, #tpu.memory_space<vmem>>) target_semaphore(%1 : memref<!tpu.dma_semaphore, #tpu.memory_space<semaphore_mem>>)
    %c1_i32 = arith.constant 1 : i32
    %2 = tpu.memref_slice %arg21[%c1_i32] : memref<4x!tpu.dma_semaphore, #tpu.memory_space<semaphore_mem>> -> memref<1x!tpu.dma_semaphore, #tpu.memory_space<semaphore_mem>>
    %3 = tpu.memref_squeeze %2 : memref<1x!tpu.dma_semaphore, #tpu.memory_space<semaphore_mem>> -> memref<!tpu.dma_semaphore, #tpu.memory_space<semaphore_mem>>
    tpu.enqueue_dma source(%arg10 : memref<1024x512xi8, #tpu.memory_space<any>>) target(%arg18 : memref<1024x512xi8, #tpu.memory_space<vmem>>) target_semaphore(%3 : memref<!tpu.dma_semaphore, #tpu.memory_space<semaphore_mem>>)
    %c2_i32 = arith.constant 2 : i32
    %4 = tpu.memref_slice %arg21[%c2_i32] : memref<4x!tpu.dma_semaphore, #tpu.memory_space<semaphore_mem>> -> memref<1x!tpu.dma_semaphore, #tpu.memory_space<semaphore_mem>>
    %5 = tpu.memref_squeeze %4 : memref<1x!tpu.dma_semaphore, #tpu.memory_space<semaphore_mem>> -> memref<!tpu.dma_semaphore, #tpu.memory_space<semaphore_mem>>
    tpu.enqueue_dma source(%arg12 : memref<128x512xbf16, #tpu.memory_space<any>>) target(%arg19 : memref<128x512xbf16, #tpu.memory_space<vmem>>) target_semaphore(%5 : memref<!tpu.dma_semaphore, #tpu.memory_space<semaphore_mem>>)
    %c3_i32 = arith.constant 3 : i32
    %6 = tpu.memref_slice %arg21[%c3_i32] : memref<4x!tpu.dma_semaphore, #tpu.memory_space<semaphore_mem>> -> memref<1x!tpu.dma_semaphore, #tpu.memory_space<semaphore_mem>>
    %7 = tpu.memref_squeeze %6 : memref<1x!tpu.dma_semaphore, #tpu.memory_space<semaphore_mem>> -> memref<!tpu.dma_semaphore, #tpu.memory_space<semaphore_mem>>
    tpu.enqueue_dma source(%arg14 : memref<512x256xbf16, #tpu.memory_space<any>>) target(%arg20 : memref<512x256xbf16, #tpu.memory_space<vmem>>) target_semaphore(%7 : memref<!tpu.dma_semaphore, #tpu.memory_space<semaphore_mem>>)
    %c0 = arith.constant 0 : index
    %c0_0 = arith.constant 0 : index
    %8 = vector.load %arg0[%c0, %c0_0] : memref<8x1xf32, #tpu.memory_space<vmem>>, vector<8x1xf32>
    %c0_1 = arith.constant 0 : index
    %c0_2 = arith.constant 0 : index
    %9 = vector.load %arg2[%c0_1, %c0_2] : memref<1x128xf32, #tpu.memory_space<vmem>>, vector<1x128xf32>
    %10 = vector.broadcast %8 : vector<8x1xf32> to vector<8x128xf32>
    %11 = vector.broadcast %9 : vector<1x128xf32> to vector<8x128xf32>
    %12 = arith.mulf %10, %11 : vector<8x128xf32>
    %13 = math.sin %12 : vector<8x128xf32>
    %14 = math.cos %12 : vector<8x128xf32>
    %c0_3 = arith.constant 0 : index
    %15 = memref.load %arg1[%c0_3] : memref<8xi32, #tpu.memory_space<smem>>
    %16 = arith.index_cast %15 : i32 to index
    %c0_4 = arith.constant 0 : index
    %17 = vector.load %arg3[%16, %c0_4] : memref<4x128xf32, #tpu.memory_space<vmem>>, vector<1x128xf32>
    %c1 = arith.constant 1 : index
    %18 = memref.load %arg1[%c1] : memref<8xi32, #tpu.memory_space<smem>>
    %19 = arith.index_cast %18 : i32 to index
    %c0_5 = arith.constant 0 : index
    %20 = vector.load %arg3[%19, %c0_5] : memref<4x128xf32, #tpu.memory_space<vmem>>, vector<1x128xf32>
    %c2 = arith.constant 2 : index
    %21 = memref.load %arg1[%c2] : memref<8xi32, #tpu.memory_space<smem>>
    %22 = arith.index_cast %21 : i32 to index
    %c0_6 = arith.constant 0 : index
    %23 = vector.load %arg3[%22, %c0_6] : memref<4x128xf32, #tpu.memory_space<vmem>>, vector<1x128xf32>
    %c3 = arith.constant 3 : index
    %24 = memref.load %arg1[%c3] : memref<8xi32, #tpu.memory_space<smem>>
    %25 = arith.index_cast %24 : i32 to index
    %c0_7 = arith.constant 0 : index
    %26 = vector.load %arg3[%25, %c0_7] : memref<4x128xf32, #tpu.memory_space<vmem>>, vector<1x128xf32>
    %c4 = arith.constant 4 : index
    %27 = memref.load %arg1[%c4] : memref<8xi32, #tpu.memory_space<smem>>
    %28 = arith.index_cast %27 : i32 to index
    %c0_8 = arith.constant 0 : index
    %29 = vector.load %arg3[%28, %c0_8] : memref<4x128xf32, #tpu.memory_space<vmem>>, vector<1x128xf32>
    %c5 = arith.constant 5 : index
    %30 = memref.load %arg1[%c5] : memref<8xi32, #tpu.memory_space<smem>>
    %31 = arith.index_cast %30 : i32 to index
    %c0_9 = arith.constant 0 : index
    %32 = vector.load %arg3[%31, %c0_9] : memref<4x128xf32, #tpu.memory_space<vmem>>, vector<1x128xf32>
    %c6 = arith.constant 6 : index
    %33 = memref.load %arg1[%c6] : memref<8xi32, #tpu.memory_space<smem>>
    %34 = arith.index_cast %33 : i32 to index
    %c0_10 = arith.constant 0 : index
    %35 = vector.load %arg3[%34, %c0_10] : memref<4x128xf32, #tpu.memory_space<vmem>>, vector<1x128xf32>
    %c7 = arith.constant 7 : index
    %36 = memref.load %arg1[%c7] : memref<8xi32, #tpu.memory_space<smem>>
    %37 = arith.index_cast %36 : i32 to index
    %c0_11 = arith.constant 0 : index
    %38 = vector.load %arg3[%37, %c0_11] : memref<4x128xf32, #tpu.memory_space<vmem>>, vector<1x128xf32>
    %39 = tpu.concatenate %17, %20, %23, %26, %29, %32, %35, %38 in 0 : vector<1x128xf32>, vector<1x128xf32>, vector<1x128xf32>, vector<1x128xf32>, vector<1x128xf32>, vector<1x128xf32>, vector<1x128xf32>, vector<1x128xf32> -> vector<8x128xf32>
    %40 = arith.truncf %39 : vector<8x128xf32> to vector<8x128xbf16>
    %41 = arith.truncf %13 : vector<8x128xf32> to vector<8x128xbf16>
    %c0_12 = arith.constant 0 : index
    %c0_13 = arith.constant 0 : index
    %42 = vector.load %arg4[%c0_12, %c0_13] : memref<128x1024xbf16, #tpu.memory_space<vmem>>, vector<128x1024xbf16>
    %cst = arith.constant dense<0.000000e+00> : vector<8x1024xf32>
    %43 = tpu.matmul %41, %42, %cst {dimension_numbers = #tpu.dot_dimension_numbers<[1], [0], [0], [1], [0, 0, 1, 1], [], []>} : vector<8x128xbf16>, vector<128x1024xbf16>, vector<8x1024xf32> -> vector<8x1024xf32>
    %44 = arith.truncf %14 : vector<8x128xf32> to vector<8x128xbf16>
    %c0_14 = arith.constant 0 : index
    %c0_15 = arith.constant 0 : index
    %45 = vector.load %arg5[%c0_14, %c0_15] : memref<128x1024xbf16, #tpu.memory_space<vmem>>, vector<128x1024xbf16>
    %cst_16 = arith.constant dense<0.000000e+00> : vector<8x1024xf32>
    %46 = tpu.matmul %44, %45, %cst_16 {dimension_numbers = #tpu.dot_dimension_numbers<[1], [0], [0], [1], [0, 0, 1, 1], [], []>} : vector<8x128xbf16>, vector<128x1024xbf16>, vector<8x1024xf32> -> vector<8x1024xf32>
    %47 = arith.addf %43, %46 : vector<8x1024xf32>
    %c0_17 = arith.constant 0 : index
    %c0_18 = arith.constant 0 : index
    %48 = vector.load %arg6[%c0_17, %c0_18] : memref<1x1024xf32, #tpu.memory_space<vmem>>, vector<1x1024xf32>
    %49 = vector.broadcast %48 : vector<1x1024xf32> to vector<8x1024xf32>
    %50 = arith.addf %47, %49 : vector<8x1024xf32>
    %51 = arith.negf %50 : vector<8x1024xf32>
    %52 = math.exp %51 : vector<8x1024xf32>
    %cst_19 = arith.constant 1.000000e+00 : f32
    %53 = vector.broadcast %cst_19 : f32 to vector<8x1024xf32>
    %54 = arith.addf %53, %52 : vector<8x1024xf32>
    %55 = arith.divf %53, %54 : vector<8x1024xf32>
    %56 = arith.mulf %50, %55 : vector<8x1024xf32>
    %c0_i32_20 = arith.constant 0 : i32
    %57 = tpu.memref_slice %arg21[%c0_i32_20] : memref<4x!tpu.dma_semaphore, #tpu.memory_space<semaphore_mem>> -> memref<1x!tpu.dma_semaphore, #tpu.memory_space<semaphore_mem>>
    %58 = tpu.memref_squeeze %57 : memref<1x!tpu.dma_semaphore, #tpu.memory_space<semaphore_mem>> -> memref<!tpu.dma_semaphore, #tpu.memory_space<semaphore_mem>>
    tpu.wait_dma2 semaphore(%58 : memref<!tpu.dma_semaphore, #tpu.memory_space<semaphore_mem>>) src(%arg7 : memref<1024x1024xi8, #tpu.memory_space<any>>) dst(%arg17 : memref<1024x1024xi8, #tpu.memory_space<vmem>>)
    %59 = arith.truncf %56 : vector<8x1024xf32> to vector<8x1024xbf16>
    %c0_21 = arith.constant 0 : index
    %c0_22 = arith.constant 0 : index
    %60 = vector.load %arg17[%c0_21, %c0_22] : memref<1024x1024xi8, #tpu.memory_space<vmem>>, vector<1024x1024xi8>
    %61 = arith.sitofp %60 : vector<1024x1024xi8> to vector<1024x1024xbf16>
    %cst_23 = arith.constant dense<0.000000e+00> : vector<8x1024xf32>
    %62 = tpu.matmul %59, %61, %cst_23 {dimension_numbers = #tpu.dot_dimension_numbers<[1], [0], [0], [1], [0, 0, 1, 1], [], []>} : vector<8x1024xbf16>, vector<1024x1024xbf16>, vector<8x1024xf32> -> vector<8x1024xf32>
    %c0_24 = arith.constant 0 : index
    %c0_25 = arith.constant 0 : index
    %63 = vector.load %arg8[%c0_24, %c0_25] : memref<1x1024xf32, #tpu.memory_space<vmem>>, vector<1x1024xf32>
    %64 = vector.broadcast %63 : vector<1x1024xf32> to vector<8x1024xf32>
    %65 = arith.mulf %62, %64 : vector<8x1024xf32>
    %c0_26 = arith.constant 0 : index
    %c0_27 = arith.constant 0 : index
    %66 = vector.load %arg9[%c0_26, %c0_27] : memref<1x1024xf32, #tpu.memory_space<vmem>>, vector<1x1024xf32>
    %67 = vector.broadcast %66 : vector<1x1024xf32> to vector<8x1024xf32>
    %68 = arith.addf %65, %67 : vector<8x1024xf32>
    %c1_i32_28 = arith.constant 1 : i32
    %69 = tpu.memref_slice %arg21[%c1_i32_28] : memref<4x!tpu.dma_semaphore, #tpu.memory_space<semaphore_mem>> -> memref<1x!tpu.dma_semaphore, #tpu.memory_space<semaphore_mem>>
    %70 = tpu.memref_squeeze %69 : memref<1x!tpu.dma_semaphore, #tpu.memory_space<semaphore_mem>> -> memref<!tpu.dma_semaphore, #tpu.memory_space<semaphore_mem>>
    tpu.wait_dma2 semaphore(%70 : memref<!tpu.dma_semaphore, #tpu.memory_space<semaphore_mem>>) src(%arg10 : memref<1024x512xi8, #tpu.memory_space<any>>) dst(%arg18 : memref<1024x512xi8, #tpu.memory_space<vmem>>)
    %c2_i32_29 = arith.constant 2 : i32
    %71 = tpu.memref_slice %arg21[%c2_i32_29] : memref<4x!tpu.dma_semaphore, #tpu.memory_space<semaphore_mem>> -> memref<1x!tpu.dma_semaphore, #tpu.memory_space<semaphore_mem>>
    %72 = tpu.memref_squeeze %71 : memref<1x!tpu.dma_semaphore, #tpu.memory_space<semaphore_mem>> -> memref<!tpu.dma_semaphore, #tpu.memory_space<semaphore_mem>>
    tpu.wait_dma2 semaphore(%72 : memref<!tpu.dma_semaphore, #tpu.memory_space<semaphore_mem>>) src(%arg12 : memref<128x512xbf16, #tpu.memory_space<any>>) dst(%arg19 : memref<128x512xbf16, #tpu.memory_space<vmem>>)
    %73 = arith.truncf %68 : vector<8x1024xf32> to vector<8x1024xbf16>
    %c0_30 = arith.constant 0 : index
    %c0_31 = arith.constant 0 : index
    %74 = vector.load %arg18[%c0_30, %c0_31] : memref<1024x512xi8, #tpu.memory_space<vmem>>, vector<1024x512xi8>
    %75 = arith.sitofp %74 : vector<1024x512xi8> to vector<1024x512xbf16>
    %cst_32 = arith.constant dense<0.000000e+00> : vector<8x512xf32>
    %76 = tpu.matmul %73, %75, %cst_32 {dimension_numbers = #tpu.dot_dimension_numbers<[1], [0], [0], [1], [0, 0, 1, 1], [], []>} : vector<8x1024xbf16>, vector<1024x512xbf16>, vector<8x512xf32> -> vector<8x512xf32>
    %c0_33 = arith.constant 0 : index
    %c0_34 = arith.constant 0 : index
    %77 = vector.load %arg11[%c0_33, %c0_34] : memref<1x512xf32, #tpu.memory_space<vmem>>, vector<1x512xf32>
    %78 = vector.broadcast %77 : vector<1x512xf32> to vector<8x512xf32>
    %79 = arith.mulf %76, %78 : vector<8x512xf32>
    %c0_35 = arith.constant 0 : index
    %c0_36 = arith.constant 0 : index
    %80 = vector.load %arg19[%c0_35, %c0_36] : memref<128x512xbf16, #tpu.memory_space<vmem>>, vector<128x512xbf16>
    %cst_37 = arith.constant dense<0.000000e+00> : vector<8x512xf32>
    %81 = tpu.matmul %40, %80, %cst_37 {dimension_numbers = #tpu.dot_dimension_numbers<[1], [0], [0], [1], [0, 0, 1, 1], [], []>} : vector<8x128xbf16>, vector<128x512xbf16>, vector<8x512xf32> -> vector<8x512xf32>
    %82 = arith.addf %79, %81 : vector<8x512xf32>
    %c0_38 = arith.constant 0 : index
    %c0_39 = arith.constant 0 : index
    %83 = vector.load %arg13[%c0_38, %c0_39] : memref<1x512xf32, #tpu.memory_space<vmem>>, vector<1x512xf32>
    %84 = vector.broadcast %83 : vector<1x512xf32> to vector<8x512xf32>
    %85 = arith.addf %82, %84 : vector<8x512xf32>
    %86 = arith.negf %85 : vector<8x512xf32>
    %87 = math.exp %86 : vector<8x512xf32>
    %cst_40 = arith.constant 1.000000e+00 : f32
    %88 = vector.broadcast %cst_40 : f32 to vector<8x512xf32>
    %89 = arith.addf %88, %87 : vector<8x512xf32>
    %90 = arith.divf %88, %89 : vector<8x512xf32>
    %91 = arith.mulf %85, %90 : vector<8x512xf32>
    %c3_i32_41 = arith.constant 3 : i32
    %92 = tpu.memref_slice %arg21[%c3_i32_41] : memref<4x!tpu.dma_semaphore, #tpu.memory_space<semaphore_mem>> -> memref<1x!tpu.dma_semaphore, #tpu.memory_space<semaphore_mem>>
    %93 = tpu.memref_squeeze %92 : memref<1x!tpu.dma_semaphore, #tpu.memory_space<semaphore_mem>> -> memref<!tpu.dma_semaphore, #tpu.memory_space<semaphore_mem>>
    tpu.wait_dma2 semaphore(%93 : memref<!tpu.dma_semaphore, #tpu.memory_space<semaphore_mem>>) src(%arg14 : memref<512x256xbf16, #tpu.memory_space<any>>) dst(%arg20 : memref<512x256xbf16, #tpu.memory_space<vmem>>)
    %94 = arith.truncf %91 : vector<8x512xf32> to vector<8x512xbf16>
    %c0_42 = arith.constant 0 : index
    %c0_43 = arith.constant 0 : index
    %95 = vector.load %arg20[%c0_42, %c0_43] : memref<512x256xbf16, #tpu.memory_space<vmem>>, vector<512x256xbf16>
    %cst_44 = arith.constant dense<0.000000e+00> : vector<8x256xf32>
    %96 = tpu.matmul %94, %95, %cst_44 {dimension_numbers = #tpu.dot_dimension_numbers<[1], [0], [0], [1], [0, 0, 1, 1], [], []>} : vector<8x512xbf16>, vector<512x256xbf16>, vector<8x256xf32> -> vector<8x256xf32>
    %c0_45 = arith.constant 0 : index
    %c0_46 = arith.constant 0 : index
    %97 = vector.load %arg15[%c0_45, %c0_46] : memref<1x256xf32, #tpu.memory_space<vmem>>, vector<1x256xf32>
    %98 = vector.broadcast %97 : vector<1x256xf32> to vector<8x256xf32>
    %99 = arith.addf %96, %98 : vector<8x256xf32>
    %c0_47 = arith.constant 0 : index
    %c0_48 = arith.constant 0 : index
    %100 = vector.load %arg16[%c0_47, %c0_48] : memref<8x256xf32, #tpu.memory_space<vmem>>, vector<8x256xf32>
    tpu.vector_store %arg16[%c0_47, %c0_48], %99 {strides = array<i32>} : memref<8x256xf32, #tpu.memory_space<vmem>>, vector<8x256xf32>,
    return
  }
}

</mosaic_0001>

<bundles_post_ra>
// kernel: tpu_custom_call.1
= control target key start
LH: loop header
LB: loop body
LE: loop exit
PB: predicated region body
PF: predicated region fallthrough
CT: control target
= control target key end

     0   :  { %s10743_s0 = inlined_call_operand.vmem [shape: f32[8,1], index: 0, kind: input, shape index: {}]   ;;  %s10744_s1 = inlined_call_operand.hbm [shape: s32[8], index: 1, kind: input, shape index: {}]   ;;  %s10745_s2 = inlined_call_operand.hbm [shape: f32[1,128], index: 2, kind: input, shape index: {}]   ;;  %s10746_s3 = inlined_call_operand.hbm [shape: f32[4,128], index: 3, kind: input, shape index: {}]   ;;  %s10747_s4 = inlined_call_operand.hbm [shape: bf16[128,1024], index: 4, kind: input, shape index: {}]   ;;  %s10748_s5 = inlined_call_operand.hbm [shape: bf16[128,1024], index: 5, kind: input, shape index: {}]   ;;  %s10749_s6 = inlined_call_operand.vmem [shape: f32[1,1024], index: 6, kind: input, shape index: {}]   ;;  %s10750_s7 = inlined_call_operand.hbm [shape: s8[1024,1024], index: 7, kind: input, shape index: {}]   ;;  %s10751_s8 = inlined_call_operand.vmem [shape: f32[1,1024], index: 8, kind: input, shape index: {}]   ;;  %s10752_s9 = inlined_call_operand.hbm [shape: f32[1,1024], index: 9, kind: input, shape index: {}]   ;;  %s10753_s10 = inlined_call_operand.hbm [shape: s8[1024,512], index: 10, kind: input, shape index: {}]   ;;  %s10754_s11 = inlined_call_operand.hbm [shape: f32[1,512], index: 11, kind: input, shape index: {}]   ;;  %s10755_s12 = inlined_call_operand.hbm [shape: bf16[128,512], index: 12, kind: input, shape index: {}]   ;;  %s10756_s13 = inlined_call_operand.vmem [shape: f32[1,512], index: 13, kind: input, shape index: {}]   ;;  %s10757_s14 = inlined_call_operand.hbm [shape: bf16[512,256], index: 14, kind: input, shape index: {}]   ;;  %s10758_s15 = inlined_call_operand.vmem [shape: f32[1,256], index: 15, kind: input, shape index: {}]   ;;  %s10759_s16 = inlined_call_operand.hbm [shape: f32[8,256], index: 16, kind: output, shape index: {}]  }
   0x1   :  { %10760 = sst [smem:[#allocation41_spill]] %s10743_s0 }
   0x2   :  { %21 = vsyncpa [#allocation10], 0 }
   0x3   :  { %22 = vsyncpa [#allocation8], 0 }
   0x4   :  { %23 = vsyncpa [#allocation13], 0 }
   0x5   :  { %24 = vsyncpa [#allocation16], 0 }
   0x6   :  { %25 = vsyncpa [#allocation19], 0  ;;  %s54_s23 = sshll.u32 %s10746_s3, 4  ;;  %s55_s23 = int_to_ptr.hbm [resolvable:$true] %s54_s23 }
   0x7   :  { %26 = vsyncpa [#allocation9], 0  ;;  %s9731_s24 = smov [#allocation12]   ;;  %s77_s28 = sshll.u32 %s10748_s5, 4  ;;  %s78_s28 = int_to_ptr.hbm [resolvable:$true] %s77_s28 }
   0x8   :  { %s56_s25 = sshll.u32 %s9731_s24, 4  ;;  %s9732_s29 = smov [#allocation15]   ;;  %s57_s25 = int_to_ptr.vmem [resolvable:$true] %s56_s25 }
   0x9   :  { %59 = dma.hbm_to_vmem [thread:$0]  %s55_s23, 64, %s57_s25, [#allocation13]  }
   0xa   :  { %s79_s30 = sshll.u32 %s9732_s29, 4  ;;  %s34_s18 = sshll.u32 %s10744_s1, 4  ;;  %s80_s30 = int_to_ptr.vmem [resolvable:$true] %s79_s30  ;;  %s35_s18 = int_to_ptr.hbm [resolvable:$true] %s34_s18 }
   0xb   :  { %s9733_s3 = smov 512   ;;  %s9734_s19 = smov 32  }
   0xc   :  { %85 = dma.hbm_to_vmem [thread:$0]  %s78_s28, 8192, %s80_s30, [#allocation16], %s9733_s3, %s9733_s3, %s9734_s19  }
   0xd   :  { %s43_s22 = sshll.u32 %s10745_s2, 4  ;;  %s9735_s23 = smov [#allocation7]   ;;  %s44_s22 = int_to_ptr.hbm [resolvable:$true] %s43_s22 }
   0xe   :  { %37 = dma.hbm_to_smem %s35_s18, 16, %s9735_s23, [#allocation10]  }
   0xf   :  { %s9736_s5 = smov [#allocation11]   ;;  %s64_s27 = sshll.u32 %s10747_s4, 4  ;;  %s65_s27 = int_to_ptr.hbm [resolvable:$true] %s64_s27 }
  0x10   :  { %s45_s24 = sshll.u32 %s9736_s5, 4  ;;  %s95_s28 = sshll.u32 %s10752_s9, 4  ;;  %s46_s24 = int_to_ptr.vmem [resolvable:$true] %s45_s24  ;;  %s96_s28 = int_to_ptr.hbm [resolvable:$true] %s95_s28 }
  0x11   :  { %48 = dma.hbm_to_vmem [thread:$0]  %s44_s22, 16, %s46_s24, [#allocation8]  }
  0x12   :  { %s9737_s30 = smov [#allocation14]   ;;  %s9738_s2 = smov [#allocation17]  }
  0x13   :  { %s66_s0 = sshll.u32 %s9737_s30, 4  ;;  %s97_s17 = sshll.u32 %s9738_s2, 4  ;;  %s67_s0 = int_to_ptr.vmem [resolvable:$true] %s66_s0  ;;  %s98_s17 = int_to_ptr.vmem [resolvable:$true] %s97_s17 }
  0x14   :  { %72 = dma.hbm_to_vmem [thread:$0]  %s65_s27, 8192, %s67_s0, [#allocation13], %s9733_s3, %s9733_s3, %s9734_s19  }
  0x15   :  { %s106_s21 = sshll.u32 %s10754_s11, 4  ;;  %s9739_s4 = smov [#allocation18]   ;;  %s107_s21 = int_to_ptr.hbm [resolvable:$true] %s106_s21 }
  0x16   :  { %100 = dma.hbm_to_vmem [thread:$0]  %s96_s28, 128, %s98_s17, [#allocation16]  }
  0x17   :  { %s108_s22 = sshll.u32 %s9739_s4, 4  ;;  %s109_s22 = int_to_ptr.vmem [resolvable:$true] %s108_s22 }
  0x18   :  { %111 = dma.hbm_to_vmem [thread:$0]  %s107_s21, 64, %s109_s22, [#allocation19]  }
  0x19   :  { %9711 = dma.done.wait [#allocation10], 16  }
  0x1a   :  { %9712 = vsyncadd [#allocation10], 4294967280 }
  0x1b   :  { %9713 = dma.done.wait [#allocation8], 16  }
  0x1c   :  { %9714 = vsyncadd [#allocation8], 4294967280 }
  0x1d   :  { %9715 = dma.done.wait [#allocation13], 8256  }
  0x1e   :  { %9716 = vsyncadd [#allocation13], 4294959040 }
  0x1f   :  { %9717 = dma.done.wait [#allocation16], 8320  }
  0x20   :  { %9718 = vsyncadd [#allocation16], 4294958976 }
  0x21   :  { %9719 = dma.done.wait [#allocation19], 64  }
  0x22   :  { %9720 = vsyncadd [#allocation19], 4294967232 }
  0x23   :  { %144 = sfence }
  0x24   :  { %s10761_s3 = sld [smem:[#allocation41_spill]]  ;;  %v9740_v1 = vmov 0   ;;  %v9382_v2 = vld [vmem:[#allocation11] ss:$0 sm:$0xff]  ;;  %v8450_v13 = vld [vmem:[#allocation15 + $0x1c0] sm:$0xf] }
  0x25   :  { %9381 = vset.pattern.permute.xlu0 %v9740_v1  ;;  %v9260_v15 = vld [vmem:[#allocation15 + $0x1dc] sm:$0xf0]  ;;  %v9256_v16 = vld [vmem:[#allocation15 + $0x1c4] sm:$0xf]  ;;  %v9741_v24 = vmov 683565275  }
  0x26   :  { %v8451_v19 = vor.u32 %v9260_v15, %v8450_v13  ;;  %v8452_v20 = vld [vmem:[#allocation15 + $0x1e0] sm:$0xf0]  ;;  %v9742_v26 = vmov 2475754826   ;;  %v8458_v29 = vld [vmem:[#allocation15 + $0x1c8] sm:$0xf] }
  0x27   :  { %v8455_v22 = vor.u32 %v9256_v16, %v8452_v20  ;;  %v9261_v30 = vld [vmem:[#allocation15 + $0x1e4] sm:$0xf0]  ;;  %v9743_v31 = vmov 2131351028   ;;  %v9744_v33 = vmov 2102212464  }
  0x28   :  { %1030 = vmatpush.bf16.msra.mxu0 %v8451_v19  ;;  %v9745_v35 = vmov 920167782   ;;  %v9257_v37 = vld [vmem:[#allocation15 + $0x1cc] sm:$0xf]  ;;  %v8418_v42 = vld [vmem:[#allocation15 + $0x180] sm:$0xf]  ;;  %v8459_v50 = vor.u32 %v9261_v30, %v8458_v29 }
  0x29   :  { %1043 = vmatpush.bf16.msra.mxu1 %v8455_v22  ;;  %v8460_v38 = vld [vmem:[#allocation15 + $0x1e8] sm:$0xf0]  ;;  %v9252_v43 = vld [vmem:[#allocation15 + $0x19c] sm:$0xf0]  ;;  %v9746_v45 = vmov 1326507024  }
  0x2a   :  { %v200_v0 = vld [vmem:[%s10761_s3] sm:$0xff]  ;;  %v9248_v51 = vld [vmem:[#allocation15 + $0x184] sm:$0xf]  ;;  %v8426_v53 = vld [vmem:[#allocation15 + $0x188] sm:$0xf]  ;;  %v8463_v56 = vor.u32 %v9257_v37, %v8460_v38  ;;  %v8419_v57 = vor.u32 %v9252_v43, %v8418_v42  ;;  %1056 = vmatpush.bf16.msra.mxu2 %v8459_v50  ;;  %s9900_s19 = sld [smem:[#allocation7]] }
  0x2b   :  { %204 = vperm.xlu0 %9381, %v200_v0   ;;  %v8420_v52 = vld [vmem:[#allocation15 + $0x1a0] sm:$0xf0]  ;;  %v9253_v58 = vld [vmem:[#allocation15 + $0x1a4] sm:$0xf0]  ;;  %v9249_v59 = vld [vmem:[#allocation15 + $0x18c] sm:$0xf] }
  0x2c   :  { %v8428_v60 = vld [vmem:[#allocation15 + $0x1a8] sm:$0xf0]  ;;  %v8386_v63 = vld [vmem:[#allocation15 + $0x140] sm:$0xf]  ;;  %1069 = vmatpush.bf16.msra.mxu3 %v8463_v56  ;;  %1031 = vmatpush.bf16.msra.mxu0 %v8419_v57  ;;  %v9245_v15 = vld [vmem:[#allocation15 + $0x164] sm:$0xf0] }
  0x2d   :  { %v9244_v0 = vld [vmem:[#allocation15 + $0x15c] sm:$0xf0]  ;;  %v9241_v16 = vld [vmem:[#allocation15 + $0x14c] sm:$0xf]  ;;  %s9902_s23 = sld [smem:[#allocation7 + $0x1]]  ;;  %vm565_vm14 = vcmask 1040384  }
  0x2e   :  { %s9904_s5 = sld [smem:[#allocation7 + $0x2]]  ;;  %v8387_v29 = vor.u32 %v9244_v0, %v8386_v63  ;;  %v9236_v37 = vld [vmem:[#allocation15 + $0x11c] sm:$0xf0]  ;;  %v9232_v38 = vld [vmem:[#allocation15 + $0x104] sm:$0xf]  ;;  %vm567_vm15 = vcmask 1041408  }
  0x2f   :  { %v8356_v43 = vld [vmem:[#allocation15 + $0x120] sm:$0xf0]  ;;  %v9233_v50 = vld [vmem:[#allocation15 + $0x10c] sm:$0xf]  ;;  %v8322_v56 = vld [vmem:[#allocation15 + $0xc0] sm:$0xf] }
  0x30   :  { %1032 = vmatpush.bf16.msra.mxu0 %v8387_v29  ;;  %v9228_v57 = vld [vmem:[#allocation15 + $0xdc] sm:$0xf0]  ;;  %s9942_s24 = sld [smem:[#allocation7 + $0x3]]  ;;  %s521_s2 = scalar_lea.vmem [#allocation12], %s9900_s19 }
  0x31   :  { %s9958_s25 = sld [smem:[#allocation7 + $0x4]]  ;;  %s152_s22 = sshll.u32 %s10750_s7, 4  ;;  %s153_s22 = int_to_ptr.hbm [resolvable:$true] %s152_s22 }
  0x32   :  { %s9962_s26 = sld [smem:[#allocation7 + $0x5]]  ;;  %s9747_s9 = smov [#allocation2]  }
  0x33   :  { %s9967_s27 = sld [smem:[#allocation7 + $0x6]]  ;;  %s524_s29 = scalar_lea.vmem [#allocation12], %s9902_s23 }
  0x34   :  { %s9972_s1 = sld [smem:[#allocation7 + $0x7]]  ;;  %s527_s28 = scalar_lea.vmem [#allocation12], %s9904_s5 }
  0x35   :  { %s154_s11 = sshll.u32 %s9747_s9, 4  ;;  %s166_s23 = sshll.u32 %s10753_s10, 4  ;;  %s155_s11 = int_to_ptr.vmem [resolvable:$true] %s154_s11  ;;  %s167_s23 = int_to_ptr.hbm [resolvable:$true] %s166_s23 }
  0x36   :  { %s530_s30 = scalar_lea.vmem [#allocation12], %s9942_s24  ;;  %s9748_s5 = smov [#allocation3]  }
  0x37   :  { %s533_s0 = scalar_lea.vmem [#allocation12], %s9958_s25  ;;  %s168_s24 = sshll.u32 %s9748_s5, 4  ;;  %s169_s24 = int_to_ptr.vmem [resolvable:$true] %s168_s24 }
  0x38   :  { %s536_s17 = scalar_lea.vmem [#allocation12], %s9962_s26  ;;  %s9749_s7 = smov [#allocation4]  }
  0x39   :  { %s539_s18 = scalar_lea.vmem [#allocation12], %s9967_s27  ;;  %s180_s27 = sshll.u32 %s10755_s12, 4  ;;  %s181_s27 = int_to_ptr.hbm [resolvable:$true] %s180_s27 }
  0x3a   :  { %s542_s20 = scalar_lea.vmem [#allocation12], %s9972_s1  ;;  %s182_s1 = sshll.u32 %s9749_s7, 4  ;;  %s183_s1 = int_to_ptr.vmem [resolvable:$true] %s182_s1 }
  0x3b   :  { %157 = dma.hbm_to_vmem [thread:$0]  %s153_s22, 32768, %s155_s11, [#allocation6] }
  0x3c   :  { %171 = dma.hbm_to_vmem [thread:$0]  %s167_s23, 16384, %s169_s24, [#allocation6 + $0x1] }
  0x3d   :  { %185 = dma.hbm_to_vmem [thread:$0]  %s181_s27, 4096, %s183_s1, [#allocation6 + $0x2] }
  0x3e   :  { %s9750_s10 = smov [#allocation5]  }
  0x9d   :  { %v205_v3 = vpop.permute.xlu0 %204 }
  0x9e   :  { %v9862_v4 = vmul.f32 %v9382_v2, %v205_v3  ;;  %v9240_v2 = vld [vmem:[#allocation15 + $0x144] sm:$0xf] }
  0x9f   :  { %v8388_v3 = vld [vmem:[#allocation15 + $0x160] sm:$0xf0] }
  0xa0   :  { %v211_v5 = vand.u32 2147483647, %v9862_v4  ;;  %v214_v6 = vand.u32 2139095040, %v9862_v4  ;;  %v8391_v30 = vor.u32 %v9240_v2, %v8388_v3  ;;  %v9225_v3 = vld [vmem:[#allocation15 + $0xcc] sm:$0xf]  ;;  %vm213_vm12 = vcmp.lt.s32.totalorder %v9862_v4, 0 }
  0xa2   :  { %v215_v7 = vshrl.u32 %v214_v6, 23  ;;  %v218_v8 = vand.u32 8388607, %v211_v5  ;;  %vm9986_vm13 = vcmp.le.f32.partialorder %v211_v5, 0.7853982 }
  0xa3   :  { %v543_v5 = vld [vmem:[%s542_s20] sm:$0x1] }
  0xa4   :  { %v8211_v9 = vadd.s32 4294967169, %v215_v7  ;;  %v219_v10 = vor.u32 8388608, %v218_v8  ;;  %v8423_v8 = vor.u32 %v9248_v51, %v8420_v52  ;;  %v8364_v51 = vld [vmem:[#allocation15 + $0x128] sm:$0xf0] }
  0xa6   :  { %v221_v11 = vadd.s32 1, %v8211_v9  ;;  %v9868_v12 = vshll.u32 %v219_v10, 8  ;;  %v8394_v9 = vld [vmem:[#allocation15 + $0x148] sm:$0xf]  ;;  %1044 = vmatpush.bf16.msra.mxu1 %v8423_v8 }
  0xa8   :  { %vm222_vm0 = vcmp.gt.s32.totalorder %v221_v11, 0  ;;  %v9873_v21 = vand.u32 65535, %v9868_v12  ;;  %v9876_v28 = vshrl.u32 %v9868_v12, 16 }
  0xa9   :  { %v223_v14 = vsel %vm222_vm0, %v221_v11, 0  ;;  %vm569_vm0 = vcmask 1042432  }
  0xaa   :  { %v9870_v17 = vshrl.u32 %v223_v14, 5  ;;  %v225_v18 = vand.u32 31, %v223_v14  ;;  %v8427_v14 = vor.u32 %v9253_v58, %v8426_v53  ;;  %1045 = vmatpush.bf16.msra.mxu1 %v8391_v30  ;;  %v9224_v58 = vld [vmem:[#allocation15 + $0xc4] sm:$0xf] }
  0xac   :  { %v226_v23 = vsub.s32 32, %v225_v18  ;;  %v228_v25 = vshll.u32 %v9741_v24, %v225_v18  ;;  %v231_v27 = vshll.u32 %v9742_v26, %v225_v18  ;;  %v234_v32 = vshll.u32 %v9743_v31, %v225_v18  ;;  %1057 = vmatpush.bf16.msra.mxu2 %v8427_v14 }
  0xad   :  { %v237_v34 = vshll.u32 %v9744_v33, %v225_v18  ;;  %v240_v36 = vshll.u32 %v9745_v35, %v225_v18  ;;  %vm243_vm1 = vcmp.lt.s32.totalorder %v9870_v17, 1  ;;  %vm244_vm2 = vcmp.lt.s32.totalorder %v9870_v17, 2  ;;  %v8396_v18 = vld [vmem:[#allocation15 + $0x168] sm:$0xf0] }
  0xae   :  { %v229_v39 = vshrl.u32 %v9742_v26, %v226_v23  ;;  %v232_v40 = vshrl.u32 %v9743_v31, %v226_v23  ;;  %v235_v41 = vshrl.u32 %v9744_v33, %v226_v23  ;;  %v238_v44 = vshrl.u32 %v9745_v35, %v226_v23 }
  0xaf   :  { %v241_v46 = vshrl.u32 %v9746_v45, %v226_v23  ;;  %vm245_vm3 = vcmp.lt.s32.totalorder %v9870_v17, 3  ;;  %vm246_vm4 = vcmp.lt.s32.totalorder %v9870_v17, 4  ;;  %v227_v10 = vshrl.u32 %v9741_v24, %v226_v23  ;;  %v9237_v45 = vld [vmem:[#allocation15 + $0x124] sm:$0xf0]  ;;  %v9201_v17 = vld [vmem:[#allocation15 + $0xc] sm:$0xf] }
  0xb0   :  { %v230_v47 = vor.u32 %v229_v39, %v228_v25  ;;  %v233_v48 = vor.u32 %v232_v40, %v231_v27  ;;  %v236_v49 = vor.u32 %v235_v41, %v234_v32  ;;  %v239_v54 = vor.u32 %v238_v44, %v237_v34  ;;  %v8362_v44 = vld [vmem:[#allocation15 + $0x108] sm:$0xf] }
  0xb1   :  { %v242_v55 = vor.u32 %v241_v46, %v240_v36  ;;  %v8431_v23 = vor.u32 %v9249_v59, %v8428_v60  ;;  %v8395_v31 = vor.u32 %v9245_v15, %v8394_v9  ;;  %v8399_v32 = vor.u32 %v9241_v16, %v8396_v18  ;;  %v8354_v36 = vld [vmem:[#allocation15 + $0x100] sm:$0xf]  ;;  %v8324_v60 = vld [vmem:[#allocation15 + $0xe0] sm:$0xf0] }
  0xb2   :  { %v251_v61 = vsel %vm243_vm1, %v230_v47, %v233_v48  ;;  %v255_v62 = vsel %vm243_vm1, %v233_v48, %v236_v49  ;;  %v252_v6 = vsel %vm246_vm4, %v239_v54, 920167782  ;;  %v248_v19 = vsel %vm246_vm4, %v236_v49, 2102212464  ;;  %v9216_v16 = vld [vmem:[#allocation15 + $0x84] sm:$0xf] }
  0xb3   :  { %v256_v7 = vsel %vm246_vm4, %v242_v55, 1326507024  ;;  %v253_v11 = vsel %vm245_vm3, %v236_v49, %v252_v6  ;;  %1070 = vmatpush.bf16.msra.mxu3 %v8431_v23  ;;  %v9908_v33 = vsel %vm243_vm1, %v227_v10, %v230_v47  ;;  %v9918_v39 = vsel %vm245_vm3, %v233_v48, %v248_v19  ;;  %1058 = vmatpush.bf16.msra.mxu2 %v8395_v31  ;;  %v8332_v6 = vld [vmem:[#allocation15 + $0xe8] sm:$0xf0]  ;;  %v8290_v10 = vld [vmem:[#allocation15 + $0x80] sm:$0xf] }
  0xb4   :  { %v257_v13 = vsel %vm245_vm3, %v239_v54, %v256_v7  ;;  %v254_v20 = vsel %vm244_vm2, %v251_v61, %v253_v11  ;;  %v8355_v59 = vor.u32 %v9236_v37, %v8354_v36  ;;  %v8330_v61 = vld [vmem:[#allocation15 + $0xc8] sm:$0xf]  ;;  %v8363_v2 = vor.u32 %v9237_v45, %v8362_v44  ;;  %v9220_v11 = vld [vmem:[#allocation15 + $0x9c] sm:$0xf0]  ;;  %v8292_v18 = vld [vmem:[#allocation15 + $0xa0] sm:$0xf0] }
  0xb5   :  { %v258_v22 = vsel %vm244_vm2, %v255_v62, %v257_v13  ;;  %v284_v26 = vand.u32 65535, %v254_v20  ;;  %v285_v27 = vshrl.u32 %v254_v20, 16  ;;  %v9229_v62 = vld [vmem:[#allocation15 + $0xe4] sm:$0xf0]  ;;  %v8367_v9 = vor.u32 %v9233_v50, %v8364_v51  ;;  %v9217_v31 = vld [vmem:[#allocation15 + $0x8c] sm:$0xf] }
  0xb6   :  { %v262_v24 = vand.u32 65535, %v258_v22  ;;  %v263_v25 = vshrl.u32 %v258_v22, 16  ;;  %1033 = vmatpush.bf16.msra.mxu0 %v8355_v59  ;;  %v8323_v22 = vor.u32 %v9228_v57, %v8322_v56  ;;  %v8327_v23 = vor.u32 %v9224_v58, %v8324_v60  ;;  %v8258_v37 = vld [vmem:[#allocation15 + $0x40] sm:$0xf]  ;;  %v8260_v44 = vld [vmem:[#allocation15 + $0x60] sm:$0xf0] }
  0xb7   :  { %v9922_v41 = vmul.u32 %v285_v27, %v9873_v21  ;;  %v9925_v42 = vmul.u32 %v284_v26, %v9876_v28  ;;  %v286_v49 = vmul.u32 %v284_v26, %v9873_v21  ;;  %v289_v48 = vmul.u32 %v285_v27, %v9876_v28  ;;  %1071 = vmatpush.bf16.msra.mxu3 %v8399_v32  ;;  %v8300_v32 = vld [vmem:[#allocation15 + $0xa8] sm:$0xf0]  ;;  %v9200_v57 = vld [vmem:[#allocation15 + $0x4] sm:$0xf]  ;;  %v9205_v60 = vld [vmem:[#allocation15 + $0x24] sm:$0xf0] }
  0xb8   :  { %v9911_v34 = vmul.u32 %v263_v25, %v9873_v21  ;;  %v9914_v35 = vmul.u32 %v262_v24, %v9876_v28  ;;  %v264_v40 = vmul.u32 %v262_v24, %v9873_v21  ;;  %v267_v46 = vmul.u32 %v263_v25, %v9876_v28  ;;  %1059 = vmatpush.bf16.msra.mxu2 %v8363_v2  ;;  %v8298_v24 = vld [vmem:[#allocation15 + $0x88] sm:$0xf]  ;;  %v8228_v58 = vld [vmem:[#allocation15 + $0x20] sm:$0xf0]  ;;  %v9258_v2 = vld [vmem:[#allocation15 + $0x1d4] sm:$0xf] }
  0xb9   :  { %v290_v54 = vshll.u32 %v9922_v41, 16  ;;  %v292_v55 = vshll.u32 %v9925_v42, 16  ;;  %v8359_v28 = vor.u32 %v9232_v38, %v8356_v43  ;;  %v9221_v25 = vld [vmem:[#allocation15 + $0xa4] sm:$0xf0]  ;;  %v291_v26 = vshrl.u32 %v9922_v41, 16 }
  0xba   :  { %v268_v47 = vshll.u32 %v9911_v34, 16  ;;  %v269_v52 = vshrl.u32 %v9911_v34, 16  ;;  %v270_v53 = vshll.u32 %v9914_v35, 16  ;;  %v271_v13 = vshrl.u32 %v9914_v35, 16  ;;  %1034 = vmatpush.bf16.msra.mxu0 %v8323_v22  ;;  %v9212_v43 = vld [vmem:[#allocation15 + $0x5c] sm:$0xf0] }
  0xbb   :  { %vm294_vm6 = vc.u32 %v286_v49, %v290_v54  ;;  %v296_v0 = vadd.s32 %v290_v54, %v286_v49  ;;  %1046 = vmatpush.bf16.msra.mxu1 %v8359_v28  ;;  %1072 = vmatpush.bf16.msra.mxu3 %v8367_v9  ;;  %v8331_v29 = vor.u32 %v9229_v62, %v8330_v61  ;;  %v293_v35 = vshrl.u32 %v9925_v42, 16  ;;  %v9208_v41 = vld [vmem:[#allocation15 + $0x44] sm:$0xf]  ;;  %v8266_v42 = vld [vmem:[#allocation15 + $0x48] sm:$0xf] }
  0xbc   :  { %vm272_vm5 = vc.u32 %v264_v40, %v268_v47  ;;  %v274_v21 = vadd.s32 %v268_v47, %v264_v40  ;;  %v295_v8 = vsel %vm294_vm6, 1, %v9740_v1  ;;  %v8335_v30 = vor.u32 %v9225_v3, %v8332_v6  ;;  %v9213_v49 = vld [vmem:[#allocation15 + $0x64] sm:$0xf0]  ;;  %v9204_v54 = vld [vmem:[#allocation15 + $0x1c] sm:$0xf0] }
  0xbd   :  { %v273_v63 = vsel %vm272_vm5, 1, %v9740_v1  ;;  %v297_v15 = vadd.s32 %v295_v8, %v289_v48  ;;  %vm298_vm8 = vc.u32 %v296_v0, %v292_v55  ;;  %v8295_v36 = vor.u32 %v9216_v16, %v8292_v18  ;;  %1060 = vmatpush.bf16.msra.mxu2 %v8331_v29  ;;  %v9209_v48 = vld [vmem:[#allocation15 + $0x4c] sm:$0xf]  ;;  %v8466_v62 = vld [vmem:[#allocation15 + $0x1d0] sm:$0xf] }
  0xbe   :  { %v275_v7 = vadd.s32 %v273_v63, %v267_v46  ;;  %vm276_vm7 = vc.u32 %v274_v21, %v270_v53  ;;  %v299_v20 = vsel %vm298_vm8, 1, %v9740_v1  ;;  %v8299_v40 = vor.u32 %v9221_v25, %v8298_v24  ;;  %v8226_v53 = vld [vmem:[#allocation15] sm:$0xf]  ;;  %v8234_v21 = vld [vmem:[#allocation15 + $0x8] sm:$0xf] }
  0xbf   :  { %v277_v14 = vsel %vm276_vm7, 1, %v9740_v1  ;;  %v301_v27 = vadd.s32 %v299_v20, %v297_v15  ;;  %1047 = vmatpush.bf16.msra.mxu1 %v8327_v23  ;;  %v8291_v1 = vor.u32 %v9220_v11, %v8290_v10  ;;  %v9946_v46 = vadd.s32 %v296_v0, %v292_v55  ;;  %1073 = vmatpush.bf16.msra.mxu3 %v8335_v30  ;;  %v8236_v61 = vld [vmem:[#allocation15 + $0x28] sm:$0xf0]  ;;  %v9262_v63 = vld [vmem:[#allocation15 + $0x1ec] sm:$0xf0] }
  0xc0   :  { %v279_v19 = vadd.s32 %v277_v14, %v275_v7  ;;  %v8303_v47 = vor.u32 %v9217_v31, %v8300_v32  ;;  %v250_v50 = vsel %vm244_vm2, %v9908_v33, %v9918_v39  ;;  %v8259_v55 = vor.u32 %v9212_v43, %v8258_v37  ;;  %v8468_v3 = vld [vmem:[#allocation15 + $0x1f0] sm:$0xf0]  ;;  %v8474_v6 = vld [vmem:[#allocation15 + $0x1d8] sm:$0xf]  ;;  %v9259_v11 = vld [vmem:[#allocation15 + $0x1dc] sm:$0xf] }
  0xc1   :  { %v302_v38 = vadd.s32 %v301_v27, %v291_v26  ;;  %1035 = vmatpush.bf16.msra.mxu0 %v8291_v1  ;;  %v8263_v56 = vor.u32 %v9208_v41, %v8260_v44  ;;  %1061 = vmatpush.bf16.msra.mxu2 %v8299_v40  ;;  %v8267_v28 = vor.u32 %v9213_v49, %v8266_v42  ;;  %v9263_v10 = vld [vmem:[#allocation15 + $0x1f4] sm:$0xf0]  ;;  %v8434_v15 = vld [vmem:[#allocation15 + $0x190] sm:$0xf]  ;;  %v9250_v22 = vld [vmem:[#allocation15 + $0x194] sm:$0xf]  ;;  %vm354_vm8 = vweird.f32 %v9862_v4 }
  0xc2   :  { %v280_v34 = vadd.s32 %v279_v19, %v269_v52  ;;  %v8268_v52 = vld [vmem:[#allocation15 + $0x68] sm:$0xf0]  ;;  %v304_v33 = vmul.u32 %v9868_v12, %v250_v50  ;;  %v8227_v8 = vor.u32 %v9204_v54, %v8226_v53  ;;  %v8231_v9 = vor.u32 %v9200_v57, %v8228_v58  ;;  %v8476_v12 = vld [vmem:[#allocation15 + $0x1f8] sm:$0xf0]  ;;  %v9254_v20 = vld [vmem:[#allocation15 + $0x1ac] sm:$0xf0] }
  0xc3   :  { %v303_v51 = vadd.s32 %v302_v38, %v293_v35  ;;  %1048 = vmatpush.bf16.msra.mxu1 %v8295_v36  ;;  %1074 = vmatpush.bf16.msra.mxu3 %v8303_v47  ;;  %v8271_v39 = vor.u32 %v9209_v48, %v8268_v52  ;;  %v8467_v14 = vor.u32 %v9262_v63, %v8466_v62  ;;  %v8436_v25 = vld [vmem:[#allocation15 + $0x1b0] sm:$0xf0]  ;;  %v8442_v26 = vld [vmem:[#allocation15 + $0x198] sm:$0xf]  ;;  %v9251_v30 = vld [vmem:[#allocation15 + $0x19c] sm:$0xf] }
  0xc4   :  { %v9944_v45 = vadd.s32 %v280_v34, %v271_v13  ;;  %v8235_v13 = vor.u32 %v9205_v60, %v8234_v21  ;;  %v8239_v18 = vor.u32 %v9201_v17, %v8236_v61  ;;  %v8471_v19 = vor.u32 %v9258_v2, %v8468_v3  ;;  %v9255_v27 = vld [vmem:[#allocation15 + $0x1b4] sm:$0xf0]  ;;  %v8444_v31 = vld [vmem:[#allocation15 + $0x1b8] sm:$0xf0]  ;;  %v8402_v1 = vld [vmem:[#allocation15 + $0x150] sm:$0xf] }
  0xc5   :  { %v307_v59 = vadd.s32 1, %v303_v51  ;;  %1036 = vmatpush.bf16.msra.mxu0 %v8259_v55  ;;  %1062 = vmatpush.bf16.msra.mxu2 %v8267_v28  ;;  %v8475_v23 = vor.u32 %v9263_v10, %v8474_v6  ;;  %v8479_v24 = vor.u32 %v9259_v11, %v8476_v12  ;;  %v8435_v32 = vor.u32 %v9254_v20, %v8434_v15  ;;  %v9246_v36 = vld [vmem:[#allocation15 + $0x16c] sm:$0xf0]  ;;  %v9242_v40 = vld [vmem:[#allocation15 + $0x154] sm:$0xf] }
  0xc6   :  { %vm306_vm9 = vc.u32 %v9944_v45, %v9946_v46  ;;  %v8439_v35 = vor.u32 %v9250_v22, %v8436_v25  ;;  %v8443_v37 = vor.u32 %v9255_v27, %v8442_v26  ;;  %v8447_v38 = vor.u32 %v9251_v30, %v8444_v31  ;;  %v8404_v43 = vld [vmem:[#allocation15 + $0x170] sm:$0xf0]  ;;  %v8410_v41 = vld [vmem:[#allocation15 + $0x158] sm:$0xf]  ;;  %v9243_v42 = vld [vmem:[#allocation15 + $0x15c] sm:$0xf] }
  0xc7   :  { %v308_v0 = vsel %vm306_vm9, %v307_v59, %v303_v51  ;;  %1049 = vmatpush.bf16.msra.mxu1 %v8263_v56  ;;  %1075 = vmatpush.bf16.msra.mxu3 %v8271_v39  ;;  %v9247_v47 = vld [vmem:[#allocation15 + $0x174] sm:$0xf0]  ;;  %v8412_v49 = vld [vmem:[#allocation15 + $0x178] sm:$0xf0]  ;;  %v8403_v48 = vor.u32 %v9246_v36, %v8402_v1  ;;  %v8407_v51 = vor.u32 %v9242_v40, %v8404_v43  ;;  %v8370_v52 = vld [vmem:[#allocation15 + $0x110] sm:$0xf] }
  0xc8   :  { %v309_v7 = vadd.s32 %v308_v0, %v304_v33  ;;  %v9238_v53 = vld [vmem:[#allocation15 + $0x12c] sm:$0xf0]  ;;  %v8411_v54 = vor.u32 %v9247_v47, %v8410_v41  ;;  %v8415_v55 = vor.u32 %v9243_v42, %v8412_v49  ;;  %v9234_v56 = vld [vmem:[#allocation15 + $0x114] sm:$0xf]  ;;  %v8378_v58 = vld [vmem:[#allocation15 + $0x118] sm:$0xf]  ;;  %v305_v15 = vadd.s32 %v9946_v46, %v9944_v45 }
  0xc9   :  { %1037 = vmatpush.bf16.msra.mxu0 %v8227_v8  ;;  %1063 = vmatpush.bf16.msra.mxu2 %v8235_v13  ;;  %v8372_v57 = vld [vmem:[#allocation15 + $0x130] sm:$0xf0]  ;;  %v9239_v59 = vld [vmem:[#allocation15 + $0x134] sm:$0xf0]  ;;  %v9235_v28 = vld [vmem:[#allocation15 + $0x11c] sm:$0xf]  ;;  %v8371_v33 = vor.u32 %v9238_v53, %v8370_v52 }
  0xca   :  { %v310_v16 = vadd.s32 536870912, %v309_v7  ;;  %v8380_v60 = vld [vmem:[#allocation15 + $0x138] sm:$0xf0]  ;;  %v8338_v39 = vld [vmem:[#allocation15 + $0xd0] sm:$0xf]  ;;  %v8375_v61 = vor.u32 %v9234_v56, %v8372_v57  ;;  %v8379_v3 = vor.u32 %v9239_v59, %v8378_v58  ;;  %vm571_vm1 = vcmask 1043456  }
  0xcb   :  { %1050 = vmatpush.bf16.msra.mxu1 %v8231_v9  ;;  %1076 = vmatpush.bf16.msra.mxu3 %v8239_v18  ;;  %v9230_v62 = vld [vmem:[#allocation15 + $0xec] sm:$0xf0]  ;;  %v9226_v63 = vld [vmem:[#allocation15 + $0xd4] sm:$0xf]  ;;  %v8383_v6 = vor.u32 %v9235_v28, %v8380_v60  ;;  %v9231_v8 = vld [vmem:[#allocation15 + $0xf4] sm:$0xf0] }
  0xcc   :  { %v9960_v29 = vshrl.u32 %v310_v16, 30  ;;  %v8340_v0 = vld [vmem:[#allocation15 + $0xf0] sm:$0xf0]  ;;  %v9227_v9 = vld [vmem:[#allocation15 + $0xdc] sm:$0xf]  ;;  %v8339_v12 = vor.u32 %v9230_v62, %v8338_v39  ;;  %vm573_vm2 = vcmask 1044480  }
  0xcd   :  { %1082 = vmatpush.bf16.msrb.mxu0 %v8467_v14  ;;  %1108 = vmatpush.bf16.msrb.mxu2 %v8475_v23  ;;  %v8348_v10 = vld [vmem:[#allocation15 + $0xf8] sm:$0xf0]  ;;  %v8306_v11 = vld [vmem:[#allocation15 + $0x90] sm:$0xf]  ;;  %v9218_v14 = vld [vmem:[#allocation15 + $0x94] sm:$0xf]  ;;  %v8343_v18 = vor.u32 %v9226_v63, %v8340_v0 }
  0xce   :  { %v312_v34 = vshll.u32 %v9960_v29, 30  ;;  %v9222_v13 = vld [vmem:[#allocation15 + $0xac] sm:$0xf0]  ;;  %v8314_v20 = vld [vmem:[#allocation15 + $0x98] sm:$0xf]  ;;  %v8351_v25 = vor.u32 %v9227_v9, %v8348_v10  ;;  %vm575_vm3 = vcmask 1045504  }
  0xcf   :  { %1095 = vmatpush.bf16.msrb.mxu1 %v8471_v19  ;;  %1121 = vmatpush.bf16.msrb.mxu3 %v8479_v24  ;;  %v8308_v19 = vld [vmem:[#allocation15 + $0xb0] sm:$0xf0]  ;;  %v9223_v26 = vld [vmem:[#allocation15 + $0xb4] sm:$0xf0]  ;;  %v9219_v27 = vld [vmem:[#allocation15 + $0x9c] sm:$0xf]  ;;  %v8307_v46 = vor.u32 %v9222_v13, %v8306_v11 }
  0xd0   :  { %v9965_v44 = vsub.s32 %v309_v7, %v312_v34  ;;  %v8346_v7 = vld [vmem:[#allocation15 + $0xd8] sm:$0xf]  ;;  %v8316_v30 = vld [vmem:[#allocation15 + $0xb8] sm:$0xf0]  ;;  %v8274_v31 = vld [vmem:[#allocation15 + $0x50] sm:$0xf] }
  0xd1   :  { %1083 = vmatpush.bf16.msrb.mxu0 %v8435_v32  ;;  %1109 = vmatpush.bf16.msrb.mxu2 %v8443_v37  ;;  %v8347_v24 = vor.u32 %v9231_v8, %v8346_v7  ;;  %v9214_v32 = vld [vmem:[#allocation15 + $0x6c] sm:$0xf0]  ;;  %v9210_v1 = vld [vmem:[#allocation15 + $0x54] sm:$0xf]  ;;  %v8311_v37 = vor.u32 %v9218_v14, %v8308_v19  ;;  %v9215_v40 = vld [vmem:[#allocation15 + $0x74] sm:$0xf0]  ;;  %v8319_v42 = vor.u32 %v9219_v27, %v8316_v30 }
  0xd2   :  { %vm314_vm10 = vcmp.lt.s32.totalorder %v9965_v44, 0  ;;  %v315_v50 = vsub.s32 0, %v9965_v44  ;;  %v8276_v36 = vld [vmem:[#allocation15 + $0x70] sm:$0xf0]  ;;  %v9211_v43 = vld [vmem:[#allocation15 + $0x5c] sm:$0xf]  ;;  %v8275_v56 = vor.u32 %v9214_v32, %v8274_v31 }
  0xd3   :  { %1096 = vmatpush.bf16.msrb.mxu1 %v8439_v35  ;;  %1122 = vmatpush.bf16.msrb.mxu3 %v8447_v38  ;;  %v8282_v38 = vld [vmem:[#allocation15 + $0x58] sm:$0xf]  ;;  %v8284_v49 = vld [vmem:[#allocation15 + $0x78] sm:$0xf0]  ;;  %v9206_v52 = vld [vmem:[#allocation15 + $0x2c] sm:$0xf0]  ;;  %v8279_v59 = vor.u32 %v9210_v1, %v8276_v36 }
  0xd4   :  { %v316_v21 = vsel %vm314_vm10, %v315_v50, %v9965_v44  ;;  %v525_v50 = vld [vmem:[%s524_s29] sm:$0x1]  ;;  %v8283_v28 = vor.u32 %v9215_v40, %v8282_v38  ;;  %v8287_v60 = vor.u32 %v9211_v43, %v8284_v49  ;;  %v8244_v7 = vld [vmem:[#allocation15 + $0x30] sm:$0xf0]  ;;  %vm577_vm4 = vcmask 1046528  }
  0xd5   :  { %v317_v17 = vclz %v316_v21  ;;  %1084 = vmatpush.bf16.msrb.mxu0 %v8403_v48  ;;  %1110 = vmatpush.bf16.msrb.mxu2 %v8411_v54  ;;  %v9977_v48 = vld [vmem:[#allocation15 + $0x10] sm:$0xf]  ;;  %v531_v54 = vld [vmem:[%s530_s30] sm:$0x1]  ;;  %v9192_v57 = vld [vmem:[#allocation14 + $0x1c4] sm:$0xf] }
  0xd6   :  { %v522_v58 = vld [vmem:[%s521_s2] sm:$0x1]  ;;  %v551_v63 = vrot.slane %v531_v54, 5  ;;  %v9196_v54 = vld [vmem:[#allocation14 + $0x1dc] sm:$0xf0]  ;;  %s194_s30 = sshll.u32 %s10757_s14, 4  ;;  %s195_s30 = int_to_ptr.hbm [resolvable:$true] %s194_s30 }
  0xd7   :  { %1097 = vmatpush.bf16.msrb.mxu1 %v8407_v51  ;;  %v8212_v2 = vadd.s32 4294967294, %v317_v17  ;;  %1123 = vmatpush.bf16.msrb.mxu3 %v8415_v55  ;;  %v528_v51 = vld [vmem:[%s527_s28] sm:$0x1] }
  0xd8   :  { %v534_v55 = vld [vmem:[%s533_s0] sm:$0x1]  ;;  %v548_v62 = vrot.slane %v528_v51, 6  ;;  %s196_s0 = sshll.u32 %s9750_s10, 4  ;;  %s197_s0 = int_to_ptr.vmem [resolvable:$true] %s196_s0 }
  0xd9   :  { %vm8213_vm11 = vcmp.lt.s32.totalorder %v8212_v2, 0  ;;  %1085 = vmatpush.bf16.msrb.mxu0 %v8371_v33  ;;  %1111 = vmatpush.bf16.msrb.mxu2 %v8379_v3  ;;  %v537_v21 = vld [vmem:[%s536_s17] sm:$0x1]  ;;  %v554_v0 = vrot.slane %v534_v55, 4  ;;  %v9202_v3 = vld [vmem:[#allocation15 + $0x14] sm:$0xf] }
  0xda   :  { %v320_v16 = vsel %vm8213_vm11, 0, %v8212_v2  ;;  %v540_v39 = vld [vmem:[%s539_s18] sm:$0x1]  ;;  %v8243_v2 = vor.u32 %v9206_v52, %v9977_v48  ;;  %v557_v8 = vrot.slane %v537_v21, 3  ;;  %v8247_v14 = vor.u32 %v9202_v3, %v8244_v7  ;;  %v8714_v21 = vld [vmem:[#allocation14 + $0x1c8] sm:$0xf] }
  0xdb   :  { %1098 = vmatpush.bf16.msrb.mxu1 %v8375_v61  ;;  %v321_v22 = vsub.s32 32, %v320_v16  ;;  %v325_v23 = vsub.s32 4294967266, %v320_v16  ;;  %1124 = vmatpush.bf16.msrb.mxu3 %v8383_v6  ;;  %v322_v34 = vshll.u32 %v9965_v44, %v320_v16  ;;  %v8315_v44 = vor.u32 %v9223_v26, %v8314_v20  ;;  %v8250_v11 = vld [vmem:[#allocation15 + $0x18] sm:$0xf]  ;;  %v9203_v16 = vld [vmem:[#allocation15 + $0x1c] sm:$0xf] }
  0xdc   :  { %v545_v61 = vrot.slane %v525_v50, 7  ;;  %v560_v9 = vrot.slane %v540_v39, 2  ;;  %v9184_v3 = vld [vmem:[#allocation14 + $0x184] sm:$0xf]  ;;  %v8682_v7 = vld [vmem:[#allocation14 + $0x188] sm:$0xf] }
  0xdd   :  { %v323_v35 = vshrl.u32 %v305_v15, %v321_v22  ;;  %v326_v45 = vadd.s32 127, %v325_v23  ;;  %1086 = vmatpush.bf16.msrb.mxu0 %v8339_v12  ;;  %1112 = vmatpush.bf16.msrb.mxu2 %v8347_v24  ;;  %v9207_v15 = vld [vmem:[#allocation15 + $0x34] sm:$0xf0]  ;;  %v8252_v22 = vld [vmem:[#allocation15 + $0x38] sm:$0xf0] }
  0xde   :  { %v566_v10 = vsel %vm565_vm14, %v522_v58, %v545_v61  ;;  %v8251_v20 = vor.u32 %v9207_v15, %v8250_v11  ;;  %v8708_v58 = vld [vmem:[#allocation14 + $0x1e0] sm:$0xf0]  ;;  %199 = dma.hbm_to_vmem [thread:$0]  %s195_s30, 8192, %s197_s0, [#allocation6 + $0x3] }
  0xdf   :  { %1099 = vmatpush.bf16.msrb.mxu1 %v8343_v18  ;;  %v324_v41 = vor.u32 %v323_v35, %v322_v34  ;;  %v327_v47 = vshll.u32 %v326_v45, 23  ;;  %1125 = vmatpush.bf16.msrb.mxu3 %v8351_v25  ;;  %v568_v13 = vsel %vm567_vm15, %v566_v10, %v548_v62  ;;  %v563_v18 = vrot.slane %v543_v5, 1  ;;  %v8674_v5 = vld [vmem:[#allocation14 + $0x180] sm:$0xf]  ;;  %v8684_v10 = vld [vmem:[#allocation14 + $0x1a8] sm:$0xf0] }
  0xe0   :  { %v570_v19 = vsel %vm569_vm0, %v568_v13, %v551_v63  ;;  %v8255_v25 = vor.u32 %v9203_v16, %v8252_v22  ;;  %v335_v34 = vsub.s32 4, %v9960_v29  ;;  %v8711_v62 = vor.u32 %v9192_v57, %v8708_v58  ;;  %v9188_v63 = vld [vmem:[#allocation14 + $0x19c] sm:$0xf0]  ;;  %v9181_v22 = vld [vmem:[#allocation14 + $0x164] sm:$0xf0] }
  0xe1   :  { %v328_v53 = vor.u32 4788187, %v327_v47  ;;  %1087 = vmatpush.bf16.msrb.mxu0 %v8307_v46  ;;  %v331_v33 = vcvt.s32.f32 %v324_v41  ;;  %1113 = vmatpush.bf16.msrb.mxu2 %v8315_v44  ;;  %v572_v24 = vsel %vm571_vm1, %v570_v19, %v554_v0  ;;  %v8675_v11 = vor.u32 %v9188_v63, %v8674_v5  ;;  %v8642_v13 = vld [vmem:[#allocation14 + $0x140] sm:$0xf]  ;;  %v8644_v19 = vld [vmem:[#allocation14 + $0x160] sm:$0xf0] }
  0xe2   :  { %v574_v27 = vsel %vm573_vm2, %v572_v24, %v557_v8  ;;  %v9189_v8 = vld [vmem:[#allocation14 + $0x1a4] sm:$0xf0]  ;;  %v8652_v24 = vld [vmem:[#allocation14 + $0x168] sm:$0xf0] }
  0xe3   :  { %1100 = vmatpush.bf16.msrb.mxu1 %v8311_v37  ;;  %v329_v17 = vand.u32 2147483647, %v328_v53  ;;  %1126 = vmatpush.bf16.msrb.mxu3 %v8319_v42  ;;  %v576_v31 = vsel %vm575_vm3, %v574_v27, %v560_v9  ;;  %v336_v37 = vsel %vm213_vm12, %v335_v34, %v9960_v29  ;;  %v8706_v53 = vld [vmem:[#allocation14 + $0x1c0] sm:$0xf]  ;;  %v9185_v9 = vld [vmem:[#allocation14 + $0x18c] sm:$0xf]  ;;  %v8683_v15 = vor.u32 %v9189_v8, %v8682_v7 }
  0xe4   :  { %v578_v32 = vsel %vm577_vm4, %v576_v31, %v563_v18  ;;  %v10011_v47 = vsel %vm9986_vm13, 0, %v336_v37  ;;  %v8707_v61 = vor.u32 %v9196_v54, %v8706_v53  ;;  %v8687_v16 = vor.u32 %v9185_v9, %v8684_v10  ;;  %v9176_v18 = vld [vmem:[#allocation14 + $0x144] sm:$0xf]  ;;  %v8610_v27 = vld [vmem:[#allocation14 + $0x100] sm:$0xf] }
  0xe5   :  { %v332_v6 = vmul.f32 %v331_v33, %v329_v17  ;;  %1088 = vmatpush.bf16.msrb.mxu0 %v8275_v56  ;;  %1114 = vmatpush.bf16.msrb.mxu2 %v8283_v28  ;;  %v10004_v46 = vpack.c.bf16 %v578_v32, %v578_v32  ;;  %v510_v50 = vand.u32 3, %v10011_v47  ;;  %v9197_v28 = vld [vmem:[#allocation14 + $0x1e4] sm:$0xf0]  ;;  %v8716_v17 = vld [vmem:[#allocation14 + $0x1e8] sm:$0xf0]  ;;  %v355_v57 = vadd.s32 3, %v10011_v47 }
  0xe6   :  { %v8715_v0 = vor.u32 %v9197_v28, %v8714_v21  ;;  %v9168_v34 = vld [vmem:[#allocation14 + $0x104] sm:$0xf]  ;;  %v8620_v37 = vld [vmem:[#allocation14 + $0x128] sm:$0xf0]  ;;  %v8586_v53 = vld [vmem:[#allocation14 + $0xc8] sm:$0xf] }
  0xe7   :  { %1101 = vmatpush.bf16.msrb.mxu1 %v8279_v59  ;;  %v333_v12 = vxor.u32 2147483648, %v332_v6  ;;  %1127 = vmatpush.bf16.msrb.mxu3 %v8287_v60  ;;  %vm511_vm5 = vcmp.lt.s32.totalorder %v510_v50, 2  ;;  %vm512_vm6 = vcmp.eq.s32.totalorder %v510_v50, 0  ;;  %vm515_vm7 = vcmp.eq.s32.totalorder %v510_v50, 2  ;;  %v9193_v60 = vld [vmem:[#allocation14 + $0x1cc] sm:$0xf] }
  0xe8   :  { %v8580_v50 = vld [vmem:[#allocation14 + $0xe0] sm:$0xf0]  ;;  %v9165_v54 = vld [vmem:[#allocation14 + $0xe4] sm:$0xf0]  ;;  %v9156_v28 = vld [vmem:[#allocation14 + $0x9c] sm:$0xf0] }
  0xe9   :  { %v334_v23 = vsel %vm213_vm12, %v333_v12, %v332_v6  ;;  %1089 = vmatpush.bf16.msrb.mxu0 %v8243_v2  ;;  %1115 = vmatpush.bf16.msrb.mxu2 %v8251_v20  ;;  %v8719_v2 = vor.u32 %v9193_v60, %v8716_v17  ;;  %v8676_v6 = vld [vmem:[#allocation14 + $0x1a0] sm:$0xf0]  ;;  %v8650_v20 = vld [vmem:[#allocation14 + $0x148] sm:$0xf]  ;;  %v8587_v60 = vor.u32 %v9165_v54, %v8586_v53  ;;  %v9153_v63 = vld [vmem:[#allocation14 + $0x8c] sm:$0xf] }
  0xea   :  { %v337_v26 = vsel %vm9986_vm13, %v9862_v4, %v334_v23  ;;  %v8679_v12 = vor.u32 %v9184_v3, %v8676_v6  ;;  %v9177_v23 = vld [vmem:[#allocation14 + $0x14c] sm:$0xf]  ;;  %v8651_v31 = vor.u32 %v9181_v22, %v8650_v20  ;;  %v9157_v5 = vld [vmem:[#allocation14 + $0xa4] sm:$0xf0]  ;;  %v8514_v6 = vld [vmem:[#allocation14 + $0x40] sm:$0xf] }
  0xeb   :  { %1102 = vmatpush.bf16.msrb.mxu1 %v8247_v14  ;;  %v339_v30 = vmul.f32 %v337_v26, %v337_v26  ;;  %1128 = vmatpush.bf16.msrb.mxu3 %v8255_v25  ;;  %v9180_v14 = vld [vmem:[#allocation14 + $0x15c] sm:$0xf0]  ;;  %v8655_v32 = vor.u32 %v9177_v23, %v8652_v24  ;;  %v8556_v47 = vld [vmem:[#allocation14 + $0xa8] sm:$0xf0]  ;;  %v9144_v10 = vld [vmem:[#allocation14 + $0x44] sm:$0xf] }
  0xec   :  { %v8643_v25 = vor.u32 %v9180_v14, %v8642_v13  ;;  %v9148_v7 = vld [vmem:[#allocation14 + $0x5c] sm:$0xf0]  ;;  %v8559_v9 = vor.u32 %v9153_v63, %v8556_v47  ;;  %v9149_v13 = vld [vmem:[#allocation14 + $0x64] sm:$0xf0]  ;;  %v9145_v14 = vld [vmem:[#allocation14 + $0x4c] sm:$0xf] }
  0xed   :  { %v340_v35 = vmul.f32 -0.001358992, %v339_v30  ;;  %v347_v45 = vmul.f32 -0.00019511016, %v339_v30  ;;  %v9140_v20 = vld [vmem:[#allocation14 + $0x1c] sm:$0xf0] }
  0xee   :  { %v9136_v22 = vld [vmem:[#allocation14 + $0x4] sm:$0xf]  ;;  %v8660_v63 = vld [vmem:[#allocation14 + $0x170] sm:$0xf0]  ;;  %v8666_v47 = vld [vmem:[#allocation14 + $0x158] sm:$0xf] }
  0xef   :  { %v341_v1 = vadd.f32 0.041655596, %v340_v35  ;;  %v348_v36 = vadd.f32 0.008332121, %v347_v45  ;;  %v8612_v35 = vld [vmem:[#allocation14 + $0x120] sm:$0xf0] }
  0xf0   :  { %v8618_v45 = vld [vmem:[#allocation14 + $0x108] sm:$0xf]  ;;  %v8484_v23 = vld [vmem:[#allocation14 + $0x20] sm:$0xf0] }
  0xf1   :  { %v342_v38 = vmul.f32 %v341_v1, %v339_v30  ;;  %v349_v40 = vmul.f32 %v348_v36, %v339_v30  ;;  %v9173_v1 = vld [vmem:[#allocation14 + $0x124] sm:$0xf0]  ;;  %v9169_v36 = vld [vmem:[#allocation14 + $0x10c] sm:$0xf] }
  0xf3   :  { %v343_v43 = vadd.f32 -0.4999988, %v342_v38  ;;  %v350_v41 = vadd.f32 -0.16666654, %v349_v40  ;;  %v8615_v40 = vor.u32 %v9168_v34, %v8612_v35  ;;  %v9198_v34 = vld [vmem:[#allocation14 + $0x1ec] sm:$0xf0] }
  0xf5   :  { %v344_v44 = vmul.f32 %v343_v43, %v339_v30  ;;  %v351_v42 = vmul.f32 %v350_v41, %v339_v30  ;;  %v9172_v30 = vld [vmem:[#allocation14 + $0x11c] sm:$0xf0] }
  0xf6   :  { %v8611_v38 = vor.u32 %v9172_v30, %v8610_v27  ;;  %v8578_v43 = vld [vmem:[#allocation14 + $0xc0] sm:$0xf]  ;;  %v9141_v27 = vld [vmem:[#allocation14 + $0x24] sm:$0xf0]  ;;  %v9137_v30 = vld [vmem:[#allocation14 + $0xc] sm:$0xf] }
  0xf7   :  { %v10013_v49 = vadd.f32 1.0, %v344_v44  ;;  %v352_v48 = vadd.f32 1.0, %v351_v42  ;;  %v9164_v41 = vld [vmem:[#allocation14 + $0xdc] sm:$0xf0]  ;;  %v8619_v44 = vor.u32 %v9173_v1, %v8618_v45  ;;  %v8623_v42 = vor.u32 %v9169_v36, %v8620_v37  ;;  %v9194_v45 = vld [vmem:[#allocation14 + $0x1d4] sm:$0xf] }
  0xf8   :  { %v8579_v58 = vor.u32 %v9164_v41, %v8578_v43  ;;  %v8724_v1 = vld [vmem:[#allocation14 + $0x1f0] sm:$0xf0]  ;;  %v8730_v36 = vld [vmem:[#allocation14 + $0x1d8] sm:$0xf]  ;;  %v9195_v43 = vld [vmem:[#allocation14 + $0x1dc] sm:$0xf] }
  0xf9   :  { %v10016_v51 = vmul.f32 %v352_v48, %v337_v26  ;;  %v362_v52 = vxor.u32 2147483648, %v10013_v49  ;;  %v8647_v26 = vor.u32 %v9176_v18, %v8644_v19  ;;  %v9160_v48 = vld [vmem:[#allocation14 + $0xc4] sm:$0xf]  ;;  %v8515_v18 = vor.u32 %v9148_v7, %v8514_v6  ;;  %v8732_v41 = vld [vmem:[#allocation14 + $0x1f8] sm:$0xf0] }
  0xfa   :  { %v8583_v21 = vor.u32 %v9160_v48, %v8580_v50  ;;  %v8690_v48 = vld [vmem:[#allocation14 + $0x190] sm:$0xf]  ;;  %v8735_v54 = vor.u32 %v9195_v43, %v8732_v41  ;;  %v9159_v43 = vld [vmem:[#allocation14 + $0xb4] sm:$0xf0]  ;;  %v9155_v41 = vld [vmem:[#allocation14 + $0x9c] sm:$0xf] }
  0xfb   :  { %v359_v29 = vxor.u32 2147483648, %v10016_v51  ;;  %v517_v56 = vsel %vm515_vm7, %v362_v52, %v10016_v51  ;;  %v9190_v50 = vld [vmem:[#allocation14 + $0x1ac] sm:$0xf0] }
  0xfc   :  { %v8691_v4 = vor.u32 %v9190_v50, %v8690_v48 }
  0xfd   :  { %v514_v55 = vsel %vm512_vm6, %v10013_v49, %v359_v29 }
  0xfe   :  { %v518_v59 = vsel %vm511_vm5, %v514_v55, %v517_v56  ;;  %v9161_v55 = vld [vmem:[#allocation14 + $0xcc] sm:$0xf] }
  0xff   :  { %v519_v33 = vsel %vm354_vm8, nan, %v518_v59  ;;  %v8588_v56 = vld [vmem:[#allocation14 + $0xe8] sm:$0xf0]  ;;  %v8546_v59 = vld [vmem:[#allocation14 + $0x80] sm:$0xf] }
 0x100   :  { %v10029_v39 = vpack.c.bf16 %v519_v33, %v519_v33  ;;  %v8591_v17 = vor.u32 %v9161_v55, %v8588_v56  ;;  %v9152_v33 = vld [vmem:[#allocation14 + $0x84] sm:$0xf]  ;;  %v9186_v55 = vld [vmem:[#allocation14 + $0x194] sm:$0xf] }
 0x101   :  { %v8692_v56 = vld [vmem:[#allocation14 + $0x1b0] sm:$0xf0] }
 0x102   :  { %1038 = vmatmul.bf16.vlgmr.msra.gmra.mxu0 %v10029_v39  ;;  %1051 = vmatmul.bf16.vlgmr.msra.gmra.mxu1 %v10029_v39 }
 0x103   :  { %1064 = vmatmul.bf16.vlgmr.msra.gmra.mxu2 %v10029_v39  ;;  %1077 = vmatmul.bf16.vlgmr.msra.gmra.mxu3 %v10029_v39 }
 0x104   :  { %1454 = vmatpush.bf16.msra.mxu0 %v8707_v61  ;;  %1467 = vmatpush.bf16.msra.mxu1 %v8711_v62  ;;  %v8548_v61 = vld [vmem:[#allocation14 + $0xa0] sm:$0xf0]  ;;  %v8554_v62 = vld [vmem:[#allocation14 + $0x88] sm:$0xf] }
 0x105   :  { %1480 = vmatpush.bf16.msra.mxu2 %v8715_v0  ;;  %1493 = vmatpush.bf16.msra.mxu3 %v8719_v2  ;;  %v356_v0 = vand.u32 3, %v355_v57  ;;  %v8547_v2 = vor.u32 %v9156_v28, %v8546_v59  ;;  %v8551_v3 = vor.u32 %v9152_v33, %v8548_v61  ;;  %v8555_v8 = vor.u32 %v9157_v5, %v8554_v62  ;;  %v8698_v57 = vld [vmem:[#allocation14 + $0x198] sm:$0xf]  ;;  %v8700_v59 = vld [vmem:[#allocation14 + $0x1b8] sm:$0xf0] }
 0x106   :  { %v9182_v33 = vld [vmem:[#allocation14 + $0x16c] sm:$0xf0]  ;;  %v9178_v5 = vld [vmem:[#allocation14 + $0x154] sm:$0xf] }
 0x107   :  { %vm357_vm9 = vcmp.lt.s32.totalorder %v356_v0, 2  ;;  %vm358_vm10 = vcmp.eq.s32.totalorder %v356_v0, 0  ;;  %vm361_vm11 = vcmp.eq.s32.totalorder %v356_v0, 2  ;;  %v9183_v0 = vld [vmem:[#allocation14 + $0x174] sm:$0xf0]  ;;  %v8663_v7 = vor.u32 %v9178_v5, %v8660_v63 }
 0x108   :  { %1455 = vmatpush.bf16.msra.mxu0 %v8675_v11  ;;  %1468 = vmatpush.bf16.msra.mxu1 %v8679_v12  ;;  %v8516_v11 = vld [vmem:[#allocation14 + $0x60] sm:$0xf0]  ;;  %v8522_v12 = vld [vmem:[#allocation14 + $0x48] sm:$0xf]  ;;  %v8506_v5 = vld [vmem:[#allocation14 + $0x18] sm:$0xf] }
 0x109   :  { %1481 = vmatpush.bf16.msra.mxu2 %v8683_v15  ;;  %1494 = vmatpush.bf16.msra.mxu3 %v8687_v16  ;;  %v8524_v15 = vld [vmem:[#allocation14 + $0x68] sm:$0xf0]  ;;  %v360_v16 = vsel %vm358_vm10, %v10013_v49, %v359_v29  ;;  %v8519_v19 = vor.u32 %v9144_v10, %v8516_v11  ;;  %v8523_v24 = vor.u32 %v9149_v13, %v8522_v12  ;;  %v9170_v12 = vld [vmem:[#allocation14 + $0x114] sm:$0xf]  ;;  %v9143_v63 = vld [vmem:[#allocation14 + $0x34] sm:$0xf0] }
 0x10a   :  { %v8492_v29 = vld [vmem:[#allocation14 + $0x28] sm:$0xf0]  ;;  %v8667_v10 = vor.u32 %v9183_v0, %v8666_v47  ;;  %v8628_v13 = vld [vmem:[#allocation14 + $0x130] sm:$0xf0]  ;;  %v9139_v47 = vld [vmem:[#allocation14 + $0x1c] sm:$0xf] }
 0x10b   :  { %v8508_v0 = vld [vmem:[#allocation14 + $0x38] sm:$0xf0] }
 0x10c   :  { %1456 = vmatpush.bf16.msra.mxu0 %v8643_v25  ;;  %1469 = vmatpush.bf16.msra.mxu1 %v8647_v26  ;;  %v8527_v25 = vor.u32 %v9145_v14, %v8524_v15  ;;  %v8490_v26 = vld [vmem:[#allocation14 + $0x8] sm:$0xf]  ;;  %v8634_v14 = vld [vmem:[#allocation14 + $0x118] sm:$0xf] }
 0x10d   :  { %1482 = vmatpush.bf16.msra.mxu2 %v8651_v31  ;;  %1495 = vmatpush.bf16.msra.mxu3 %v8655_v32  ;;  %v363_v31 = vsel %vm361_vm11, %v362_v52, %v10016_v51  ;;  %v8722_v32 = vld [vmem:[#allocation14 + $0x1d0] sm:$0xf]  ;;  %v8491_v49 = vor.u32 %v9141_v27, %v8490_v26  ;;  %v9175_v15 = vld [vmem:[#allocation14 + $0x134] sm:$0xf0]  ;;  %v8596_v26 = vld [vmem:[#allocation14 + $0xf0] sm:$0xf0] }
 0x10e   :  { %v364_v35 = vsel %vm357_vm9, %v360_v16, %v363_v31  ;;  %v8723_v52 = vor.u32 %v9198_v34, %v8722_v32  ;;  %v8636_v16 = vld [vmem:[#allocation14 + $0x138] sm:$0xf0]  ;;  %v8602_v27 = vld [vmem:[#allocation14 + $0xd8] sm:$0xf] }
 0x10f   :  { %v365_v51 = vsel %vm354_vm8, nan, %v364_v35  ;;  %v9163_v31 = vld [vmem:[#allocation14 + $0xdc] sm:$0xf]  ;;  %v8562_v35 = vld [vmem:[#allocation14 + $0x90] sm:$0xf] }
 0x110   :  { %1457 = vmatpush.bf16.msra.mxu0 %v8611_v38  ;;  %1470 = vmatpush.bf16.msra.mxu1 %v8615_v40  ;;  %v8487_v38 = vor.u32 %v9136_v22, %v8484_v23  ;;  %v9199_v40 = vld [vmem:[#allocation14 + $0x1f4] sm:$0xf0]  ;;  %v10050_v28 = vpack.c.bf16 %v365_v51, %v365_v51  ;;  %v9166_v22 = vld [vmem:[#allocation14 + $0xec] sm:$0xf0]  ;;  %v8635_v23 = vor.u32 %v9175_v15, %v8634_v14 }
 0x111   :  { %1483 = vmatpush.bf16.msra.mxu2 %v8619_v44  ;;  %1496 = vmatpush.bf16.msra.mxu3 %v8623_v42  ;;  %v8495_v44 = vor.u32 %v9137_v30, %v8492_v29  ;;  %v8727_v42 = vor.u32 %v9194_v45, %v8724_v1  ;;  %v8731_v53 = vor.u32 %v9199_v40, %v8730_v36  ;;  %v9167_v30 = vld [vmem:[#allocation14 + $0xf4] sm:$0xf0]  ;;  %v8604_v29 = vld [vmem:[#allocation14 + $0xf8] sm:$0xf0]  ;;  %v9158_v45 = vld [vmem:[#allocation14 + $0xac] sm:$0xf0] }
 0x112   :  { %1090 = vmatmul.bf16.vlgmr.msrb.gmra.mxu0 %v10029_v39  ;;  %1103 = vmatmul.bf16.vlgmr.msrb.gmra.mxu1 %v10029_v39  ;;  %v8603_v1 = vor.u32 %v9167_v30, %v8602_v27  ;;  %v8607_v36 = vor.u32 %v9163_v31, %v8604_v29  ;;  %v8570_v40 = vld [vmem:[#allocation14 + $0x98] sm:$0xf] }
 0x113   :  { %1116 = vmatmul.bf16.vlgmr.msrb.gmra.mxu2 %v10029_v39  ;;  %1129 = vmatmul.bf16.vlgmr.msrb.gmra.mxu3 %v10029_v39  ;;  %v8482_v39 = vld [vmem:[#allocation14] sm:$0xf]  ;;  %v8571_v48 = vor.u32 %v9159_v43, %v8570_v40 }
 0x114   :  { %1458 = vmatpush.bf16.msra.mxu0 %v8579_v58  ;;  %1471 = vmatpush.bf16.msra.mxu1 %v8583_v21  ;;  %v8483_v37 = vor.u32 %v9140_v20, %v8482_v39  ;;  %v9191_v58 = vld [vmem:[#allocation14 + $0x1b4] sm:$0xf0]  ;;  %v9187_v21 = vld [vmem:[#allocation14 + $0x19c] sm:$0xf]  ;;  %v8594_v20 = vld [vmem:[#allocation14 + $0xd0] sm:$0xf] }
 0x115   :  { %1484 = vmatpush.bf16.msra.mxu2 %v8587_v60  ;;  %1497 = vmatpush.bf16.msra.mxu3 %v8591_v17  ;;  %v8695_v60 = vor.u32 %v9186_v55, %v8692_v56  ;;  %v8658_v17 = vld [vmem:[#allocation14 + $0x150] sm:$0xf]  ;;  %v8699_v61 = vor.u32 %v9191_v58, %v8698_v57  ;;  %v8703_v62 = vor.u32 %v9187_v21, %v8700_v59  ;;  %v9171_v39 = vld [vmem:[#allocation14 + $0x11c] sm:$0xf]  ;;  %v8538_v55 = vld [vmem:[#allocation14 + $0x58] sm:$0xf] }
 0x116   :  { %v8659_v6 = vor.u32 %v9182_v33, %v8658_v17  ;;  %v8595_v32 = vor.u32 %v9166_v22, %v8594_v20  ;;  %v9151_v56 = vld [vmem:[#allocation14 + $0x74] sm:$0xf0]  ;;  %v9147_v57 = vld [vmem:[#allocation14 + $0x5c] sm:$0xf] }
 0x117   :  { %v8540_v58 = vld [vmem:[#allocation14 + $0x78] sm:$0xf0]  ;;  %v8539_v17 = vor.u32 %v9151_v56, %v8538_v55 }
 0x118   :  { %1459 = vmatpush.bf16.msra.mxu0 %v8547_v2  ;;  %1472 = vmatpush.bf16.msra.mxu1 %v8551_v3  ;;  %v9179_v2 = vld [vmem:[#allocation14 + $0x15c] sm:$0xf]  ;;  %v8543_v33 = vor.u32 %v9147_v57, %v8540_v58 }
 0x119   :  { %1485 = vmatpush.bf16.msra.mxu2 %v8555_v8  ;;  %1498 = vmatpush.bf16.msra.mxu3 %v8559_v9  ;;  %v8668_v3 = vld [vmem:[#allocation14 + $0x178] sm:$0xf0]  ;;  %v8626_v8 = vld [vmem:[#allocation14 + $0x110] sm:$0xf] }
 0x11a   :  { %v9174_v9 = vld [vmem:[#allocation14 + $0x12c] sm:$0xf0]  ;;  %v8671_v11 = vor.u32 %v9179_v2, %v8668_v3  ;;  %v10083_v22 = vld [vmem:[%s10749_s6] sm:$0xff] }
 0x11c   :  { %1460 = vmatpush.bf16.msra.mxu0 %v8515_v18  ;;  %1473 = vmatpush.bf16.msra.mxu1 %v8519_v19  ;;  %v8627_v18 = vor.u32 %v9174_v9, %v8626_v8  ;;  %v8631_v19 = vor.u32 %v9170_v12, %v8628_v13 }
 0x11d   :  { %1486 = vmatpush.bf16.msra.mxu2 %v8523_v24  ;;  %1499 = vmatpush.bf16.msra.mxu3 %v8527_v25  ;;  %v8639_v24 = vor.u32 %v9171_v39, %v8636_v16  ;;  %v9162_v25 = vld [vmem:[#allocation14 + $0xd4] sm:$0xf] }
 0x11e   :  { %v8599_v34 = vor.u32 %v9162_v25, %v8596_v26  ;;  %v1560_v25 = vperm.slane %v10083_v22, 0  ;;  %v1561_v26 = vperm.slane %v10083_v22, 1 }
 0x120   :  { %1461 = vmatpush.bf16.msra.mxu0 %v8483_v37  ;;  %1474 = vmatpush.bf16.msra.mxu1 %v8487_v38  ;;  %v9154_v37 = vld [vmem:[#allocation14 + $0x94] sm:$0xf] }
 0x121   :  { %1487 = vmatpush.bf16.msra.mxu2 %v8491_v49  ;;  %1500 = vmatpush.bf16.msra.mxu3 %v8495_v44  ;;  %v8564_v38 = vld [vmem:[#allocation14 + $0xb0] sm:$0xf0]  ;;  %v8572_v49 = vld [vmem:[#allocation14 + $0xb8] sm:$0xf0]  ;;  %v8563_v44 = vor.u32 %v9158_v45, %v8562_v35 }
 0x122   :  { %v8567_v51 = vor.u32 %v9154_v37, %v8564_v38  ;;  %v8575_v50 = vor.u32 %v9155_v41, %v8572_v49 }
 0x123   :  { %1462 = vmatmul.bf16.vlgmr.msra.gmra.mxu0 %v10050_v28  ;;  %1475 = vmatmul.bf16.vlgmr.msra.gmra.mxu1 %v10050_v28 }
 0x124   :  { %1506 = vmatpush.bf16.msrb.mxu0 %v8723_v52  ;;  %1519 = vmatpush.bf16.msrb.mxu1 %v8727_v42  ;;  %v8530_v52 = vld [vmem:[#allocation14 + $0x50] sm:$0xf] }
 0x125   :  { %1532 = vmatpush.bf16.msrb.mxu2 %v8731_v53  ;;  %1545 = vmatpush.bf16.msrb.mxu3 %v8735_v54  ;;  %v9150_v42 = vld [vmem:[#allocation14 + $0x6c] sm:$0xf0]  ;;  %v9146_v53 = vld [vmem:[#allocation14 + $0x54] sm:$0xf] }
 0x126   :  { %1488 = vmatmul.bf16.vlgmr.msra.gmra.mxu2 %v10050_v28  ;;  %1501 = vmatmul.bf16.vlgmr.msra.gmra.mxu3 %v10050_v28  ;;  %v8532_v54 = vld [vmem:[#allocation14 + $0x70] sm:$0xf0]  ;;  %v8531_v21 = vor.u32 %v9150_v42, %v8530_v52 }
 0x127   :  { %v8535_v59 = vor.u32 %v9146_v53, %v8532_v54 }
 0x128   :  { %1507 = vmatpush.bf16.msrb.mxu0 %v8691_v4  ;;  %1520 = vmatpush.bf16.msrb.mxu1 %v8695_v60  ;;  %v8498_v4 = vld [vmem:[#allocation14 + $0x10] sm:$0xf] }
 0x129   :  { %1533 = vmatpush.bf16.msrb.mxu2 %v8699_v61  ;;  %1546 = vmatpush.bf16.msrb.mxu3 %v8703_v62  ;;  %v9142_v60 = vld [vmem:[#allocation14 + $0x2c] sm:$0xf0]  ;;  %v9138_v61 = vld [vmem:[#allocation14 + $0x14] sm:$0xf] }
 0x12a   :  { %v8500_v62 = vld [vmem:[#allocation14 + $0x30] sm:$0xf0]  ;;  %v8499_v2 = vor.u32 %v9142_v60, %v8498_v4 }
 0x12b   :  { %v8503_v3 = vor.u32 %v9138_v61, %v8500_v62 }
 0x12c   :  { %1508 = vmatpush.bf16.msrb.mxu0 %v8659_v6  ;;  %1521 = vmatpush.bf16.msrb.mxu1 %v8663_v7  ;;  %v8507_v6 = vor.u32 %v9143_v63, %v8506_v5  ;;  %v8511_v7 = vor.u32 %v9139_v47, %v8508_v0 }
 0x12d   :  { %1534 = vmatpush.bf16.msrb.mxu2 %v8667_v10  ;;  %1547 = vmatpush.bf16.msrb.mxu3 %v8671_v11 }
 0x130   :  { %1509 = vmatpush.bf16.msrb.mxu0 %v8627_v18  ;;  %1522 = vmatpush.bf16.msrb.mxu1 %v8631_v19 }
 0x131   :  { %1535 = vmatpush.bf16.msrb.mxu2 %v8635_v23  ;;  %1548 = vmatpush.bf16.msrb.mxu3 %v8639_v24 }
 0x134   :  { %1510 = vmatpush.bf16.msrb.mxu0 %v8595_v32  ;;  %1523 = vmatpush.bf16.msrb.mxu1 %v8599_v34 }
 0x135   :  { %1536 = vmatpush.bf16.msrb.mxu2 %v8603_v1  ;;  %1549 = vmatpush.bf16.msrb.mxu3 %v8607_v36  ;;  %v1562_v1 = vperm.slane %v10083_v22, 2  ;;  %v1563_v36 = vperm.slane %v10083_v22, 3 }
 0x138   :  { %1511 = vmatpush.bf16.msrb.mxu0 %v8563_v44  ;;  %1524 = vmatpush.bf16.msrb.mxu1 %v8567_v51 }
 0x139   :  { %1537 = vmatpush.bf16.msrb.mxu2 %v8571_v48  ;;  %1550 = vmatpush.bf16.msrb.mxu3 %v8575_v50 }
 0x13c   :  { %1512 = vmatpush.bf16.msrb.mxu0 %v8531_v21  ;;  %1525 = vmatpush.bf16.msrb.mxu1 %v8535_v59 }
 0x13d   :  { %1538 = vmatpush.bf16.msrb.mxu2 %v8539_v17  ;;  %1551 = vmatpush.bf16.msrb.mxu3 %v8543_v33 }
 0x140   :  { %1513 = vmatpush.bf16.msrb.mxu0 %v8499_v2  ;;  %1526 = vmatpush.bf16.msrb.mxu1 %v8503_v3  ;;  %v1564_v2 = vperm.slane %v10083_v22, 4  ;;  %v1565_v3 = vperm.slane %v10083_v22, 5 }
 0x141   :  { %1539 = vmatpush.bf16.msrb.mxu2 %v8507_v6  ;;  %1552 = vmatpush.bf16.msrb.mxu3 %v8511_v7  ;;  %v1566_v6 = vperm.slane %v10083_v22, 6 }
 0x143   :  { %1514 = vmatmul.bf16.vlgmr.msrb.gmra.mxu0 %v10050_v28  ;;  %1527 = vmatmul.bf16.vlgmr.msrb.gmra.mxu1 %v10050_v28 }
 0x144   :  { %1540 = vmatmul.bf16.vlgmr.msrb.gmra.mxu2 %v10050_v28  ;;  %1553 = vmatmul.bf16.vlgmr.msrb.gmra.mxu3 %v10050_v28 }
 0x17f   :  { %v1039_v28 = vpop.f32.mrf.mxu0  ;;  %v1052_v8 = vpop.f32.mrf.mxu1 }
 0x186   :  { %v1065_v9 = vpop.f32.mrf.mxu2  ;;  %v1078_v10 = vpop.f32.mrf.mxu3 }
 0x187   :  { %v1041_v11 = vpop.f32.mrf.mxu0  ;;  %v1054_v12 = vpop.f32.mrf.mxu1 }
 0x18e   :  { %v1067_v13 = vpop.f32.mrf.mxu2  ;;  %v1080_v14 = vpop.f32.mrf.mxu3 }
 0x18f   :  { %v10072_v15 = vpop.f32.mrf.mxu0  ;;  %v10074_v39 = vpop.f32.mrf.mxu1 }
 0x196   :  { %v10076_v16 = vpop.f32.mrf.mxu2  ;;  %v10078_v18 = vpop.f32.mrf.mxu3 }
 0x197   :  { %v1093_v19 = vpop.f32.mrf.mxu0  ;;  %v1106_v20 = vpop.f32.mrf.mxu1 }
 0x19e   :  { %v1119_v23 = vpop.f32.mrf.mxu2  ;;  %v1132_v24 = vpop.f32.mrf.mxu3 }
 0x1a0   :  { %v1463_v27 = vpop.f32.mrf.mxu0  ;;  %v1476_v30 = vpop.f32.mrf.mxu1 }
 0x1a1   :  { %v1464_v31 = vadd.f32 %v1463_v27, %v1039_v28  ;;  %v1477_v29 = vadd.f32 %v1476_v30, %v1052_v8  ;;  %v1567_v28 = vperm.slane %v10083_v22, 7 }
 0x1a3   :  { %v10087_v32 = vadd.f32 %v1560_v25, %v1464_v31  ;;  %v10089_v34 = vadd.f32 %v1561_v26, %v1477_v29 }
 0x1a5   :  { %v8736_v35 = vmul.f32 -1.442695, %v10087_v32  ;;  %v8737_v45 = vmul.f32 -1.442695, %v10089_v34 }
 0x1a7   :  { %9383 = vpow2.f32 %v8736_v35 }
 0x1a8   :  { %9385 = vpow2.f32 %v8737_v45  ;;  %v1465_v41 = vpop.f32.mrf.mxu0  ;;  %v1478_v49 = vpop.f32.mrf.mxu1 }
 0x1a9   :  { %v1489_v37 = vpop.f32.mrf.mxu2  ;;  %v1502_v38 = vpop.f32.mrf.mxu3 }
 0x1aa   :  { %v1490_v40 = vadd.f32 %v1489_v37, %v1065_v9  ;;  %v1503_v43 = vadd.f32 %v1502_v38, %v1078_v10 }
 0x1ac   :  { %v10095_v44 = vadd.f32 %v1562_v1, %v1490_v40  ;;  %v10097_v51 = vadd.f32 %v1563_v36, %v1503_v43 }
 0x1ad   :  { %v9384_v48 = vpop.eup %9383 }
 0x1ae   :  { %v8738_v52 = vmul.f32 -1.442695, %v10095_v44  ;;  %v8739_v42 = vmul.f32 -1.442695, %v10097_v51  ;;  %v9386_v50 = vpop.eup %9385  ;;  %v1608_v53 = vadd.f32 1.0, %v9384_v48 }
 0x1af   :  { %v1609_v54 = vadd.f32 1.0, %v9386_v50 }
 0x1b0   :  { %9387 = vpow2.f32 %v8738_v52  ;;  %v1625_v33 = vand.u32 2147483647, %v1608_v53  ;;  %v1627_v61 = vand.u32 2147483648, %v1608_v53  ;;  %vm1621_vm12 = vweird.f32 %v1608_v53 }
 0x1b1   :  { %9389 = vpow2.f32 %v8739_v42  ;;  %v1491_v55 = vpop.f32.mrf.mxu2  ;;  %v1504_v56 = vpop.f32.mrf.mxu3  ;;  %v1640_v63 = vand.u32 2147483647, %v1609_v54  ;;  %v1642_v47 = vand.u32 2147483648, %v1609_v54  ;;  %vm1636_vm15 = vweird.f32 %v1609_v54 }
 0x1b2   :  { %9391 = vrcp.f32 %v1608_v53  ;;  %vm10111_vm14 = vcmp.eq.f32.partialorder %v1625_v33, 8.507059e+37  ;;  %v1628_v12 = vor.u32 1.1754944e-38, %v1627_v61 }
 0x1b3   :  { %9393 = vrcp.f32 %v1609_v54  ;;  %vm10115_vm1 = vcmp.eq.f32.partialorder %v1640_v63, 8.507059e+37  ;;  %v1643_v14 = vor.u32 1.1754944e-38, %v1642_v47 }
 0x1b6   :  { %v9388_v57 = vpop.eup %9387 }
 0x1b7   :  { %v9390_v58 = vpop.eup %9389  ;;  %v10101_v21 = vadd.f32 1.0, %v9388_v57 }
 0x1b8   :  { %v9392_v59 = vpop.eup %9391  ;;  %v10103_v4 = vadd.f32 1.0, %v9390_v58 }
 0x1b9   :  { %v9394_v60 = vpop.eup %9393  ;;  %v1617_v17 = vmul.f32 %v9392_v59, %v1608_v53  ;;  %9395 = vrcp.f32 %v10101_v21  ;;  %vm1622_vm13 = vweird.f32 %v9392_v59  ;;  %vm1651_vm3 = vweird.f32 %v10101_v21 }
 0x1ba   :  { %v1632_v62 = vmul.f32 %v9394_v60, %v1609_v54  ;;  %9397 = vrcp.f32 %v10103_v4  ;;  %vm1637_vm0 = vweird.f32 %v9394_v60  ;;  %vm1623_vm2 = vmor %vm1621_vm12, %vm1622_vm13  ;;  %v1655_v30 = vand.u32 2147483647, %v10101_v21 }
 0x1bb   :  { %v1618_v5 = vsub.f32 1.0, %v1617_v17  ;;  %vm1638_vm4 = vmor %vm1636_vm15, %vm1637_vm0  ;;  %v1657_v31 = vand.u32 2147483648, %v10101_v21  ;;  %vm1666_vm6 = vweird.f32 %v10103_v4  ;;  %v1670_v49 = vand.u32 2147483647, %v10103_v4 }
 0x1bc   :  { %v1633_v0 = vsub.f32 1.0, %v1632_v62  ;;  %vm1656_vm9 = vcmp.eq.f32.partialorder %v1655_v30, 8.507059e+37 }
 0x1bd   :  { %v1619_v7 = vmul.f32 %v9392_v59, %v1618_v5  ;;  %v1658_v54 = vor.u32 1.1754944e-38, %v1657_v31  ;;  %vm1671_vm11 = vcmp.eq.f32.partialorder %v1670_v49, 8.507059e+37 }
 0x1be   :  { %v1634_v9 = vmul.f32 %v9394_v60, %v1633_v0 }
 0x1bf   :  { %v9396_v10 = vpop.eup %9395  ;;  %v1620_v11 = vadd.f32 %v9392_v59, %v1619_v7 }
 0x1c0   :  { %v1515_v19 = vpop.f32.mrf.mxu0  ;;  %v1528_v20 = vpop.f32.mrf.mxu1  ;;  %v1635_v23 = vadd.f32 %v9394_v60, %v1634_v9  ;;  %v1647_v24 = vmul.f32 %v9396_v10, %v10101_v21  ;;  %vm1652_vm5 = vweird.f32 %v9396_v10 }
 0x1c1   :  { %v1516_v25 = vadd.f32 %v1515_v19, %v10072_v15  ;;  %v9398_v26 = vpop.eup %9397  ;;  %v1624_v27 = vsel %vm1623_vm2, %v9392_v59, %v1620_v11  ;;  %v1529_v29 = vadd.f32 %v1528_v20, %v10074_v39  ;;  %vm1653_vm8 = vmor %vm1651_vm3, %vm1652_vm5 }
 0x1c2   :  { %v1629_v35 = vsel %vm10111_vm14, %v1628_v12, %v1624_v27  ;;  %v1639_v45 = vsel %vm1638_vm4, %v9394_v60, %v1635_v23  ;;  %v1648_v1 = vsub.f32 1.0, %v1647_v24  ;;  %v1662_v36 = vmul.f32 %v9398_v26, %v10103_v4 }
 0x1c3   :  { %v10131_v15 = vmul.f32 %v1629_v35, %v10087_v32  ;;  %v1644_v37 = vsel %vm10115_vm1, %v1643_v14, %v1639_v45  ;;  %v10135_v38 = vadd.f32 %v1564_v2, %v1516_v25  ;;  %v10140_v41 = vadd.f32 %v1565_v3, %v1529_v29 }
 0x1c4   :  { %v10138_v40 = vmul.f32 %v1644_v37, %v10089_v34  ;;  %v1649_v39 = vmul.f32 %v9396_v10, %v1648_v1  ;;  %v1663_v43 = vsub.f32 1.0, %v1662_v36  ;;  %v1672_v32 = vand.u32 2147483648, %v10103_v4 }
 0x1c5   :  { %v8740_v52 = vmul.f32 -1.442695, %v10135_v38  ;;  %vm1667_vm7 = vweird.f32 %v9398_v26  ;;  %v8741_v50 = vmul.f32 -1.442695, %v10140_v41 }
 0x1c6   :  { %v1650_v42 = vadd.f32 %v9396_v10, %v1649_v39  ;;  %v1664_v48 = vmul.f32 %v9398_v26, %v1663_v43  ;;  %vm1668_vm10 = vmor %vm1666_vm6, %vm1667_vm7  ;;  %v1673_v33 = vor.u32 1.1754944e-38, %v1672_v32 }
 0x1c7   :  { %v1541_v53 = vpop.f32.mrf.mxu2  ;;  %v1554_v34 = vpop.f32.mrf.mxu3  ;;  %9399 = vpow2.f32 %v8740_v52 }
 0x1c8   :  { %v1542_v55 = vadd.f32 %v1541_v53, %v10076_v16  ;;  %v1555_v56 = vadd.f32 %v1554_v34, %v10078_v18  ;;  %v1517_v57 = vpop.f32.mrf.mxu0  ;;  %v1530_v58 = vpop.f32.mrf.mxu1  ;;  %v1654_v59 = vsel %vm1653_vm8, %v9396_v10, %v1650_v42  ;;  %v1665_v60 = vadd.f32 %v9398_v26, %v1664_v48 }
 0x1c9   :  { %9401 = vpow2.f32 %v8741_v50  ;;  %v1659_v17 = vsel %vm1656_vm9, %v1658_v54, %v1654_v59 }
 0x1ca   :  { %v10157_v21 = vadd.f32 %v1566_v6, %v1542_v55  ;;  %v10159_v61 = vadd.f32 %v1567_v28, %v1555_v56  ;;  %v10162_v16 = vmul.f32 %v1659_v17, %v10095_v44  ;;  %v1669_v18 = vsel %vm1668_vm10, %v9398_v26, %v1665_v60 }
 0x1cb   :  { %v1674_v62 = vsel %vm1671_vm11, %v1673_v33, %v1669_v18 }
 0x1cc   :  { %v8742_v5 = vmul.f32 -1.442695, %v10157_v21  ;;  %v8743_v63 = vmul.f32 -1.442695, %v10159_v61  ;;  %v10167_v4 = vmul.f32 %v1674_v62, %v10097_v51 }
 0x1cd   :  { %v9400_v47 = vpop.eup %9399 }
 0x1ce   :  { %9403 = vpow2.f32 %v8742_v5  ;;  %v1612_v0 = vadd.f32 1.0, %v9400_v47 }
 0x1cf   :  { %v9402_v22 = vpop.eup %9401  ;;  %9405 = vpow2.f32 %v8743_v63  ;;  %v1543_v2 = vpop.f32.mrf.mxu2 }
 0x1d0   :  { %v1556_v3 = vpop.f32.mrf.mxu3  ;;  %v1613_v6 = vadd.f32 1.0, %v9402_v22  ;;  %9407 = vrcp.f32 %v1612_v0  ;;  %v1685_v13 = vand.u32 2147483647, %v1612_v0  ;;  %v1687_v14 = vand.u32 2147483648, %v1612_v0 }
 0x1d1   :  { %vm1681_vm13 = vweird.f32 %v1612_v0 }
 0x1d2   :  { %9409 = vrcp.f32 %v1613_v6  ;;  %v1700_v20 = vand.u32 2147483647, %v1613_v6  ;;  %v1702_v23 = vand.u32 2147483648, %v1613_v6  ;;  %vm1696_vm14 = vweird.f32 %v1613_v6 }
 0x1d3   :  { %vm1686_vm0 = vcmp.eq.f32.partialorder %v1685_v13, 8.507059e+37  ;;  %v1688_v31 = vor.u32 1.1754944e-38, %v1687_v14 }
 0x1d4   :  { %v9404_v44 = vpop.eup %9403  ;;  %vm1701_vm2 = vcmp.eq.f32.partialorder %v1700_v20, 8.507059e+37  ;;  %v1703_v45 = vor.u32 1.1754944e-38, %v1702_v23 }
 0x1d5   :  { %v9406_v7 = vpop.eup %9405  ;;  %v1614_v28 = vadd.f32 1.0, %v9404_v44 }
 0x1d6   :  { %v1615_v8 = vadd.f32 1.0, %v9406_v7  ;;  %v9408_v9 = vpop.eup %9407 }
 0x1d7   :  { %9411 = vrcp.f32 %v1614_v28  ;;  %v1677_v11 = vmul.f32 %v9408_v9, %v1612_v0  ;;  %vm1682_vm12 = vweird.f32 %v9408_v9  ;;  %v1715_v39 = vand.u32 2147483647, %v1614_v28 }
 0x1d8   :  { %v9410_v10 = vpop.eup %9409  ;;  %9413 = vrcp.f32 %v1615_v8  ;;  %vm1683_vm1 = vmor %vm1681_vm13, %vm1682_vm12  ;;  %v1717_v43 = vand.u32 2147483648, %v1614_v28  ;;  %v1732_v42 = vand.u32 2147483648, %v1615_v8  ;;  %v1730_v55 = vand.u32 2147483647, %v1615_v8 }
 0x1d9   :  { %v1692_v51 = vmul.f32 %v9410_v10, %v1613_v6  ;;  %v1678_v12 = vsub.f32 1.0, %v1677_v11  ;;  %vm1697_vm15 = vweird.f32 %v9410_v10  ;;  %vm1711_vm6 = vweird.f32 %v1614_v28 }
 0x1da   :  { %vm1698_vm3 = vmor %vm1696_vm14, %vm1697_vm15  ;;  %v1718_v57 = vor.u32 1.1754944e-38, %v1717_v43  ;;  %vm1726_vm8 = vweird.f32 %v1615_v8  ;;  %vm1716_vm9 = vcmp.eq.f32.partialorder %v1715_v39, 8.507059e+37  ;;  %vm1731_vm11 = vcmp.eq.f32.partialorder %v1730_v55, 8.507059e+37 }
 0x1db   :  { %v1693_v19 = vsub.f32 1.0, %v1692_v51  ;;  %v1679_v24 = vmul.f32 %v9408_v9, %v1678_v12 }
 0x1dd   :  { %v9412_v25 = vpop.eup %9411  ;;  %v1694_v26 = vmul.f32 %v9410_v10, %v1693_v19  ;;  %v1680_v30 = vadd.f32 %v9408_v9, %v1679_v24 }
 0x1de   :  { %v9414_v27 = vpop.eup %9413  ;;  %v1707_v29 = vmul.f32 %v9412_v25, %v1614_v28  ;;  %vm1712_vm4 = vweird.f32 %v9412_v25 }
 0x1df   :  { %v1695_v35 = vadd.f32 %v9410_v10, %v1694_v26  ;;  %v1722_v1 = vmul.f32 %v9414_v27, %v1615_v8  ;;  %v1684_v36 = vsel %vm1683_vm1, %v9408_v9, %v1680_v30  ;;  %vm1727_vm5 = vweird.f32 %v9414_v27  ;;  %vm1713_vm7 = vmor %vm1711_vm6, %vm1712_vm4 }
 0x1e0   :  { %v1708_v37 = vsub.f32 1.0, %v1707_v29  ;;  %v1689_v49 = vsel %vm1686_vm0, %v1688_v31, %v1684_v36  ;;  %vm1728_vm10 = vmor %vm1726_vm8, %vm1727_vm5 }
 0x1e1   :  { %v1699_v32 = vsel %vm1698_vm3, %v9410_v10, %v1695_v35  ;;  %v1723_v52 = vsub.f32 1.0, %v1722_v1  ;;  %v10170_v48 = vmul.f32 %v1689_v49, %v10135_v38  ;;  %v1733_v38 = vor.u32 1.1754944e-38, %v1732_v42 }
 0x1e2   :  { %v1704_v50 = vsel %vm1701_vm2, %v1703_v45, %v1699_v32  ;;  %v1709_v53 = vmul.f32 %v9412_v25, %v1708_v37 }
 0x1e3   :  { %v10173_v34 = vmul.f32 %v1704_v50, %v10140_v41  ;;  %v1724_v54 = vmul.f32 %v9414_v27, %v1723_v52 }
 0x1e4   :  { %v1710_v56 = vadd.f32 %v9412_v25, %v1709_v53 }
 0x1e5   :  { %v1725_v58 = vadd.f32 %v9414_v27, %v1724_v54 }
 0x1e6   :  { %v1714_v59 = vsel %vm1713_vm7, %v9412_v25, %v1710_v56 }
 0x1e7   :  { %v1719_v60 = vsel %vm1716_vm9, %v1718_v57, %v1714_v59  ;;  %v1729_v17 = vsel %vm1728_vm10, %v9414_v27, %v1725_v58 }
 0x1e8   :  { %v10176_v33 = vmul.f32 %v1719_v60, %v10157_v21  ;;  %v1734_v41 = vsel %vm1731_vm11, %v1733_v38, %v1729_v17 }
 0x1e9   :  { %v10179_v18 = vmul.f32 %v1734_v41, %v10159_v61 }
 0x1ea   :  { %9721 = dma.done.wait [#allocation6], 32768 }
 0x1eb   :  { %9722 = vsyncadd [#allocation6], 4294934528  ;;  %v1780_v62 = vld [vmem:[#allocation2 + $0xc0] sm:$0xff] }
 0x1ec   :  { %v1812_v5 = vld [vmem:[#allocation2 + $0x1c0] sm:$0xff]  ;;  %v2124_v47 = vunpack.c.2.s8 %v1780_v62  ;;  %v2132_v22 = vunpack.c.3.s8 %v1780_v62  ;;  %v2108_v19 = vunpack.c.0.s8 %v1780_v62  ;;  %v2116_v20 = vunpack.c.1.s8 %v1780_v62 }
 0x1ed   :  { %v1844_v63 = vld [vmem:[#allocation2 + $0x2c0] sm:$0xff]  ;;  %v2252_v0 = vunpack.c.2.s8 %v1812_v5  ;;  %v2260_v2 = vunpack.c.3.s8 %v1812_v5  ;;  %v2236_v25 = vunpack.c.0.s8 %v1812_v5  ;;  %v2244_v26 = vunpack.c.1.s8 %v1812_v5 }
 0x1ee   :  { %v1876_v3 = vld [vmem:[#allocation2 + $0x3c0] sm:$0xff]  ;;  %v2380_v6 = vunpack.c.2.s8 %v1844_v63  ;;  %v2388_v44 = vunpack.c.3.s8 %v1844_v63  ;;  %v3148_v21 = vcvt.s32.f32 %v2124_v47  ;;  %v3156_v8 = vcvt.s32.f32 %v2132_v22 }
 0x1ef   :  { %v2508_v7 = vunpack.c.2.s8 %v1876_v3  ;;  %v2516_v28 = vunpack.c.3.s8 %v1876_v3  ;;  %v3276_v9 = vcvt.s32.f32 %v2252_v0  ;;  %v3284_v10 = vcvt.s32.f32 %v2260_v2  ;;  %v1772_v27 = vld [vmem:[#allocation2 + $0x80] sm:$0xff] }
 0x1f0   :  { %v3404_v61 = vcvt.s32.f32 %v2380_v6  ;;  %v3412_v11 = vcvt.s32.f32 %v2388_v44  ;;  %v4116_v13 = vpack.c.bf16 %v3156_v8, %v3148_v21  ;;  %v3132_v30 = vcvt.s32.f32 %v2108_v19  ;;  %v1804_v39 = vld [vmem:[#allocation2 + $0x180] sm:$0xff] }
 0x1f1   :  { %v3532_v51 = vcvt.s32.f32 %v2508_v7  ;;  %v3540_v12 = vcvt.s32.f32 %v2516_v28  ;;  %v4180_v14 = vpack.c.bf16 %v3284_v10, %v3276_v9  ;;  %v3140_v31 = vcvt.s32.f32 %v2116_v20  ;;  %v1836_v42 = vld [vmem:[#allocation2 + $0x280] sm:$0xff] }
 0x1f2   :  { %v4244_v23 = vpack.c.bf16 %v3412_v11, %v3404_v61  ;;  %4572 = vmatpush.bf16.msra.mxu0 %v4116_v13  ;;  %v2364_v29 = vunpack.c.0.s8 %v1844_v63  ;;  %v2372_v35 = vunpack.c.1.s8 %v1844_v63  ;;  %v3260_v45 = vcvt.s32.f32 %v2236_v25  ;;  %v1868_v56 = vld [vmem:[#allocation2 + $0x380] sm:$0xff] }
 0x1f3   :  { %v4308_v24 = vpack.c.bf16 %v3540_v12, %v3532_v51  ;;  %4585 = vmatpush.bf16.msra.mxu1 %v4180_v14  ;;  %v3268_v1 = vcvt.s32.f32 %v2244_v26  ;;  %v2492_v36 = vunpack.c.0.s8 %v1876_v3  ;;  %v2500_v37 = vunpack.c.1.s8 %v1876_v3  ;;  %v1764_v11 = vld [vmem:[#allocation2 + $0x40] sm:$0xff] }
 0x1f4   :  { %4598 = vmatpush.bf16.msra.mxu2 %v4244_v23  ;;  %v4108_v43 = vpack.c.bf16 %v3140_v31, %v3132_v30  ;;  %v3388_v49 = vcvt.s32.f32 %v2364_v29  ;;  %v3396_v32 = vcvt.s32.f32 %v2372_v35  ;;  %v2092_v52 = vunpack.c.2.s8 %v1772_v27  ;;  %v1796_v25 = vld [vmem:[#allocation2 + $0x140] sm:$0xff] }
 0x1f5   :  { %4611 = vmatpush.bf16.msra.mxu3 %v4308_v24  ;;  %v4172_v50 = vpack.c.bf16 %v3268_v1, %v3260_v45  ;;  %v3516_v53 = vcvt.s32.f32 %v2492_v36  ;;  %v3524_v54 = vcvt.s32.f32 %v2500_v37  ;;  %v2100_v55 = vunpack.c.3.s8 %v1772_v27  ;;  %v1828_v29 = vld [vmem:[#allocation2 + $0x240] sm:$0xff] }
 0x1f6   :  { %4573 = vmatpush.bf16.msra.mxu0 %v4108_v43  ;;  %v4236_v57 = vpack.c.bf16 %v3396_v32, %v3388_v49  ;;  %v3116_v58 = vcvt.s32.f32 %v2092_v52  ;;  %v2220_v59 = vunpack.c.2.s8 %v1804_v39  ;;  %v2228_v38 = vunpack.c.3.s8 %v1804_v39  ;;  %v1860_v37 = vld [vmem:[#allocation2 + $0x340] sm:$0xff] }
 0x1f7   :  { %4586 = vmatpush.bf16.msra.mxu1 %v4172_v50  ;;  %v4300_v60 = vpack.c.bf16 %v3524_v54, %v3516_v53  ;;  %v3124_v17 = vcvt.s32.f32 %v2100_v55  ;;  %v2348_v41 = vunpack.c.2.s8 %v1836_v42  ;;  %v2356_v62 = vunpack.c.3.s8 %v1836_v42 }
 0x1f8   :  { %4599 = vmatpush.bf16.msra.mxu2 %v4236_v57  ;;  %v3244_v5 = vcvt.s32.f32 %v2220_v59  ;;  %v3252_v63 = vcvt.s32.f32 %v2228_v38  ;;  %v2476_v47 = vunpack.c.2.s8 %v1868_v56  ;;  %v2484_v22 = vunpack.c.3.s8 %v1868_v56 }
 0x1f9   :  { %4612 = vmatpush.bf16.msra.mxu3 %v4300_v60  ;;  %v4100_v0 = vpack.c.bf16 %v3124_v17, %v3116_v58  ;;  %v3372_v2 = vcvt.s32.f32 %v2348_v41  ;;  %v3380_v3 = vcvt.s32.f32 %v2356_v62  ;;  %v2076_v6 = vunpack.c.0.s8 %v1772_v27 }
 0x1fa   :  { %v4164_v44 = vpack.c.bf16 %v3252_v63, %v3244_v5  ;;  %v3500_v7 = vcvt.s32.f32 %v2476_v47  ;;  %v3508_v28 = vcvt.s32.f32 %v2484_v22  ;;  %v2084_v21 = vunpack.c.1.s8 %v1772_v27 }
 0x1fb   :  { %4574 = vmatpush.bf16.msra.mxu0 %v4100_v0  ;;  %v4228_v8 = vpack.c.bf16 %v3380_v3, %v3372_v2  ;;  %v3100_v9 = vcvt.s32.f32 %v2076_v6  ;;  %v2204_v10 = vunpack.c.0.s8 %v1804_v39  ;;  %v2212_v61 = vunpack.c.1.s8 %v1804_v39  ;;  %v1756_v2 = vld [vmem:[#allocation2] sm:$0xff] }
 0x1fc   :  { %4587 = vmatpush.bf16.msra.mxu1 %v4164_v44  ;;  %v4292_v51 = vpack.c.bf16 %v3508_v28, %v3500_v7  ;;  %v3108_v12 = vcvt.s32.f32 %v2084_v21  ;;  %v2332_v13 = vunpack.c.0.s8 %v1836_v42  ;;  %v2340_v14 = vunpack.c.1.s8 %v1836_v42 }
 0x1fd   :  { %4600 = vmatpush.bf16.msra.mxu2 %v4228_v8  ;;  %v3228_v19 = vcvt.s32.f32 %v2204_v10  ;;  %v3236_v20 = vcvt.s32.f32 %v2212_v61  ;;  %v2460_v23 = vunpack.c.0.s8 %v1868_v56  ;;  %v2468_v24 = vunpack.c.1.s8 %v1868_v56  ;;  %v1788_v10 = vld [vmem:[#allocation2 + $0x100] sm:$0xff] }
 0x1fe   :  { %4613 = vmatpush.bf16.msra.mxu3 %v4292_v51  ;;  %v4092_v26 = vpack.c.bf16 %v3108_v12, %v3100_v9  ;;  %v3356_v27 = vcvt.s32.f32 %v2332_v13  ;;  %v3364_v30 = vcvt.s32.f32 %v2340_v14  ;;  %v2060_v31 = vunpack.c.2.s8 %v1764_v11  ;;  %v1820_v13 = vld [vmem:[#allocation2 + $0x200] sm:$0xff] }
 0x1ff   :  { %v4156_v35 = vpack.c.bf16 %v3236_v20, %v3228_v19  ;;  %v3484_v45 = vcvt.s32.f32 %v2460_v23  ;;  %v3492_v1 = vcvt.s32.f32 %v2468_v24  ;;  %v2068_v36 = vunpack.c.3.s8 %v1764_v11  ;;  %v1852_v24 = vld [vmem:[#allocation2 + $0x300] sm:$0xff] }
 0x200   :  { %4575 = vmatpush.bf16.msra.mxu0 %v4092_v26  ;;  %v4220_v39 = vpack.c.bf16 %v3364_v30, %v3356_v27  ;;  %v3084_v43 = vcvt.s32.f32 %v2060_v31  ;;  %v2188_v49 = vunpack.c.2.s8 %v1796_v25  ;;  %v2196_v32 = vunpack.c.3.s8 %v1796_v25 }
 0x201   :  { %4588 = vmatpush.bf16.msra.mxu1 %v4156_v35  ;;  %v4284_v52 = vpack.c.bf16 %v3492_v1, %v3484_v45  ;;  %v3092_v42 = vcvt.s32.f32 %v2068_v36  ;;  %v2316_v50 = vunpack.c.2.s8 %v1828_v29  ;;  %v2324_v53 = vunpack.c.3.s8 %v1828_v29 }
 0x202   :  { %4601 = vmatpush.bf16.msra.mxu2 %v4220_v39  ;;  %v3212_v54 = vcvt.s32.f32 %v2188_v49  ;;  %v3220_v55 = vcvt.s32.f32 %v2196_v32  ;;  %v2444_v56 = vunpack.c.2.s8 %v1860_v37  ;;  %v2452_v57 = vunpack.c.3.s8 %v1860_v37 }
 0x203   :  { %4614 = vmatpush.bf16.msra.mxu3 %v4284_v52  ;;  %v4084_v58 = vpack.c.bf16 %v3092_v42, %v3084_v43  ;;  %v3340_v59 = vcvt.s32.f32 %v2316_v50  ;;  %v3348_v38 = vcvt.s32.f32 %v2324_v53  ;;  %v2044_v60 = vunpack.c.0.s8 %v1764_v11 }
 0x204   :  { %v4148_v17 = vpack.c.bf16 %v3220_v55, %v3212_v54  ;;  %v3468_v41 = vcvt.s32.f32 %v2444_v56  ;;  %v3476_v62 = vcvt.s32.f32 %v2452_v57  ;;  %v2052_v5 = vunpack.c.1.s8 %v1764_v11 }
 0x205   :  { %4576 = vmatpush.bf16.msra.mxu0 %v4084_v58  ;;  %v4212_v63 = vpack.c.bf16 %v3348_v38, %v3340_v59  ;;  %v3068_v47 = vcvt.s32.f32 %v2044_v60  ;;  %v2172_v22 = vunpack.c.0.s8 %v1796_v25  ;;  %v2180_v0 = vunpack.c.1.s8 %v1796_v25  ;;  %v1908_v59 = vld [vmem:[#allocation2 + $0x4c0] sm:$0xff] }
 0x206   :  { %4589 = vmatpush.bf16.msra.mxu1 %v4148_v17  ;;  %v4276_v3 = vpack.c.bf16 %v3476_v62, %v3468_v41  ;;  %v3076_v6 = vcvt.s32.f32 %v2052_v5  ;;  %v2300_v44 = vunpack.c.0.s8 %v1828_v29  ;;  %v2308_v7 = vunpack.c.1.s8 %v1828_v29 }
 0x207   :  { %4602 = vmatpush.bf16.msra.mxu2 %v4212_v63  ;;  %v3196_v28 = vcvt.s32.f32 %v2172_v22  ;;  %v3204_v21 = vcvt.s32.f32 %v2180_v0  ;;  %v2428_v8 = vunpack.c.0.s8 %v1860_v37  ;;  %v2436_v9 = vunpack.c.1.s8 %v1860_v37  ;;  %v1940_v22 = vld [vmem:[#allocation2 + $0x5c0] sm:$0xff] }
 0x208   :  { %4615 = vmatpush.bf16.msra.mxu3 %v4276_v3  ;;  %v4076_v61 = vpack.c.bf16 %v3076_v6, %v3068_v47  ;;  %v3324_v11 = vcvt.s32.f32 %v2300_v44  ;;  %v3332_v51 = vcvt.s32.f32 %v2308_v7  ;;  %v2028_v12 = vunpack.c.2.s8 %v1756_v2  ;;  %v1972_v44 = vld [vmem:[#allocation2 + $0x6c0] sm:$0xff] }
 0x209   :  { %v4140_v14 = vpack.c.bf16 %v3204_v21, %v3196_v28  ;;  %v3452_v19 = vcvt.s32.f32 %v2428_v8  ;;  %v3460_v20 = vcvt.s32.f32 %v2436_v9  ;;  %v2036_v23 = vunpack.c.3.s8 %v1756_v2  ;;  %v2004_v9 = vld [vmem:[#allocation2 + $0x7c0] sm:$0xff] }
 0x20a   :  { %4577 = vmatpush.bf16.msra.mxu0 %v4076_v61  ;;  %v4204_v25 = vpack.c.bf16 %v3332_v51, %v3324_v11  ;;  %v3052_v26 = vcvt.s32.f32 %v2028_v12  ;;  %v2156_v27 = vunpack.c.2.s8 %v1788_v10  ;;  %v2164_v30 = vunpack.c.3.s8 %v1788_v10 }
 0x20b   :  { %4590 = vmatpush.bf16.msra.mxu1 %v4140_v14  ;;  %v4268_v31 = vpack.c.bf16 %v3460_v20, %v3452_v19  ;;  %v3060_v29 = vcvt.s32.f32 %v2036_v23  ;;  %v2284_v35 = vunpack.c.2.s8 %v1820_v13  ;;  %v2292_v45 = vunpack.c.3.s8 %v1820_v13 }
 0x20c   :  { %4603 = vmatpush.bf16.msra.mxu2 %v4204_v25  ;;  %v3180_v1 = vcvt.s32.f32 %v2156_v27  ;;  %v3188_v36 = vcvt.s32.f32 %v2164_v30  ;;  %v2412_v37 = vunpack.c.2.s8 %v1852_v24  ;;  %v2420_v39 = vunpack.c.3.s8 %v1852_v24 }
 0x20d   :  { %4616 = vmatpush.bf16.msra.mxu3 %v4268_v31  ;;  %v4068_v43 = vpack.c.bf16 %v3060_v29, %v3052_v26  ;;  %v3308_v49 = vcvt.s32.f32 %v2284_v35  ;;  %v3316_v32 = vcvt.s32.f32 %v2292_v45  ;;  %v2012_v52 = vunpack.c.0.s8 %v1756_v2 }
 0x20e   :  { %v4132_v42 = vpack.c.bf16 %v3188_v36, %v3180_v1  ;;  %v3436_v50 = vcvt.s32.f32 %v2412_v37  ;;  %v3444_v53 = vcvt.s32.f32 %v2420_v39  ;;  %v2020_v54 = vunpack.c.1.s8 %v1756_v2 }
 0x20f   :  { %4578 = vmatpush.bf16.msra.mxu0 %v4068_v43  ;;  %v4196_v55 = vpack.c.bf16 %v3316_v32, %v3308_v49  ;;  %v3036_v56 = vcvt.s32.f32 %v2012_v52  ;;  %v2140_v57 = vunpack.c.0.s8 %v1788_v10  ;;  %v2148_v58 = vunpack.c.1.s8 %v1788_v10  ;;  %v1900_v49 = vld [vmem:[#allocation2 + $0x480] sm:$0xff] }
 0x210   :  { %4591 = vmatpush.bf16.msra.mxu1 %v4132_v42  ;;  %v4260_v38 = vpack.c.bf16 %v3444_v53, %v3436_v50  ;;  %v3044_v60 = vcvt.s32.f32 %v2020_v54  ;;  %v2268_v17 = vunpack.c.0.s8 %v1820_v13  ;;  %v2276_v41 = vunpack.c.1.s8 %v1820_v13 }
 0x211   :  { %4604 = vmatpush.bf16.msra.mxu2 %v4196_v55  ;;  %v3164_v62 = vcvt.s32.f32 %v2140_v57  ;;  %v3172_v5 = vcvt.s32.f32 %v2148_v58  ;;  %v2396_v63 = vunpack.c.0.s8 %v1852_v24  ;;  %v2404_v47 = vunpack.c.1.s8 %v1852_v24  ;;  %v1932_v57 = vld [vmem:[#allocation2 + $0x580] sm:$0xff] }
 0x212   :  { %4617 = vmatpush.bf16.msra.mxu3 %v4260_v38  ;;  %v4060_v0 = vpack.c.bf16 %v3044_v60, %v3036_v56  ;;  %v3292_v2 = vcvt.s32.f32 %v2268_v17  ;;  %v3300_v3 = vcvt.s32.f32 %v2276_v41  ;;  %v2636_v6 = vunpack.c.2.s8 %v1908_v59  ;;  %v1964_v17 = vld [vmem:[#allocation2 + $0x680] sm:$0xff] }
 0x213   :  { %v4124_v7 = vpack.c.bf16 %v3172_v5, %v3164_v62  ;;  %v3420_v28 = vcvt.s32.f32 %v2396_v63  ;;  %v3428_v21 = vcvt.s32.f32 %v2404_v47  ;;  %v2644_v8 = vunpack.c.3.s8 %v1908_v59  ;;  %v1996_v47 = vld [vmem:[#allocation2 + $0x780] sm:$0xff] }
 0x214   :  { %4579 = vmatpush.bf16.msra.mxu0 %v4060_v0  ;;  %v4188_v10 = vpack.c.bf16 %v3300_v3, %v3292_v2  ;;  %v3660_v61 = vcvt.s32.f32 %v2636_v6  ;;  %v2764_v11 = vunpack.c.2.s8 %v1940_v22  ;;  %v2772_v51 = vunpack.c.3.s8 %v1940_v22 }
 0x215   :  { %4592 = vmatpush.bf16.msra.mxu1 %v4124_v7  ;;  %v4252_v12 = vpack.c.bf16 %v3428_v21, %v3420_v28  ;;  %v3668_v13 = vcvt.s32.f32 %v2644_v8  ;;  %v2892_v14 = vunpack.c.2.s8 %v1972_v44  ;;  %v2900_v19 = vunpack.c.3.s8 %v1972_v44 }
 0x216   :  { %4605 = vmatpush.bf16.msra.mxu2 %v4188_v10  ;;  %v3788_v20 = vcvt.s32.f32 %v2764_v11  ;;  %v3796_v23 = vcvt.s32.f32 %v2772_v51  ;;  %v3020_v24 = vunpack.c.2.s8 %v2004_v9  ;;  %v3028_v25 = vunpack.c.3.s8 %v2004_v9 }
 0x217   :  { %4618 = vmatpush.bf16.msra.mxu3 %v4252_v12  ;;  %v4372_v26 = vpack.c.bf16 %v3668_v13, %v3660_v61  ;;  %v3916_v27 = vcvt.s32.f32 %v2892_v14  ;;  %v3924_v30 = vcvt.s32.f32 %v2900_v19  ;;  %v2620_v31 = vunpack.c.0.s8 %v1908_v59 }
 0x218   :  { %v4436_v29 = vpack.c.bf16 %v3796_v23, %v3788_v20  ;;  %v4044_v35 = vcvt.s32.f32 %v3020_v24  ;;  %v4052_v45 = vcvt.s32.f32 %v3028_v25  ;;  %v2628_v1 = vunpack.c.1.s8 %v1908_v59 }
 0x219   :  { %4624 = vmatpush.bf16.msrb.mxu0 %v4372_v26  ;;  %v4500_v36 = vpack.c.bf16 %v3924_v30, %v3916_v27  ;;  %v3644_v37 = vcvt.s32.f32 %v2620_v31  ;;  %v2748_v39 = vunpack.c.0.s8 %v1940_v22  ;;  %v2756_v43 = vunpack.c.1.s8 %v1940_v22  ;;  %v1892_v27 = vld [vmem:[#allocation2 + $0x440] sm:$0xff] }
 0x21a   :  { %4637 = vmatpush.bf16.msrb.mxu1 %v4436_v29  ;;  %v4564_v32 = vpack.c.bf16 %v4052_v45, %v4044_v35  ;;  %v3652_v52 = vcvt.s32.f32 %v2628_v1  ;;  %v2876_v42 = vunpack.c.0.s8 %v1972_v44  ;;  %v2884_v50 = vunpack.c.1.s8 %v1972_v44 }
 0x21b   :  { %4650 = vmatpush.bf16.msrb.mxu2 %v4500_v36  ;;  %v3772_v53 = vcvt.s32.f32 %v2748_v39  ;;  %v3780_v54 = vcvt.s32.f32 %v2756_v43  ;;  %v3004_v55 = vunpack.c.0.s8 %v2004_v9  ;;  %v3012_v56 = vunpack.c.1.s8 %v2004_v9  ;;  %v1924_v39 = vld [vmem:[#allocation2 + $0x540] sm:$0xff] }
 0x21c   :  { %4663 = vmatpush.bf16.msrb.mxu3 %v4564_v32  ;;  %v4364_v58 = vpack.c.bf16 %v3652_v52, %v3644_v37  ;;  %v3900_v59 = vcvt.s32.f32 %v2876_v42  ;;  %v3908_v38 = vcvt.s32.f32 %v2884_v50  ;;  %v2604_v60 = vunpack.c.2.s8 %v1900_v49  ;;  %v1956_v42 = vld [vmem:[#allocation2 + $0x640] sm:$0xff] }
 0x21d   :  { %v4428_v41 = vpack.c.bf16 %v3780_v54, %v3772_v53  ;;  %v4028_v62 = vcvt.s32.f32 %v3004_v55  ;;  %v4036_v5 = vcvt.s32.f32 %v3012_v56  ;;  %v2612_v63 = vunpack.c.3.s8 %v1900_v49  ;;  %v1988_v56 = vld [vmem:[#allocation2 + $0x740] sm:$0xff] }
 0x21e   :  { %4625 = vmatpush.bf16.msrb.mxu0 %v4364_v58  ;;  %v4492_v22 = vpack.c.bf16 %v3908_v38, %v3900_v59  ;;  %v3628_v0 = vcvt.s32.f32 %v2604_v60  ;;  %v2732_v2 = vunpack.c.2.s8 %v1932_v57  ;;  %v2740_v3 = vunpack.c.3.s8 %v1932_v57 }
 0x21f   :  { %4638 = vmatpush.bf16.msrb.mxu1 %v4428_v41  ;;  %v4556_v6 = vpack.c.bf16 %v4036_v5, %v4028_v62  ;;  %v3636_v44 = vcvt.s32.f32 %v2612_v63  ;;  %v2860_v7 = vunpack.c.2.s8 %v1964_v17  ;;  %v2868_v28 = vunpack.c.3.s8 %v1964_v17 }
 0x220   :  { %4651 = vmatpush.bf16.msrb.mxu2 %v4492_v22  ;;  %v3756_v21 = vcvt.s32.f32 %v2732_v2  ;;  %v3764_v8 = vcvt.s32.f32 %v2740_v3  ;;  %v2988_v9 = vunpack.c.2.s8 %v1996_v47  ;;  %v2996_v10 = vunpack.c.3.s8 %v1996_v47 }
 0x221   :  { %4664 = vmatpush.bf16.msrb.mxu3 %v4556_v6  ;;  %v4356_v61 = vpack.c.bf16 %v3636_v44, %v3628_v0  ;;  %v3884_v11 = vcvt.s32.f32 %v2860_v7  ;;  %v3892_v51 = vcvt.s32.f32 %v2868_v28  ;;  %v2588_v12 = vunpack.c.0.s8 %v1900_v49 }
 0x222   :  { %v4420_v13 = vpack.c.bf16 %v3764_v8, %v3756_v21  ;;  %v4012_v14 = vcvt.s32.f32 %v2988_v9  ;;  %v4020_v19 = vcvt.s32.f32 %v2996_v10  ;;  %v2596_v20 = vunpack.c.1.s8 %v1900_v49 }
 0x223   :  { %4626 = vmatpush.bf16.msrb.mxu0 %v4356_v61  ;;  %v4484_v23 = vpack.c.bf16 %v3892_v51, %v3884_v11  ;;  %v3612_v24 = vcvt.s32.f32 %v2588_v12  ;;  %v2716_v25 = vunpack.c.0.s8 %v1932_v57  ;;  %v2724_v26 = vunpack.c.1.s8 %v1932_v57 }
 0x224   :  { %4639 = vmatpush.bf16.msrb.mxu1 %v4420_v13  ;;  %v4548_v30 = vpack.c.bf16 %v4020_v19, %v4012_v14  ;;  %v3620_v31 = vcvt.s32.f32 %v2596_v20  ;;  %v2844_v29 = vunpack.c.0.s8 %v1964_v17  ;;  %v2852_v35 = vunpack.c.1.s8 %v1964_v17 }
 0x225   :  { %4652 = vmatpush.bf16.msrb.mxu2 %v4484_v23  ;;  %v3740_v45 = vcvt.s32.f32 %v2716_v25  ;;  %v3748_v1 = vcvt.s32.f32 %v2724_v26  ;;  %v2972_v36 = vunpack.c.0.s8 %v1996_v47  ;;  %v2980_v37 = vunpack.c.1.s8 %v1996_v47  ;;  %v1884_v23 = vld [vmem:[#allocation2 + $0x400] sm:$0xff] }
 0x226   :  { %4665 = vmatpush.bf16.msrb.mxu3 %v4548_v30  ;;  %v4348_v43 = vpack.c.bf16 %v3620_v31, %v3612_v24  ;;  %v3868_v49 = vcvt.s32.f32 %v2844_v29  ;;  %v3876_v32 = vcvt.s32.f32 %v2852_v35  ;;  %v2572_v52 = vunpack.c.2.s8 %v1892_v27  ;;  %v1916_v30 = vld [vmem:[#allocation2 + $0x500] sm:$0xff] }
 0x227   :  { %v4412_v50 = vpack.c.bf16 %v3748_v1, %v3740_v45  ;;  %v3996_v53 = vcvt.s32.f32 %v2972_v36  ;;  %v4004_v54 = vcvt.s32.f32 %v2980_v37  ;;  %v2580_v55 = vunpack.c.3.s8 %v1892_v27  ;;  %v1948_v31 = vld [vmem:[#allocation2 + $0x600] sm:$0xff] }
 0x228   :  { %4627 = vmatpush.bf16.msrb.mxu0 %v4348_v43  ;;  %v4476_v57 = vpack.c.bf16 %v3876_v32, %v3868_v49  ;;  %v3596_v58 = vcvt.s32.f32 %v2572_v52  ;;  %v2700_v59 = vunpack.c.2.s8 %v1924_v39  ;;  %v2708_v38 = vunpack.c.3.s8 %v1924_v39  ;;  %v1980_v36 = vld [vmem:[#allocation2 + $0x700] sm:$0xff] }
 0x229   :  { %4640 = vmatpush.bf16.msrb.mxu1 %v4412_v50  ;;  %v4540_v60 = vpack.c.bf16 %v4004_v54, %v3996_v53  ;;  %v3604_v17 = vcvt.s32.f32 %v2580_v55  ;;  %v2828_v41 = vunpack.c.2.s8 %v1956_v42  ;;  %v2836_v62 = vunpack.c.3.s8 %v1956_v42 }
 0x22a   :  { %4653 = vmatpush.bf16.msrb.mxu2 %v4476_v57  ;;  %v3724_v5 = vcvt.s32.f32 %v2700_v59  ;;  %v3732_v63 = vcvt.s32.f32 %v2708_v38  ;;  %v2956_v47 = vunpack.c.2.s8 %v1988_v56  ;;  %v2964_v22 = vunpack.c.3.s8 %v1988_v56 }
 0x22b   :  { %4666 = vmatpush.bf16.msrb.mxu3 %v4540_v60  ;;  %v4340_v0 = vpack.c.bf16 %v3604_v17, %v3596_v58  ;;  %v3852_v2 = vcvt.s32.f32 %v2828_v41  ;;  %v3860_v3 = vcvt.s32.f32 %v2836_v62  ;;  %v10183_v6 = vpack.c.bf16 %v10162_v16, %v10162_v16 }
 0x22c   :  { %v4404_v44 = vpack.c.bf16 %v3732_v63, %v3724_v5  ;;  %v3980_v7 = vcvt.s32.f32 %v2956_v47  ;;  %v3988_v28 = vcvt.s32.f32 %v2964_v22  ;;  %v2556_v21 = vunpack.c.0.s8 %v1892_v27 }
 0x22d   :  { %4628 = vmatpush.bf16.msrb.mxu0 %v4340_v0  ;;  %v4468_v8 = vpack.c.bf16 %v3860_v3, %v3852_v2  ;;  %4606 = vmatmul.bf16.vlgmr.msra.gmra.mxu2 %v10183_v6  ;;  %v2564_v9 = vunpack.c.1.s8 %v1892_v27  ;;  %v2684_v10 = vunpack.c.0.s8 %v1924_v39  ;;  %v2692_v61 = vunpack.c.1.s8 %v1924_v39  ;;  %v1781_v2 = vld [vmem:[#allocation2 + $0xc8] sm:$0xff] }
 0x22e   :  { %4641 = vmatpush.bf16.msrb.mxu1 %v4404_v44  ;;  %v4532_v11 = vpack.c.bf16 %v3988_v28, %v3980_v7  ;;  %v3580_v51 = vcvt.s32.f32 %v2556_v21  ;;  %v2812_v12 = vunpack.c.0.s8 %v1956_v42  ;;  %v2820_v13 = vunpack.c.1.s8 %v1956_v42 }
 0x22f   :  { %4654 = vmatpush.bf16.msrb.mxu2 %v4468_v8  ;;  %v3588_v14 = vcvt.s32.f32 %v2564_v9  ;;  %v3708_v16 = vcvt.s32.f32 %v2684_v10  ;;  %v3716_v19 = vcvt.s32.f32 %v2692_v61  ;;  %v2940_v20 = vunpack.c.0.s8 %v1988_v56  ;;  %v1813_v61 = vld [vmem:[#allocation2 + $0x1c8] sm:$0xff] }
 0x230   :  { %4667 = vmatpush.bf16.msrb.mxu3 %v4532_v11  ;;  %v3836_v24 = vcvt.s32.f32 %v2812_v12  ;;  %v3844_v25 = vcvt.s32.f32 %v2820_v13  ;;  %v2948_v26 = vunpack.c.1.s8 %v1988_v56  ;;  %v10188_v27 = vpack.c.bf16 %v10131_v15, %v10131_v15 }
 0x231   :  { %v4332_v29 = vpack.c.bf16 %v3588_v14, %v3580_v51  ;;  %v4396_v35 = vpack.c.bf16 %v3716_v19, %v3708_v16  ;;  %v3964_v45 = vcvt.s32.f32 %v2940_v20  ;;  %v10192_v1 = vpack.c.bf16 %v10167_v4, %v10167_v4  ;;  %v1845_v14 = vld [vmem:[#allocation2 + $0x2c8] sm:$0xff] }
 0x232   :  { %v4460_v37 = vpack.c.bf16 %v3844_v25, %v3836_v24  ;;  %v3972_v39 = vcvt.s32.f32 %v2948_v26  ;;  %4580 = vmatmul.bf16.vlgmr.msra.gmra.mxu0 %v10188_v27  ;;  %v10197_v43 = vpack.c.bf16 %v10138_v40, %v10138_v40  ;;  %v2540_v15 = vunpack.c.2.s8 %v1884_v23  ;;  %v1877_v24 = vld [vmem:[#allocation2 + $0x3c8] sm:$0xff] }
 0x233   :  { %4629 = vmatpush.bf16.msrb.mxu0 %v4332_v29  ;;  %4642 = vmatpush.bf16.msrb.mxu1 %v4396_v35  ;;  %v2548_v49 = vunpack.c.3.s8 %v1884_v23  ;;  %v2668_v32 = vunpack.c.2.s8 %v1916_v30  ;;  %v2676_v52 = vunpack.c.3.s8 %v1916_v30  ;;  %v2796_v42 = vunpack.c.2.s8 %v1948_v31 }
 0x234   :  { %4655 = vmatpush.bf16.msrb.mxu2 %v4460_v37  ;;  %v4524_v50 = vpack.c.bf16 %v3972_v39, %v3964_v45  ;;  %4619 = vmatmul.bf16.vlgmr.msra.gmra.mxu3 %v10192_v1  ;;  %v3564_v4 = vcvt.s32.f32 %v2540_v15  ;;  %v2804_v53 = vunpack.c.3.s8 %v1948_v31  ;;  %v2924_v54 = vunpack.c.2.s8 %v1980_v36 }
 0x235   :  { %4593 = vmatmul.bf16.vlgmr.msra.gmra.mxu1 %v10197_v43  ;;  %v3572_v55 = vcvt.s32.f32 %v2548_v49  ;;  %v3692_v56 = vcvt.s32.f32 %v2668_v32  ;;  %v3700_v40 = vcvt.s32.f32 %v2676_v52  ;;  %v3820_v57 = vcvt.s32.f32 %v2796_v42 }
 0x236   :  { %4668 = vmatpush.bf16.msrb.mxu3 %v4524_v50  ;;  %v3828_v58 = vcvt.s32.f32 %v2804_v53  ;;  %v2932_v59 = vunpack.c.3.s8 %v1980_v36  ;;  %v3948_v38 = vcvt.s32.f32 %v2924_v54  ;;  %v2524_v60 = vunpack.c.0.s8 %v1884_v23 }
 0x237   :  { %v4324_v17 = vpack.c.bf16 %v3572_v55, %v3564_v4  ;;  %v4388_v41 = vpack.c.bf16 %v3700_v40, %v3692_v56  ;;  %v2532_v62 = vunpack.c.1.s8 %v1884_v23  ;;  %v2652_v5 = vunpack.c.0.s8 %v1916_v30 }
 0x238   :  { %v4452_v63 = vpack.c.bf16 %v3828_v58, %v3820_v57  ;;  %v3956_v47 = vcvt.s32.f32 %v2932_v59  ;;  %v3548_v22 = vcvt.s32.f32 %v2524_v60  ;;  %v2660_v0 = vunpack.c.1.s8 %v1916_v30 }
 0x239   :  { %4630 = vmatpush.bf16.msrb.mxu0 %v4324_v17  ;;  %4643 = vmatpush.bf16.msrb.mxu1 %v4388_v41  ;;  %v3556_v3 = vcvt.s32.f32 %v2532_v62  ;;  %v3676_v44 = vcvt.s32.f32 %v2652_v5  ;;  %v2780_v7 = vunpack.c.0.s8 %v1948_v31  ;;  %v2788_v28 = vunpack.c.1.s8 %v1948_v31 }
 0x23a   :  { %4656 = vmatpush.bf16.msrb.mxu2 %v4452_v63  ;;  %v4516_v21 = vpack.c.bf16 %v3956_v47, %v3948_v38  ;;  %v3684_v8 = vcvt.s32.f32 %v2660_v0  ;;  %v2908_v9 = vunpack.c.0.s8 %v1980_v36  ;;  %v2916_v10 = vunpack.c.1.s8 %v1980_v36  ;;  %v1773_v47 = vld [vmem:[#allocation2 + $0x88] sm:$0xff] }
 0x23b   :  { %v4316_v11 = vpack.c.bf16 %v3556_v3, %v3548_v22  ;;  %v3804_v51 = vcvt.s32.f32 %v2780_v7  ;;  %v3812_v12 = vcvt.s32.f32 %v2788_v28  ;;  %v2125_v13 = vunpack.c.2.s8 %v1781_v2  ;;  %v1837_v7 = vld [vmem:[#allocation2 + $0x288] sm:$0xff] }
 0x23c   :  { %4669 = vmatpush.bf16.msrb.mxu3 %v4516_v21  ;;  %v4380_v16 = vpack.c.bf16 %v3684_v8, %v3676_v44  ;;  %v3932_v19 = vcvt.s32.f32 %v2908_v9  ;;  %v3940_v20 = vcvt.s32.f32 %v2916_v10  ;;  %v2133_v23 = vunpack.c.3.s8 %v1781_v2  ;;  %v1805_v44 = vld [vmem:[#allocation2 + $0x188] sm:$0xff] }
 0x23d   :  { %4631 = vmatpush.bf16.msrb.mxu0 %v4316_v11  ;;  %v4444_v25 = vpack.c.bf16 %v3812_v12, %v3804_v51  ;;  %v3149_v26 = vcvt.s32.f32 %v2125_v13  ;;  %v2253_v30 = vunpack.c.2.s8 %v1813_v61  ;;  %v2261_v31 = vunpack.c.3.s8 %v1813_v61  ;;  %v10209_v10 = vld [vmem:[#allocation2 + $0x388] sm:$0xff] }
 0x23e   :  { %4644 = vmatpush.bf16.msrb.mxu1 %v4380_v16  ;;  %v4508_v29 = vpack.c.bf16 %v3940_v20, %v3932_v19  ;;  %v3157_v35 = vcvt.s32.f32 %v2133_v23  ;;  %v2381_v45 = vunpack.c.2.s8 %v1845_v14  ;;  %v2389_v36 = vunpack.c.3.s8 %v1845_v14 }
 0x23f   :  { %4657 = vmatpush.bf16.msrb.mxu2 %v4444_v25  ;;  %v3277_v37 = vcvt.s32.f32 %v2253_v30  ;;  %v3285_v39 = vcvt.s32.f32 %v2261_v31  ;;  %v2509_v15 = vunpack.c.2.s8 %v1877_v24  ;;  %v2517_v49 = vunpack.c.3.s8 %v1877_v24 }
 0x240   :  { %4670 = vmatpush.bf16.msrb.mxu3 %v4508_v29  ;;  %v4117_v32 = vpack.c.bf16 %v3157_v35, %v3149_v26  ;;  %v3405_v52 = vcvt.s32.f32 %v2381_v45  ;;  %v3413_v42 = vcvt.s32.f32 %v2389_v36  ;;  %v2109_v50 = vunpack.c.0.s8 %v1781_v2 }
 0x241   :  { %v4181_v4 = vpack.c.bf16 %v3285_v39, %v3277_v37  ;;  %v3533_v53 = vcvt.s32.f32 %v2509_v15  ;;  %v3541_v54 = vcvt.s32.f32 %v2517_v49  ;;  %v2117_v55 = vunpack.c.1.s8 %v1781_v2 }
 0x242   :  { %4676 = vmatpush.bf16.msra.mxu0 %v4117_v32  ;;  %v4245_v56 = vpack.c.bf16 %v3413_v42, %v3405_v52  ;;  %v3133_v40 = vcvt.s32.f32 %v2109_v50  ;;  %v2237_v57 = vunpack.c.0.s8 %v1813_v61  ;;  %v2245_v58 = vunpack.c.1.s8 %v1813_v61  ;;  %v1765_v42 = vld [vmem:[#allocation2 + $0x48] sm:$0xff] }
 0x243   :  { %4689 = vmatpush.bf16.msra.mxu1 %v4181_v4  ;;  %v4309_v59 = vpack.c.bf16 %v3541_v54, %v3533_v53  ;;  %v3141_v38 = vcvt.s32.f32 %v2117_v55  ;;  %v2365_v60 = vunpack.c.0.s8 %v1845_v14  ;;  %v2373_v17 = vunpack.c.1.s8 %v1845_v14  ;;  %v1797_v55 = vld [vmem:[#allocation2 + $0x148] sm:$0xff] }
 0x244   :  { %4702 = vmatpush.bf16.msra.mxu2 %v4245_v56  ;;  %v3261_v41 = vcvt.s32.f32 %v2237_v57  ;;  %v3269_v62 = vcvt.s32.f32 %v2245_v58  ;;  %v2493_v5 = vunpack.c.0.s8 %v1877_v24  ;;  %v2501_v63 = vunpack.c.1.s8 %v1877_v24 }
 0x245   :  { %4715 = vmatpush.bf16.msra.mxu3 %v4309_v59  ;;  %v4109_v22 = vpack.c.bf16 %v3141_v38, %v3133_v40  ;;  %v3389_v0 = vcvt.s32.f32 %v2365_v60  ;;  %v3397_v2 = vcvt.s32.f32 %v2373_v17  ;;  %v10203_v3 = vpack.c.bf16 %v10176_v33, %v10176_v33  ;;  %v1829_v17 = vld [vmem:[#allocation2 + $0x248] sm:$0xff] }
 0x246   :  { %v4173_v28 = vpack.c.bf16 %v3269_v62, %v3261_v41  ;;  %v3517_v21 = vcvt.s32.f32 %v2493_v5  ;;  %v3525_v8 = vcvt.s32.f32 %v2501_v63  ;;  %v10207_v9 = vpack.c.bf16 %v10170_v48, %v10170_v48 }
 0x247   :  { %4677 = vmatpush.bf16.msra.mxu0 %v4109_v22  ;;  %v4237_v61 = vpack.c.bf16 %v3397_v2, %v3389_v0  ;;  %4658 = vmatmul.bf16.vlgmr.msrb.gmra.mxu2 %v10203_v3  ;;  %v10214_v11 = vpack.c.bf16 %v10179_v18, %v10179_v18  ;;  %v2093_v33 = vunpack.c.2.s8 %v1773_v47  ;;  %v2101_v51 = vunpack.c.3.s8 %v1773_v47 }
 0x248   :  { %4690 = vmatpush.bf16.msra.mxu1 %v4173_v28  ;;  %v4301_v12 = vpack.c.bf16 %v3525_v8, %v3517_v21  ;;  %4632 = vmatmul.bf16.vlgmr.msrb.gmra.mxu0 %v10207_v9  ;;  %v2221_v13 = vunpack.c.2.s8 %v1805_v44  ;;  %v2229_v14 = vunpack.c.3.s8 %v1805_v44  ;;  %v2349_v48 = vunpack.c.2.s8 %v1837_v7 }
 0x249   :  { %4703 = vmatpush.bf16.msra.mxu2 %v4237_v61  ;;  %4671 = vmatmul.bf16.vlgmr.msrb.gmra.mxu3 %v10214_v11  ;;  %v3117_v16 = vcvt.s32.f32 %v2093_v33  ;;  %v3125_v19 = vcvt.s32.f32 %v2101_v51  ;;  %v2357_v20 = vunpack.c.3.s8 %v1837_v7  ;;  %v2477_v23 = vunpack.c.2.s8 %v10209_v10 }
 0x24a   :  { %4716 = vmatpush.bf16.msra.mxu3 %v4301_v12  ;;  %v3245_v18 = vcvt.s32.f32 %v2221_v13  ;;  %v3253_v24 = vcvt.s32.f32 %v2229_v14  ;;  %v3373_v25 = vcvt.s32.f32 %v2349_v48  ;;  %v2485_v26 = vunpack.c.3.s8 %v10209_v10 }
 0x24b   :  { %v4101_v30 = vpack.c.bf16 %v3125_v19, %v3117_v16  ;;  %v3381_v31 = vcvt.s32.f32 %v2357_v20  ;;  %v3501_v29 = vcvt.s32.f32 %v2477_v23  ;;  %v10222_v35 = vpack.c.bf16 %v10173_v34, %v10173_v34 }
 0x24c   :  { %v4165_v45 = vpack.c.bf16 %v3253_v24, %v3245_v18  ;;  %v3509_v36 = vcvt.s32.f32 %v2485_v26  ;;  %v2077_v37 = vunpack.c.0.s8 %v1773_v47  ;;  %v2085_v39 = vunpack.c.1.s8 %v1773_v47  ;;  %v1861_v47 = vld [vmem:[#allocation2 + $0x348] sm:$0xff] }
 0x24d   :  { %4678 = vmatpush.bf16.msra.mxu0 %v4101_v30  ;;  %v4229_v15 = vpack.c.bf16 %v3381_v31, %v3373_v25  ;;  %4645 = vmatmul.bf16.vlgmr.msrb.gmra.mxu1 %v10222_v35  ;;  %v2205_v49 = vunpack.c.0.s8 %v1805_v44  ;;  %v2213_v32 = vunpack.c.1.s8 %v1805_v44  ;;  %v2333_v52 = vunpack.c.0.s8 %v1837_v7  ;;  %v1757_v30 = vld [vmem:[#allocation2 + $0x8] sm:$0xff] }
 0x24e   :  { %4691 = vmatpush.bf16.msra.mxu1 %v4165_v45  ;;  %v4293_v50 = vpack.c.bf16 %v3509_v36, %v3501_v29  ;;  %v3101_v4 = vcvt.s32.f32 %v2077_v37  ;;  %v3109_v53 = vcvt.s32.f32 %v2085_v39  ;;  %v2341_v54 = vunpack.c.1.s8 %v1837_v7 }
 0x24f   :  { %4704 = vmatpush.bf16.msra.mxu2 %v4229_v15  ;;  %v3229_v34 = vcvt.s32.f32 %v2205_v49  ;;  %v3237_v56 = vcvt.s32.f32 %v2213_v32  ;;  %v3357_v40 = vcvt.s32.f32 %v2333_v52  ;;  %v2461_v57 = vunpack.c.0.s8 %v10209_v10  ;;  %v1789_v32 = vld [vmem:[#allocation2 + $0x108] sm:$0xff] }
 0x250   :  { %4717 = vmatpush.bf16.msra.mxu3 %v4293_v50  ;;  %v4093_v58 = vpack.c.bf16 %v3109_v53, %v3101_v4  ;;  %v3365_v59 = vcvt.s32.f32 %v2341_v54  ;;  %v2469_v38 = vunpack.c.1.s8 %v10209_v10  ;;  %v2061_v60 = vunpack.c.2.s8 %v1765_v42  ;;  %v1821_v53 = vld [vmem:[#allocation2 + $0x208] sm:$0xff] }
 0x251   :  { %v4157_v41 = vpack.c.bf16 %v3237_v56, %v3229_v34  ;;  %v3485_v62 = vcvt.s32.f32 %v2461_v57  ;;  %v2069_v5 = vunpack.c.3.s8 %v1765_v42  ;;  %v2189_v63 = vunpack.c.2.s8 %v1797_v55 }
 0x252   :  { %4679 = vmatpush.bf16.msra.mxu0 %v4093_v58  ;;  %v4221_v22 = vpack.c.bf16 %v3365_v59, %v3357_v40  ;;  %v3493_v0 = vcvt.s32.f32 %v2469_v38  ;;  %v3085_v2 = vcvt.s32.f32 %v2061_v60  ;;  %v2197_v44 = vunpack.c.3.s8 %v1797_v55  ;;  %v1853_v40 = vld [vmem:[#allocation2 + $0x308] sm:$0xff] }
 0x253   :  { %4692 = vmatpush.bf16.msra.mxu1 %v4157_v41  ;;  %v3093_v7 = vcvt.s32.f32 %v2069_v5  ;;  %v3213_v28 = vcvt.s32.f32 %v2189_v63  ;;  %v2317_v21 = vunpack.c.2.s8 %v1829_v17  ;;  %v2325_v8 = vunpack.c.3.s8 %v1829_v17 }
 0x254   :  { %4705 = vmatpush.bf16.msra.mxu2 %v4221_v22  ;;  %v4285_v61 = vpack.c.bf16 %v3493_v0, %v3485_v62  ;;  %v3221_v10 = vcvt.s32.f32 %v2197_v44  ;;  %v2445_v33 = vunpack.c.2.s8 %v1861_v47  ;;  %v2453_v51 = vunpack.c.3.s8 %v1861_v47 }
 0x255   :  { %v4085_v12 = vpack.c.bf16 %v3093_v7, %v3085_v2  ;;  %v3341_v13 = vcvt.s32.f32 %v2317_v21  ;;  %v3349_v14 = vcvt.s32.f32 %v2325_v8  ;;  %v2045_v48 = vunpack.c.0.s8 %v1765_v42 }
 0x256   :  { %4718 = vmatpush.bf16.msra.mxu3 %v4285_v61  ;;  %v4149_v16 = vpack.c.bf16 %v3221_v10, %v3213_v28  ;;  %v3469_v19 = vcvt.s32.f32 %v2445_v33  ;;  %v3477_v20 = vcvt.s32.f32 %v2453_v51  ;;  %v2053_v23 = vunpack.c.1.s8 %v1765_v42 }
 0x257   :  { %4680 = vmatpush.bf16.msra.mxu0 %v4085_v12  ;;  %v4213_v18 = vpack.c.bf16 %v3349_v14, %v3341_v13  ;;  %v3069_v24 = vcvt.s32.f32 %v2045_v48  ;;  %v2173_v25 = vunpack.c.0.s8 %v1797_v55  ;;  %v2181_v26 = vunpack.c.1.s8 %v1797_v55  ;;  %v1909_v13 = vld [vmem:[#allocation2 + $0x4c8] sm:$0xff] }
 0x258   :  { %4693 = vmatpush.bf16.msra.mxu1 %v4149_v16  ;;  %v4277_v31 = vpack.c.bf16 %v3477_v20, %v3469_v19  ;;  %v3077_v29 = vcvt.s32.f32 %v2053_v23  ;;  %v2301_v45 = vunpack.c.0.s8 %v1829_v17  ;;  %v2309_v36 = vunpack.c.1.s8 %v1829_v17 }
 0x259   :  { %4706 = vmatpush.bf16.msra.mxu2 %v4213_v18  ;;  %v3197_v37 = vcvt.s32.f32 %v2173_v25  ;;  %v3205_v39 = vcvt.s32.f32 %v2181_v26  ;;  %v2429_v15 = vunpack.c.0.s8 %v1861_v47  ;;  %v2437_v49 = vunpack.c.1.s8 %v1861_v47  ;;  %v1941_v25 = vld [vmem:[#allocation2 + $0x5c8] sm:$0xff] }
 0x25a   :  { %4719 = vmatpush.bf16.msra.mxu3 %v4277_v31  ;;  %v4077_v52 = vpack.c.bf16 %v3077_v29, %v3069_v24  ;;  %v3325_v42 = vcvt.s32.f32 %v2301_v45  ;;  %v3333_v50 = vcvt.s32.f32 %v2309_v36  ;;  %v2029_v4 = vunpack.c.2.s8 %v1757_v30  ;;  %v1973_v45 = vld [vmem:[#allocation2 + $0x6c8] sm:$0xff] }
 0x25b   :  { %v4141_v54 = vpack.c.bf16 %v3205_v39, %v3197_v37  ;;  %v3453_v55 = vcvt.s32.f32 %v2429_v15  ;;  %v3461_v34 = vcvt.s32.f32 %v2437_v49  ;;  %v2037_v56 = vunpack.c.3.s8 %v1757_v30  ;;  %v2005_v49 = vld [vmem:[#allocation2 + $0x7c8] sm:$0xff] }
 0x25c   :  { %4681 = vmatpush.bf16.msra.mxu0 %v4077_v52  ;;  %v4205_v57 = vpack.c.bf16 %v3333_v50, %v3325_v42  ;;  %v3053_v58 = vcvt.s32.f32 %v2029_v4  ;;  %v2157_v59 = vunpack.c.2.s8 %v1789_v32  ;;  %v2165_v38 = vunpack.c.3.s8 %v1789_v32 }
 0x25d   :  { %4694 = vmatpush.bf16.msra.mxu1 %v4141_v54  ;;  %v4269_v60 = vpack.c.bf16 %v3461_v34, %v3453_v55  ;;  %v3061_v17 = vcvt.s32.f32 %v2037_v56  ;;  %v2285_v41 = vunpack.c.2.s8 %v1821_v53  ;;  %v2293_v62 = vunpack.c.3.s8 %v1821_v53 }
 0x25e   :  { %4707 = vmatpush.bf16.msra.mxu2 %v4205_v57  ;;  %v3181_v5 = vcvt.s32.f32 %v2157_v59  ;;  %v3189_v63 = vcvt.s32.f32 %v2165_v38  ;;  %v2413_v47 = vunpack.c.2.s8 %v1853_v40  ;;  %v2421_v22 = vunpack.c.3.s8 %v1853_v40 }
 0x25f   :  { %4720 = vmatpush.bf16.msra.mxu3 %v4269_v60  ;;  %v4069_v0 = vpack.c.bf16 %v3061_v17, %v3053_v58  ;;  %v3309_v2 = vcvt.s32.f32 %v2285_v41  ;;  %v3317_v44 = vcvt.s32.f32 %v2293_v62  ;;  %v2013_v7 = vunpack.c.0.s8 %v1757_v30 }
 0x260   :  { %v4133_v28 = vpack.c.bf16 %v3189_v63, %v3181_v5  ;;  %v3437_v21 = vcvt.s32.f32 %v2413_v47  ;;  %v3445_v8 = vcvt.s32.f32 %v2421_v22  ;;  %v2021_v61 = vunpack.c.1.s8 %v1757_v30 }
 0x261   :  { %4682 = vmatpush.bf16.msra.mxu0 %v4069_v0  ;;  %v4197_v10 = vpack.c.bf16 %v3317_v44, %v3309_v2  ;;  %v3037_v33 = vcvt.s32.f32 %v2013_v7  ;;  %v2141_v51 = vunpack.c.0.s8 %v1789_v32  ;;  %v2149_v12 = vunpack.c.1.s8 %v1789_v32  ;;  %v1901_v2 = vld [vmem:[#allocation2 + $0x488] sm:$0xff] }
 0x262   :  { %4695 = vmatpush.bf16.msra.mxu1 %v4133_v28  ;;  %v4261_v14 = vpack.c.bf16 %v3445_v8, %v3437_v21  ;;  %v3045_v48 = vcvt.s32.f32 %v2021_v61  ;;  %v2269_v16 = vunpack.c.0.s8 %v1821_v53  ;;  %v2277_v19 = vunpack.c.1.s8 %v1821_v53 }
 0x263   :  { %4708 = vmatpush.bf16.msra.mxu2 %v4197_v10  ;;  %v3165_v20 = vcvt.s32.f32 %v2141_v51  ;;  %v3173_v23 = vcvt.s32.f32 %v2149_v12  ;;  %v2397_v18 = vunpack.c.0.s8 %v1853_v40  ;;  %v2405_v24 = vunpack.c.1.s8 %v1853_v40  ;;  %v1933_v51 = vld [vmem:[#allocation2 + $0x588] sm:$0xff] }
 0x264   :  { %4721 = vmatpush.bf16.msra.mxu3 %v4261_v14  ;;  %v4061_v26 = vpack.c.bf16 %v3045_v48, %v3037_v33  ;;  %v3293_v30 = vcvt.s32.f32 %v2269_v16  ;;  %v3301_v31 = vcvt.s32.f32 %v2277_v19  ;;  %v2637_v29 = vunpack.c.2.s8 %v1909_v13  ;;  %v1965_v16 = vld [vmem:[#allocation2 + $0x688] sm:$0xff] }
 0x265   :  { %v4125_v36 = vpack.c.bf16 %v3173_v23, %v3165_v20  ;;  %v3421_v37 = vcvt.s32.f32 %v2397_v18  ;;  %v3429_v39 = vcvt.s32.f32 %v2405_v24  ;;  %v2645_v15 = vunpack.c.3.s8 %v1909_v13  ;;  %v1997_v24 = vld [vmem:[#allocation2 + $0x788] sm:$0xff] }
 0x266   :  { %4683 = vmatpush.bf16.msra.mxu0 %v4061_v26  ;;  %v4189_v32 = vpack.c.bf16 %v3301_v31, %v3293_v30  ;;  %v3661_v52 = vcvt.s32.f32 %v2637_v29  ;;  %v2765_v42 = vunpack.c.2.s8 %v1941_v25  ;;  %v2773_v50 = vunpack.c.3.s8 %v1941_v25 }
 0x267   :  { %4696 = vmatpush.bf16.msra.mxu1 %v4125_v36  ;;  %v4253_v4 = vpack.c.bf16 %v3429_v39, %v3421_v37  ;;  %v3669_v53 = vcvt.s32.f32 %v2645_v15  ;;  %v2893_v54 = vunpack.c.2.s8 %v1973_v45  ;;  %v2901_v55 = vunpack.c.3.s8 %v1973_v45 }
 0x268   :  { %4709 = vmatpush.bf16.msra.mxu2 %v4189_v32  ;;  %v3789_v34 = vcvt.s32.f32 %v2765_v42  ;;  %v3797_v56 = vcvt.s32.f32 %v2773_v50  ;;  %v3021_v40 = vunpack.c.2.s8 %v2005_v49  ;;  %v3029_v57 = vunpack.c.3.s8 %v2005_v49 }
 0x269   :  { %4722 = vmatpush.bf16.msra.mxu3 %v4253_v4  ;;  %v4373_v58 = vpack.c.bf16 %v3669_v53, %v3661_v52  ;;  %v3917_v59 = vcvt.s32.f32 %v2893_v54  ;;  %v3925_v38 = vcvt.s32.f32 %v2901_v55  ;;  %v2621_v60 = vunpack.c.0.s8 %v1909_v13  ;;  %4684 = vmatmul.bf16.vlgmr.msra.gmra.mxu0 %v10188_v27 }
 0x26a   :  { %v4437_v17 = vpack.c.bf16 %v3797_v56, %v3789_v34  ;;  %v4045_v41 = vcvt.s32.f32 %v3021_v40  ;;  %v4053_v62 = vcvt.s32.f32 %v3029_v57  ;;  %v2629_v5 = vunpack.c.1.s8 %v1909_v13  ;;  %4697 = vmatmul.bf16.vlgmr.msra.gmra.mxu1 %v10197_v43 }
 0x26b   :  { %4728 = vmatpush.bf16.msrb.mxu0 %v4373_v58  ;;  %v4501_v63 = vpack.c.bf16 %v3925_v38, %v3917_v59  ;;  %v3645_v47 = vcvt.s32.f32 %v2621_v60  ;;  %v2749_v22 = vunpack.c.0.s8 %v1941_v25  ;;  %v2757_v0 = vunpack.c.1.s8 %v1941_v25  ;;  %4710 = vmatmul.bf16.vlgmr.msra.gmra.mxu2 %v10183_v6  ;;  %v1893_v59 = vld [vmem:[#allocation2 + $0x448] sm:$0xff] }
 0x26c   :  { %4741 = vmatpush.bf16.msrb.mxu1 %v4437_v17  ;;  %v4565_v44 = vpack.c.bf16 %v4053_v62, %v4045_v41  ;;  %v3653_v7 = vcvt.s32.f32 %v2629_v5  ;;  %v2877_v28 = vunpack.c.0.s8 %v1973_v45  ;;  %v2885_v21 = vunpack.c.1.s8 %v1973_v45  ;;  %4723 = vmatmul.bf16.vlgmr.msra.gmra.mxu3 %v10192_v1 }
 0x26d   :  { %4754 = vmatpush.bf16.msrb.mxu2 %v4501_v63  ;;  %v3773_v8 = vcvt.s32.f32 %v2749_v22  ;;  %v3781_v61 = vcvt.s32.f32 %v2757_v0  ;;  %v3005_v10 = vunpack.c.0.s8 %v2005_v49  ;;  %v3013_v33 = vunpack.c.1.s8 %v2005_v49  ;;  %v1925_v22 = vld [vmem:[#allocation2 + $0x548] sm:$0xff] }
 0x26e   :  { %4767 = vmatpush.bf16.msrb.mxu3 %v4565_v44  ;;  %v4365_v12 = vpack.c.bf16 %v3653_v7, %v3645_v47  ;;  %v3901_v13 = vcvt.s32.f32 %v2877_v28  ;;  %v3909_v14 = vcvt.s32.f32 %v2885_v21  ;;  %v2605_v48 = vunpack.c.2.s8 %v1901_v2  ;;  %v1957_v28 = vld [vmem:[#allocation2 + $0x648] sm:$0xff] }
 0x26f   :  { %v4429_v19 = vpack.c.bf16 %v3781_v61, %v3773_v8  ;;  %v4029_v20 = vcvt.s32.f32 %v3005_v10  ;;  %v4037_v23 = vcvt.s32.f32 %v3013_v33  ;;  %v2613_v18 = vunpack.c.3.s8 %v1901_v2  ;;  %v1989_v33 = vld [vmem:[#allocation2 + $0x748] sm:$0xff] }
 0x270   :  { %4729 = vmatpush.bf16.msrb.mxu0 %v4365_v12  ;;  %v4493_v25 = vpack.c.bf16 %v3909_v14, %v3901_v13  ;;  %v3629_v26 = vcvt.s32.f32 %v2605_v48  ;;  %v2733_v30 = vunpack.c.2.s8 %v1933_v51  ;;  %v2741_v31 = vunpack.c.3.s8 %v1933_v51 }
 0x271   :  { %4742 = vmatpush.bf16.msrb.mxu1 %v4429_v19  ;;  %v4557_v29 = vpack.c.bf16 %v4037_v23, %v4029_v20  ;;  %v3637_v45 = vcvt.s32.f32 %v2613_v18  ;;  %v2861_v36 = vunpack.c.2.s8 %v1965_v16  ;;  %v2869_v37 = vunpack.c.3.s8 %v1965_v16 }
 0x272   :  { %4755 = vmatpush.bf16.msrb.mxu2 %v4493_v25  ;;  %v3757_v39 = vcvt.s32.f32 %v2733_v30  ;;  %v3765_v15 = vcvt.s32.f32 %v2741_v31  ;;  %v2989_v49 = vunpack.c.2.s8 %v1997_v24  ;;  %v2997_v32 = vunpack.c.3.s8 %v1997_v24 }
 0x273   :  { %4768 = vmatpush.bf16.msrb.mxu3 %v4557_v29  ;;  %v4357_v52 = vpack.c.bf16 %v3637_v45, %v3629_v26  ;;  %v3885_v42 = vcvt.s32.f32 %v2861_v36  ;;  %v3893_v50 = vcvt.s32.f32 %v2869_v37  ;;  %v2589_v4 = vunpack.c.0.s8 %v1901_v2 }
 0x274   :  { %v4421_v53 = vpack.c.bf16 %v3765_v15, %v3757_v39  ;;  %v4013_v54 = vcvt.s32.f32 %v2989_v49  ;;  %v4021_v55 = vcvt.s32.f32 %v2997_v32  ;;  %v2597_v34 = vunpack.c.1.s8 %v1901_v2 }
 0x275   :  { %4730 = vmatpush.bf16.msrb.mxu0 %v4357_v52  ;;  %v4485_v56 = vpack.c.bf16 %v3893_v50, %v3885_v42  ;;  %v3613_v40 = vcvt.s32.f32 %v2589_v4  ;;  %v2717_v57 = vunpack.c.0.s8 %v1933_v51  ;;  %v2725_v58 = vunpack.c.1.s8 %v1933_v51  ;;  %v1885_v42 = vld [vmem:[#allocation2 + $0x408] sm:$0xff] }
 0x276   :  { %4743 = vmatpush.bf16.msrb.mxu1 %v4421_v53  ;;  %v4549_v38 = vpack.c.bf16 %v4021_v55, %v4013_v54  ;;  %v3621_v60 = vcvt.s32.f32 %v2597_v34  ;;  %v2845_v17 = vunpack.c.0.s8 %v1965_v16  ;;  %v2853_v41 = vunpack.c.1.s8 %v1965_v16 }
 0x277   :  { %4756 = vmatpush.bf16.msrb.mxu2 %v4485_v56  ;;  %v3741_v62 = vcvt.s32.f32 %v2717_v57  ;;  %v3749_v5 = vcvt.s32.f32 %v2725_v58  ;;  %v2973_v63 = vunpack.c.0.s8 %v1997_v24  ;;  %v2981_v47 = vunpack.c.1.s8 %v1997_v24  ;;  %v1917_v57 = vld [vmem:[#allocation2 + $0x508] sm:$0xff] }
 0x278   :  { %4769 = vmatpush.bf16.msrb.mxu3 %v4549_v38  ;;  %v4349_v0 = vpack.c.bf16 %v3621_v60, %v3613_v40  ;;  %v3869_v2 = vcvt.s32.f32 %v2845_v17  ;;  %v3877_v44 = vcvt.s32.f32 %v2853_v41  ;;  %v2573_v7 = vunpack.c.2.s8 %v1893_v59  ;;  %v1949_v17 = vld [vmem:[#allocation2 + $0x608] sm:$0xff] }
 0x279   :  { %v4413_v21 = vpack.c.bf16 %v3749_v5, %v3741_v62  ;;  %v3997_v8 = vcvt.s32.f32 %v2973_v63  ;;  %v4005_v61 = vcvt.s32.f32 %v2981_v47  ;;  %v2581_v10 = vunpack.c.3.s8 %v1893_v59  ;;  %v1981_v47 = vld [vmem:[#allocation2 + $0x708] sm:$0xff] }
 0x27a   :  { %4731 = vmatpush.bf16.msrb.mxu0 %v4349_v0  ;;  %v4477_v51 = vpack.c.bf16 %v3877_v44, %v3869_v2  ;;  %v3597_v12 = vcvt.s32.f32 %v2573_v7  ;;  %v2701_v13 = vunpack.c.2.s8 %v1925_v22  ;;  %v2709_v14 = vunpack.c.3.s8 %v1925_v22 }
 0x27b   :  { %4744 = vmatpush.bf16.msrb.mxu1 %v4413_v21  ;;  %v4541_v48 = vpack.c.bf16 %v4005_v61, %v3997_v8  ;;  %v3605_v16 = vcvt.s32.f32 %v2581_v10  ;;  %v2829_v19 = vunpack.c.2.s8 %v1957_v28  ;;  %v2837_v20 = vunpack.c.3.s8 %v1957_v28 }
 0x27c   :  { %4757 = vmatpush.bf16.msrb.mxu2 %v4477_v51  ;;  %v3725_v23 = vcvt.s32.f32 %v2701_v13  ;;  %v3733_v18 = vcvt.s32.f32 %v2709_v14  ;;  %v2957_v24 = vunpack.c.2.s8 %v1989_v33  ;;  %v2965_v25 = vunpack.c.3.s8 %v1989_v33 }
 0x27d   :  { %4770 = vmatpush.bf16.msrb.mxu3 %v4541_v48  ;;  %v4341_v26 = vpack.c.bf16 %v3605_v16, %v3597_v12  ;;  %v3853_v30 = vcvt.s32.f32 %v2829_v19  ;;  %v3861_v31 = vcvt.s32.f32 %v2837_v20  ;;  %v2557_v29 = vunpack.c.0.s8 %v1893_v59 }
 0x27e   :  { %v4405_v45 = vpack.c.bf16 %v3733_v18, %v3725_v23  ;;  %v3981_v36 = vcvt.s32.f32 %v2957_v24  ;;  %v3989_v37 = vcvt.s32.f32 %v2965_v25  ;;  %v2565_v39 = vunpack.c.1.s8 %v1893_v59 }
 0x27f   :  { %4732 = vmatpush.bf16.msrb.mxu0 %v4341_v26  ;;  %v4469_v15 = vpack.c.bf16 %v3861_v31, %v3853_v30  ;;  %v3581_v49 = vcvt.s32.f32 %v2557_v29  ;;  %v2685_v32 = vunpack.c.0.s8 %v1925_v22  ;;  %v2693_v52 = vunpack.c.1.s8 %v1925_v22  ;;  %v1782_v30 = vld [vmem:[#allocation2 + $0xd0] sm:$0xff] }
 0x280   :  { %4745 = vmatpush.bf16.msrb.mxu1 %v4405_v45  ;;  %v4533_v50 = vpack.c.bf16 %v3989_v37, %v3981_v36  ;;  %v3589_v4 = vcvt.s32.f32 %v2565_v39  ;;  %v2813_v53 = vunpack.c.0.s8 %v1957_v28  ;;  %v2821_v54 = vunpack.c.1.s8 %v1957_v28 }
 0x281   :  { %4758 = vmatpush.bf16.msrb.mxu2 %v4469_v15  ;;  %v3709_v55 = vcvt.s32.f32 %v2685_v32  ;;  %v3717_v34 = vcvt.s32.f32 %v2693_v52  ;;  %v2941_v56 = vunpack.c.0.s8 %v1989_v33  ;;  %v2949_v40 = vunpack.c.1.s8 %v1989_v33  ;;  %v1814_v32 = vld [vmem:[#allocation2 + $0x1d0] sm:$0xff] }
 0x282   :  { %4771 = vmatpush.bf16.msrb.mxu3 %v4533_v50  ;;  %v4333_v58 = vpack.c.bf16 %v3589_v4, %v3581_v49  ;;  %v3837_v59 = vcvt.s32.f32 %v2813_v53  ;;  %v3845_v38 = vcvt.s32.f32 %v2821_v54  ;;  %v2541_v60 = vunpack.c.2.s8 %v1885_v42  ;;  %v1846_v53 = vld [vmem:[#allocation2 + $0x2d0] sm:$0xff] }
 0x283   :  { %v4397_v41 = vpack.c.bf16 %v3717_v34, %v3709_v55  ;;  %v3965_v62 = vcvt.s32.f32 %v2941_v56  ;;  %v3973_v5 = vcvt.s32.f32 %v2949_v40  ;;  %v2549_v63 = vunpack.c.3.s8 %v1885_v42  ;;  %v1878_v40 = vld [vmem:[#allocation2 + $0x3d0] sm:$0xff] }
 0x284   :  { %4733 = vmatpush.bf16.msrb.mxu0 %v4333_v58  ;;  %v4461_v22 = vpack.c.bf16 %v3845_v38, %v3837_v59  ;;  %v3565_v0 = vcvt.s32.f32 %v2541_v60  ;;  %v2669_v2 = vunpack.c.2.s8 %v1917_v57  ;;  %v2677_v44 = vunpack.c.3.s8 %v1917_v57 }
 0x285   :  { %4746 = vmatpush.bf16.msrb.mxu1 %v4397_v41  ;;  %v4525_v7 = vpack.c.bf16 %v3973_v5, %v3965_v62  ;;  %v3573_v28 = vcvt.s32.f32 %v2549_v63  ;;  %v2797_v21 = vunpack.c.2.s8 %v1949_v17  ;;  %v2805_v8 = vunpack.c.3.s8 %v1949_v17 }
 0x286   :  { %4759 = vmatpush.bf16.msrb.mxu2 %v4461_v22  ;;  %v3693_v61 = vcvt.s32.f32 %v2669_v2  ;;  %v3701_v10 = vcvt.s32.f32 %v2677_v44  ;;  %v2925_v33 = vunpack.c.2.s8 %v1981_v47  ;;  %v2933_v51 = vunpack.c.3.s8 %v1981_v47 }
 0x287   :  { %4772 = vmatpush.bf16.msrb.mxu3 %v4525_v7  ;;  %v4325_v12 = vpack.c.bf16 %v3573_v28, %v3565_v0  ;;  %v3821_v13 = vcvt.s32.f32 %v2797_v21  ;;  %v3829_v14 = vcvt.s32.f32 %v2805_v8  ;;  %v2525_v48 = vunpack.c.0.s8 %v1885_v42 }
 0x288   :  { %v4389_v16 = vpack.c.bf16 %v3701_v10, %v3693_v61  ;;  %v3949_v19 = vcvt.s32.f32 %v2925_v33  ;;  %v3957_v20 = vcvt.s32.f32 %v2933_v51  ;;  %v2533_v23 = vunpack.c.1.s8 %v1885_v42 }
 0x289   :  { %4734 = vmatpush.bf16.msrb.mxu0 %v4325_v12  ;;  %v4453_v18 = vpack.c.bf16 %v3829_v14, %v3821_v13  ;;  %v3549_v24 = vcvt.s32.f32 %v2525_v48  ;;  %v2653_v25 = vunpack.c.0.s8 %v1917_v57  ;;  %v2661_v26 = vunpack.c.1.s8 %v1917_v57  ;;  %v1774_v13 = vld [vmem:[#allocation2 + $0x90] sm:$0xff] }
 0x28a   :  { %4747 = vmatpush.bf16.msrb.mxu1 %v4389_v16  ;;  %v4517_v31 = vpack.c.bf16 %v3957_v20, %v3949_v19  ;;  %v3557_v29 = vcvt.s32.f32 %v2533_v23  ;;  %v2781_v45 = vunpack.c.0.s8 %v1949_v17  ;;  %v2789_v36 = vunpack.c.1.s8 %v1949_v17 }
 0x28b   :  { %4760 = vmatpush.bf16.msrb.mxu2 %v4453_v18  ;;  %v3677_v37 = vcvt.s32.f32 %v2653_v25  ;;  %v3685_v39 = vcvt.s32.f32 %v2661_v26  ;;  %v2909_v15 = vunpack.c.0.s8 %v1981_v47  ;;  %v2917_v49 = vunpack.c.1.s8 %v1981_v47  ;;  %v1806_v25 = vld [vmem:[#allocation2 + $0x190] sm:$0xff] }
 0x28c   :  { %4773 = vmatpush.bf16.msrb.mxu3 %v4517_v31  ;;  %v4317_v52 = vpack.c.bf16 %v3557_v29, %v3549_v24  ;;  %v3805_v42 = vcvt.s32.f32 %v2781_v45  ;;  %v3813_v50 = vcvt.s32.f32 %v2789_v36  ;;  %v2126_v4 = vunpack.c.2.s8 %v1782_v30  ;;  %v1838_v45 = vld [vmem:[#allocation2 + $0x290] sm:$0xff] }
 0x28d   :  { %v4381_v54 = vpack.c.bf16 %v3685_v39, %v3677_v37  ;;  %v3933_v55 = vcvt.s32.f32 %v2909_v15  ;;  %v3941_v34 = vcvt.s32.f32 %v2917_v49  ;;  %v2134_v56 = vunpack.c.3.s8 %v1782_v30  ;;  %v1870_v49 = vld [vmem:[#allocation2 + $0x390] sm:$0xff] }
 0x28e   :  { %4735 = vmatpush.bf16.msrb.mxu0 %v4317_v52  ;;  %v4445_v57 = vpack.c.bf16 %v3813_v50, %v3805_v42  ;;  %v3150_v58 = vcvt.s32.f32 %v2126_v4  ;;  %v2254_v59 = vunpack.c.2.s8 %v1814_v32  ;;  %v2262_v38 = vunpack.c.3.s8 %v1814_v32 }
 0x28f   :  { %4748 = vmatpush.bf16.msrb.mxu1 %v4381_v54  ;;  %v4509_v60 = vpack.c.bf16 %v3941_v34, %v3933_v55  ;;  %v3158_v17 = vcvt.s32.f32 %v2134_v56  ;;  %v2382_v41 = vunpack.c.2.s8 %v1846_v53  ;;  %v2390_v62 = vunpack.c.3.s8 %v1846_v53 }
 0x290   :  { %4761 = vmatpush.bf16.msrb.mxu2 %v4445_v57  ;;  %v3278_v5 = vcvt.s32.f32 %v2254_v59  ;;  %v3286_v63 = vcvt.s32.f32 %v2262_v38  ;;  %v2510_v47 = vunpack.c.2.s8 %v1878_v40  ;;  %v2518_v22 = vunpack.c.3.s8 %v1878_v40 }
 0x291   :  { %4774 = vmatpush.bf16.msrb.mxu3 %v4509_v60  ;;  %v4118_v0 = vpack.c.bf16 %v3158_v17, %v3150_v58  ;;  %v3406_v2 = vcvt.s32.f32 %v2382_v41  ;;  %v3414_v44 = vcvt.s32.f32 %v2390_v62  ;;  %v2110_v7 = vunpack.c.0.s8 %v1782_v30  ;;  %4736 = vmatmul.bf16.vlgmr.msrb.gmra.mxu0 %v10207_v9 }
 0x292   :  { %v4182_v28 = vpack.c.bf16 %v3286_v63, %v3278_v5  ;;  %v3534_v21 = vcvt.s32.f32 %v2510_v47  ;;  %v3542_v8 = vcvt.s32.f32 %v2518_v22  ;;  %v2118_v61 = vunpack.c.1.s8 %v1782_v30  ;;  %4749 = vmatmul.bf16.vlgmr.msrb.gmra.mxu1 %v10222_v35 }
 0x293   :  { %4780 = vmatpush.bf16.msra.mxu0 %v4118_v0  ;;  %v4246_v10 = vpack.c.bf16 %v3414_v44, %v3406_v2  ;;  %v3134_v33 = vcvt.s32.f32 %v2110_v7  ;;  %v2238_v51 = vunpack.c.0.s8 %v1814_v32  ;;  %v2246_v12 = vunpack.c.1.s8 %v1814_v32  ;;  %4762 = vmatmul.bf16.vlgmr.msrb.gmra.mxu2 %v10203_v3  ;;  %v1766_v2 = vld [vmem:[#allocation2 + $0x50] sm:$0xff] }
 0x294   :  { %4793 = vmatpush.bf16.msra.mxu1 %v4182_v28  ;;  %v4310_v14 = vpack.c.bf16 %v3542_v8, %v3534_v21  ;;  %v3142_v48 = vcvt.s32.f32 %v2118_v61  ;;  %v2366_v16 = vunpack.c.0.s8 %v1846_v53  ;;  %v2374_v19 = vunpack.c.1.s8 %v1846_v53  ;;  %4775 = vmatmul.bf16.vlgmr.msrb.gmra.mxu3 %v10214_v11 }
 0x295   :  { %4806 = vmatpush.bf16.msra.mxu2 %v4246_v10  ;;  %v3262_v20 = vcvt.s32.f32 %v2238_v51  ;;  %v3270_v23 = vcvt.s32.f32 %v2246_v12  ;;  %v2494_v18 = vunpack.c.0.s8 %v1878_v40  ;;  %v2502_v24 = vunpack.c.1.s8 %v1878_v40  ;;  %v1798_v51 = vld [vmem:[#allocation2 + $0x150] sm:$0xff] }
 0x296   :  { %4819 = vmatpush.bf16.msra.mxu3 %v4310_v14  ;;  %v4110_v26 = vpack.c.bf16 %v3142_v48, %v3134_v33  ;;  %v3390_v30 = vcvt.s32.f32 %v2366_v16  ;;  %v3398_v31 = vcvt.s32.f32 %v2374_v19  ;;  %v2094_v29 = vunpack.c.2.s8 %v1774_v13  ;;  %v1830_v16 = vld [vmem:[#allocation2 + $0x250] sm:$0xff] }
 0x297   :  { %v4174_v36 = vpack.c.bf16 %v3270_v23, %v3262_v20  ;;  %v3518_v37 = vcvt.s32.f32 %v2494_v18  ;;  %v3526_v39 = vcvt.s32.f32 %v2502_v24  ;;  %v2102_v15 = vunpack.c.3.s8 %v1774_v13  ;;  %v1862_v24 = vld [vmem:[#allocation2 + $0x350] sm:$0xff] }
 0x298   :  { %4781 = vmatpush.bf16.msra.mxu0 %v4110_v26  ;;  %v4238_v32 = vpack.c.bf16 %v3398_v31, %v3390_v30  ;;  %v3118_v52 = vcvt.s32.f32 %v2094_v29  ;;  %v2222_v42 = vunpack.c.2.s8 %v1806_v25  ;;  %v2230_v50 = vunpack.c.3.s8 %v1806_v25 }
 0x299   :  { %4794 = vmatpush.bf16.msra.mxu1 %v4174_v36  ;;  %v4302_v4 = vpack.c.bf16 %v3526_v39, %v3518_v37  ;;  %v3126_v53 = vcvt.s32.f32 %v2102_v15  ;;  %v2350_v54 = vunpack.c.2.s8 %v1838_v45  ;;  %v2358_v55 = vunpack.c.3.s8 %v1838_v45 }
 0x29a   :  { %4807 = vmatpush.bf16.msra.mxu2 %v4238_v32  ;;  %v3246_v34 = vcvt.s32.f32 %v2222_v42  ;;  %v3254_v56 = vcvt.s32.f32 %v2230_v50  ;;  %v2478_v40 = vunpack.c.2.s8 %v1870_v49  ;;  %v2486_v57 = vunpack.c.3.s8 %v1870_v49 }
 0x29b   :  { %4820 = vmatpush.bf16.msra.mxu3 %v4302_v4  ;;  %v4102_v58 = vpack.c.bf16 %v3126_v53, %v3118_v52  ;;  %v3374_v59 = vcvt.s32.f32 %v2350_v54  ;;  %v3382_v38 = vcvt.s32.f32 %v2358_v55  ;;  %v2078_v60 = vunpack.c.0.s8 %v1774_v13 }
 0x29c   :  { %v4166_v17 = vpack.c.bf16 %v3254_v56, %v3246_v34  ;;  %v3502_v41 = vcvt.s32.f32 %v2478_v40  ;;  %v3510_v62 = vcvt.s32.f32 %v2486_v57  ;;  %v2086_v5 = vunpack.c.1.s8 %v1774_v13 }
 0x29d   :  { %4782 = vmatpush.bf16.msra.mxu0 %v4102_v58  ;;  %v4230_v63 = vpack.c.bf16 %v3382_v38, %v3374_v59  ;;  %v3102_v47 = vcvt.s32.f32 %v2078_v60  ;;  %v2206_v22 = vunpack.c.0.s8 %v1806_v25  ;;  %v2214_v0 = vunpack.c.1.s8 %v1806_v25  ;;  %v1758_v59 = vld [vmem:[#allocation2 + $0x10] sm:$0xff] }
 0x29e   :  { %4795 = vmatpush.bf16.msra.mxu1 %v4166_v17  ;;  %v4294_v44 = vpack.c.bf16 %v3510_v62, %v3502_v41  ;;  %v3110_v7 = vcvt.s32.f32 %v2086_v5  ;;  %v2334_v28 = vunpack.c.0.s8 %v1838_v45  ;;  %v2342_v21 = vunpack.c.1.s8 %v1838_v45 }
 0x29f   :  { %4808 = vmatpush.bf16.msra.mxu2 %v4230_v63  ;;  %v3230_v8 = vcvt.s32.f32 %v2206_v22  ;;  %v3238_v61 = vcvt.s32.f32 %v2214_v0  ;;  %v2462_v10 = vunpack.c.0.s8 %v1870_v49  ;;  %v2470_v33 = vunpack.c.1.s8 %v1870_v49  ;;  %v1790_v22 = vld [vmem:[#allocation2 + $0x110] sm:$0xff] }
 0x2a0   :  { %4821 = vmatpush.bf16.msra.mxu3 %v4294_v44  ;;  %v4094_v12 = vpack.c.bf16 %v3110_v7, %v3102_v47  ;;  %v3358_v13 = vcvt.s32.f32 %v2334_v28  ;;  %v3366_v14 = vcvt.s32.f32 %v2342_v21  ;;  %v2062_v48 = vunpack.c.2.s8 %v1766_v2  ;;  %v1822_v28 = vld [vmem:[#allocation2 + $0x210] sm:$0xff] }
 0x2a1   :  { %v4158_v19 = vpack.c.bf16 %v3238_v61, %v3230_v8  ;;  %v3486_v20 = vcvt.s32.f32 %v2462_v10  ;;  %v3494_v23 = vcvt.s32.f32 %v2470_v33  ;;  %v2070_v18 = vunpack.c.3.s8 %v1766_v2  ;;  %v1854_v33 = vld [vmem:[#allocation2 + $0x310] sm:$0xff] }
 0x2a2   :  { %4783 = vmatpush.bf16.msra.mxu0 %v4094_v12  ;;  %v4222_v25 = vpack.c.bf16 %v3366_v14, %v3358_v13  ;;  %v3086_v26 = vcvt.s32.f32 %v2062_v48  ;;  %v2190_v30 = vunpack.c.2.s8 %v1798_v51  ;;  %v2198_v31 = vunpack.c.3.s8 %v1798_v51 }
 0x2a3   :  { %4796 = vmatpush.bf16.msra.mxu1 %v4158_v19  ;;  %v4286_v29 = vpack.c.bf16 %v3494_v23, %v3486_v20  ;;  %v3094_v45 = vcvt.s32.f32 %v2070_v18  ;;  %v2318_v36 = vunpack.c.2.s8 %v1830_v16  ;;  %v2326_v37 = vunpack.c.3.s8 %v1830_v16 }
 0x2a4   :  { %4809 = vmatpush.bf16.msra.mxu2 %v4222_v25  ;;  %v3214_v39 = vcvt.s32.f32 %v2190_v30  ;;  %v3222_v15 = vcvt.s32.f32 %v2198_v31  ;;  %v2446_v49 = vunpack.c.2.s8 %v1862_v24  ;;  %v2454_v32 = vunpack.c.3.s8 %v1862_v24 }
 0x2a5   :  { %4822 = vmatpush.bf16.msra.mxu3 %v4286_v29  ;;  %v4086_v52 = vpack.c.bf16 %v3094_v45, %v3086_v26  ;;  %v3342_v42 = vcvt.s32.f32 %v2318_v36  ;;  %v3350_v50 = vcvt.s32.f32 %v2326_v37  ;;  %v2046_v4 = vunpack.c.0.s8 %v1766_v2 }
 0x2a6   :  { %v4150_v53 = vpack.c.bf16 %v3222_v15, %v3214_v39  ;;  %v3470_v54 = vcvt.s32.f32 %v2446_v49  ;;  %v3478_v55 = vcvt.s32.f32 %v2454_v32  ;;  %v2054_v34 = vunpack.c.1.s8 %v1766_v2 }
 0x2a7   :  { %4784 = vmatpush.bf16.msra.mxu0 %v4086_v52  ;;  %v4214_v56 = vpack.c.bf16 %v3350_v50, %v3342_v42  ;;  %v3070_v40 = vcvt.s32.f32 %v2046_v4  ;;  %v2174_v57 = vunpack.c.0.s8 %v1798_v51  ;;  %v2182_v58 = vunpack.c.1.s8 %v1798_v51  ;;  %v1910_v42 = vld [vmem:[#allocation2 + $0x4d0] sm:$0xff] }
 0x2a8   :  { %4797 = vmatpush.bf16.msra.mxu1 %v4150_v53  ;;  %v4278_v38 = vpack.c.bf16 %v3478_v55, %v3470_v54  ;;  %v3078_v60 = vcvt.s32.f32 %v2054_v34  ;;  %v2302_v17 = vunpack.c.0.s8 %v1830_v16  ;;  %v2310_v41 = vunpack.c.1.s8 %v1830_v16 }
 0x2a9   :  { %4810 = vmatpush.bf16.msra.mxu2 %v4214_v56  ;;  %v3198_v62 = vcvt.s32.f32 %v2174_v57  ;;  %v3206_v5 = vcvt.s32.f32 %v2182_v58  ;;  %v2430_v63 = vunpack.c.0.s8 %v1862_v24  ;;  %v2438_v47 = vunpack.c.1.s8 %v1862_v24  ;;  %v1942_v57 = vld [vmem:[#allocation2 + $0x5d0] sm:$0xff] }
 0x2aa   :  { %4823 = vmatpush.bf16.msra.mxu3 %v4278_v38  ;;  %v4078_v0 = vpack.c.bf16 %v3078_v60, %v3070_v40  ;;  %v3326_v2 = vcvt.s32.f32 %v2302_v17  ;;  %v3334_v44 = vcvt.s32.f32 %v2310_v41  ;;  %v2030_v7 = vunpack.c.2.s8 %v1758_v59  ;;  %v1974_v17 = vld [vmem:[#allocation2 + $0x6d0] sm:$0xff] }
 0x2ab   :  { %v4142_v21 = vpack.c.bf16 %v3206_v5, %v3198_v62  ;;  %v3454_v8 = vcvt.s32.f32 %v2430_v63  ;;  %v3462_v61 = vcvt.s32.f32 %v2438_v47  ;;  %v2038_v10 = vunpack.c.3.s8 %v1758_v59  ;;  %v2006_v47 = vld [vmem:[#allocation2 + $0x7d0] sm:$0xff] }
 0x2ac   :  { %4785 = vmatpush.bf16.msra.mxu0 %v4078_v0  ;;  %v4206_v51 = vpack.c.bf16 %v3334_v44, %v3326_v2  ;;  %v3054_v12 = vcvt.s32.f32 %v2030_v7  ;;  %v2158_v13 = vunpack.c.2.s8 %v1790_v22  ;;  %v2166_v14 = vunpack.c.3.s8 %v1790_v22 }
 0x2ad   :  { %4798 = vmatpush.bf16.msra.mxu1 %v4142_v21  ;;  %v4270_v48 = vpack.c.bf16 %v3462_v61, %v3454_v8  ;;  %v3062_v16 = vcvt.s32.f32 %v2038_v10  ;;  %v2286_v19 = vunpack.c.2.s8 %v1822_v28  ;;  %v2294_v20 = vunpack.c.3.s8 %v1822_v28 }
 0x2ae   :  { %4811 = vmatpush.bf16.msra.mxu2 %v4206_v51  ;;  %v3182_v23 = vcvt.s32.f32 %v2158_v13  ;;  %v3190_v18 = vcvt.s32.f32 %v2166_v14  ;;  %v2414_v24 = vunpack.c.2.s8 %v1854_v33  ;;  %v2422_v25 = vunpack.c.3.s8 %v1854_v33 }
 0x2af   :  { %4824 = vmatpush.bf16.msra.mxu3 %v4270_v48  ;;  %v4070_v26 = vpack.c.bf16 %v3062_v16, %v3054_v12  ;;  %v3310_v30 = vcvt.s32.f32 %v2286_v19  ;;  %v3318_v31 = vcvt.s32.f32 %v2294_v20  ;;  %v2014_v29 = vunpack.c.0.s8 %v1758_v59 }
 0x2b0   :  { %v4134_v45 = vpack.c.bf16 %v3190_v18, %v3182_v23  ;;  %v3438_v36 = vcvt.s32.f32 %v2414_v24  ;;  %v3446_v37 = vcvt.s32.f32 %v2422_v25  ;;  %v2022_v39 = vunpack.c.1.s8 %v1758_v59 }
 0x2b1   :  { %4786 = vmatpush.bf16.msra.mxu0 %v4070_v26  ;;  %v4198_v15 = vpack.c.bf16 %v3318_v31, %v3310_v30  ;;  %v3038_v49 = vcvt.s32.f32 %v2014_v29  ;;  %v2142_v32 = vunpack.c.0.s8 %v1790_v22  ;;  %v2150_v52 = vunpack.c.1.s8 %v1790_v22  ;;  %v1902_v30 = vld [vmem:[#allocation2 + $0x490] sm:$0xff] }
 0x2b2   :  { %4799 = vmatpush.bf16.msra.mxu1 %v4134_v45  ;;  %v4262_v50 = vpack.c.bf16 %v3446_v37, %v3438_v36  ;;  %v3046_v4 = vcvt.s32.f32 %v2022_v39  ;;  %v2270_v53 = vunpack.c.0.s8 %v1822_v28  ;;  %v2278_v54 = vunpack.c.1.s8 %v1822_v28 }
 0x2b3   :  { %4812 = vmatpush.bf16.msra.mxu2 %v4198_v15  ;;  %v3166_v55 = vcvt.s32.f32 %v2142_v32  ;;  %v3174_v34 = vcvt.s32.f32 %v2150_v52  ;;  %v2398_v56 = vunpack.c.0.s8 %v1854_v33  ;;  %v2406_v40 = vunpack.c.1.s8 %v1854_v33  ;;  %v1934_v32 = vld [vmem:[#allocation2 + $0x590] sm:$0xff] }
 0x2b4   :  { %4825 = vmatpush.bf16.msra.mxu3 %v4262_v50  ;;  %v4062_v58 = vpack.c.bf16 %v3046_v4, %v3038_v49  ;;  %v3294_v59 = vcvt.s32.f32 %v2270_v53  ;;  %v3302_v38 = vcvt.s32.f32 %v2278_v54  ;;  %v2638_v60 = vunpack.c.2.s8 %v1910_v42  ;;  %v1966_v53 = vld [vmem:[#allocation2 + $0x690] sm:$0xff] }
 0x2b5   :  { %v4126_v41 = vpack.c.bf16 %v3174_v34, %v3166_v55  ;;  %v3422_v62 = vcvt.s32.f32 %v2398_v56  ;;  %v3430_v5 = vcvt.s32.f32 %v2406_v40  ;;  %v2646_v63 = vunpack.c.3.s8 %v1910_v42  ;;  %v1998_v40 = vld [vmem:[#allocation2 + $0x790] sm:$0xff] }
 0x2b6   :  { %4787 = vmatpush.bf16.msra.mxu0 %v4062_v58  ;;  %v4190_v22 = vpack.c.bf16 %v3302_v38, %v3294_v59  ;;  %v3662_v0 = vcvt.s32.f32 %v2638_v60  ;;  %v2766_v2 = vunpack.c.2.s8 %v1942_v57  ;;  %v2774_v44 = vunpack.c.3.s8 %v1942_v57 }
 0x2b7   :  { %4800 = vmatpush.bf16.msra.mxu1 %v4126_v41  ;;  %v4254_v7 = vpack.c.bf16 %v3430_v5, %v3422_v62  ;;  %v3670_v28 = vcvt.s32.f32 %v2646_v63  ;;  %v2894_v21 = vunpack.c.2.s8 %v1974_v17  ;;  %v2902_v8 = vunpack.c.3.s8 %v1974_v17 }
 0x2b8   :  { %4813 = vmatpush.bf16.msra.mxu2 %v4190_v22  ;;  %v3790_v61 = vcvt.s32.f32 %v2766_v2  ;;  %v3798_v10 = vcvt.s32.f32 %v2774_v44  ;;  %v3022_v33 = vunpack.c.2.s8 %v2006_v47  ;;  %v3030_v51 = vunpack.c.3.s8 %v2006_v47 }
 0x2b9   :  { %4826 = vmatpush.bf16.msra.mxu3 %v4254_v7  ;;  %v4374_v12 = vpack.c.bf16 %v3670_v28, %v3662_v0  ;;  %v3918_v13 = vcvt.s32.f32 %v2894_v21  ;;  %v3926_v14 = vcvt.s32.f32 %v2902_v8  ;;  %v2622_v48 = vunpack.c.0.s8 %v1910_v42  ;;  %4788 = vmatmul.bf16.vlgmr.msra.gmra.mxu0 %v10188_v27 }
 0x2ba   :  { %v4438_v16 = vpack.c.bf16 %v3798_v10, %v3790_v61  ;;  %v4046_v19 = vcvt.s32.f32 %v3022_v33  ;;  %v4054_v20 = vcvt.s32.f32 %v3030_v51  ;;  %v2630_v23 = vunpack.c.1.s8 %v1910_v42  ;;  %4801 = vmatmul.bf16.vlgmr.msra.gmra.mxu1 %v10197_v43 }
 0x2bb   :  { %4832 = vmatpush.bf16.msrb.mxu0 %v4374_v12  ;;  %v4502_v18 = vpack.c.bf16 %v3926_v14, %v3918_v13  ;;  %v3646_v24 = vcvt.s32.f32 %v2622_v48  ;;  %v2750_v25 = vunpack.c.0.s8 %v1942_v57  ;;  %v2758_v26 = vunpack.c.1.s8 %v1942_v57  ;;  %4814 = vmatmul.bf16.vlgmr.msra.gmra.mxu2 %v10183_v6  ;;  %v1894_v13 = vld [vmem:[#allocation2 + $0x450] sm:$0xff] }
 0x2bc   :  { %4845 = vmatpush.bf16.msrb.mxu1 %v4438_v16  ;;  %v4566_v31 = vpack.c.bf16 %v4054_v20, %v4046_v19  ;;  %v3654_v29 = vcvt.s32.f32 %v2630_v23  ;;  %v2878_v45 = vunpack.c.0.s8 %v1974_v17  ;;  %v2886_v36 = vunpack.c.1.s8 %v1974_v17  ;;  %4827 = vmatmul.bf16.vlgmr.msra.gmra.mxu3 %v10192_v1  ;;  %v10239_v20 = vpop.f32.mrf.mxu0  ;;  %v10241_v23 = vpop.f32.mrf.mxu1 }
 0x2bd   :  { %4858 = vmatpush.bf16.msrb.mxu2 %v4502_v18  ;;  %v3774_v37 = vcvt.s32.f32 %v2750_v25  ;;  %v3782_v39 = vcvt.s32.f32 %v2758_v26  ;;  %v3006_v15 = vunpack.c.0.s8 %v2006_v47  ;;  %v3014_v49 = vunpack.c.1.s8 %v2006_v47 }
 0x2be   :  { %4871 = vmatpush.bf16.msrb.mxu3 %v4566_v31  ;;  %v4366_v52 = vpack.c.bf16 %v3654_v29, %v3646_v24  ;;  %v3902_v42 = vcvt.s32.f32 %v2878_v45  ;;  %v3910_v50 = vcvt.s32.f32 %v2886_v36  ;;  %v2606_v4 = vunpack.c.2.s8 %v1902_v30 }
 0x2bf   :  { %v4430_v54 = vpack.c.bf16 %v3782_v39, %v3774_v37  ;;  %v4030_v55 = vcvt.s32.f32 %v3006_v15  ;;  %v4038_v34 = vcvt.s32.f32 %v3014_v49  ;;  %v2614_v56 = vunpack.c.3.s8 %v1902_v30  ;;  %v1958_v37 = vld [vmem:[#allocation2 + $0x650] sm:$0xff] }
 0x2c0   :  { %4833 = vmatpush.bf16.msrb.mxu0 %v4366_v52  ;;  %v4494_v57 = vpack.c.bf16 %v3910_v50, %v3902_v42  ;;  %v3630_v58 = vcvt.s32.f32 %v2606_v4  ;;  %v2734_v59 = vunpack.c.2.s8 %v1934_v32  ;;  %v2742_v38 = vunpack.c.3.s8 %v1934_v32  ;;  %v1990_v52 = vld [vmem:[#allocation2 + $0x750] sm:$0xff] }
 0x2c1   :  { %4846 = vmatpush.bf16.msrb.mxu1 %v4430_v54  ;;  %v4558_v60 = vpack.c.bf16 %v4038_v34, %v4030_v55  ;;  %v3638_v17 = vcvt.s32.f32 %v2614_v56  ;;  %v2862_v41 = vunpack.c.2.s8 %v1966_v53  ;;  %v2870_v62 = vunpack.c.3.s8 %v1966_v53 }
 0x2c2   :  { %4859 = vmatpush.bf16.msrb.mxu2 %v4494_v57  ;;  %v3758_v5 = vcvt.s32.f32 %v2734_v59  ;;  %v3766_v63 = vcvt.s32.f32 %v2742_v38  ;;  %v2990_v47 = vunpack.c.2.s8 %v1998_v40  ;;  %v2998_v22 = vunpack.c.3.s8 %v1998_v40  ;;  %v10243_v38 = vpop.f32.mrf.mxu2 }
 0x2c3   :  { %4872 = vmatpush.bf16.msrb.mxu3 %v4558_v60  ;;  %v4358_v0 = vpack.c.bf16 %v3638_v17, %v3630_v58  ;;  %v3886_v2 = vcvt.s32.f32 %v2862_v41  ;;  %v3894_v44 = vcvt.s32.f32 %v2870_v62  ;;  %v2590_v7 = vunpack.c.0.s8 %v1902_v30  ;;  %v10245_v60 = vpop.f32.mrf.mxu3 }
 0x2c4   :  { %v4422_v28 = vpack.c.bf16 %v3766_v63, %v3758_v5  ;;  %v4014_v21 = vcvt.s32.f32 %v2990_v47  ;;  %v4022_v8 = vcvt.s32.f32 %v2998_v22  ;;  %v2598_v61 = vunpack.c.1.s8 %v1902_v30  ;;  %v1926_v30 = vld [vmem:[#allocation2 + $0x550] sm:$0xff] }
 0x2c5   :  { %4834 = vmatpush.bf16.msrb.mxu0 %v4358_v0  ;;  %v4486_v10 = vpack.c.bf16 %v3894_v44, %v3886_v2  ;;  %v3614_v33 = vcvt.s32.f32 %v2590_v7  ;;  %v2718_v51 = vunpack.c.0.s8 %v1934_v32  ;;  %v2726_v12 = vunpack.c.1.s8 %v1934_v32  ;;  %v4583_v2 = vpop.f32.mrf.mxu0  ;;  %v4596_v44 = vpop.f32.mrf.mxu1 }
 0x2c6   :  { %4847 = vmatpush.bf16.msrb.mxu1 %v4422_v28  ;;  %v4550_v14 = vpack.c.bf16 %v4022_v8, %v4014_v21  ;;  %v3622_v48 = vcvt.s32.f32 %v2598_v61  ;;  %v2846_v16 = vunpack.c.0.s8 %v1966_v53  ;;  %v2854_v19 = vunpack.c.1.s8 %v1966_v53  ;;  %v1886_v61 = vld [vmem:[#allocation2 + $0x410] sm:$0xff]  ;;  %v10247_v44 = vld [vmem:[#allocation2 + $0xd8] sm:$0xff] }
 0x2c7   :  { %4860 = vmatpush.bf16.msrb.mxu2 %v4486_v10  ;;  %v3742_v18 = vcvt.s32.f32 %v2718_v51  ;;  %v3750_v24 = vcvt.s32.f32 %v2726_v12  ;;  %v2974_v25 = vunpack.c.0.s8 %v1998_v40  ;;  %v2982_v26 = vunpack.c.1.s8 %v1998_v40 }
 0x2c8   :  { %4873 = vmatpush.bf16.msrb.mxu3 %v4550_v14  ;;  %v4350_v31 = vpack.c.bf16 %v3622_v48, %v3614_v33  ;;  %v3870_v29 = vcvt.s32.f32 %v2846_v16  ;;  %v3878_v45 = vcvt.s32.f32 %v2854_v19  ;;  %v2574_v36 = vunpack.c.2.s8 %v1894_v13 }
 0x2c9   :  { %v4414_v39 = vpack.c.bf16 %v3750_v24, %v3742_v18  ;;  %v3998_v15 = vcvt.s32.f32 %v2974_v25  ;;  %v4006_v49 = vcvt.s32.f32 %v2982_v26  ;;  %v2582_v32 = vunpack.c.3.s8 %v1894_v13  ;;  %v1918_v18 = vld [vmem:[#allocation2 + $0x510] sm:$0xff] }
 0x2ca   :  { %4835 = vmatpush.bf16.msrb.mxu0 %v4350_v31  ;;  %v4478_v42 = vpack.c.bf16 %v3878_v45, %v3870_v29  ;;  %v3598_v50 = vcvt.s32.f32 %v2574_v36  ;;  %v2702_v4 = vunpack.c.2.s8 %v1926_v30  ;;  %v2710_v53 = vunpack.c.3.s8 %v1926_v30  ;;  %v1950_v31 = vld [vmem:[#allocation2 + $0x610] sm:$0xff] }
 0x2cb   :  { %4848 = vmatpush.bf16.msrb.mxu1 %v4414_v39  ;;  %v4542_v54 = vpack.c.bf16 %v4006_v49, %v3998_v15  ;;  %v3606_v55 = vcvt.s32.f32 %v2582_v32  ;;  %v2830_v34 = vunpack.c.2.s8 %v1958_v37  ;;  %v2838_v56 = vunpack.c.3.s8 %v1958_v37  ;;  %v1982_v39 = vld [vmem:[#allocation2 + $0x710] sm:$0xff] }
 0x2cc   :  { %4861 = vmatpush.bf16.msrb.mxu2 %v4478_v42  ;;  %v3726_v40 = vcvt.s32.f32 %v2702_v4  ;;  %v3734_v57 = vcvt.s32.f32 %v2710_v53  ;;  %v2958_v58 = vunpack.c.2.s8 %v1990_v52  ;;  %v2966_v59 = vunpack.c.3.s8 %v1990_v52  ;;  %v4609_v42 = vpop.f32.mrf.mxu2 }
 0x2cd   :  { %4874 = vmatpush.bf16.msrb.mxu3 %v4542_v54  ;;  %v4342_v17 = vpack.c.bf16 %v3606_v55, %v3598_v50  ;;  %v3854_v41 = vcvt.s32.f32 %v2830_v34  ;;  %v3862_v62 = vcvt.s32.f32 %v2838_v56  ;;  %v2558_v5 = vunpack.c.0.s8 %v1894_v13  ;;  %v4622_v50 = vpop.f32.mrf.mxu3 }
 0x2ce   :  { %v4406_v63 = vpack.c.bf16 %v3734_v57, %v3726_v40  ;;  %v3982_v47 = vcvt.s32.f32 %v2958_v58  ;;  %v3990_v22 = vcvt.s32.f32 %v2966_v59  ;;  %v2566_v0 = vunpack.c.1.s8 %v1894_v13 }
 0x2cf   :  { %4836 = vmatpush.bf16.msrb.mxu0 %v4342_v17  ;;  %v4470_v7 = vpack.c.bf16 %v3862_v62, %v3854_v41  ;;  %v3582_v28 = vcvt.s32.f32 %v2558_v5  ;;  %v2686_v21 = vunpack.c.0.s8 %v1926_v30  ;;  %v2694_v8 = vunpack.c.1.s8 %v1926_v30 }
 0x2d0   :  { %4849 = vmatpush.bf16.msrb.mxu1 %v4406_v63  ;;  %v4534_v10 = vpack.c.bf16 %v3990_v22, %v3982_v47  ;;  %v3590_v33 = vcvt.s32.f32 %v2566_v0  ;;  %v2814_v51 = vunpack.c.0.s8 %v1958_v37  ;;  %v2822_v12 = vunpack.c.1.s8 %v1958_v37 }
 0x2d1   :  { %4862 = vmatpush.bf16.msrb.mxu2 %v4470_v7  ;;  %v3710_v14 = vcvt.s32.f32 %v2686_v21  ;;  %v3718_v48 = vcvt.s32.f32 %v2694_v8  ;;  %v2942_v16 = vunpack.c.0.s8 %v1990_v52  ;;  %v2950_v19 = vunpack.c.1.s8 %v1990_v52 }
 0x2d2   :  { %4875 = vmatpush.bf16.msrb.mxu3 %v4534_v10  ;;  %v4334_v13 = vpack.c.bf16 %v3590_v33, %v3582_v28  ;;  %v3838_v24 = vcvt.s32.f32 %v2814_v51  ;;  %v3846_v25 = vcvt.s32.f32 %v2822_v12  ;;  %v2542_v26 = vunpack.c.2.s8 %v1886_v61 }
 0x2d3   :  { %v4398_v29 = vpack.c.bf16 %v3718_v48, %v3710_v14  ;;  %v3966_v30 = vcvt.s32.f32 %v2942_v16  ;;  %v3974_v45 = vcvt.s32.f32 %v2950_v19  ;;  %v2550_v36 = vunpack.c.3.s8 %v1886_v61  ;;  %v1815_v14 = vld [vmem:[#allocation2 + $0x1d8] sm:$0xff]  ;;  %v10249_v48 = vpop.f32.mrf.mxu0 }
 0x2d4   :  { %4837 = vmatpush.bf16.msrb.mxu0 %v4334_v13  ;;  %v4462_v15 = vpack.c.bf16 %v3846_v25, %v3838_v24  ;;  %v3566_v37 = vcvt.s32.f32 %v2542_v26  ;;  %v2670_v49 = vunpack.c.2.s8 %v1918_v18  ;;  %v2678_v32 = vunpack.c.3.s8 %v1918_v18  ;;  %v1847_v24 = vld [vmem:[#allocation2 + $0x2d8] sm:$0xff] }
 0x2d5   :  { %4850 = vmatpush.bf16.msrb.mxu1 %v4398_v29  ;;  %v4526_v52 = vpack.c.bf16 %v3974_v45, %v3966_v30  ;;  %v3574_v4 = vcvt.s32.f32 %v2550_v36  ;;  %v2798_v53 = vunpack.c.2.s8 %v1950_v31  ;;  %v2806_v54 = vunpack.c.3.s8 %v1950_v31  ;;  %v1879_v30 = vld [vmem:[#allocation2 + $0x3d8] sm:$0xff] }
 0x2d6   :  { %4863 = vmatpush.bf16.msrb.mxu2 %v4462_v15  ;;  %v3694_v55 = vcvt.s32.f32 %v2670_v49  ;;  %v3702_v34 = vcvt.s32.f32 %v2678_v32  ;;  %v2926_v56 = vunpack.c.2.s8 %v1982_v39  ;;  %v2934_v40 = vunpack.c.3.s8 %v1982_v39 }
 0x2d7   :  { %4876 = vmatpush.bf16.msrb.mxu3 %v4526_v52  ;;  %v4326_v57 = vpack.c.bf16 %v3574_v4, %v3566_v37  ;;  %v3822_v58 = vcvt.s32.f32 %v2798_v53  ;;  %v3830_v59 = vcvt.s32.f32 %v2806_v54  ;;  %v2526_v17 = vunpack.c.0.s8 %v1886_v61  ;;  %v10255_v54 = vpop.f32.mrf.mxu2 }
 0x2d8   :  { %v4390_v41 = vpack.c.bf16 %v3702_v34, %v3694_v55  ;;  %v3950_v62 = vcvt.s32.f32 %v2926_v56  ;;  %v3958_v5 = vcvt.s32.f32 %v2934_v40  ;;  %v2534_v63 = vunpack.c.1.s8 %v1886_v61  ;;  %v10251_v61 = vpop.f32.mrf.mxu1  ;;  %v10257_v55 = vpop.f32.mrf.mxu3 }
 0x2d9   :  { %4838 = vmatpush.bf16.msrb.mxu0 %v4326_v57  ;;  %v4454_v47 = vpack.c.bf16 %v3830_v59, %v3822_v58  ;;  %v3550_v22 = vcvt.s32.f32 %v2526_v17  ;;  %v2654_v0 = vunpack.c.0.s8 %v1918_v18  ;;  %v2662_v2 = vunpack.c.1.s8 %v1918_v18 }
 0x2da   :  { %4851 = vmatpush.bf16.msrb.mxu1 %v4390_v41  ;;  %v4518_v7 = vpack.c.bf16 %v3958_v5, %v3950_v62  ;;  %v3558_v28 = vcvt.s32.f32 %v2534_v63  ;;  %v2782_v21 = vunpack.c.0.s8 %v1950_v31  ;;  %v2790_v8 = vunpack.c.1.s8 %v1950_v31 }
 0x2db   :  { %4864 = vmatpush.bf16.msrb.mxu2 %v4454_v47  ;;  %v3678_v10 = vcvt.s32.f32 %v2654_v0  ;;  %v3686_v33 = vcvt.s32.f32 %v2662_v2  ;;  %v2910_v51 = vunpack.c.0.s8 %v1982_v39  ;;  %v2918_v12 = vunpack.c.1.s8 %v1982_v39 }
 0x2dc   :  { %4877 = vmatpush.bf16.msrb.mxu3 %v4518_v7  ;;  %v4318_v16 = vpack.c.bf16 %v3558_v28, %v3550_v22  ;;  %v3806_v19 = vcvt.s32.f32 %v2782_v21  ;;  %v3814_v18 = vcvt.s32.f32 %v2790_v8  ;;  %v2127_v13 = vunpack.c.2.s8 %v10247_v44  ;;  %v4635_v22 = vpop.f32.mrf.mxu0  ;;  %v1775_v28 = vld [vmem:[#allocation2 + $0x98] sm:$0xff] }
 0x2dd   :  { %v4382_v25 = vpack.c.bf16 %v3686_v33, %v3678_v10  ;;  %v3934_v26 = vcvt.s32.f32 %v2910_v51  ;;  %v3942_v31 = vcvt.s32.f32 %v2918_v12  ;;  %v2135_v29 = vunpack.c.3.s8 %v10247_v44 }
 0x2de   :  { %4839 = vmatpush.bf16.msrb.mxu0 %v4318_v16  ;;  %v4446_v45 = vpack.c.bf16 %v3814_v18, %v3806_v19  ;;  %v3151_v36 = vcvt.s32.f32 %v2127_v13  ;;  %v2255_v39 = vunpack.c.2.s8 %v1815_v14  ;;  %v2263_v15 = vunpack.c.3.s8 %v1815_v14  ;;  %v1807_v16 = vld [vmem:[#allocation2 + $0x198] sm:$0xff] }
 0x2df   :  { %4852 = vmatpush.bf16.msrb.mxu1 %v4382_v25  ;;  %v4510_v37 = vpack.c.bf16 %v3942_v31, %v3934_v26  ;;  %v3159_v49 = vcvt.s32.f32 %v2135_v29  ;;  %v2383_v32 = vunpack.c.2.s8 %v1847_v24  ;;  %v2391_v42 = vunpack.c.3.s8 %v1847_v24  ;;  %v1839_v19 = vld [vmem:[#allocation2 + $0x298] sm:$0xff] }
 0x2e0   :  { %4865 = vmatpush.bf16.msrb.mxu2 %v4446_v45  ;;  %v3279_v50 = vcvt.s32.f32 %v2255_v39  ;;  %v3287_v52 = vcvt.s32.f32 %v2263_v15  ;;  %v2511_v4 = vunpack.c.2.s8 %v1879_v30  ;;  %v2519_v53 = vunpack.c.3.s8 %v1879_v30  ;;  %v4648_v0 = vpop.f32.mrf.mxu1  ;;  %v1871_v26 = vld [vmem:[#allocation2 + $0x398] sm:$0xff]  ;;  %v4661_v39 = vpop.f32.mrf.mxu2 }
 0x2e1   :  { %4878 = vmatpush.bf16.msrb.mxu3 %v4510_v37  ;;  %v4119_v34 = vpack.c.bf16 %v3159_v49, %v3151_v36  ;;  %v3407_v56 = vcvt.s32.f32 %v2383_v32  ;;  %v3415_v40 = vcvt.s32.f32 %v2391_v42  ;;  %v4595_v57 = vadd.f32 %v10241_v23, %v10239_v20  ;;  %4840 = vmatmul.bf16.vlgmr.msrb.gmra.mxu0 %v10207_v9  ;;  %v4674_v15 = vpop.f32.mrf.mxu3  ;;  %v1767_v0 = vld [vmem:[#allocation2 + $0x58] sm:$0xff] }
 0x2e2   :  { %v4183_v58 = vpack.c.bf16 %v3287_v52, %v3279_v50  ;;  %v3535_v59 = vcvt.s32.f32 %v2511_v4  ;;  %v3543_v17 = vcvt.s32.f32 %v2519_v53  ;;  %v2111_v41 = vunpack.c.0.s8 %v10247_v44  ;;  %4853 = vmatmul.bf16.vlgmr.msrb.gmra.mxu1 %v10222_v35 }
 0x2e3   :  { %4884 = vmatpush.bf16.msra.mxu0 %v4119_v34  ;;  %v4247_v62 = vpack.c.bf16 %v3415_v40, %v3407_v56  ;;  %v2119_v5 = vunpack.c.1.s8 %v10247_v44  ;;  %v2239_v63 = vunpack.c.0.s8 %v1815_v14  ;;  %v2247_v47 = vunpack.c.1.s8 %v1815_v14  ;;  %4866 = vmatmul.bf16.vlgmr.msrb.gmra.mxu2 %v10203_v3 }
 0x2e4   :  { %4897 = vmatpush.bf16.msra.mxu1 %v4183_v58  ;;  %v4311_v20 = vpack.c.bf16 %v3543_v17, %v3535_v59  ;;  %v3135_v23 = vcvt.s32.f32 %v2111_v41  ;;  %v2367_v2 = vunpack.c.0.s8 %v1847_v24  ;;  %v2375_v7 = vunpack.c.1.s8 %v1847_v24  ;;  %4879 = vmatmul.bf16.vlgmr.msrb.gmra.mxu3 %v10214_v11 }
 0x2e5   :  { %4910 = vmatpush.bf16.msra.mxu2 %v4247_v62  ;;  %v3143_v21 = vcvt.s32.f32 %v2119_v5  ;;  %v3263_v8 = vcvt.s32.f32 %v2239_v63  ;;  %v3271_v10 = vcvt.s32.f32 %v2247_v47  ;;  %v2495_v33 = vunpack.c.0.s8 %v1879_v30 }
 0x2e6   :  { %4923 = vmatpush.bf16.msra.mxu3 %v4311_v20  ;;  %v3391_v44 = vcvt.s32.f32 %v2367_v2  ;;  %v3399_v51 = vcvt.s32.f32 %v2375_v7  ;;  %v2503_v12 = vunpack.c.1.s8 %v1879_v30  ;;  %v4608_v14 = vadd.f32 %v10243_v38, %v4595_v57 }
 0x2e7   :  { %v4111_v18 = vpack.c.bf16 %v3143_v21, %v3135_v23  ;;  %v4175_v13 = vpack.c.bf16 %v3271_v10, %v3263_v8  ;;  %v3519_v25 = vcvt.s32.f32 %v2495_v33  ;;  %v2095_v24 = vunpack.c.2.s8 %v1775_v28  ;;  %v1799_v21 = vld [vmem:[#allocation2 + $0x158] sm:$0xff] }
 0x2e8   :  { %v4239_v31 = vpack.c.bf16 %v3399_v51, %v3391_v44  ;;  %v3527_v29 = vcvt.s32.f32 %v2503_v12  ;;  %v10269_v45 = vadd.f32 %v10245_v60, %v4608_v14  ;;  %v2103_v36 = vunpack.c.3.s8 %v1775_v28 }
 0x2e9   :  { %4885 = vmatpush.bf16.msra.mxu0 %v4111_v18  ;;  %4898 = vmatpush.bf16.msra.mxu1 %v4175_v13  ;;  %v3119_v30 = vcvt.s32.f32 %v2095_v24  ;;  %v2223_v37 = vunpack.c.2.s8 %v1807_v16  ;;  %v2231_v38 = vunpack.c.3.s8 %v1807_v16  ;;  %v2351_v49 = vunpack.c.2.s8 %v1839_v19  ;;  %v1831_v18 = vld [vmem:[#allocation2 + $0x258] sm:$0xff] }
 0x2ea   :  { %4911 = vmatpush.bf16.msra.mxu2 %v4239_v31  ;;  %v4303_v32 = vpack.c.bf16 %v3527_v29, %v3519_v25  ;;  %v3127_v42 = vcvt.s32.f32 %v2103_v36  ;;  %v2359_v50 = vunpack.c.3.s8 %v1839_v19  ;;  %v2479_v52 = vunpack.c.2.s8 %v1871_v26  ;;  %v1863_v31 = vld [vmem:[#allocation2 + $0x358] sm:$0xff] }
 0x2eb   :  { %v3247_v4 = vcvt.s32.f32 %v2223_v37  ;;  %v3255_v53 = vcvt.s32.f32 %v2231_v38  ;;  %v3375_v34 = vcvt.s32.f32 %v2351_v49  ;;  %v2487_v56 = vunpack.c.3.s8 %v1871_v26 }
 0x2ec   :  { %4924 = vmatpush.bf16.msra.mxu3 %v4303_v32  ;;  %v4103_v60 = vpack.c.bf16 %v3127_v42, %v3119_v30  ;;  %v3383_v40 = vcvt.s32.f32 %v2359_v50  ;;  %v3503_v57 = vcvt.s32.f32 %v2479_v52  ;;  %v2079_v58 = vunpack.c.0.s8 %v1775_v28 }
 0x2ed   :  { %v4167_v59 = vpack.c.bf16 %v3255_v53, %v3247_v4  ;;  %v3511_v17 = vcvt.s32.f32 %v2487_v56  ;;  %v2087_v41 = vunpack.c.1.s8 %v1775_v28  ;;  %v2207_v62 = vunpack.c.0.s8 %v1807_v16 }
 0x2ee   :  { %4886 = vmatpush.bf16.msra.mxu0 %v4103_v60  ;;  %v4231_v5 = vpack.c.bf16 %v3383_v40, %v3375_v34  ;;  %v3103_v63 = vcvt.s32.f32 %v2079_v58  ;;  %v2215_v47 = vunpack.c.1.s8 %v1807_v16  ;;  %v2335_v22 = vunpack.c.0.s8 %v1839_v19 }
 0x2ef   :  { %4899 = vmatpush.bf16.msra.mxu1 %v4167_v59  ;;  %v4295_v20 = vpack.c.bf16 %v3511_v17, %v3503_v57  ;;  %v3111_v23 = vcvt.s32.f32 %v2087_v41  ;;  %v3231_v2 = vcvt.s32.f32 %v2207_v62  ;;  %v2343_v7 = vunpack.c.1.s8 %v1839_v19 }
 0x2f0   :  { %4912 = vmatpush.bf16.msra.mxu2 %v4231_v5  ;;  %v3239_v8 = vcvt.s32.f32 %v2215_v47  ;;  %v3359_v10 = vcvt.s32.f32 %v2335_v22  ;;  %v2463_v33 = vunpack.c.0.s8 %v1871_v26  ;;  %v2471_v44 = vunpack.c.1.s8 %v1871_v26 }
 0x2f1   :  { %4925 = vmatpush.bf16.msra.mxu3 %v4295_v20  ;;  %v4095_v28 = vpack.c.bf16 %v3111_v23, %v3103_v63  ;;  %v3367_v51 = vcvt.s32.f32 %v2343_v7  ;;  %v2063_v12 = vunpack.c.2.s8 %v1767_v0  ;;  %v2071_v14 = vunpack.c.3.s8 %v1767_v0  ;;  %v10279_v20 = vld [vmem:[#allocation17] sm:$0xff] }
 0x2f2   :  { %v4159_v16 = vpack.c.bf16 %v3239_v8, %v3231_v2  ;;  %v3487_v13 = vcvt.s32.f32 %v2463_v33  ;;  %v3495_v25 = vcvt.s32.f32 %v2471_v44  ;;  %v2191_v24 = vunpack.c.2.s8 %v1799_v21  ;;  %v1791_v8 = vld [vmem:[#allocation2 + $0x118] sm:$0xff] }
 0x2f3   :  { %4887 = vmatpush.bf16.msra.mxu0 %v4095_v28  ;;  %v4223_v29 = vpack.c.bf16 %v3367_v51, %v3359_v10  ;;  %v3087_v19 = vcvt.s32.f32 %v2063_v12  ;;  %v3095_v36 = vcvt.s32.f32 %v2071_v14  ;;  %v2199_v39 = vunpack.c.3.s8 %v1799_v21  ;;  %v1823_v51 = vld [vmem:[#allocation2 + $0x218] sm:$0xff] }
 0x2f4   :  { %4900 = vmatpush.bf16.msra.mxu1 %v4159_v16  ;;  %v4287_v15 = vpack.c.bf16 %v3495_v25, %v3487_v13  ;;  %v3215_v30 = vcvt.s32.f32 %v2191_v24  ;;  %v2319_v26 = vunpack.c.2.s8 %v1831_v18  ;;  %v2327_v37 = vunpack.c.3.s8 %v1831_v18  ;;  %v1855_v13 = vld [vmem:[#allocation2 + $0x318] sm:$0xff] }
 0x2f5   :  { %4913 = vmatpush.bf16.msra.mxu2 %v4223_v29  ;;  %v4087_v38 = vpack.c.bf16 %v3095_v36, %v3087_v19  ;;  %v3223_v49 = vcvt.s32.f32 %v2199_v39  ;;  %v2447_v32 = vunpack.c.2.s8 %v1863_v31  ;;  %v2455_v42 = vunpack.c.3.s8 %v1863_v31 }
 0x2f6   :  { %4926 = vmatpush.bf16.msra.mxu3 %v4287_v15  ;;  %v3343_v50 = vcvt.s32.f32 %v2319_v26  ;;  %v3351_v52 = vcvt.s32.f32 %v2327_v37  ;;  %v4634_v4 = vadd.f32 %v10249_v48, %v10269_v45  ;;  %v2047_v53 = vunpack.c.0.s8 %v1767_v0  ;;  %v10277_v48 = vld [vmem:[%s10751_s8] sm:$0xff] }
 0x2f7   :  { %4888 = vmatpush.bf16.msra.mxu0 %v4087_v38  ;;  %v4151_v34 = vpack.c.bf16 %v3223_v49, %v3215_v30  ;;  %v3471_v56 = vcvt.s32.f32 %v2447_v32  ;;  %v3479_v60 = vcvt.s32.f32 %v2455_v42  ;;  %v2055_v40 = vunpack.c.1.s8 %v1767_v0 }
 0x2f8   :  { %v4215_v57 = vpack.c.bf16 %v3351_v52, %v3343_v50  ;;  %v4647_v58 = vadd.f32 %v10251_v61, %v4634_v4  ;;  %v3071_v59 = vcvt.s32.f32 %v2047_v53  ;;  %v2175_v17 = vunpack.c.0.s8 %v1799_v21  ;;  %v1759_v61 = vld [vmem:[#allocation2 + $0x18] sm:$0xff] }
 0x2f9   :  { %4901 = vmatpush.bf16.msra.mxu1 %v4151_v34  ;;  %v4279_v41 = vpack.c.bf16 %v3479_v60, %v3471_v56  ;;  %v3079_v62 = vcvt.s32.f32 %v2055_v40  ;;  %v2183_v5 = vunpack.c.1.s8 %v1799_v21  ;;  %v2303_v63 = vunpack.c.0.s8 %v1831_v18 }
 0x2fa   :  { %4914 = vmatpush.bf16.msra.mxu2 %v4215_v57  ;;  %v3199_v45 = vcvt.s32.f32 %v2175_v17  ;;  %v2311_v47 = vunpack.c.1.s8 %v1831_v18  ;;  %v2431_v22 = vunpack.c.0.s8 %v1863_v31  ;;  %v2439_v0 = vunpack.c.1.s8 %v1863_v31  ;;  %v1911_v17 = vld [vmem:[#allocation2 + $0x4d8] sm:$0xff] }
 0x2fb   :  { %4927 = vmatpush.bf16.msra.mxu3 %v4279_v41  ;;  %v4079_v23 = vpack.c.bf16 %v3079_v62, %v3071_v59  ;;  %v3207_v2 = vcvt.s32.f32 %v2183_v5  ;;  %v3327_v7 = vcvt.s32.f32 %v2303_v63  ;;  %v4660_v21 = vadd.f32 %v10255_v54, %v4647_v58 }
 0x2fc   :  { %v3335_v10 = vcvt.s32.f32 %v2311_v47  ;;  %v3455_v33 = vcvt.s32.f32 %v2431_v22  ;;  %v3463_v44 = vcvt.s32.f32 %v2439_v0  ;;  %v5406_v28 = vperm.slane %v10277_v48, 0 }
 0x2fd   :  { %4889 = vmatpush.bf16.msra.mxu0 %v4079_v23  ;;  %v4143_v12 = vpack.c.bf16 %v3207_v2, %v3199_v45  ;;  %v4673_v14 = vadd.f32 %v10257_v55, %v4660_v21  ;;  %v5432_v18 = vperm.slane %v10279_v20, 0  ;;  %v2031_v16 = vunpack.c.2.s8 %v1759_v61  ;;  %v1943_v45 = vld [vmem:[#allocation2 + $0x5d8] sm:$0xff] }
 0x2fe   :  { %v4207_v25 = vpack.c.bf16 %v3335_v10, %v3327_v7  ;;  %v4271_v24 = vpack.c.bf16 %v3463_v44, %v3455_v33  ;;  %v2039_v31 = vunpack.c.3.s8 %v1759_v61  ;;  %v2159_v29 = vunpack.c.2.s8 %v1791_v8  ;;  %v1975_v10 = vld [vmem:[#allocation2 + $0x6d8] sm:$0xff] }
 0x2ff   :  { %4902 = vmatpush.bf16.msra.mxu1 %v4143_v12  ;;  %v5422_v54 = vmul.f32 %v5406_v28, %v4673_v14  ;;  %v3055_v19 = vcvt.s32.f32 %v2031_v16  ;;  %v2167_v36 = vunpack.c.3.s8 %v1791_v8  ;;  %v2287_v39 = vunpack.c.2.s8 %v1823_v51  ;;  %v2007_v12 = vld [vmem:[#allocation2 + $0x7d8] sm:$0xff] }
 0x300   :  { %4915 = vmatpush.bf16.msra.mxu2 %v4207_v25  ;;  %4928 = vmatpush.bf16.msra.mxu3 %v4271_v24  ;;  %v3063_v15 = vcvt.s32.f32 %v2039_v31  ;;  %v3183_v30 = vcvt.s32.f32 %v2159_v29  ;;  %v2295_v26 = vunpack.c.3.s8 %v1823_v51  ;;  %v2415_v37 = vunpack.c.2.s8 %v1855_v13 }
 0x301   :  { %v10285_v55 = vadd.f32 %v5432_v18, %v5422_v54  ;;  %v3191_v38 = vcvt.s32.f32 %v2167_v36  ;;  %v3311_v49 = vcvt.s32.f32 %v2287_v39  ;;  %v2423_v32 = vunpack.c.3.s8 %v1855_v13 }
 0x302   :  { %v4071_v42 = vpack.c.bf16 %v3063_v15, %v3055_v19  ;;  %v3319_v50 = vcvt.s32.f32 %v2295_v26  ;;  %v3439_v52 = vcvt.s32.f32 %v2415_v37  ;;  %v2015_v4 = vunpack.c.0.s8 %v1759_v61 }
 0x303   :  { %v4135_v53 = vpack.c.bf16 %v3191_v38, %v3183_v30  ;;  %v3447_v34 = vcvt.s32.f32 %v2423_v32  ;;  %v2023_v56 = vunpack.c.1.s8 %v1759_v61  ;;  %v2143_v60 = vunpack.c.0.s8 %v1791_v8 }
 0x304   :  { %4890 = vmatpush.bf16.msra.mxu0 %v4071_v42  ;;  %v4199_v40 = vpack.c.bf16 %v3319_v50, %v3311_v49  ;;  %v3039_v57 = vcvt.s32.f32 %v2015_v4  ;;  %v2151_v58 = vunpack.c.1.s8 %v1791_v8  ;;  %v2271_v59 = vunpack.c.0.s8 %v1823_v51 }
 0x305   :  { %4903 = vmatpush.bf16.msra.mxu1 %v4135_v53  ;;  %v4263_v41 = vpack.c.bf16 %v3447_v34, %v3439_v52  ;;  %v3047_v62 = vcvt.s32.f32 %v2023_v56  ;;  %v3167_v5 = vcvt.s32.f32 %v2143_v60  ;;  %v2279_v63 = vunpack.c.1.s8 %v1823_v51  ;;  %v1903_v53 = vld [vmem:[#allocation2 + $0x498] sm:$0xff] }
 0x306   :  { %4916 = vmatpush.bf16.msra.mxu2 %v4199_v40  ;;  %v3175_v47 = vcvt.s32.f32 %v2151_v58  ;;  %v3295_v22 = vcvt.s32.f32 %v2271_v59  ;;  %v2399_v0 = vunpack.c.0.s8 %v1855_v13  ;;  %v2407_v23 = vunpack.c.1.s8 %v1855_v13 }
 0x307   :  { %4929 = vmatpush.bf16.msra.mxu3 %v4263_v41  ;;  %v4063_v61 = vpack.c.bf16 %v3047_v62, %v3039_v57  ;;  %v3303_v2 = vcvt.s32.f32 %v2279_v63  ;;  %v2639_v7 = vunpack.c.2.s8 %v1911_v17  ;;  %v2647_v21 = vunpack.c.3.s8 %v1911_v17  ;;  %v1935_v57 = vld [vmem:[#allocation2 + $0x598] sm:$0xff] }
 0x308   :  { %v4127_v8 = vpack.c.bf16 %v3175_v47, %v3167_v5  ;;  %v3423_v33 = vcvt.s32.f32 %v2399_v0  ;;  %v3431_v44 = vcvt.s32.f32 %v2407_v23  ;;  %v2767_v28 = vunpack.c.2.s8 %v1943_v45  ;;  %v1967_v47 = vld [vmem:[#allocation2 + $0x698] sm:$0xff] }
 0x309   :  { %4891 = vmatpush.bf16.msra.mxu0 %v4063_v61  ;;  %v4191_v14 = vpack.c.bf16 %v3303_v2, %v3295_v22  ;;  %v3663_v51 = vcvt.s32.f32 %v2639_v7  ;;  %v3671_v18 = vcvt.s32.f32 %v2647_v21  ;;  %v2775_v16 = vunpack.c.3.s8 %v1943_v45  ;;  %v1999_v2 = vld [vmem:[#allocation2 + $0x798] sm:$0xff] }
 0x30a   :  { %4904 = vmatpush.bf16.msra.mxu1 %v4127_v8  ;;  %v4255_v25 = vpack.c.bf16 %v3431_v44, %v3423_v33  ;;  %v3791_v24 = vcvt.s32.f32 %v2767_v28  ;;  %v2895_v13 = vunpack.c.2.s8 %v1975_v10  ;;  %v2903_v31 = vunpack.c.3.s8 %v1975_v10 }
 0x30b   :  { %4917 = vmatpush.bf16.msra.mxu2 %v4191_v14  ;;  %v4375_v29 = vpack.c.bf16 %v3671_v18, %v3663_v51  ;;  %v3799_v54 = vcvt.s32.f32 %v2775_v16  ;;  %v3023_v19 = vunpack.c.2.s8 %v2007_v12  ;;  %v3031_v36 = vunpack.c.3.s8 %v2007_v12 }
 0x30c   :  { %4930 = vmatpush.bf16.msra.mxu3 %v4255_v25  ;;  %v3919_v39 = vcvt.s32.f32 %v2895_v13  ;;  %v3927_v15 = vcvt.s32.f32 %v2903_v31  ;;  %v2623_v30 = vunpack.c.0.s8 %v1911_v17  ;;  %v2631_v26 = vunpack.c.1.s8 %v1911_v17  ;;  %4892 = vmatmul.bf16.vlgmr.msra.gmra.mxu0 %v10188_v27 }
 0x30d   :  { %4936 = vmatpush.bf16.msrb.mxu0 %v4375_v29  ;;  %v4439_v37 = vpack.c.bf16 %v3799_v54, %v3791_v24  ;;  %v4047_v38 = vcvt.s32.f32 %v3023_v19  ;;  %v4055_v49 = vcvt.s32.f32 %v3031_v36  ;;  %v2751_v32 = vunpack.c.0.s8 %v1943_v45  ;;  %4905 = vmatmul.bf16.vlgmr.msra.gmra.mxu1 %v10197_v43 }
 0x30e   :  { %v4503_v42 = vpack.c.bf16 %v3927_v15, %v3919_v39  ;;  %v3647_v50 = vcvt.s32.f32 %v2623_v30  ;;  %v3655_v52 = vcvt.s32.f32 %v2631_v26  ;;  %v2759_v4 = vunpack.c.1.s8 %v1943_v45  ;;  %4918 = vmatmul.bf16.vlgmr.msra.gmra.mxu2 %v10183_v6 }
 0x30f   :  { %4949 = vmatpush.bf16.msrb.mxu1 %v4439_v37  ;;  %v4567_v34 = vpack.c.bf16 %v4055_v49, %v4047_v38  ;;  %v3775_v56 = vcvt.s32.f32 %v2751_v32  ;;  %v2879_v60 = vunpack.c.0.s8 %v1975_v10  ;;  %v2887_v40 = vunpack.c.1.s8 %v1975_v10  ;;  %4931 = vmatmul.bf16.vlgmr.msra.gmra.mxu3 %v10192_v1  ;;  %v1895_v37 = vld [vmem:[#allocation2 + $0x458] sm:$0xff] }
 0x310   :  { %4962 = vmatpush.bf16.msrb.mxu2 %v4503_v42  ;;  %v4367_v58 = vpack.c.bf16 %v3655_v52, %v3647_v50  ;;  %v3783_v59 = vcvt.s32.f32 %v2759_v4  ;;  %v3007_v17 = vunpack.c.0.s8 %v2007_v12  ;;  %v3015_v41 = vunpack.c.1.s8 %v2007_v12  ;;  %v1927_v50 = vld [vmem:[#allocation2 + $0x558] sm:$0xff]  ;;  %v10291_v52 = vpop.f32.mrf.mxu0  ;;  %v10293_v4 = vpop.f32.mrf.mxu1 }
 0x311   :  { %4975 = vmatpush.bf16.msrb.mxu3 %v4567_v34  ;;  %v3903_v62 = vcvt.s32.f32 %v2879_v60  ;;  %v3911_v5 = vcvt.s32.f32 %v2887_v40  ;;  %v2607_v63 = vunpack.c.2.s8 %v1903_v53  ;;  %v2615_v45 = vunpack.c.3.s8 %v1903_v53 }
 0x312   :  { %4937 = vmatpush.bf16.msrb.mxu0 %v4367_v58  ;;  %v4431_v22 = vpack.c.bf16 %v3783_v59, %v3775_v56  ;;  %v4031_v0 = vcvt.s32.f32 %v3007_v17  ;;  %v4039_v23 = vcvt.s32.f32 %v3015_v41  ;;  %v2735_v61 = vunpack.c.2.s8 %v1935_v57  ;;  %v1959_v17 = vld [vmem:[#allocation2 + $0x658] sm:$0xff] }
 0x313   :  { %v4495_v7 = vpack.c.bf16 %v3911_v5, %v3903_v62  ;;  %v3631_v21 = vcvt.s32.f32 %v2607_v63  ;;  %v3639_v10 = vcvt.s32.f32 %v2615_v45  ;;  %v2743_v8 = vunpack.c.3.s8 %v1935_v57  ;;  %v1991_v45 = vld [vmem:[#allocation2 + $0x758] sm:$0xff] }
 0x314   :  { %4950 = vmatpush.bf16.msrb.mxu1 %v4431_v22  ;;  %v4559_v33 = vpack.c.bf16 %v4039_v23, %v4031_v0  ;;  %v3759_v44 = vcvt.s32.f32 %v2735_v61  ;;  %v2863_v28 = vunpack.c.2.s8 %v1967_v47  ;;  %v2871_v12 = vunpack.c.3.s8 %v1967_v47 }
 0x315   :  { %4963 = vmatpush.bf16.msrb.mxu2 %v4495_v7  ;;  %v4359_v14 = vpack.c.bf16 %v3639_v10, %v3631_v21  ;;  %v3767_v51 = vcvt.s32.f32 %v2743_v8  ;;  %v2991_v18 = vunpack.c.2.s8 %v1999_v2  ;;  %v2999_v16 = vunpack.c.3.s8 %v1999_v2  ;;  %v10295_v10 = vpop.f32.mrf.mxu2  ;;  %v10297_v8 = vpop.f32.mrf.mxu3 }
 0x316   :  { %4976 = vmatpush.bf16.msrb.mxu3 %v4559_v33  ;;  %v3887_v25 = vcvt.s32.f32 %v2863_v28  ;;  %v3895_v24 = vcvt.s32.f32 %v2871_v12  ;;  %v2591_v13 = vunpack.c.0.s8 %v1903_v53  ;;  %v2599_v31 = vunpack.c.1.s8 %v1903_v53 }
 0x317   :  { %4938 = vmatpush.bf16.msrb.mxu0 %v4359_v14  ;;  %v4423_v29 = vpack.c.bf16 %v3767_v51, %v3759_v44  ;;  %v4015_v54 = vcvt.s32.f32 %v2991_v18  ;;  %v4023_v19 = vcvt.s32.f32 %v2999_v16  ;;  %v2719_v36 = vunpack.c.0.s8 %v1935_v57 }
 0x318   :  { %v4487_v39 = vpack.c.bf16 %v3895_v24, %v3887_v25  ;;  %v3615_v15 = vcvt.s32.f32 %v2591_v13  ;;  %v3623_v30 = vcvt.s32.f32 %v2599_v31  ;;  %v2727_v26 = vunpack.c.1.s8 %v1935_v57 }
 0x319   :  { %4951 = vmatpush.bf16.msrb.mxu1 %v4423_v29  ;;  %v4551_v38 = vpack.c.bf16 %v4023_v19, %v4015_v54  ;;  %v3743_v49 = vcvt.s32.f32 %v2719_v36  ;;  %v2847_v32 = vunpack.c.0.s8 %v1967_v47  ;;  %v2855_v42 = vunpack.c.1.s8 %v1967_v47  ;;  %v4687_v29 = vpop.f32.mrf.mxu0  ;;  %v4700_v54 = vpop.f32.mrf.mxu1 }
 0x31a   :  { %4964 = vmatpush.bf16.msrb.mxu2 %v4487_v39  ;;  %v4351_v53 = vpack.c.bf16 %v3623_v30, %v3615_v15  ;;  %v3751_v34 = vcvt.s32.f32 %v2727_v26  ;;  %v2975_v56 = vunpack.c.0.s8 %v1999_v2  ;;  %v2983_v60 = vunpack.c.1.s8 %v1999_v2  ;;  %v1887_v30 = vld [vmem:[#allocation2 + $0x418] sm:$0xff] }
 0x31b   :  { %4977 = vmatpush.bf16.msrb.mxu3 %v4551_v38  ;;  %v3871_v40 = vcvt.s32.f32 %v2847_v32  ;;  %v3879_v58 = vcvt.s32.f32 %v2855_v42  ;;  %v2575_v57 = vunpack.c.2.s8 %v1895_v37  ;;  %v2583_v59 = vunpack.c.3.s8 %v1895_v37  ;;  %v1919_v42 = vld [vmem:[#allocation2 + $0x518] sm:$0xff] }
 0x31c   :  { %4939 = vmatpush.bf16.msrb.mxu0 %v4351_v53  ;;  %v4415_v41 = vpack.c.bf16 %v3751_v34, %v3743_v49  ;;  %v3999_v62 = vcvt.s32.f32 %v2975_v56  ;;  %v4007_v5 = vcvt.s32.f32 %v2983_v60  ;;  %v2703_v63 = vunpack.c.2.s8 %v1927_v50 }
 0x31d   :  { %v4479_v47 = vpack.c.bf16 %v3879_v58, %v3871_v40  ;;  %v3599_v22 = vcvt.s32.f32 %v2575_v57  ;;  %v3607_v0 = vcvt.s32.f32 %v2583_v59  ;;  %v2711_v23 = vunpack.c.3.s8 %v1927_v50  ;;  %v1951_v59 = vld [vmem:[#allocation2 + $0x618] sm:$0xff] }
 0x31e   :  { %4952 = vmatpush.bf16.msrb.mxu1 %v4415_v41  ;;  %v4543_v61 = vpack.c.bf16 %v4007_v5, %v3999_v62  ;;  %v3727_v7 = vcvt.s32.f32 %v2703_v63  ;;  %v2831_v2 = vunpack.c.2.s8 %v1959_v17  ;;  %v2839_v21 = vunpack.c.3.s8 %v1959_v17  ;;  %v1983_v63 = vld [vmem:[#allocation2 + $0x718] sm:$0xff] }
 0x31f   :  { %4965 = vmatpush.bf16.msrb.mxu2 %v4479_v47  ;;  %v4343_v33 = vpack.c.bf16 %v3607_v0, %v3599_v22  ;;  %v3735_v44 = vcvt.s32.f32 %v2711_v23  ;;  %v2959_v28 = vunpack.c.2.s8 %v1991_v45  ;;  %v2967_v12 = vunpack.c.3.s8 %v1991_v45  ;;  %v4713_v47 = vpop.f32.mrf.mxu2 }
 0x320   :  { %4978 = vmatpush.bf16.msrb.mxu3 %v4543_v61  ;;  %v3855_v14 = vcvt.s32.f32 %v2831_v2  ;;  %v3863_v51 = vcvt.s32.f32 %v2839_v21  ;;  %v2559_v18 = vunpack.c.0.s8 %v1895_v37  ;;  %v2567_v16 = vunpack.c.1.s8 %v1895_v37  ;;  %v1880_v47 = vld [vmem:[#allocation2 + $0x3e0] sm:$0xff] }
 0x321   :  { %4940 = vmatpush.bf16.msrb.mxu0 %v4343_v33  ;;  %v4407_v25 = vpack.c.bf16 %v3735_v44, %v3727_v7  ;;  %v3983_v24 = vcvt.s32.f32 %v2959_v28  ;;  %v3991_v13 = vcvt.s32.f32 %v2967_v12  ;;  %v2687_v31 = vunpack.c.0.s8 %v1927_v50 }
 0x322   :  { %v4471_v19 = vpack.c.bf16 %v3863_v51, %v3855_v14  ;;  %v3583_v36 = vcvt.s32.f32 %v2559_v18  ;;  %v3591_v39 = vcvt.s32.f32 %v2567_v16  ;;  %v2695_v15 = vunpack.c.1.s8 %v1927_v50 }
 0x323   :  { %4953 = vmatpush.bf16.msrb.mxu1 %v4407_v25  ;;  %v4535_v26 = vpack.c.bf16 %v3991_v13, %v3983_v24  ;;  %v3711_v38 = vcvt.s32.f32 %v2687_v31  ;;  %v2815_v49 = vunpack.c.0.s8 %v1959_v17  ;;  %v2823_v32 = vunpack.c.1.s8 %v1959_v17  ;;  %v4726_v17 = vpop.f32.mrf.mxu3 }
 0x324   :  { %4966 = vmatpush.bf16.msrb.mxu2 %v4471_v19  ;;  %v4335_v37 = vpack.c.bf16 %v3591_v39, %v3583_v36  ;;  %v3719_v53 = vcvt.s32.f32 %v2695_v15  ;;  %v2943_v34 = vunpack.c.0.s8 %v1991_v45  ;;  %v2951_v56 = vunpack.c.1.s8 %v1991_v45  ;;  %v10299_v39 = vld [vmem:[#allocation2 + $0xe0] sm:$0xff] }
 0x325   :  { %4979 = vmatpush.bf16.msrb.mxu3 %v4535_v26  ;;  %v3839_v60 = vcvt.s32.f32 %v2815_v49  ;;  %v3847_v40 = vcvt.s32.f32 %v2823_v32  ;;  %v2543_v58 = vunpack.c.2.s8 %v1887_v30  ;;  %v2551_v57 = vunpack.c.3.s8 %v1887_v30  ;;  %v10301_v32 = vld [vmem:[#allocation2 + $0x1e0] sm:$0xff] }
 0x326   :  { %4941 = vmatpush.bf16.msrb.mxu0 %v4335_v37  ;;  %v4399_v50 = vpack.c.bf16 %v3719_v53, %v3711_v38  ;;  %v3967_v41 = vcvt.s32.f32 %v2943_v34  ;;  %v3975_v62 = vcvt.s32.f32 %v2951_v56  ;;  %v2671_v5 = vunpack.c.2.s8 %v1919_v42  ;;  %v10303_v56 = vpop.f32.mrf.mxu0 }
 0x327   :  { %v4463_v22 = vpack.c.bf16 %v3847_v40, %v3839_v60  ;;  %v3567_v0 = vcvt.s32.f32 %v2543_v58  ;;  %v3575_v23 = vcvt.s32.f32 %v2551_v57  ;;  %v2679_v61 = vunpack.c.3.s8 %v1919_v42  ;;  %v10305_v60 = vpop.f32.mrf.mxu1 }
 0x328   :  { %4954 = vmatpush.bf16.msrb.mxu1 %v4399_v50  ;;  %v4527_v45 = vpack.c.bf16 %v3975_v62, %v3967_v41  ;;  %v3695_v7 = vcvt.s32.f32 %v2671_v5  ;;  %v2799_v2 = vunpack.c.2.s8 %v1951_v59  ;;  %v2807_v21 = vunpack.c.3.s8 %v1951_v59  ;;  %v1848_v50 = vld [vmem:[#allocation2 + $0x2e0] sm:$0xff] }
 0x329   :  { %4967 = vmatpush.bf16.msrb.mxu2 %v4463_v22  ;;  %v4327_v33 = vpack.c.bf16 %v3575_v23, %v3567_v0  ;;  %v3703_v44 = vcvt.s32.f32 %v2679_v61  ;;  %v2927_v28 = vunpack.c.2.s8 %v1983_v63  ;;  %v2935_v12 = vunpack.c.3.s8 %v1983_v63 }
 0x32a   :  { %4980 = vmatpush.bf16.msrb.mxu3 %v4527_v45  ;;  %v3823_v14 = vcvt.s32.f32 %v2799_v2  ;;  %v3831_v51 = vcvt.s32.f32 %v2807_v21  ;;  %v2527_v18 = vunpack.c.0.s8 %v1887_v30  ;;  %v2535_v16 = vunpack.c.1.s8 %v1887_v30 }
 0x32b   :  { %4942 = vmatpush.bf16.msrb.mxu0 %v4327_v33  ;;  %v4391_v25 = vpack.c.bf16 %v3703_v44, %v3695_v7  ;;  %v3951_v24 = vcvt.s32.f32 %v2927_v28  ;;  %v3959_v13 = vcvt.s32.f32 %v2935_v12  ;;  %v2655_v31 = vunpack.c.0.s8 %v1919_v42  ;;  %v10312_v28 = vpop.f32.mrf.mxu2  ;;  %v10314_v12 = vpop.f32.mrf.mxu3 }
 0x32c   :  { %v4455_v29 = vpack.c.bf16 %v3831_v51, %v3823_v14  ;;  %v3551_v54 = vcvt.s32.f32 %v2527_v18  ;;  %v3559_v19 = vcvt.s32.f32 %v2535_v16  ;;  %v2663_v36 = vunpack.c.1.s8 %v1919_v42 }
 0x32d   :  { %4955 = vmatpush.bf16.msrb.mxu1 %v4391_v25  ;;  %v4519_v15 = vpack.c.bf16 %v3959_v13, %v3951_v24  ;;  %v3679_v26 = vcvt.s32.f32 %v2655_v31  ;;  %v2783_v38 = vunpack.c.0.s8 %v1951_v59  ;;  %v2791_v49 = vunpack.c.1.s8 %v1951_v59 }
 0x32e   :  { %4968 = vmatpush.bf16.msrb.mxu2 %v4455_v29  ;;  %v4319_v30 = vpack.c.bf16 %v3559_v19, %v3551_v54  ;;  %v3687_v37 = vcvt.s32.f32 %v2663_v36  ;;  %v2911_v53 = vunpack.c.0.s8 %v1983_v63  ;;  %v2919_v34 = vunpack.c.1.s8 %v1983_v63 }
 0x32f   :  { %4981 = vmatpush.bf16.msrb.mxu3 %v4519_v15  ;;  %v3807_v42 = vcvt.s32.f32 %v2783_v38  ;;  %v3815_v40 = vcvt.s32.f32 %v2791_v49  ;;  %v2128_v58 = vunpack.c.2.s8 %v10299_v39  ;;  %v2136_v57 = vunpack.c.3.s8 %v10299_v39  ;;  %v4739_v15 = vpop.f32.mrf.mxu0 }
 0x330   :  { %4943 = vmatpush.bf16.msrb.mxu0 %v4319_v30  ;;  %v4383_v59 = vpack.c.bf16 %v3687_v37, %v3679_v26  ;;  %v3935_v41 = vcvt.s32.f32 %v2911_v53  ;;  %v3943_v62 = vcvt.s32.f32 %v2919_v34  ;;  %v2256_v5 = vunpack.c.2.s8 %v10301_v32 }
 0x331   :  { %v4447_v63 = vpack.c.bf16 %v3815_v40, %v3807_v42  ;;  %v3152_v17 = vcvt.s32.f32 %v2128_v58  ;;  %v3160_v22 = vcvt.s32.f32 %v2136_v57  ;;  %v2264_v0 = vunpack.c.3.s8 %v10301_v32  ;;  %v1808_v42 = vld [vmem:[#allocation2 + $0x1a0] sm:$0xff] }
 0x332   :  { %4956 = vmatpush.bf16.msrb.mxu1 %v4383_v59  ;;  %v4511_v23 = vpack.c.bf16 %v3943_v62, %v3935_v41  ;;  %v3280_v61 = vcvt.s32.f32 %v2256_v5  ;;  %v2384_v45 = vunpack.c.2.s8 %v1848_v50  ;;  %v2392_v7 = vunpack.c.3.s8 %v1848_v50  ;;  %v1840_v59 = vld [vmem:[#allocation2 + $0x2a0] sm:$0xff] }
 0x333   :  { %4969 = vmatpush.bf16.msrb.mxu2 %v4447_v63  ;;  %v4120_v2 = vpack.c.bf16 %v3160_v22, %v3152_v17  ;;  %v3288_v21 = vcvt.s32.f32 %v2264_v0  ;;  %v2512_v33 = vunpack.c.2.s8 %v1880_v47  ;;  %v2520_v44 = vunpack.c.3.s8 %v1880_v47  ;;  %4944 = vmatmul.bf16.vlgmr.msrb.gmra.mxu0 %v10207_v9  ;;  %v1872_v63 = vld [vmem:[#allocation2 + $0x3a0] sm:$0xff] }
 0x334   :  { %4982 = vmatpush.bf16.msrb.mxu3 %v4511_v23  ;;  %v3408_v14 = vcvt.s32.f32 %v2384_v45  ;;  %v3416_v51 = vcvt.s32.f32 %v2392_v7  ;;  %v4699_v18 = vadd.f32 %v10293_v4, %v10291_v52  ;;  %v2112_v16 = vunpack.c.0.s8 %v10299_v39  ;;  %v4752_v52 = vpop.f32.mrf.mxu1  ;;  %v4765_v23 = vpop.f32.mrf.mxu2 }
 0x335   :  { %4988 = vmatpush.bf16.msra.mxu0 %v4120_v2  ;;  %v4184_v25 = vpack.c.bf16 %v3288_v21, %v3280_v61  ;;  %v3536_v24 = vcvt.s32.f32 %v2512_v33  ;;  %v3544_v13 = vcvt.s32.f32 %v2520_v44  ;;  %v2120_v31 = vunpack.c.1.s8 %v10299_v39  ;;  %4957 = vmatmul.bf16.vlgmr.msrb.gmra.mxu1 %v10222_v35  ;;  %v1776_v39 = vld [vmem:[#allocation2 + $0xa0] sm:$0xff]  ;;  %v4778_v61 = vpop.f32.mrf.mxu3 }
 0x336   :  { %v4248_v29 = vpack.c.bf16 %v3416_v51, %v3408_v14  ;;  %v3136_v54 = vcvt.s32.f32 %v2112_v16  ;;  %v2240_v19 = vunpack.c.0.s8 %v10301_v32  ;;  %v2248_v36 = vunpack.c.1.s8 %v10301_v32  ;;  %4970 = vmatmul.bf16.vlgmr.msrb.gmra.mxu2 %v10203_v3  ;;  %v1864_v23 = vld [vmem:[#allocation2 + $0x360] sm:$0xff] }
 0x337   :  { %5001 = vmatpush.bf16.msra.mxu1 %v4184_v25  ;;  %v4312_v4 = vpack.c.bf16 %v3544_v13, %v3536_v24  ;;  %v3144_v26 = vcvt.s32.f32 %v2120_v31  ;;  %v2368_v38 = vunpack.c.0.s8 %v1848_v50  ;;  %v2376_v49 = vunpack.c.1.s8 %v1848_v50  ;;  %4983 = vmatmul.bf16.vlgmr.msrb.gmra.mxu3 %v10214_v11 }
 0x338   :  { %5014 = vmatpush.bf16.msra.mxu2 %v4248_v29  ;;  %v3264_v30 = vcvt.s32.f32 %v2240_v19  ;;  %v3272_v37 = vcvt.s32.f32 %v2248_v36  ;;  %v2496_v53 = vunpack.c.0.s8 %v1880_v47  ;;  %v2504_v34 = vunpack.c.1.s8 %v1880_v47 }
 0x339   :  { %5027 = vmatpush.bf16.msra.mxu3 %v4312_v4  ;;  %v4112_v32 = vpack.c.bf16 %v3144_v26, %v3136_v54  ;;  %v3392_v40 = vcvt.s32.f32 %v2368_v38  ;;  %v3400_v58 = vcvt.s32.f32 %v2376_v49  ;;  %v4712_v57 = vadd.f32 %v10295_v10, %v4699_v18  ;;  %v1768_v38 = vld [vmem:[#allocation2 + $0x60] sm:$0xff] }
 0x33a   :  { %v4176_v41 = vpack.c.bf16 %v3272_v37, %v3264_v30  ;;  %v3520_v62 = vcvt.s32.f32 %v2496_v53  ;;  %v3528_v5 = vcvt.s32.f32 %v2504_v34  ;;  %v2096_v50 = vunpack.c.2.s8 %v1776_v39  ;;  %v1800_v34 = vld [vmem:[#allocation2 + $0x160] sm:$0xff] }
 0x33b   :  { %4989 = vmatpush.bf16.msra.mxu0 %v4112_v32  ;;  %v4240_v17 = vpack.c.bf16 %v3400_v58, %v3392_v40  ;;  %v10327_v22 = vadd.f32 %v10297_v8, %v4712_v57  ;;  %v2104_v0 = vunpack.c.3.s8 %v1776_v39  ;;  %v2224_v47 = vunpack.c.2.s8 %v1808_v42  ;;  %v1832_v57 = vld [vmem:[#allocation2 + $0x260] sm:$0xff] }
 0x33c   :  { %5002 = vmatpush.bf16.msra.mxu1 %v4176_v41  ;;  %v4304_v45 = vpack.c.bf16 %v3528_v5, %v3520_v62  ;;  %v3120_v7 = vcvt.s32.f32 %v2096_v50  ;;  %v2232_v2 = vunpack.c.3.s8 %v1808_v42  ;;  %v2352_v10 = vunpack.c.2.s8 %v1840_v59 }
 0x33d   :  { %5015 = vmatpush.bf16.msra.mxu2 %v4240_v17  ;;  %v3128_v21 = vcvt.s32.f32 %v2104_v0  ;;  %v3248_v33 = vcvt.s32.f32 %v2224_v47  ;;  %v2360_v44 = vunpack.c.3.s8 %v1840_v59  ;;  %v2480_v14 = vunpack.c.2.s8 %v1872_v63 }
 0x33e   :  { %5028 = vmatpush.bf16.msra.mxu3 %v4304_v45  ;;  %v3256_v51 = vcvt.s32.f32 %v2232_v2  ;;  %v3376_v18 = vcvt.s32.f32 %v2352_v10  ;;  %v2488_v16 = vunpack.c.3.s8 %v1872_v63  ;;  %v2080_v8 = vunpack.c.0.s8 %v1776_v39 }
 0x33f   :  { %v4104_v25 = vpack.c.bf16 %v3128_v21, %v3120_v7  ;;  %v3384_v24 = vcvt.s32.f32 %v2360_v44  ;;  %v3504_v13 = vcvt.s32.f32 %v2480_v14  ;;  %v2088_v31 = vunpack.c.1.s8 %v1776_v39 }
 0x340   :  { %v4168_v29 = vpack.c.bf16 %v3256_v51, %v3248_v33  ;;  %v3512_v54 = vcvt.s32.f32 %v2488_v16  ;;  %v3104_v19 = vcvt.s32.f32 %v2080_v8  ;;  %v2208_v36 = vunpack.c.0.s8 %v1808_v42 }
 0x341   :  { %4990 = vmatpush.bf16.msra.mxu0 %v4104_v25  ;;  %v4232_v15 = vpack.c.bf16 %v3384_v24, %v3376_v18  ;;  %v3112_v52 = vcvt.s32.f32 %v2088_v31  ;;  %v2216_v4 = vunpack.c.1.s8 %v1808_v42  ;;  %v2336_v26 = vunpack.c.0.s8 %v1840_v59 }
 0x342   :  { %5003 = vmatpush.bf16.msra.mxu1 %v4168_v29  ;;  %v4296_v49 = vpack.c.bf16 %v3512_v54, %v3504_v13  ;;  %v3232_v30 = vcvt.s32.f32 %v2208_v36  ;;  %v2344_v37 = vunpack.c.1.s8 %v1840_v59  ;;  %v2464_v53 = vunpack.c.0.s8 %v1872_v63 }
 0x343   :  { %5016 = vmatpush.bf16.msra.mxu2 %v4232_v15  ;;  %v4096_v32 = vpack.c.bf16 %v3112_v52, %v3104_v19  ;;  %v3240_v40 = vcvt.s32.f32 %v2216_v4  ;;  %v3360_v39 = vcvt.s32.f32 %v2336_v26  ;;  %v2472_v58 = vunpack.c.1.s8 %v1872_v63 }
 0x344   :  { %5029 = vmatpush.bf16.msra.mxu3 %v4296_v49  ;;  %v3368_v41 = vcvt.s32.f32 %v2344_v37  ;;  %v3488_v62 = vcvt.s32.f32 %v2464_v53  ;;  %v2064_v5 = vunpack.c.2.s8 %v1768_v38  ;;  %v2072_v50 = vunpack.c.3.s8 %v1768_v38  ;;  %v1760_v53 = vld [vmem:[#allocation2 + $0x20] sm:$0xff] }
 0x345   :  { %4991 = vmatpush.bf16.msra.mxu0 %v4096_v32  ;;  %v4160_v42 = vpack.c.bf16 %v3240_v40, %v3232_v30  ;;  %v3496_v17 = vcvt.s32.f32 %v2472_v58  ;;  %v2192_v0 = vunpack.c.2.s8 %v1800_v34  ;;  %v2200_v47 = vunpack.c.3.s8 %v1800_v34 }
 0x346   :  { %v4224_v59 = vpack.c.bf16 %v3368_v41, %v3360_v39  ;;  %v3088_v61 = vcvt.s32.f32 %v2064_v5  ;;  %v3096_v45 = vcvt.s32.f32 %v2072_v50  ;;  %v2320_v7 = vunpack.c.2.s8 %v1832_v57  ;;  %v1824_v5 = vld [vmem:[#allocation2 + $0x220] sm:$0xff] }
 0x347   :  { %5004 = vmatpush.bf16.msra.mxu1 %v4160_v42  ;;  %v4288_v2 = vpack.c.bf16 %v3496_v17, %v3488_v62  ;;  %v3216_v10 = vcvt.s32.f32 %v2192_v0  ;;  %v3224_v63 = vcvt.s32.f32 %v2200_v47  ;;  %v2328_v21 = vunpack.c.3.s8 %v1832_v57  ;;  %v1856_v0 = vld [vmem:[#allocation2 + $0x320] sm:$0xff] }
 0x348   :  { %5017 = vmatpush.bf16.msra.mxu2 %v4224_v59  ;;  %v4088_v33 = vpack.c.bf16 %v3096_v45, %v3088_v61  ;;  %v3344_v44 = vcvt.s32.f32 %v2320_v7  ;;  %v2448_v14 = vunpack.c.2.s8 %v1864_v23  ;;  %v2456_v51 = vunpack.c.3.s8 %v1864_v23 }
 0x349   :  { %5030 = vmatpush.bf16.msra.mxu3 %v4288_v2  ;;  %v4152_v18 = vpack.c.bf16 %v3224_v63, %v3216_v10  ;;  %v3352_v16 = vcvt.s32.f32 %v2328_v21  ;;  %v4738_v8 = vadd.f32 %v10303_v56, %v10327_v22  ;;  %v2048_v25 = vunpack.c.0.s8 %v1768_v38 }
 0x34a   :  { %4992 = vmatpush.bf16.msra.mxu0 %v4088_v33  ;;  %v3472_v24 = vcvt.s32.f32 %v2448_v14  ;;  %v3480_v13 = vcvt.s32.f32 %v2456_v51  ;;  %v2056_v31 = vunpack.c.1.s8 %v1768_v38  ;;  %v2176_v29 = vunpack.c.0.s8 %v1800_v34 }
 0x34b   :  { %5005 = vmatpush.bf16.msra.mxu1 %v4152_v18  ;;  %v4216_v54 = vpack.c.bf16 %v3352_v16, %v3344_v44  ;;  %v4751_v19 = vadd.f32 %v10305_v60, %v4738_v8  ;;  %v3072_v36 = vcvt.s32.f32 %v2048_v25  ;;  %v2184_v15 = vunpack.c.1.s8 %v1800_v34  ;;  %v1792_v60 = vld [vmem:[#allocation2 + $0x120] sm:$0xff] }
 0x34c   :  { %v4280_v52 = vpack.c.bf16 %v3480_v13, %v3472_v24  ;;  %v3080_v4 = vcvt.s32.f32 %v2056_v31  ;;  %v3200_v26 = vcvt.s32.f32 %v2176_v29  ;;  %v2304_v49 = vunpack.c.0.s8 %v1832_v57 }
 0x34d   :  { %5018 = vmatpush.bf16.msra.mxu2 %v4216_v54  ;;  %v3208_v30 = vcvt.s32.f32 %v2184_v15  ;;  %v2312_v37 = vunpack.c.1.s8 %v1832_v57  ;;  %v2432_v56 = vunpack.c.0.s8 %v1864_v23  ;;  %v2440_v22 = vunpack.c.1.s8 %v1864_v23 }
 0x34e   :  { %5031 = vmatpush.bf16.msra.mxu3 %v4280_v52  ;;  %v4080_v32 = vpack.c.bf16 %v3080_v4, %v3072_v36  ;;  %v3328_v38 = vcvt.s32.f32 %v2304_v49  ;;  %v4764_v40 = vadd.f32 %v10312_v28, %v4751_v19  ;;  %v5407_v39 = vperm.slane %v10277_v48, 1  ;;  %v1912_v36 = vld [vmem:[#allocation2 + $0x4e0] sm:$0xff] }
 0x34f   :  { %v4144_v58 = vpack.c.bf16 %v3208_v30, %v3200_v26  ;;  %v3336_v34 = vcvt.s32.f32 %v2312_v37  ;;  %v3456_v41 = vcvt.s32.f32 %v2432_v56  ;;  %v3464_v62 = vcvt.s32.f32 %v2440_v22  ;;  %v1944_v49 = vld [vmem:[#allocation2 + $0x5e0] sm:$0xff] }
 0x350   :  { %4993 = vmatpush.bf16.msra.mxu0 %v4080_v32  ;;  %v4777_v50 = vadd.f32 %v10314_v12, %v4764_v40  ;;  %v5433_v57 = vperm.slane %v10279_v20, 1  ;;  %v2032_v42 = vunpack.c.2.s8 %v1760_v53  ;;  %v2040_v17 = vunpack.c.3.s8 %v1760_v53  ;;  %v1976_v32 = vld [vmem:[#allocation2 + $0x6e0] sm:$0xff] }
 0x351   :  { %5006 = vmatpush.bf16.msra.mxu1 %v4144_v58  ;;  %v4208_v47 = vpack.c.bf16 %v3336_v34, %v3328_v38  ;;  %v4272_v23 = vpack.c.bf16 %v3464_v62, %v3456_v41  ;;  %v2160_v28 = vunpack.c.2.s8 %v1792_v60  ;;  %v2168_v59 = vunpack.c.3.s8 %v1792_v60 }
 0x352   :  { %v5423_v48 = vmul.f32 %v5407_v39, %v4777_v50  ;;  %v3056_v61 = vcvt.s32.f32 %v2032_v42  ;;  %v3064_v45 = vcvt.s32.f32 %v2040_v17  ;;  %v2288_v7 = vunpack.c.2.s8 %v1824_v5 }
 0x353   :  { %5019 = vmatpush.bf16.msra.mxu2 %v4208_v47  ;;  %5032 = vmatpush.bf16.msra.mxu3 %v4272_v23  ;;  %v3184_v2 = vcvt.s32.f32 %v2160_v28  ;;  %v3192_v10 = vcvt.s32.f32 %v2168_v59  ;;  %v2296_v63 = vunpack.c.3.s8 %v1824_v5  ;;  %v2416_v12 = vunpack.c.2.s8 %v1856_v0 }
 0x354   :  { %v10336_v21 = vadd.f32 %v5433_v57, %v5423_v48  ;;  %v4072_v20 = vpack.c.bf16 %v3064_v45, %v3056_v61  ;;  %v3312_v33 = vcvt.s32.f32 %v2288_v7  ;;  %v2424_v44 = vunpack.c.3.s8 %v1856_v0 }
 0x355   :  { %v4136_v14 = vpack.c.bf16 %v3192_v10, %v3184_v2  ;;  %v3320_v51 = vcvt.s32.f32 %v2296_v63  ;;  %v3440_v18 = vcvt.s32.f32 %v2416_v12  ;;  %v2016_v16 = vunpack.c.0.s8 %v1760_v53 }
 0x356   :  { %4994 = vmatpush.bf16.msra.mxu0 %v4072_v20  ;;  %v3448_v8 = vcvt.s32.f32 %v2424_v44  ;;  %v2024_v25 = vunpack.c.1.s8 %v1760_v53  ;;  %v2144_v24 = vunpack.c.0.s8 %v1792_v60  ;;  %v2152_v13 = vunpack.c.1.s8 %v1792_v60  ;;  %v2008_v60 = vld [vmem:[#allocation2 + $0x7e0] sm:$0xff] }
 0x357   :  { %5007 = vmatpush.bf16.msra.mxu1 %v4136_v14  ;;  %v4200_v31 = vpack.c.bf16 %v3320_v51, %v3312_v33  ;;  %v3040_v29 = vcvt.s32.f32 %v2016_v16  ;;  %v2272_v54 = vunpack.c.0.s8 %v1824_v5  ;;  %v2280_v19 = vunpack.c.1.s8 %v1824_v5  ;;  %v1904_v16 = vld [vmem:[#allocation2 + $0x4a0] sm:$0xff] }
 0x358   :  { %v4264_v15 = vpack.c.bf16 %v3448_v8, %v3440_v18  ;;  %v3048_v52 = vcvt.s32.f32 %v2024_v25  ;;  %v3168_v4 = vcvt.s32.f32 %v2144_v24  ;;  %v3176_v26 = vcvt.s32.f32 %v2152_v13 }
 0x359   :  { %5020 = vmatpush.bf16.msra.mxu2 %v4200_v31  ;;  %v3296_v30 = vcvt.s32.f32 %v2272_v54  ;;  %v3304_v37 = vcvt.s32.f32 %v2280_v19  ;;  %v2400_v56 = vunpack.c.0.s8 %v1856_v0  ;;  %v2408_v22 = vunpack.c.1.s8 %v1856_v0  ;;  %v1936_v31 = vld [vmem:[#allocation2 + $0x5a0] sm:$0xff] }
 0x35a   :  { %5033 = vmatpush.bf16.msra.mxu3 %v4264_v15  ;;  %v4064_v53 = vpack.c.bf16 %v3048_v52, %v3040_v29  ;;  %v4128_v38 = vpack.c.bf16 %v3176_v26, %v3168_v4  ;;  %v2640_v40 = vunpack.c.2.s8 %v1912_v36  ;;  %v2648_v39 = vunpack.c.3.s8 %v1912_v36  ;;  %v1968_v15 = vld [vmem:[#allocation2 + $0x6a0] sm:$0xff] }
 0x35b   :  { %v4192_v58 = vpack.c.bf16 %v3304_v37, %v3296_v30  ;;  %v3424_v34 = vcvt.s32.f32 %v2400_v56  ;;  %v3432_v41 = vcvt.s32.f32 %v2408_v22  ;;  %v2768_v62 = vunpack.c.2.s8 %v1944_v49 }
 0x35c   :  { %4995 = vmatpush.bf16.msra.mxu0 %v4064_v53  ;;  %5008 = vmatpush.bf16.msra.mxu1 %v4128_v38  ;;  %v3664_v5 = vcvt.s32.f32 %v2640_v40  ;;  %v3672_v50 = vcvt.s32.f32 %v2648_v39  ;;  %v2776_v57 = vunpack.c.3.s8 %v1944_v49  ;;  %v2896_v42 = vunpack.c.2.s8 %v1976_v32 }
 0x35d   :  { %5021 = vmatpush.bf16.msra.mxu2 %v4192_v58  ;;  %v4256_v17 = vpack.c.bf16 %v3432_v41, %v3424_v34  ;;  %v3792_v0 = vcvt.s32.f32 %v2768_v62  ;;  %v2904_v47 = vunpack.c.3.s8 %v1976_v32  ;;  %v3024_v23 = vunpack.c.2.s8 %v2008_v60 }
 0x35e   :  { %v4376_v28 = vpack.c.bf16 %v3672_v50, %v3664_v5  ;;  %v3800_v59 = vcvt.s32.f32 %v2776_v57  ;;  %v3920_v48 = vcvt.s32.f32 %v2896_v42  ;;  %v3032_v61 = vunpack.c.3.s8 %v2008_v60 }
 0x35f   :  { %5034 = vmatpush.bf16.msra.mxu3 %v4256_v17  ;;  %v3928_v45 = vcvt.s32.f32 %v2904_v47  ;;  %v4048_v7 = vcvt.s32.f32 %v3024_v23  ;;  %v2624_v2 = vunpack.c.0.s8 %v1912_v36  ;;  %v2632_v10 = vunpack.c.1.s8 %v1912_v36  ;;  %4996 = vmatmul.bf16.vlgmr.msra.gmra.mxu0 %v10188_v27 }
 0x360   :  { %5040 = vmatpush.bf16.msrb.mxu0 %v4376_v28  ;;  %v4440_v63 = vpack.c.bf16 %v3800_v59, %v3792_v0  ;;  %v4056_v12 = vcvt.s32.f32 %v3032_v61  ;;  %v2752_v20 = vunpack.c.0.s8 %v1944_v49  ;;  %v2760_v33 = vunpack.c.1.s8 %v1944_v49  ;;  %5022 = vmatmul.bf16.vlgmr.msra.gmra.mxu2 %v10183_v6 }
 0x361   :  { %v4504_v44 = vpack.c.bf16 %v3928_v45, %v3920_v48  ;;  %v3648_v14 = vcvt.s32.f32 %v2624_v2  ;;  %v3656_v51 = vcvt.s32.f32 %v2632_v10  ;;  %v2880_v18 = vunpack.c.0.s8 %v1976_v32  ;;  %5009 = vmatmul.bf16.vlgmr.msra.gmra.mxu1 %v10197_v43  ;;  %v1896_v10 = vld [vmem:[#allocation2 + $0x460] sm:$0xff] }
 0x362   :  { %5053 = vmatpush.bf16.msrb.mxu1 %v4440_v63  ;;  %v4568_v8 = vpack.c.bf16 %v4056_v12, %v4048_v7  ;;  %v3776_v25 = vcvt.s32.f32 %v2752_v20  ;;  %v3784_v24 = vcvt.s32.f32 %v2760_v33  ;;  %v2888_v13 = vunpack.c.1.s8 %v1976_v32  ;;  %5035 = vmatmul.bf16.vlgmr.msra.gmra.mxu3 %v10192_v1  ;;  %v2000_v32 = vld [vmem:[#allocation2 + $0x7a0] sm:$0xff] }
 0x363   :  { %5066 = vmatpush.bf16.msrb.mxu2 %v4504_v44  ;;  %v4368_v29 = vpack.c.bf16 %v3656_v51, %v3648_v14  ;;  %v3904_v54 = vcvt.s32.f32 %v2880_v18  ;;  %v3008_v19 = vunpack.c.0.s8 %v2008_v60  ;;  %v3016_v36 = vunpack.c.1.s8 %v2008_v60  ;;  %v1928_v44 = vld [vmem:[#allocation2 + $0x560] sm:$0xff]  ;;  %v10342_v14 = vpop.f32.mrf.mxu0  ;;  %v10344_v51 = vpop.f32.mrf.mxu1 }
 0x364   :  { %5079 = vmatpush.bf16.msrb.mxu3 %v4568_v8  ;;  %v4432_v52 = vpack.c.bf16 %v3784_v24, %v3776_v25  ;;  %v3912_v4 = vcvt.s32.f32 %v2888_v13  ;;  %v2608_v26 = vunpack.c.2.s8 %v1904_v16  ;;  %v2616_v49 = vunpack.c.3.s8 %v1904_v16  ;;  %v1960_v24 = vld [vmem:[#allocation2 + $0x660] sm:$0xff] }
 0x365   :  { %5041 = vmatpush.bf16.msrb.mxu0 %v4368_v29  ;;  %v4032_v30 = vcvt.s32.f32 %v3008_v19  ;;  %v4040_v37 = vcvt.s32.f32 %v3016_v36  ;;  %v2736_v56 = vunpack.c.2.s8 %v1936_v31  ;;  %v2744_v22 = vunpack.c.3.s8 %v1936_v31 }
 0x366   :  { %5054 = vmatpush.bf16.msrb.mxu1 %v4432_v52  ;;  %v4496_v53 = vpack.c.bf16 %v3912_v4, %v3904_v54  ;;  %v3632_v38 = vcvt.s32.f32 %v2608_v26  ;;  %v3640_v40 = vcvt.s32.f32 %v2616_v49  ;;  %v2864_v39 = vunpack.c.2.s8 %v1968_v15  ;;  %v1992_v4 = vld [vmem:[#allocation2 + $0x760] sm:$0xff] }
 0x367   :  { %v4560_v58 = vpack.c.bf16 %v4040_v37, %v4032_v30  ;;  %v3760_v34 = vcvt.s32.f32 %v2736_v56  ;;  %v3768_v60 = vcvt.s32.f32 %v2744_v22  ;;  %v2872_v41 = vunpack.c.3.s8 %v1968_v15 }
 0x368   :  { %5067 = vmatpush.bf16.msrb.mxu2 %v4496_v53  ;;  %v4360_v62 = vpack.c.bf16 %v3640_v40, %v3632_v38  ;;  %v3888_v5 = vcvt.s32.f32 %v2864_v39  ;;  %v2992_v50 = vunpack.c.2.s8 %v2000_v32  ;;  %v3000_v57 = vunpack.c.3.s8 %v2000_v32  ;;  %v10346_v38 = vpop.f32.mrf.mxu2  ;;  %v10348_v40 = vpop.f32.mrf.mxu3 }
 0x369   :  { %5080 = vmatpush.bf16.msrb.mxu3 %v4560_v58  ;;  %v4424_v42 = vpack.c.bf16 %v3768_v60, %v3760_v34  ;;  %v3896_v17 = vcvt.s32.f32 %v2872_v41  ;;  %v2592_v0 = vunpack.c.0.s8 %v1904_v16  ;;  %v2600_v47 = vunpack.c.1.s8 %v1904_v16 }
 0x36a   :  { %5042 = vmatpush.bf16.msrb.mxu0 %v4360_v62  ;;  %v4016_v23 = vcvt.s32.f32 %v2992_v50  ;;  %v4024_v28 = vcvt.s32.f32 %v3000_v57  ;;  %v2720_v59 = vunpack.c.0.s8 %v1936_v31  ;;  %v2728_v48 = vunpack.c.1.s8 %v1936_v31 }
 0x36b   :  { %5055 = vmatpush.bf16.msrb.mxu1 %v4424_v42  ;;  %v4488_v61 = vpack.c.bf16 %v3896_v17, %v3888_v5  ;;  %v3616_v45 = vcvt.s32.f32 %v2592_v0  ;;  %v3624_v7 = vcvt.s32.f32 %v2600_v47  ;;  %v2848_v2 = vunpack.c.0.s8 %v1968_v15  ;;  %v4791_v47 = vpop.f32.mrf.mxu0 }
 0x36c   :  { %v4552_v63 = vpack.c.bf16 %v4024_v28, %v4016_v23  ;;  %v3744_v12 = vcvt.s32.f32 %v2720_v59  ;;  %v3752_v20 = vcvt.s32.f32 %v2728_v48  ;;  %v2856_v33 = vunpack.c.1.s8 %v1968_v15  ;;  %v4804_v23 = vpop.f32.mrf.mxu1 }
 0x36d   :  { %5068 = vmatpush.bf16.msrb.mxu2 %v4488_v61  ;;  %v4352_v18 = vpack.c.bf16 %v3624_v7, %v3616_v45  ;;  %v3872_v16 = vcvt.s32.f32 %v2848_v2  ;;  %v2976_v8 = vunpack.c.0.s8 %v2000_v32  ;;  %v2984_v25 = vunpack.c.1.s8 %v2000_v32  ;;  %v1888_v45 = vld [vmem:[#allocation2 + $0x420] sm:$0xff] }
 0x36e   :  { %5081 = vmatpush.bf16.msrb.mxu3 %v4552_v63  ;;  %v4416_v13 = vpack.c.bf16 %v3752_v20, %v3744_v12  ;;  %v3880_v31 = vcvt.s32.f32 %v2856_v33  ;;  %v2576_v29 = vunpack.c.2.s8 %v1896_v10  ;;  %v2584_v54 = vunpack.c.3.s8 %v1896_v10  ;;  %v1920_v20 = vld [vmem:[#allocation2 + $0x520] sm:$0xff] }
 0x36f   :  { %5043 = vmatpush.bf16.msrb.mxu0 %v4352_v18  ;;  %v4000_v19 = vcvt.s32.f32 %v2976_v8  ;;  %v4008_v36 = vcvt.s32.f32 %v2984_v25  ;;  %v2704_v15 = vunpack.c.2.s8 %v1928_v44  ;;  %v2712_v52 = vunpack.c.3.s8 %v1928_v44  ;;  %v1952_v8 = vld [vmem:[#allocation2 + $0x620] sm:$0xff] }
 0x370   :  { %5056 = vmatpush.bf16.msrb.mxu1 %v4416_v13  ;;  %v4480_v26 = vpack.c.bf16 %v3880_v31, %v3872_v16  ;;  %v3600_v49 = vcvt.s32.f32 %v2576_v29  ;;  %v3608_v30 = vcvt.s32.f32 %v2584_v54  ;;  %v2832_v37 = vunpack.c.2.s8 %v1960_v24 }
 0x371   :  { %v4544_v56 = vpack.c.bf16 %v4008_v36, %v4000_v19  ;;  %v3728_v22 = vcvt.s32.f32 %v2704_v15  ;;  %v3736_v32 = vcvt.s32.f32 %v2712_v52  ;;  %v2840_v53 = vunpack.c.3.s8 %v1960_v24  ;;  %v1984_v15 = vld [vmem:[#allocation2 + $0x720] sm:$0xff]  ;;  %v4817_v52 = vpop.f32.mrf.mxu2 }
 0x372   :  { %5069 = vmatpush.bf16.msrb.mxu2 %v4480_v26  ;;  %v4344_v39 = vpack.c.bf16 %v3608_v30, %v3600_v49  ;;  %v3856_v58 = vcvt.s32.f32 %v2832_v37  ;;  %v2960_v34 = vunpack.c.2.s8 %v1992_v4  ;;  %v2968_v60 = vunpack.c.3.s8 %v1992_v4 }
 0x373   :  { %5082 = vmatpush.bf16.msrb.mxu3 %v4544_v56  ;;  %v4408_v41 = vpack.c.bf16 %v3736_v32, %v3728_v22  ;;  %v3864_v62 = vcvt.s32.f32 %v2840_v53  ;;  %v2560_v5 = vunpack.c.0.s8 %v1896_v10  ;;  %v2568_v50 = vunpack.c.1.s8 %v1896_v10 }
 0x374   :  { %5044 = vmatpush.bf16.msrb.mxu0 %v4344_v39  ;;  %v3984_v57 = vcvt.s32.f32 %v2960_v34  ;;  %v3992_v42 = vcvt.s32.f32 %v2968_v60  ;;  %v2688_v17 = vunpack.c.0.s8 %v1928_v44  ;;  %v2696_v0 = vunpack.c.1.s8 %v1928_v44 }
 0x375   :  { %5057 = vmatpush.bf16.msrb.mxu1 %v4408_v41  ;;  %v4472_v28 = vpack.c.bf16 %v3864_v62, %v3856_v58  ;;  %v3584_v59 = vcvt.s32.f32 %v2560_v5  ;;  %v3592_v48 = vcvt.s32.f32 %v2568_v50  ;;  %v2816_v61 = vunpack.c.0.s8 %v1960_v24 }
 0x376   :  { %v4536_v7 = vpack.c.bf16 %v3992_v42, %v3984_v57  ;;  %v3712_v2 = vcvt.s32.f32 %v2688_v17  ;;  %v3720_v63 = vcvt.s32.f32 %v2696_v0  ;;  %v2824_v12 = vunpack.c.1.s8 %v1960_v24  ;;  %v4830_v24 = vpop.f32.mrf.mxu3 }
 0x377   :  { %5070 = vmatpush.bf16.msrb.mxu2 %v4472_v28  ;;  %v4336_v10 = vpack.c.bf16 %v3592_v48, %v3584_v59  ;;  %v3840_v33 = vcvt.s32.f32 %v2816_v61  ;;  %v2944_v18 = vunpack.c.0.s8 %v1992_v4  ;;  %v2952_v16 = vunpack.c.1.s8 %v1992_v4  ;;  %v10350_v59 = vld [vmem:[#allocation2 + $0xe8] sm:$0xff] }
 0x378   :  { %5083 = vmatpush.bf16.msrb.mxu3 %v4536_v7  ;;  %v4400_v44 = vpack.c.bf16 %v3720_v63, %v3712_v2  ;;  %v3848_v25 = vcvt.s32.f32 %v2824_v12  ;;  %v2544_v13 = vunpack.c.2.s8 %v1888_v45  ;;  %v2552_v31 = vunpack.c.3.s8 %v1888_v45  ;;  %v10352_v63 = vld [vmem:[#allocation2 + $0x1e8] sm:$0xff] }
 0x379   :  { %5045 = vmatpush.bf16.msrb.mxu0 %v4336_v10  ;;  %v3968_v29 = vcvt.s32.f32 %v2944_v18  ;;  %v3976_v54 = vcvt.s32.f32 %v2952_v16  ;;  %v2672_v19 = vunpack.c.2.s8 %v1920_v20  ;;  %v2680_v36 = vunpack.c.3.s8 %v1920_v20  ;;  %v10354_v18 = vld [vmem:[#allocation2 + $0x2e8] sm:$0xff]  ;;  %v10358_v16 = vpop.f32.mrf.mxu1 }
 0x37a   :  { %5058 = vmatpush.bf16.msrb.mxu1 %v4400_v44  ;;  %v4464_v26 = vpack.c.bf16 %v3848_v25, %v3840_v33  ;;  %v3568_v49 = vcvt.s32.f32 %v2544_v13  ;;  %v3576_v30 = vcvt.s32.f32 %v2552_v31  ;;  %v2800_v37 = vunpack.c.2.s8 %v1952_v8 }
 0x37b   :  { %v4528_v4 = vpack.c.bf16 %v3976_v54, %v3968_v29  ;;  %v3696_v56 = vcvt.s32.f32 %v2672_v19  ;;  %v3704_v22 = vcvt.s32.f32 %v2680_v36  ;;  %v2808_v32 = vunpack.c.3.s8 %v1952_v8  ;;  %v1881_v36 = vld [vmem:[#allocation2 + $0x3e8] sm:$0xff] }
 0x37c   :  { %5071 = vmatpush.bf16.msrb.mxu2 %v4464_v26  ;;  %v4328_v53 = vpack.c.bf16 %v3576_v30, %v3568_v49  ;;  %v3824_v39 = vcvt.s32.f32 %v2800_v37  ;;  %v2928_v58 = vunpack.c.2.s8 %v1984_v15  ;;  %v2936_v34 = vunpack.c.3.s8 %v1984_v15 }
 0x37d   :  { %5084 = vmatpush.bf16.msrb.mxu3 %v4528_v4  ;;  %v4392_v60 = vpack.c.bf16 %v3704_v22, %v3696_v56  ;;  %v3832_v41 = vcvt.s32.f32 %v2808_v32  ;;  %v2528_v62 = vunpack.c.0.s8 %v1888_v45  ;;  %v2536_v5 = vunpack.c.1.s8 %v1888_v45 }
 0x37e   :  { %5046 = vmatpush.bf16.msrb.mxu0 %v4328_v53  ;;  %v3952_v50 = vcvt.s32.f32 %v2928_v58  ;;  %v3960_v57 = vcvt.s32.f32 %v2936_v34  ;;  %v2656_v42 = vunpack.c.0.s8 %v1920_v20  ;;  %v2664_v17 = vunpack.c.1.s8 %v1920_v20  ;;  %v10356_v20 = vpop.f32.mrf.mxu0  ;;  %v10369_v58 = vpop.f32.mrf.mxu3 }
 0x37f   :  { %5059 = vmatpush.bf16.msrb.mxu1 %v4392_v60  ;;  %v4456_v0 = vpack.c.bf16 %v3832_v41, %v3824_v39  ;;  %v3552_v47 = vcvt.s32.f32 %v2528_v62  ;;  %v3560_v23 = vcvt.s32.f32 %v2536_v5  ;;  %v2784_v28 = vunpack.c.0.s8 %v1952_v8  ;;  %v10367_v39 = vpop.f32.mrf.mxu2 }
 0x380   :  { %v4520_v48 = vpack.c.bf16 %v3960_v57, %v3952_v50  ;;  %v3680_v61 = vcvt.s32.f32 %v2656_v42  ;;  %v3688_v7 = vcvt.s32.f32 %v2664_v17  ;;  %v2792_v2 = vunpack.c.1.s8 %v1952_v8 }
 0x381   :  { %5072 = vmatpush.bf16.msrb.mxu2 %v4456_v0  ;;  %v4320_v45 = vpack.c.bf16 %v3560_v23, %v3552_v47  ;;  %v3808_v12 = vcvt.s32.f32 %v2784_v28  ;;  %v2912_v10 = vunpack.c.0.s8 %v1984_v15  ;;  %v2920_v33 = vunpack.c.1.s8 %v1984_v15  ;;  %v4856_v28 = vpop.f32.mrf.mxu1 }
 0x382   :  { %5085 = vmatpush.bf16.msrb.mxu3 %v4520_v48  ;;  %v4384_v44 = vpack.c.bf16 %v3688_v7, %v3680_v61  ;;  %v3816_v25 = vcvt.s32.f32 %v2792_v2  ;;  %v2129_v13 = vunpack.c.2.s8 %v10350_v59  ;;  %v2137_v8 = vunpack.c.3.s8 %v10350_v59 }
 0x383   :  { %5047 = vmatpush.bf16.msrb.mxu0 %v4320_v45  ;;  %v3936_v31 = vcvt.s32.f32 %v2912_v10  ;;  %v3944_v29 = vcvt.s32.f32 %v2920_v33  ;;  %v2257_v54 = vunpack.c.2.s8 %v10352_v63  ;;  %v2265_v19 = vunpack.c.3.s8 %v10352_v63 }
 0x384   :  { %5060 = vmatpush.bf16.msrb.mxu1 %v4384_v44  ;;  %v4448_v15 = vpack.c.bf16 %v3816_v25, %v3808_v12  ;;  %v3153_v52 = vcvt.s32.f32 %v2129_v13  ;;  %v3161_v24 = vcvt.s32.f32 %v2137_v8  ;;  %v2385_v26 = vunpack.c.2.s8 %v10354_v18  ;;  %v1841_v8 = vld [vmem:[#allocation2 + $0x2a8] sm:$0xff] }
 0x385   :  { %v4512_v49 = vpack.c.bf16 %v3944_v29, %v3936_v31  ;;  %v3281_v30 = vcvt.s32.f32 %v2257_v54  ;;  %v3289_v37 = vcvt.s32.f32 %v2265_v19  ;;  %v2393_v4 = vunpack.c.3.s8 %v10354_v18 }
 0x386   :  { %5073 = vmatpush.bf16.msrb.mxu2 %v4448_v15  ;;  %v4121_v56 = vpack.c.bf16 %v3161_v24, %v3153_v52  ;;  %v3409_v22 = vcvt.s32.f32 %v2385_v26  ;;  %v2513_v32 = vunpack.c.2.s8 %v1881_v36  ;;  %v2521_v53 = vunpack.c.3.s8 %v1881_v36  ;;  %5048 = vmatmul.bf16.vlgmr.msrb.gmra.mxu0 %v10207_v9 }
 0x387   :  { %5086 = vmatpush.bf16.msrb.mxu3 %v4512_v49  ;;  %v4185_v34 = vpack.c.bf16 %v3289_v37, %v3281_v30  ;;  %v3417_v60 = vcvt.s32.f32 %v2393_v4  ;;  %v4803_v41 = vadd.f32 %v10344_v51, %v10342_v14  ;;  %v2113_v62 = vunpack.c.0.s8 %v10350_v59  ;;  %5061 = vmatmul.bf16.vlgmr.msrb.gmra.mxu1 %v10222_v35  ;;  %v1777_v14 = vld [vmem:[#allocation2 + $0xa8] sm:$0xff]  ;;  %v4843_v51 = vpop.f32.mrf.mxu0  ;;  %v4869_v26 = vpop.f32.mrf.mxu2 }
 0x388   :  { %5092 = vmatpush.bf16.msra.mxu0 %v4121_v56  ;;  %v3537_v5 = vcvt.s32.f32 %v2513_v32  ;;  %v3545_v50 = vcvt.s32.f32 %v2521_v53  ;;  %v2121_v57 = vunpack.c.1.s8 %v10350_v59  ;;  %v2241_v42 = vunpack.c.0.s8 %v10352_v63  ;;  %v4882_v49 = vpop.f32.mrf.mxu3 }
 0x389   :  { %5105 = vmatpush.bf16.msra.mxu1 %v4185_v34  ;;  %v4249_v17 = vpack.c.bf16 %v3417_v60, %v3409_v22  ;;  %v3137_v0 = vcvt.s32.f32 %v2113_v62  ;;  %v2249_v47 = vunpack.c.1.s8 %v10352_v63  ;;  %v2369_v23 = vunpack.c.0.s8 %v10354_v18  ;;  %5074 = vmatmul.bf16.vlgmr.msrb.gmra.mxu2 %v10203_v3  ;;  %v1809_v63 = vld [vmem:[#allocation2 + $0x1a8] sm:$0xff] }
 0x38a   :  { %v4313_v48 = vpack.c.bf16 %v3545_v50, %v3537_v5  ;;  %v3145_v61 = vcvt.s32.f32 %v2121_v57  ;;  %v3265_v7 = vcvt.s32.f32 %v2241_v42  ;;  %v2377_v2 = vunpack.c.1.s8 %v10354_v18  ;;  %5087 = vmatmul.bf16.vlgmr.msrb.gmra.mxu3 %v10214_v11  ;;  %v1873_v18 = vld [vmem:[#allocation2 + $0x3a8] sm:$0xff] }
 0x38b   :  { %5118 = vmatpush.bf16.msra.mxu2 %v4249_v17  ;;  %v3273_v59 = vcvt.s32.f32 %v2249_v47  ;;  %v3393_v45 = vcvt.s32.f32 %v2369_v23  ;;  %v2497_v12 = vunpack.c.0.s8 %v1881_v36  ;;  %v2505_v10 = vunpack.c.1.s8 %v1881_v36  ;;  %v1769_v23 = vld [vmem:[#allocation2 + $0x68] sm:$0xff] }
 0x38c   :  { %5131 = vmatpush.bf16.msra.mxu3 %v4313_v48  ;;  %v4113_v33 = vpack.c.bf16 %v3145_v61, %v3137_v0  ;;  %v3401_v44 = vcvt.s32.f32 %v2377_v2  ;;  %v4816_v25 = vadd.f32 %v10346_v38, %v4803_v41  ;;  %v2097_v13 = vunpack.c.2.s8 %v1777_v14 }
 0x38d   :  { %v4177_v31 = vpack.c.bf16 %v3273_v59, %v3265_v7  ;;  %v3521_v29 = vcvt.s32.f32 %v2497_v12  ;;  %v3529_v54 = vcvt.s32.f32 %v2505_v10  ;;  %v2105_v19 = vunpack.c.3.s8 %v1777_v14  ;;  %v1801_v12 = vld [vmem:[#allocation2 + $0x168] sm:$0xff] }
 0x38e   :  { %5093 = vmatpush.bf16.msra.mxu0 %v4113_v33  ;;  %v4241_v15 = vpack.c.bf16 %v3401_v44, %v3393_v45  ;;  %v10384_v52 = vadd.f32 %v10348_v40, %v4816_v25  ;;  %v3121_v24 = vcvt.s32.f32 %v2097_v13  ;;  %v2225_v36 = vunpack.c.2.s8 %v1809_v63  ;;  %v1833_v25 = vld [vmem:[#allocation2 + $0x268] sm:$0xff] }
 0x38f   :  { %5106 = vmatpush.bf16.msra.mxu1 %v4177_v31  ;;  %v4305_v30 = vpack.c.bf16 %v3529_v54, %v3521_v29  ;;  %v3129_v37 = vcvt.s32.f32 %v2105_v19  ;;  %v2233_v38 = vunpack.c.3.s8 %v1809_v63  ;;  %v2353_v4 = vunpack.c.2.s8 %v1841_v8  ;;  %v1865_v54 = vld [vmem:[#allocation2 + $0x368] sm:$0xff] }
 0x390   :  { %5119 = vmatpush.bf16.msra.mxu2 %v4241_v15  ;;  %v3249_v56 = vcvt.s32.f32 %v2225_v36  ;;  %v2361_v22 = vunpack.c.3.s8 %v1841_v8  ;;  %v2481_v32 = vunpack.c.2.s8 %v1873_v18  ;;  %v2489_v53 = vunpack.c.3.s8 %v1873_v18 }
 0x391   :  { %5132 = vmatpush.bf16.msra.mxu3 %v4305_v30  ;;  %v4105_v34 = vpack.c.bf16 %v3129_v37, %v3121_v24  ;;  %v3257_v60 = vcvt.s32.f32 %v2233_v38  ;;  %v3377_v41 = vcvt.s32.f32 %v2353_v4  ;;  %v2081_v40 = vunpack.c.0.s8 %v1777_v14 }
 0x392   :  { %v3385_v62 = vcvt.s32.f32 %v2361_v22  ;;  %v3505_v5 = vcvt.s32.f32 %v2481_v32  ;;  %v3513_v50 = vcvt.s32.f32 %v2489_v53  ;;  %v2089_v57 = vunpack.c.1.s8 %v1777_v14 }
 0x393   :  { %5094 = vmatpush.bf16.msra.mxu0 %v4105_v34  ;;  %v4169_v42 = vpack.c.bf16 %v3257_v60, %v3249_v56  ;;  %v3105_v17 = vcvt.s32.f32 %v2081_v40  ;;  %v2209_v0 = vunpack.c.0.s8 %v1809_v63  ;;  %v2217_v47 = vunpack.c.1.s8 %v1809_v63 }
 0x394   :  { %v4233_v51 = vpack.c.bf16 %v3385_v62, %v3377_v41  ;;  %v4297_v28 = vpack.c.bf16 %v3513_v50, %v3505_v5  ;;  %v3113_v48 = vcvt.s32.f32 %v2089_v57  ;;  %v2337_v61 = vunpack.c.0.s8 %v1841_v8 }
 0x395   :  { %5107 = vmatpush.bf16.msra.mxu1 %v4169_v42  ;;  %v3233_v7 = vcvt.s32.f32 %v2209_v0  ;;  %v3241_v2 = vcvt.s32.f32 %v2217_v47  ;;  %v2345_v59 = vunpack.c.1.s8 %v1841_v8  ;;  %v2465_v45 = vunpack.c.0.s8 %v1873_v18 }
 0x396   :  { %5120 = vmatpush.bf16.msra.mxu2 %v4233_v51  ;;  %5133 = vmatpush.bf16.msra.mxu3 %v4297_v28  ;;  %v4097_v10 = vpack.c.bf16 %v3113_v48, %v3105_v17  ;;  %v3361_v14 = vcvt.s32.f32 %v2337_v61  ;;  %v2473_v33 = vunpack.c.1.s8 %v1873_v18  ;;  %v2065_v44 = vunpack.c.2.s8 %v1769_v23 }
 0x397   :  { %v4161_v13 = vpack.c.bf16 %v3241_v2, %v3233_v7  ;;  %v3369_v63 = vcvt.s32.f32 %v2345_v59  ;;  %v3489_v31 = vcvt.s32.f32 %v2465_v45  ;;  %v2073_v29 = vunpack.c.3.s8 %v1769_v23  ;;  %v1761_v59 = vld [vmem:[#allocation2 + $0x28] sm:$0xff] }
 0x398   :  { %5095 = vmatpush.bf16.msra.mxu0 %v4097_v10  ;;  %v3497_v19 = vcvt.s32.f32 %v2473_v33  ;;  %v3089_v15 = vcvt.s32.f32 %v2065_v44  ;;  %v2193_v24 = vunpack.c.2.s8 %v1801_v12  ;;  %v2201_v36 = vunpack.c.3.s8 %v1801_v12  ;;  %v1825_v33 = vld [vmem:[#allocation2 + $0x228] sm:$0xff] }
 0x399   :  { %5108 = vmatpush.bf16.msra.mxu1 %v4161_v13  ;;  %v4225_v8 = vpack.c.bf16 %v3369_v63, %v3361_v14  ;;  %v3097_v26 = vcvt.s32.f32 %v2073_v29  ;;  %v2321_v49 = vunpack.c.2.s8 %v1833_v25  ;;  %v2329_v30 = vunpack.c.3.s8 %v1833_v25  ;;  %v1793_v14 = vld [vmem:[#allocation2 + $0x128] sm:$0xff] }
 0x39a   :  { %v4289_v37 = vpack.c.bf16 %v3497_v19, %v3489_v31  ;;  %v3217_v38 = vcvt.s32.f32 %v2193_v24  ;;  %v3225_v18 = vcvt.s32.f32 %v2201_v36  ;;  %v2449_v4 = vunpack.c.2.s8 %v1865_v54  ;;  %v10396_v63 = vld [vmem:[#allocation17] sm:$0xff] }
 0x39b   :  { %5121 = vmatpush.bf16.msra.mxu2 %v4225_v8  ;;  %v4089_v56 = vpack.c.bf16 %v3097_v26, %v3089_v15  ;;  %v3345_v22 = vcvt.s32.f32 %v2321_v49  ;;  %v3353_v32 = vcvt.s32.f32 %v2329_v30  ;;  %v2457_v53 = vunpack.c.3.s8 %v1865_v54  ;;  %v1857_v15 = vld [vmem:[#allocation2 + $0x328] sm:$0xff] }
 0x39c   :  { %5134 = vmatpush.bf16.msra.mxu3 %v4289_v37  ;;  %v4153_v34 = vpack.c.bf16 %v3225_v18, %v3217_v38  ;;  %v3473_v60 = vcvt.s32.f32 %v2449_v4  ;;  %v4842_v41 = vadd.f32 %v10356_v20, %v10384_v52  ;;  %v2049_v40 = vunpack.c.0.s8 %v1769_v23 }
 0x39d   :  { %5096 = vmatpush.bf16.msra.mxu0 %v4089_v56  ;;  %v4217_v62 = vpack.c.bf16 %v3353_v32, %v3345_v22  ;;  %v3481_v5 = vcvt.s32.f32 %v2457_v53  ;;  %v2057_v50 = vunpack.c.1.s8 %v1769_v23  ;;  %v2177_v57 = vunpack.c.0.s8 %v1801_v12 }
 0x39e   :  { %5109 = vmatpush.bf16.msra.mxu1 %v4153_v34  ;;  %v4855_v42 = vadd.f32 %v10358_v16, %v4842_v41  ;;  %v3073_v17 = vcvt.s32.f32 %v2049_v40  ;;  %v2185_v0 = vunpack.c.1.s8 %v1801_v12  ;;  %v2305_v47 = vunpack.c.0.s8 %v1833_v25  ;;  %v10393_v16 = vld [vmem:[%s10751_s8] sm:$0xff] }
 0x39f   :  { %5122 = vmatpush.bf16.msra.mxu2 %v4217_v62  ;;  %v4281_v51 = vpack.c.bf16 %v3481_v5, %v3473_v60  ;;  %v3081_v28 = vcvt.s32.f32 %v2057_v50  ;;  %v3201_v48 = vcvt.s32.f32 %v2177_v57  ;;  %v2313_v61 = vunpack.c.1.s8 %v1833_v25 }
 0x3a0   :  { %v3209_v7 = vcvt.s32.f32 %v2185_v0  ;;  %v3329_v2 = vcvt.s32.f32 %v2305_v47  ;;  %v2433_v20 = vunpack.c.0.s8 %v1865_v54  ;;  %v2441_v52 = vunpack.c.1.s8 %v1865_v54 }
 0x3a1   :  { %5135 = vmatpush.bf16.msra.mxu3 %v4281_v51  ;;  %v4081_v45 = vpack.c.bf16 %v3081_v28, %v3073_v17  ;;  %v3337_v23 = vcvt.s32.f32 %v2313_v61  ;;  %v4868_v10 = vadd.f32 %v10367_v39, %v4855_v42  ;;  %v5408_v12 = vperm.slane %v10393_v16, 2  ;;  %v1913_v28 = vld [vmem:[#allocation2 + $0x4e8] sm:$0xff] }
 0x3a2   :  { %v4145_v44 = vpack.c.bf16 %v3209_v7, %v3201_v48  ;;  %v3457_v25 = vcvt.s32.f32 %v2433_v20  ;;  %v3465_v13 = vcvt.s32.f32 %v2441_v52  ;;  %v5434_v31 = vperm.slane %v10396_v63, 2  ;;  %v1945_v20 = vld [vmem:[#allocation2 + $0x5e8] sm:$0xff] }
 0x3a3   :  { %5097 = vmatpush.bf16.msra.mxu0 %v4081_v45  ;;  %v4209_v29 = vpack.c.bf16 %v3337_v23, %v3329_v2  ;;  %v4881_v39 = vadd.f32 %v10369_v58, %v4868_v10  ;;  %v2033_v54 = vunpack.c.2.s8 %v1761_v59  ;;  %v2041_v19 = vunpack.c.3.s8 %v1761_v59  ;;  %v1977_v10 = vld [vmem:[#allocation2 + $0x6e8] sm:$0xff] }
 0x3a4   :  { %5110 = vmatpush.bf16.msra.mxu1 %v4145_v44  ;;  %v4273_v24 = vpack.c.bf16 %v3465_v13, %v3457_v25  ;;  %v2161_v36 = vunpack.c.2.s8 %v1793_v14  ;;  %v2169_v8 = vunpack.c.3.s8 %v1793_v14  ;;  %v2289_v26 = vunpack.c.2.s8 %v1825_v33  ;;  %v2009_v13 = vld [vmem:[#allocation2 + $0x7e8] sm:$0xff] }
 0x3a5   :  { %5123 = vmatpush.bf16.msra.mxu2 %v4209_v29  ;;  %v5424_v49 = vmul.f32 %v5408_v12, %v4881_v39  ;;  %v3057_v30 = vcvt.s32.f32 %v2033_v54  ;;  %v3065_v37 = vcvt.s32.f32 %v2041_v19  ;;  %v2297_v38 = vunpack.c.3.s8 %v1825_v33 }
 0x3a6   :  { %5136 = vmatpush.bf16.msra.mxu3 %v4273_v24  ;;  %v3185_v18 = vcvt.s32.f32 %v2161_v36  ;;  %v3193_v4 = vcvt.s32.f32 %v2169_v8  ;;  %v3313_v56 = vcvt.s32.f32 %v2289_v26  ;;  %v2417_v22 = vunpack.c.2.s8 %v1857_v15 }
 0x3a7   :  { %v10400_v32 = vadd.f32 %v5434_v31, %v5424_v49  ;;  %v4073_v58 = vpack.c.bf16 %v3065_v37, %v3057_v30  ;;  %v3321_v53 = vcvt.s32.f32 %v2297_v38  ;;  %v2425_v34 = vunpack.c.3.s8 %v1857_v15 }
 0x3a8   :  { %v4137_v60 = vpack.c.bf16 %v3193_v4, %v3185_v18  ;;  %v3441_v41 = vcvt.s32.f32 %v2417_v22  ;;  %v2017_v40 = vunpack.c.0.s8 %v1761_v59  ;;  %v2025_v62 = vunpack.c.1.s8 %v1761_v59 }
 0x3a9   :  { %5098 = vmatpush.bf16.msra.mxu0 %v4073_v58  ;;  %v4201_v5 = vpack.c.bf16 %v3321_v53, %v3313_v56  ;;  %v3449_v50 = vcvt.s32.f32 %v2425_v34  ;;  %v2145_v57 = vunpack.c.0.s8 %v1793_v14  ;;  %v2153_v42 = vunpack.c.1.s8 %v1793_v14 }
 0x3aa   :  { %5111 = vmatpush.bf16.msra.mxu1 %v4137_v60  ;;  %v3041_v17 = vcvt.s32.f32 %v2017_v40  ;;  %v3049_v0 = vcvt.s32.f32 %v2025_v62  ;;  %v2273_v47 = vunpack.c.0.s8 %v1825_v33  ;;  %v2281_v51 = vunpack.c.1.s8 %v1825_v33 }
 0x3ab   :  { %5124 = vmatpush.bf16.msra.mxu2 %v4201_v5  ;;  %v4265_v48 = vpack.c.bf16 %v3449_v50, %v3441_v41  ;;  %v3169_v61 = vcvt.s32.f32 %v2145_v57  ;;  %v3177_v7 = vcvt.s32.f32 %v2153_v42  ;;  %v2401_v2 = vunpack.c.0.s8 %v1857_v15  ;;  %v1905_v57 = vld [vmem:[#allocation2 + $0x4a8] sm:$0xff] }
 0x3ac   :  { %v4065_v52 = vpack.c.bf16 %v3049_v0, %v3041_v17  ;;  %v3297_v45 = vcvt.s32.f32 %v2273_v47  ;;  %v3305_v59 = vcvt.s32.f32 %v2281_v51  ;;  %v2409_v23 = vunpack.c.1.s8 %v1857_v15  ;;  %v1937_v51 = vld [vmem:[#allocation2 + $0x5a8] sm:$0xff] }
 0x3ad   :  { %5137 = vmatpush.bf16.msra.mxu3 %v4265_v48  ;;  %v4129_v12 = vpack.c.bf16 %v3177_v7, %v3169_v61  ;;  %v3425_v14 = vcvt.s32.f32 %v2401_v2  ;;  %v2641_v44 = vunpack.c.2.s8 %v1913_v28  ;;  %v2649_v25 = vunpack.c.3.s8 %v1913_v28  ;;  %v1969_v2 = vld [vmem:[#allocation2 + $0x6a8] sm:$0xff] }
 0x3ae   :  { %5099 = vmatpush.bf16.msra.mxu0 %v4065_v52  ;;  %v4193_v33 = vpack.c.bf16 %v3305_v59, %v3297_v45  ;;  %v3433_v31 = vcvt.s32.f32 %v2409_v23  ;;  %v2769_v29 = vunpack.c.2.s8 %v1945_v20  ;;  %v2777_v39 = vunpack.c.3.s8 %v1945_v20  ;;  %v2001_v23 = vld [vmem:[#allocation2 + $0x7a8] sm:$0xff] }
 0x3af   :  { %5112 = vmatpush.bf16.msra.mxu1 %v4129_v12  ;;  %v3665_v54 = vcvt.s32.f32 %v2641_v44  ;;  %v3673_v19 = vcvt.s32.f32 %v2649_v25  ;;  %v2897_v24 = vunpack.c.2.s8 %v1977_v10  ;;  %v2905_v36 = vunpack.c.3.s8 %v1977_v10 }
 0x3b0   :  { %5125 = vmatpush.bf16.msra.mxu2 %v4193_v33  ;;  %v4257_v8 = vpack.c.bf16 %v3433_v31, %v3425_v14  ;;  %v3793_v15 = vcvt.s32.f32 %v2769_v29  ;;  %v3801_v26 = vcvt.s32.f32 %v2777_v39  ;;  %v3025_v49 = vunpack.c.2.s8 %v2009_v13 }
 0x3b1   :  { %v4377_v30 = vpack.c.bf16 %v3673_v19, %v3665_v54  ;;  %v3921_v37 = vcvt.s32.f32 %v2897_v24  ;;  %v3929_v38 = vcvt.s32.f32 %v2905_v36  ;;  %v3033_v18 = vunpack.c.3.s8 %v2009_v13  ;;  %5100 = vmatmul.bf16.vlgmr.msra.gmra.mxu0 %v10188_v27 }
 0x3b2   :  { %5138 = vmatpush.bf16.msra.mxu3 %v4257_v8  ;;  %v4441_v4 = vpack.c.bf16 %v3801_v26, %v3793_v15  ;;  %v4049_v56 = vcvt.s32.f32 %v3025_v49  ;;  %v2625_v22 = vunpack.c.0.s8 %v1913_v28  ;;  %v2633_v58 = vunpack.c.1.s8 %v1913_v28  ;;  %5113 = vmatmul.bf16.vlgmr.msra.gmra.mxu1 %v10197_v43 }
 0x3b3   :  { %5144 = vmatpush.bf16.msrb.mxu0 %v4377_v30  ;;  %v4505_v53 = vpack.c.bf16 %v3929_v38, %v3921_v37  ;;  %v4057_v34 = vcvt.s32.f32 %v3033_v18  ;;  %v2753_v60 = vunpack.c.0.s8 %v1945_v20  ;;  %v2761_v41 = vunpack.c.1.s8 %v1945_v20  ;;  %5126 = vmatmul.bf16.vlgmr.msra.gmra.mxu2 %v10183_v6 }
 0x3b4   :  { %5157 = vmatpush.bf16.msrb.mxu1 %v4441_v4  ;;  %v3649_v40 = vcvt.s32.f32 %v2625_v22  ;;  %v3657_v62 = vcvt.s32.f32 %v2633_v58  ;;  %v2881_v5 = vunpack.c.0.s8 %v1977_v10  ;;  %v2889_v50 = vunpack.c.1.s8 %v1977_v10 }
 0x3b5   :  { %5170 = vmatpush.bf16.msrb.mxu2 %v4505_v53  ;;  %v4569_v42 = vpack.c.bf16 %v4057_v34, %v4049_v56  ;;  %v3777_v17 = vcvt.s32.f32 %v2753_v60  ;;  %v3785_v0 = vcvt.s32.f32 %v2761_v41  ;;  %v3009_v47 = vunpack.c.0.s8 %v2009_v13  ;;  %5139 = vmatmul.bf16.vlgmr.msra.gmra.mxu3 %v10192_v1  ;;  %v1897_v60 = vld [vmem:[#allocation2 + $0x468] sm:$0xff] }
 0x3b6   :  { %v4369_v28 = vpack.c.bf16 %v3657_v62, %v3649_v40  ;;  %v3905_v48 = vcvt.s32.f32 %v2881_v5  ;;  %v3913_v61 = vcvt.s32.f32 %v2889_v50  ;;  %v3017_v7 = vunpack.c.1.s8 %v2009_v13  ;;  %v1929_v50 = vld [vmem:[#allocation2 + $0x568] sm:$0xff] }
 0x3b7   :  { %5183 = vmatpush.bf16.msrb.mxu3 %v4569_v42  ;;  %v4433_v20 = vpack.c.bf16 %v3785_v0, %v3777_v17  ;;  %v4033_v52 = vcvt.s32.f32 %v3009_v47  ;;  %v2609_v45 = vunpack.c.2.s8 %v1905_v57  ;;  %v2617_v59 = vunpack.c.3.s8 %v1905_v57  ;;  %v10406_v42 = vpop.f32.mrf.mxu0 }
 0x3b8   :  { %5145 = vmatpush.bf16.msrb.mxu0 %v4369_v28  ;;  %v4497_v10 = vpack.c.bf16 %v3913_v61, %v3905_v48  ;;  %v4041_v12 = vcvt.s32.f32 %v3017_v7  ;;  %v2737_v14 = vunpack.c.2.s8 %v1937_v51  ;;  %v2745_v44 = vunpack.c.3.s8 %v1937_v51  ;;  %v1961_v28 = vld [vmem:[#allocation2 + $0x668] sm:$0xff] }
 0x3b9   :  { %5158 = vmatpush.bf16.msrb.mxu1 %v4433_v20  ;;  %v3633_v25 = vcvt.s32.f32 %v2609_v45  ;;  %v3641_v33 = vcvt.s32.f32 %v2617_v59  ;;  %v2865_v31 = vunpack.c.2.s8 %v1969_v2  ;;  %v2873_v29 = vunpack.c.3.s8 %v1969_v2  ;;  %v1993_v20 = vld [vmem:[#allocation2 + $0x768] sm:$0xff] }
 0x3ba   :  { %5171 = vmatpush.bf16.msrb.mxu2 %v4497_v10  ;;  %v4561_v39 = vpack.c.bf16 %v4041_v12, %v4033_v52  ;;  %v3761_v13 = vcvt.s32.f32 %v2737_v14  ;;  %v3769_v54 = vcvt.s32.f32 %v2745_v44  ;;  %v2993_v19 = vunpack.c.2.s8 %v2001_v23 }
 0x3bb   :  { %v4361_v24 = vpack.c.bf16 %v3641_v33, %v3633_v25  ;;  %v3889_v36 = vcvt.s32.f32 %v2865_v31  ;;  %v3897_v8 = vcvt.s32.f32 %v2873_v29  ;;  %v3001_v15 = vunpack.c.3.s8 %v2001_v23 }
 0x3bc   :  { %5184 = vmatpush.bf16.msrb.mxu3 %v4561_v39  ;;  %v4425_v26 = vpack.c.bf16 %v3769_v54, %v3761_v13  ;;  %v4017_v49 = vcvt.s32.f32 %v2993_v19  ;;  %v2593_v30 = vunpack.c.0.s8 %v1905_v57  ;;  %v2601_v37 = vunpack.c.1.s8 %v1905_v57  ;;  %v10408_v57 = vpop.f32.mrf.mxu1  ;;  %v10410_v39 = vpop.f32.mrf.mxu2 }
 0x3bd   :  { %5146 = vmatpush.bf16.msrb.mxu0 %v4361_v24  ;;  %v4489_v38 = vpack.c.bf16 %v3897_v8, %v3889_v36  ;;  %v4025_v18 = vcvt.s32.f32 %v3001_v15  ;;  %v2721_v4 = vunpack.c.0.s8 %v1937_v51  ;;  %v2729_v56 = vunpack.c.1.s8 %v1937_v51  ;;  %v10412_v13 = vpop.f32.mrf.mxu3 }
 0x3be   :  { %5159 = vmatpush.bf16.msrb.mxu1 %v4425_v26  ;;  %v3617_v22 = vcvt.s32.f32 %v2593_v30  ;;  %v3625_v58 = vcvt.s32.f32 %v2601_v37  ;;  %v2849_v53 = vunpack.c.0.s8 %v1969_v2  ;;  %v2857_v34 = vunpack.c.1.s8 %v1969_v2 }
 0x3bf   :  { %5172 = vmatpush.bf16.msrb.mxu2 %v4489_v38  ;;  %v4553_v41 = vpack.c.bf16 %v4025_v18, %v4017_v49  ;;  %v3745_v40 = vcvt.s32.f32 %v2721_v4  ;;  %v3753_v62 = vcvt.s32.f32 %v2729_v56  ;;  %v2977_v5 = vunpack.c.0.s8 %v2001_v23  ;;  %v4895_v4 = vpop.f32.mrf.mxu0 }
 0x3c0   :  { %v4353_v17 = vpack.c.bf16 %v3625_v58, %v3617_v22  ;;  %v3873_v0 = vcvt.s32.f32 %v2849_v53  ;;  %v3881_v47 = vcvt.s32.f32 %v2857_v34  ;;  %v2985_v51 = vunpack.c.1.s8 %v2001_v23 }
 0x3c1   :  { %5185 = vmatpush.bf16.msrb.mxu3 %v4553_v41  ;;  %v4417_v48 = vpack.c.bf16 %v3753_v62, %v3745_v40  ;;  %v4001_v61 = vcvt.s32.f32 %v2977_v5  ;;  %v2577_v7 = vunpack.c.2.s8 %v1897_v60  ;;  %v2585_v2 = vunpack.c.3.s8 %v1897_v60  ;;  %v1889_v41 = vld [vmem:[#allocation2 + $0x428] sm:$0xff] }
 0x3c2   :  { %5147 = vmatpush.bf16.msrb.mxu0 %v4353_v17  ;;  %v4481_v52 = vpack.c.bf16 %v3881_v47, %v3873_v0  ;;  %v4009_v45 = vcvt.s32.f32 %v2985_v51  ;;  %v2705_v59 = vunpack.c.2.s8 %v1929_v50  ;;  %v2713_v10 = vunpack.c.3.s8 %v1929_v50  ;;  %v1921_v0 = vld [vmem:[#allocation2 + $0x528] sm:$0xff] }
 0x3c3   :  { %5160 = vmatpush.bf16.msrb.mxu1 %v4417_v48  ;;  %v3601_v12 = vcvt.s32.f32 %v2577_v7  ;;  %v3609_v14 = vcvt.s32.f32 %v2585_v2  ;;  %v2833_v44 = vunpack.c.2.s8 %v1961_v28  ;;  %v2841_v25 = vunpack.c.3.s8 %v1961_v28 }
 0x3c4   :  { %5173 = vmatpush.bf16.msrb.mxu2 %v4481_v52  ;;  %v4545_v33 = vpack.c.bf16 %v4009_v45, %v4001_v61  ;;  %v3729_v23 = vcvt.s32.f32 %v2705_v59  ;;  %v3737_v31 = vcvt.s32.f32 %v2713_v10  ;;  %v2961_v29 = vunpack.c.2.s8 %v1993_v20  ;;  %v4908_v56 = vpop.f32.mrf.mxu1  ;;  %v1953_v61 = vld [vmem:[#allocation2 + $0x628] sm:$0xff] }
 0x3c5   :  { %v4345_v54 = vpack.c.bf16 %v3609_v14, %v3601_v12  ;;  %v3857_v19 = vcvt.s32.f32 %v2833_v44  ;;  %v3865_v24 = vcvt.s32.f32 %v2841_v25  ;;  %v2969_v36 = vunpack.c.3.s8 %v1993_v20  ;;  %v1985_v45 = vld [vmem:[#allocation2 + $0x728] sm:$0xff]  ;;  %v4921_v14 = vpop.f32.mrf.mxu2  ;;  %v4934_v44 = vpop.f32.mrf.mxu3 }
 0x3c6   :  { %5186 = vmatpush.bf16.msrb.mxu3 %v4545_v33  ;;  %v4409_v8 = vpack.c.bf16 %v3737_v31, %v3729_v23  ;;  %v3985_v15 = vcvt.s32.f32 %v2961_v29  ;;  %v2561_v26 = vunpack.c.0.s8 %v1897_v60  ;;  %v2569_v49 = vunpack.c.1.s8 %v1897_v60 }
 0x3c7   :  { %5148 = vmatpush.bf16.msrb.mxu0 %v4345_v54  ;;  %v4473_v30 = vpack.c.bf16 %v3865_v24, %v3857_v19  ;;  %v3993_v37 = vcvt.s32.f32 %v2969_v36  ;;  %v2689_v38 = vunpack.c.0.s8 %v1929_v50  ;;  %v2697_v18 = vunpack.c.1.s8 %v1929_v50 }
 0x3c8   :  { %5161 = vmatpush.bf16.msrb.mxu1 %v4409_v8  ;;  %v3585_v22 = vcvt.s32.f32 %v2561_v26  ;;  %v3593_v58 = vcvt.s32.f32 %v2569_v49  ;;  %v2817_v53 = vunpack.c.0.s8 %v1961_v28  ;;  %v2825_v34 = vunpack.c.1.s8 %v1961_v28 }
 0x3c9   :  { %5174 = vmatpush.bf16.msrb.mxu2 %v4473_v30  ;;  %v4537_v40 = vpack.c.bf16 %v3993_v37, %v3985_v15  ;;  %v3713_v62 = vcvt.s32.f32 %v2689_v38  ;;  %v3721_v5 = vcvt.s32.f32 %v2697_v18  ;;  %v2945_v17 = vunpack.c.0.s8 %v1993_v20 }
 0x3ca   :  { %v4337_v60 = vpack.c.bf16 %v3593_v58, %v3585_v22  ;;  %v3841_v47 = vcvt.s32.f32 %v2817_v53  ;;  %v3849_v51 = vcvt.s32.f32 %v2825_v34  ;;  %v2953_v48 = vunpack.c.1.s8 %v1993_v20 }
 0x3cb   :  { %5187 = vmatpush.bf16.msrb.mxu3 %v4537_v40  ;;  %v4401_v50 = vpack.c.bf16 %v3721_v5, %v3713_v62  ;;  %v3969_v7 = vcvt.s32.f32 %v2945_v17  ;;  %v2545_v2 = vunpack.c.2.s8 %v1889_v41  ;;  %v2553_v52 = vunpack.c.3.s8 %v1889_v41  ;;  %v10414_v40 = vld [vmem:[#allocation2 + $0xf0] sm:$0xff] }
 0x3cc   :  { %5149 = vmatpush.bf16.msrb.mxu0 %v4337_v60  ;;  %v4465_v28 = vpack.c.bf16 %v3849_v51, %v3841_v47  ;;  %v3977_v59 = vcvt.s32.f32 %v2953_v48  ;;  %v2673_v10 = vunpack.c.2.s8 %v1921_v0  ;;  %v2681_v12 = vunpack.c.3.s8 %v1921_v0  ;;  %v1818_v47 = vld [vmem:[#allocation2 + $0x1f0] sm:$0xff]  ;;  %v10416_v51 = vpop.f32.mrf.mxu0 }
 0x3cd   :  { %5162 = vmatpush.bf16.msrb.mxu1 %v4401_v50  ;;  %v3569_v25 = vcvt.s32.f32 %v2545_v2  ;;  %v3577_v33 = vcvt.s32.f32 %v2553_v52  ;;  %v2801_v23 = vunpack.c.2.s8 %v1953_v61  ;;  %v2809_v31 = vunpack.c.3.s8 %v1953_v61  ;;  %v1850_v2 = vld [vmem:[#allocation2 + $0x2f0] sm:$0xff] }
 0x3ce   :  { %5175 = vmatpush.bf16.msrb.mxu2 %v4465_v28  ;;  %v4529_v20 = vpack.c.bf16 %v3977_v59, %v3969_v7  ;;  %v3697_v29 = vcvt.s32.f32 %v2673_v10  ;;  %v3705_v54 = vcvt.s32.f32 %v2681_v12  ;;  %v2929_v19 = vunpack.c.2.s8 %v1985_v45  ;;  %v1882_v10 = vld [vmem:[#allocation2 + $0x3f0] sm:$0xff] }
 0x3cf   :  { %v4329_v24 = vpack.c.bf16 %v3577_v33, %v3569_v25  ;;  %v3825_v36 = vcvt.s32.f32 %v2801_v23  ;;  %v3833_v8 = vcvt.s32.f32 %v2809_v31  ;;  %v2937_v15 = vunpack.c.3.s8 %v1985_v45 }
 0x3d0   :  { %5188 = vmatpush.bf16.msrb.mxu3 %v4529_v20  ;;  %v4393_v26 = vpack.c.bf16 %v3705_v54, %v3697_v29  ;;  %v3953_v49 = vcvt.s32.f32 %v2929_v19  ;;  %v2529_v30 = vunpack.c.0.s8 %v1889_v41  ;;  %v2537_v37 = vunpack.c.1.s8 %v1889_v41  ;;  %v10418_v41 = vpop.f32.mrf.mxu1 }
 0x3d1   :  { %5150 = vmatpush.bf16.msrb.mxu0 %v4329_v24  ;;  %v4457_v38 = vpack.c.bf16 %v3833_v8, %v3825_v36  ;;  %v3961_v18 = vcvt.s32.f32 %v2937_v15  ;;  %v2657_v4 = vunpack.c.0.s8 %v1921_v0  ;;  %v2665_v56 = vunpack.c.1.s8 %v1921_v0 }
 0x3d2   :  { %5163 = vmatpush.bf16.msrb.mxu1 %v4393_v26  ;;  %v3553_v22 = vcvt.s32.f32 %v2529_v30  ;;  %v3561_v58 = vcvt.s32.f32 %v2537_v37  ;;  %v2785_v53 = vunpack.c.0.s8 %v1953_v61  ;;  %v2793_v34 = vunpack.c.1.s8 %v1953_v61  ;;  %v10423_v26 = vpop.f32.mrf.mxu2 }
 0x3d3   :  { %5176 = vmatpush.bf16.msrb.mxu2 %v4457_v38  ;;  %v4521_v62 = vpack.c.bf16 %v3961_v18, %v3953_v49  ;;  %v3681_v5 = vcvt.s32.f32 %v2657_v4  ;;  %v3689_v17 = vcvt.s32.f32 %v2665_v56  ;;  %v2913_v60 = vunpack.c.0.s8 %v1985_v45  ;;  %v10425_v49 = vpop.f32.mrf.mxu3 }
 0x3d4   :  { %v4321_v48 = vpack.c.bf16 %v3561_v58, %v3553_v22  ;;  %v3809_v50 = vcvt.s32.f32 %v2785_v53  ;;  %v3817_v0 = vcvt.s32.f32 %v2793_v34  ;;  %v2921_v7 = vunpack.c.1.s8 %v1985_v45  ;;  %v4947_v53 = vpop.f32.mrf.mxu0 }
 0x3d5   :  { %5189 = vmatpush.bf16.msrb.mxu3 %v4521_v62  ;;  %v4385_v52 = vpack.c.bf16 %v3689_v17, %v3681_v5  ;;  %v3937_v61 = vcvt.s32.f32 %v2913_v60  ;;  %v2130_v28 = vunpack.c.2.s8 %v10414_v40  ;;  %v2138_v59 = vunpack.c.3.s8 %v10414_v40 }
 0x3d6   :  { %5151 = vmatpush.bf16.msrb.mxu0 %v4321_v48  ;;  %v4449_v12 = vpack.c.bf16 %v3817_v0, %v3809_v50  ;;  %v3945_v14 = vcvt.s32.f32 %v2921_v7  ;;  %v2258_v44 = vunpack.c.2.s8 %v1818_v47  ;;  %v2266_v25 = vunpack.c.3.s8 %v1818_v47 }
 0x3d7   :  { %5164 = vmatpush.bf16.msrb.mxu1 %v4385_v52  ;;  %v3154_v33 = vcvt.s32.f32 %v2130_v28  ;;  %v3162_v23 = vcvt.s32.f32 %v2138_v59  ;;  %v2386_v31 = vunpack.c.2.s8 %v1850_v2  ;;  %v2394_v20 = vunpack.c.3.s8 %v1850_v2  ;;  %v1810_v28 = vld [vmem:[#allocation2 + $0x1b0] sm:$0xff] }
 0x3d8   :  { %5177 = vmatpush.bf16.msrb.mxu2 %v4449_v12  ;;  %v4513_v45 = vpack.c.bf16 %v3945_v14, %v3937_v61  ;;  %v3282_v29 = vcvt.s32.f32 %v2258_v44  ;;  %v3290_v54 = vcvt.s32.f32 %v2266_v25  ;;  %v2514_v19 = vunpack.c.2.s8 %v1882_v10  ;;  %v4960_v34 = vpop.f32.mrf.mxu1 }
 0x3d9   :  { %v4122_v24 = vpack.c.bf16 %v3162_v23, %v3154_v33  ;;  %v3410_v36 = vcvt.s32.f32 %v2386_v31  ;;  %v3418_v8 = vcvt.s32.f32 %v2394_v20  ;;  %v2522_v15 = vunpack.c.3.s8 %v1882_v10  ;;  %5152 = vmatmul.bf16.vlgmr.msrb.gmra.mxu0 %v10207_v9  ;;  %v1874_v31 = vld [vmem:[#allocation2 + $0x3b0] sm:$0xff] }
 0x3da   :  { %5190 = vmatpush.bf16.msrb.mxu3 %v4513_v45  ;;  %v4186_v30 = vpack.c.bf16 %v3290_v54, %v3282_v29  ;;  %v3538_v37 = vcvt.s32.f32 %v2514_v19  ;;  %v4907_v38 = vadd.f32 %v10408_v57, %v10406_v42  ;;  %v2114_v18 = vunpack.c.0.s8 %v10414_v40  ;;  %5165 = vmatmul.bf16.vlgmr.msrb.gmra.mxu1 %v10222_v35  ;;  %v1778_v42 = vld [vmem:[#allocation2 + $0xb0] sm:$0xff]  ;;  %v4973_v54 = vpop.f32.mrf.mxu2 }
 0x3db   :  { %5196 = vmatpush.bf16.msra.mxu0 %v4122_v24  ;;  %v4250_v4 = vpack.c.bf16 %v3418_v8, %v3410_v36  ;;  %v3546_v56 = vcvt.s32.f32 %v2522_v15  ;;  %v2122_v22 = vunpack.c.1.s8 %v10414_v40  ;;  %v2242_v58 = vunpack.c.0.s8 %v1818_v47  ;;  %5178 = vmatmul.bf16.vlgmr.msrb.gmra.mxu2 %v10203_v3  ;;  %v4986_v19 = vpop.f32.mrf.mxu3 }
 0x3dc   :  { %5209 = vmatpush.bf16.msra.mxu1 %v4186_v30  ;;  %v3138_v62 = vcvt.s32.f32 %v2114_v18  ;;  %v2250_v5 = vunpack.c.1.s8 %v1818_v47  ;;  %v2370_v17 = vunpack.c.0.s8 %v1850_v2  ;;  %v2378_v60 = vunpack.c.1.s8 %v1850_v2  ;;  %v1842_v2 = vld [vmem:[#allocation2 + $0x2b0] sm:$0xff] }
 0x3dd   :  { %5222 = vmatpush.bf16.msra.mxu2 %v4250_v4  ;;  %v4314_v57 = vpack.c.bf16 %v3546_v56, %v3538_v37  ;;  %v3146_v48 = vcvt.s32.f32 %v2122_v22  ;;  %v3266_v50 = vcvt.s32.f32 %v2242_v58  ;;  %v2498_v0 = vunpack.c.0.s8 %v1882_v10  ;;  %5191 = vmatmul.bf16.vlgmr.msrb.gmra.mxu3 %v10214_v11 }
 0x3de   :  { %v3274_v7 = vcvt.s32.f32 %v2250_v5  ;;  %v3394_v40 = vcvt.s32.f32 %v2370_v17  ;;  %v3402_v52 = vcvt.s32.f32 %v2378_v60  ;;  %v2506_v61 = vunpack.c.1.s8 %v1882_v10 }
 0x3df   :  { %5235 = vmatpush.bf16.msra.mxu3 %v4314_v57  ;;  %v4114_v59 = vpack.c.bf16 %v3146_v48, %v3138_v62  ;;  %v3522_v12 = vcvt.s32.f32 %v2498_v0  ;;  %v4920_v47 = vadd.f32 %v10410_v39, %v4907_v38  ;;  %v2098_v14 = vunpack.c.2.s8 %v1778_v42  ;;  %v1770_v57 = vld [vmem:[#allocation2 + $0x70] sm:$0xff] }
 0x3e0   :  { %v4178_v44 = vpack.c.bf16 %v3274_v7, %v3266_v50  ;;  %v4242_v25 = vpack.c.bf16 %v3402_v52, %v3394_v40  ;;  %v3530_v33 = vcvt.s32.f32 %v2506_v61  ;;  %v2106_v23 = vunpack.c.3.s8 %v1778_v42 }
 0x3e1   :  { %5197 = vmatpush.bf16.msra.mxu0 %v4114_v59  ;;  %v10436_v20 = vadd.f32 %v10412_v13, %v4920_v47  ;;  %v3122_v45 = vcvt.s32.f32 %v2098_v14  ;;  %v2226_v29 = vunpack.c.2.s8 %v1810_v28  ;;  %v2234_v10 = vunpack.c.3.s8 %v1810_v28 }
 0x3e2   :  { %5210 = vmatpush.bf16.msra.mxu1 %v4178_v44  ;;  %5223 = vmatpush.bf16.msra.mxu2 %v4242_v25  ;;  %v4306_v24 = vpack.c.bf16 %v3530_v33, %v3522_v12  ;;  %v3130_v39 = vcvt.s32.f32 %v2106_v23  ;;  %v2354_v36 = vunpack.c.2.s8 %v1842_v2  ;;  %v2362_v8 = vunpack.c.3.s8 %v1842_v2  ;;  %v1802_v12 = vld [vmem:[#allocation2 + $0x170] sm:$0xff] }
 0x3e3   :  { %v3250_v15 = vcvt.s32.f32 %v2226_v29  ;;  %v3258_v30 = vcvt.s32.f32 %v2234_v10  ;;  %v2482_v37 = vunpack.c.2.s8 %v1874_v31  ;;  %v2490_v38 = vunpack.c.3.s8 %v1874_v31  ;;  %v1834_v25 = vld [vmem:[#allocation2 + $0x270] sm:$0xff] }
 0x3e4   :  { %5236 = vmatpush.bf16.msra.mxu3 %v4306_v24  ;;  %v4106_v18 = vpack.c.bf16 %v3130_v39, %v3122_v45  ;;  %v3378_v4 = vcvt.s32.f32 %v2354_v36  ;;  %v3386_v13 = vcvt.s32.f32 %v2362_v8  ;;  %v2082_v56 = vunpack.c.0.s8 %v1778_v42  ;;  %v1866_v29 = vld [vmem:[#allocation2 + $0x370] sm:$0xff] }
 0x3e5   :  { %v4170_v22 = vpack.c.bf16 %v3258_v30, %v3250_v15  ;;  %v3506_v58 = vcvt.s32.f32 %v2482_v37  ;;  %v3514_v53 = vcvt.s32.f32 %v2490_v38  ;;  %v2090_v34 = vunpack.c.1.s8 %v1778_v42 }
 0x3e6   :  { %5198 = vmatpush.bf16.msra.mxu0 %v4106_v18  ;;  %v4234_v62 = vpack.c.bf16 %v3386_v13, %v3378_v4  ;;  %v3106_v5 = vcvt.s32.f32 %v2082_v56  ;;  %v2210_v17 = vunpack.c.0.s8 %v1810_v28  ;;  %v2218_v60 = vunpack.c.1.s8 %v1810_v28 }
 0x3e7   :  { %5211 = vmatpush.bf16.msra.mxu1 %v4170_v22  ;;  %v4298_v48 = vpack.c.bf16 %v3514_v53, %v3506_v58  ;;  %v3114_v50 = vcvt.s32.f32 %v2090_v34  ;;  %v2338_v0 = vunpack.c.0.s8 %v1842_v2  ;;  %v2346_v7 = vunpack.c.1.s8 %v1842_v2 }
 0x3e8   :  { %5224 = vmatpush.bf16.msra.mxu2 %v4234_v62  ;;  %v3234_v40 = vcvt.s32.f32 %v2210_v17  ;;  %v3242_v52 = vcvt.s32.f32 %v2218_v60  ;;  %v2466_v61 = vunpack.c.0.s8 %v1874_v31  ;;  %v2474_v59 = vunpack.c.1.s8 %v1874_v31 }
 0x3e9   :  { %5237 = vmatpush.bf16.msra.mxu3 %v4298_v48  ;;  %v4098_v47 = vpack.c.bf16 %v3114_v50, %v3106_v5  ;;  %v3362_v42 = vcvt.s32.f32 %v2338_v0  ;;  %v3370_v14 = vcvt.s32.f32 %v2346_v7  ;;  %v2066_v44 = vunpack.c.2.s8 %v1770_v57 }
 0x3ea   :  { %v4162_v33 = vpack.c.bf16 %v3242_v52, %v3234_v40  ;;  %v3490_v28 = vcvt.s32.f32 %v2466_v61  ;;  %v3498_v23 = vcvt.s32.f32 %v2474_v59  ;;  %v2074_v45 = vunpack.c.3.s8 %v1770_v57 }
 0x3eb   :  { %5199 = vmatpush.bf16.msra.mxu0 %v4098_v47  ;;  %v4226_v10 = vpack.c.bf16 %v3370_v14, %v3362_v42  ;;  %v3090_v2 = vcvt.s32.f32 %v2066_v44  ;;  %v2194_v54 = vunpack.c.2.s8 %v1802_v12  ;;  %v2202_v19 = vunpack.c.3.s8 %v1802_v12  ;;  %v1762_v42 = vld [vmem:[#allocation2 + $0x30] sm:$0xff] }
 0x3ec   :  { %5212 = vmatpush.bf16.msra.mxu1 %v4162_v33  ;;  %v4290_v24 = vpack.c.bf16 %v3498_v23, %v3490_v28  ;;  %v3098_v31 = vcvt.s32.f32 %v2074_v45  ;;  %v2322_v39 = vunpack.c.2.s8 %v1834_v25  ;;  %v2330_v36 = vunpack.c.3.s8 %v1834_v25 }
 0x3ed   :  { %5225 = vmatpush.bf16.msra.mxu2 %v4226_v10  ;;  %v3218_v8 = vcvt.s32.f32 %v2194_v54  ;;  %v3226_v15 = vcvt.s32.f32 %v2202_v19  ;;  %v2450_v30 = vunpack.c.2.s8 %v1866_v29  ;;  %v2458_v37 = vunpack.c.3.s8 %v1866_v29 }
 0x3ee   :  { %5238 = vmatpush.bf16.msra.mxu3 %v4290_v24  ;;  %v4090_v38 = vpack.c.bf16 %v3098_v31, %v3090_v2  ;;  %v3346_v18 = vcvt.s32.f32 %v2322_v39  ;;  %v3354_v4 = vcvt.s32.f32 %v2330_v36  ;;  %v4946_v13 = vadd.f32 %v10416_v51, %v10436_v20 }
 0x3ef   :  { %v4154_v56 = vpack.c.bf16 %v3226_v15, %v3218_v8  ;;  %v3474_v22 = vcvt.s32.f32 %v2450_v30  ;;  %v3482_v58 = vcvt.s32.f32 %v2458_v37  ;;  %v2050_v53 = vunpack.c.0.s8 %v1770_v57 }
 0x3f0   :  { %5200 = vmatpush.bf16.msra.mxu0 %v4090_v38  ;;  %v4218_v34 = vpack.c.bf16 %v3354_v4, %v3346_v18  ;;  %v4959_v62 = vadd.f32 %v10418_v41, %v4946_v13  ;;  %v2058_v5 = vunpack.c.1.s8 %v1770_v57  ;;  %v2178_v17 = vunpack.c.0.s8 %v1802_v12  ;;  %v1794_v41 = vld [vmem:[#allocation2 + $0x130] sm:$0xff] }
 0x3f1   :  { %5213 = vmatpush.bf16.msra.mxu1 %v4154_v56  ;;  %v4282_v60 = vpack.c.bf16 %v3482_v58, %v3474_v22  ;;  %v3074_v48 = vcvt.s32.f32 %v2050_v53  ;;  %v2186_v50 = vunpack.c.1.s8 %v1802_v12  ;;  %v2306_v0 = vunpack.c.0.s8 %v1834_v25  ;;  %v1826_v12 = vld [vmem:[#allocation2 + $0x230] sm:$0xff] }
 0x3f2   :  { %5226 = vmatpush.bf16.msra.mxu2 %v4218_v34  ;;  %v3082_v7 = vcvt.s32.f32 %v2058_v5  ;;  %v3202_v40 = vcvt.s32.f32 %v2178_v17  ;;  %v2314_v52 = vunpack.c.1.s8 %v1834_v25  ;;  %v2434_v51 = vunpack.c.0.s8 %v1866_v29 }
 0x3f3   :  { %5239 = vmatpush.bf16.msra.mxu3 %v4282_v60  ;;  %v3210_v20 = vcvt.s32.f32 %v2186_v50  ;;  %v3330_v61 = vcvt.s32.f32 %v2306_v0  ;;  %v2442_v59 = vunpack.c.1.s8 %v1866_v29  ;;  %v4972_v47 = vadd.f32 %v10423_v26, %v4959_v62  ;;  %v1858_v26 = vld [vmem:[#allocation2 + $0x330] sm:$0xff] }
 0x3f4   :  { %v4082_v57 = vpack.c.bf16 %v3082_v7, %v3074_v48  ;;  %v3338_v14 = vcvt.s32.f32 %v2314_v52  ;;  %v3458_v44 = vcvt.s32.f32 %v2434_v51  ;;  %v5409_v33 = vperm.slane %v10393_v16, 3  ;;  %v1914_v60 = vld [vmem:[#allocation2 + $0x4f0] sm:$0xff] }
 0x3f5   :  { %v4146_v28 = vpack.c.bf16 %v3210_v20, %v3202_v40  ;;  %v3466_v23 = vcvt.s32.f32 %v2442_v59  ;;  %v4985_v45 = vadd.f32 %v10425_v49, %v4972_v47  ;;  %v5435_v25 = vperm.slane %v10396_v63, 3 }
 0x3f6   :  { %5201 = vmatpush.bf16.msra.mxu0 %v4082_v57  ;;  %v4210_v10 = vpack.c.bf16 %v3338_v14, %v3330_v61  ;;  %v2034_v2 = vunpack.c.2.s8 %v1762_v42  ;;  %v2042_v29 = vunpack.c.3.s8 %v1762_v42  ;;  %v2162_v54 = vunpack.c.2.s8 %v1794_v41  ;;  %v1946_v61 = vld [vmem:[#allocation2 + $0x5f0] sm:$0xff] }
 0x3f7   :  { %5214 = vmatpush.bf16.msra.mxu1 %v4146_v28  ;;  %v4274_v19 = vpack.c.bf16 %v3466_v23, %v3458_v44  ;;  %v5425_v24 = vmul.f32 %v5409_v33, %v4985_v45  ;;  %v2170_v31 = vunpack.c.3.s8 %v1794_v41  ;;  %v2290_v39 = vunpack.c.2.s8 %v1826_v12  ;;  %v1978_v14 = vld [vmem:[#allocation2 + $0x6f0] sm:$0xff] }
 0x3f8   :  { %5227 = vmatpush.bf16.msra.mxu2 %v4210_v10  ;;  %v3058_v16 = vcvt.s32.f32 %v2034_v2  ;;  %v3066_v36 = vcvt.s32.f32 %v2042_v29  ;;  %v3186_v8 = vcvt.s32.f32 %v2162_v54  ;;  %v2298_v15 = vunpack.c.3.s8 %v1826_v12  ;;  %v2010_v23 = vld [vmem:[#allocation2 + $0x7f0] sm:$0xff] }
 0x3f9   :  { %5240 = vmatpush.bf16.msra.mxu3 %v4274_v19  ;;  %v10445_v49 = vadd.f32 %v5435_v25, %v5425_v24  ;;  %v3194_v63 = vcvt.s32.f32 %v2170_v31  ;;  %v3314_v30 = vcvt.s32.f32 %v2290_v39  ;;  %v2418_v37 = vunpack.c.2.s8 %v1858_v26 }
 0x3fa   :  { %v4074_v38 = vpack.c.bf16 %v3066_v36, %v3058_v16  ;;  %v3322_v18 = vcvt.s32.f32 %v2298_v15  ;;  %v2426_v4 = vunpack.c.3.s8 %v1858_v26  ;;  %v2018_v13 = vunpack.c.0.s8 %v1762_v42 }
 0x3fb   :  { %v4138_v56 = vpack.c.bf16 %v3194_v63, %v3186_v8  ;;  %v3442_v22 = vcvt.s32.f32 %v2418_v37  ;;  %v2026_v58 = vunpack.c.1.s8 %v1762_v42  ;;  %v2146_v53 = vunpack.c.0.s8 %v1794_v41 }
 0x3fc   :  { %5202 = vmatpush.bf16.msra.mxu0 %v4074_v38  ;;  %v4202_v34 = vpack.c.bf16 %v3322_v18, %v3314_v30  ;;  %v3450_v62 = vcvt.s32.f32 %v2426_v4  ;;  %v3042_v5 = vcvt.s32.f32 %v2018_v13  ;;  %v2154_v17 = vunpack.c.1.s8 %v1794_v41 }
 0x3fd   :  { %5215 = vmatpush.bf16.msra.mxu1 %v4138_v56  ;;  %v3050_v48 = vcvt.s32.f32 %v2026_v58  ;;  %v3170_v50 = vcvt.s32.f32 %v2146_v53  ;;  %v2274_v0 = vunpack.c.0.s8 %v1826_v12  ;;  %v2282_v7 = vunpack.c.1.s8 %v1826_v12 }
 0x3fe   :  { %5228 = vmatpush.bf16.msra.mxu2 %v4202_v34  ;;  %v4266_v40 = vpack.c.bf16 %v3450_v62, %v3442_v22  ;;  %v3178_v52 = vcvt.s32.f32 %v2154_v17  ;;  %v2402_v51 = vunpack.c.0.s8 %v1858_v26  ;;  %v2410_v20 = vunpack.c.1.s8 %v1858_v26  ;;  %v1906_v22 = vld [vmem:[#allocation2 + $0x4b0] sm:$0xff] }
 0x3ff   :  { %v4066_v59 = vpack.c.bf16 %v3050_v48, %v3042_v5  ;;  %v3298_v47 = vcvt.s32.f32 %v2274_v0  ;;  %v3306_v42 = vcvt.s32.f32 %v2282_v7  ;;  %v2642_v57 = vunpack.c.2.s8 %v1914_v60 }
 0x400   :  { %5241 = vmatpush.bf16.msra.mxu3 %v4266_v40  ;;  %v4130_v44 = vpack.c.bf16 %v3178_v52, %v3170_v50  ;;  %v3426_v41 = vcvt.s32.f32 %v2402_v51  ;;  %v3434_v33 = vcvt.s32.f32 %v2410_v20  ;;  %v2650_v28 = vunpack.c.3.s8 %v1914_v60  ;;  %v1938_v50 = vld [vmem:[#allocation2 + $0x5b0] sm:$0xff] }
 0x401   :  { %5203 = vmatpush.bf16.msra.mxu0 %v4066_v59  ;;  %v4194_v45 = vpack.c.bf16 %v3306_v42, %v3298_v47  ;;  %v3666_v12 = vcvt.s32.f32 %v2642_v57  ;;  %v2770_v25 = vunpack.c.2.s8 %v1946_v61  ;;  %v2778_v10 = vunpack.c.3.s8 %v1946_v61  ;;  %v1970_v51 = vld [vmem:[#allocation2 + $0x6b0] sm:$0xff] }
 0x402   :  { %5216 = vmatpush.bf16.msra.mxu1 %v4130_v44  ;;  %v4258_v2 = vpack.c.bf16 %v3434_v33, %v3426_v41  ;;  %v3674_v29 = vcvt.s32.f32 %v2650_v28  ;;  %v2898_v54 = vunpack.c.2.s8 %v1978_v14  ;;  %v2906_v26 = vunpack.c.3.s8 %v1978_v14  ;;  %v2002_v42 = vld [vmem:[#allocation2 + $0x7b0] sm:$0xff] }
 0x403   :  { %5229 = vmatpush.bf16.msra.mxu2 %v4194_v45  ;;  %v3794_v19 = vcvt.s32.f32 %v2770_v25  ;;  %v3802_v24 = vcvt.s32.f32 %v2778_v10  ;;  %v3026_v31 = vunpack.c.2.s8 %v2010_v23  ;;  %v3034_v39 = vunpack.c.3.s8 %v2010_v23 }
 0x404   :  { %5242 = vmatpush.bf16.msra.mxu3 %v4258_v2  ;;  %v4378_v16 = vpack.c.bf16 %v3674_v29, %v3666_v12  ;;  %v3922_v36 = vcvt.s32.f32 %v2898_v54  ;;  %v3930_v8 = vcvt.s32.f32 %v2906_v26  ;;  %v2626_v15 = vunpack.c.0.s8 %v1914_v60  ;;  %5204 = vmatmul.bf16.vlgmr.msra.gmra.mxu0 %v10188_v27 }
 0x405   :  { %v4442_v63 = vpack.c.bf16 %v3802_v24, %v3794_v19  ;;  %v4050_v30 = vcvt.s32.f32 %v3026_v31  ;;  %v4058_v37 = vcvt.s32.f32 %v3034_v39  ;;  %v2634_v38 = vunpack.c.1.s8 %v1914_v60  ;;  %5217 = vmatmul.bf16.vlgmr.msra.gmra.mxu1 %v10197_v43 }
 0x406   :  { %5248 = vmatpush.bf16.msrb.mxu0 %v4378_v16  ;;  %v4506_v18 = vpack.c.bf16 %v3930_v8, %v3922_v36  ;;  %v3650_v4 = vcvt.s32.f32 %v2626_v15  ;;  %v2754_v13 = vunpack.c.0.s8 %v1946_v61  ;;  %v2762_v56 = vunpack.c.1.s8 %v1946_v61  ;;  %5230 = vmatmul.bf16.vlgmr.msra.gmra.mxu2 %v10183_v6 }
 0x407   :  { %5261 = vmatpush.bf16.msrb.mxu1 %v4442_v63  ;;  %v4570_v58 = vpack.c.bf16 %v4058_v37, %v4050_v30  ;;  %v3658_v53 = vcvt.s32.f32 %v2634_v38  ;;  %v2882_v34 = vunpack.c.0.s8 %v1978_v14  ;;  %v2890_v62 = vunpack.c.1.s8 %v1978_v14  ;;  %5243 = vmatmul.bf16.vlgmr.msra.gmra.mxu3 %v10192_v1  ;;  %v1898_v30 = vld [vmem:[#allocation2 + $0x470] sm:$0xff] }
 0x408   :  { %5274 = vmatpush.bf16.msrb.mxu2 %v4506_v18  ;;  %v3778_v5 = vcvt.s32.f32 %v2754_v13  ;;  %v3786_v17 = vcvt.s32.f32 %v2762_v56  ;;  %v3010_v60 = vunpack.c.0.s8 %v2010_v23  ;;  %v3018_v48 = vunpack.c.1.s8 %v2010_v23  ;;  %v10451_v13 = vpop.f32.mrf.mxu0  ;;  %v10453_v56 = vpop.f32.mrf.mxu1 }
 0x409   :  { %5287 = vmatpush.bf16.msrb.mxu3 %v4570_v58  ;;  %v4370_v0 = vpack.c.bf16 %v3658_v53, %v3650_v4  ;;  %v3906_v7 = vcvt.s32.f32 %v2882_v34  ;;  %v3914_v40 = vcvt.s32.f32 %v2890_v62  ;;  %v2610_v52 = vunpack.c.2.s8 %v1906_v22  ;;  %v1930_v62 = vld [vmem:[#allocation2 + $0x570] sm:$0xff] }
 0x40a   :  { %v4434_v20 = vpack.c.bf16 %v3786_v17, %v3778_v5  ;;  %v4034_v61 = vcvt.s32.f32 %v3010_v60  ;;  %v4042_v59 = vcvt.s32.f32 %v3018_v48  ;;  %v2618_v47 = vunpack.c.3.s8 %v1906_v22 }
 0x40b   :  { %5249 = vmatpush.bf16.msrb.mxu0 %v4370_v0  ;;  %v4498_v57 = vpack.c.bf16 %v3914_v40, %v3906_v7  ;;  %v3634_v14 = vcvt.s32.f32 %v2610_v52  ;;  %v2738_v44 = vunpack.c.2.s8 %v1938_v50  ;;  %v2746_v41 = vunpack.c.3.s8 %v1938_v50 }
 0x40c   :  { %5262 = vmatpush.bf16.msrb.mxu1 %v4434_v20  ;;  %v4562_v33 = vpack.c.bf16 %v4042_v59, %v4034_v61  ;;  %v3642_v28 = vcvt.s32.f32 %v2618_v47  ;;  %v2866_v23 = vunpack.c.2.s8 %v1970_v51  ;;  %v2874_v45 = vunpack.c.3.s8 %v1970_v51 }
 0x40d   :  { %5275 = vmatpush.bf16.msrb.mxu2 %v4498_v57  ;;  %v3762_v12 = vcvt.s32.f32 %v2738_v44  ;;  %v3770_v25 = vcvt.s32.f32 %v2746_v41  ;;  %v2994_v10 = vunpack.c.2.s8 %v2002_v42  ;;  %v3002_v2 = vunpack.c.3.s8 %v2002_v42 }
 0x40e   :  { %5288 = vmatpush.bf16.msrb.mxu3 %v4562_v33  ;;  %v4362_v29 = vpack.c.bf16 %v3642_v28, %v3634_v14  ;;  %v3890_v54 = vcvt.s32.f32 %v2866_v23  ;;  %v3898_v26 = vcvt.s32.f32 %v2874_v45  ;;  %v2594_v19 = vunpack.c.0.s8 %v1906_v22  ;;  %v10455_v45 = vpop.f32.mrf.mxu2 }
 0x40f   :  { %v4426_v24 = vpack.c.bf16 %v3770_v25, %v3762_v12  ;;  %v4018_v31 = vcvt.s32.f32 %v2994_v10  ;;  %v4026_v39 = vcvt.s32.f32 %v3002_v2  ;;  %v2602_v16 = vunpack.c.1.s8 %v1906_v22  ;;  %v10457_v12 = vpop.f32.mrf.mxu3 }
 0x410   :  { %5250 = vmatpush.bf16.msrb.mxu0 %v4362_v29  ;;  %v4490_v36 = vpack.c.bf16 %v3898_v26, %v3890_v54  ;;  %v3618_v8 = vcvt.s32.f32 %v2594_v19  ;;  %v2722_v15 = vunpack.c.0.s8 %v1938_v50  ;;  %v2730_v63 = vunpack.c.1.s8 %v1938_v50  ;;  %v1962_v50 = vld [vmem:[#allocation2 + $0x670] sm:$0xff] }
 0x411   :  { %5263 = vmatpush.bf16.msrb.mxu1 %v4426_v24  ;;  %v4554_v37 = vpack.c.bf16 %v4026_v39, %v4018_v31  ;;  %v3626_v38 = vcvt.s32.f32 %v2602_v16  ;;  %v2850_v18 = vunpack.c.0.s8 %v1970_v51  ;;  %v2858_v4 = vunpack.c.1.s8 %v1970_v51  ;;  %v1994_v51 = vld [vmem:[#allocation2 + $0x770] sm:$0xff]  ;;  %v4999_v31 = vpop.f32.mrf.mxu0  ;;  %v5012_v39 = vpop.f32.mrf.mxu1 }
 0x412   :  { %5276 = vmatpush.bf16.msrb.mxu2 %v4490_v36  ;;  %v3746_v58 = vcvt.s32.f32 %v2722_v15  ;;  %v3754_v53 = vcvt.s32.f32 %v2730_v63  ;;  %v2978_v34 = vunpack.c.0.s8 %v2002_v42  ;;  %v2986_v22 = vunpack.c.1.s8 %v2002_v42  ;;  %v1890_v63 = vld [vmem:[#allocation2 + $0x430] sm:$0xff] }
 0x413   :  { %5289 = vmatpush.bf16.msrb.mxu3 %v4554_v37  ;;  %v4354_v5 = vpack.c.bf16 %v3626_v38, %v3618_v8  ;;  %v3874_v17 = vcvt.s32.f32 %v2850_v18  ;;  %v3882_v60 = vcvt.s32.f32 %v2858_v4  ;;  %v2578_v48 = vunpack.c.2.s8 %v1898_v30 }
 0x414   :  { %v4418_v0 = vpack.c.bf16 %v3754_v53, %v3746_v58  ;;  %v4002_v7 = vcvt.s32.f32 %v2978_v34  ;;  %v4010_v40 = vcvt.s32.f32 %v2986_v22  ;;  %v2586_v52 = vunpack.c.3.s8 %v1898_v30 }
 0x415   :  { %5251 = vmatpush.bf16.msrb.mxu0 %v4354_v5  ;;  %v4482_v20 = vpack.c.bf16 %v3882_v60, %v3874_v17  ;;  %v3602_v61 = vcvt.s32.f32 %v2578_v48  ;;  %v2706_v59 = vunpack.c.2.s8 %v1930_v62  ;;  %v2714_v47 = vunpack.c.3.s8 %v1930_v62  ;;  %v1922_v5 = vld [vmem:[#allocation2 + $0x530] sm:$0xff] }
 0x416   :  { %5264 = vmatpush.bf16.msrb.mxu1 %v4418_v0  ;;  %v4546_v57 = vpack.c.bf16 %v4010_v40, %v4002_v7  ;;  %v3610_v42 = vcvt.s32.f32 %v2586_v52  ;;  %v2834_v14 = vunpack.c.2.s8 %v1962_v50  ;;  %v2842_v44 = vunpack.c.3.s8 %v1962_v50  ;;  %v1954_v0 = vld [vmem:[#allocation2 + $0x630] sm:$0xff] }
 0x417   :  { %5277 = vmatpush.bf16.msrb.mxu2 %v4482_v20  ;;  %v3730_v41 = vcvt.s32.f32 %v2706_v59  ;;  %v3738_v33 = vcvt.s32.f32 %v2714_v47  ;;  %v2962_v28 = vunpack.c.2.s8 %v1994_v51  ;;  %v2970_v23 = vunpack.c.3.s8 %v1994_v51  ;;  %v1986_v20 = vld [vmem:[#allocation2 + $0x730] sm:$0xff] }
 0x418   :  { %5290 = vmatpush.bf16.msrb.mxu3 %v4546_v57  ;;  %v4346_v25 = vpack.c.bf16 %v3610_v42, %v3602_v61  ;;  %v3858_v10 = vcvt.s32.f32 %v2834_v14  ;;  %v3866_v2 = vcvt.s32.f32 %v2842_v44  ;;  %v2562_v29 = vunpack.c.0.s8 %v1898_v30  ;;  %v5025_v57 = vpop.f32.mrf.mxu2  ;;  %v5038_v42 = vpop.f32.mrf.mxu3 }
 0x419   :  { %v4410_v54 = vpack.c.bf16 %v3738_v33, %v3730_v41  ;;  %v3986_v26 = vcvt.s32.f32 %v2962_v28  ;;  %v3994_v19 = vcvt.s32.f32 %v2970_v23  ;;  %v2570_v24 = vunpack.c.1.s8 %v1898_v30 }
 0x41a   :  { %5252 = vmatpush.bf16.msrb.mxu0 %v4346_v25  ;;  %v4474_v16 = vpack.c.bf16 %v3866_v2, %v3858_v10  ;;  %v3586_v36 = vcvt.s32.f32 %v2562_v29  ;;  %v2690_v8 = vunpack.c.0.s8 %v1930_v62  ;;  %v2698_v15 = vunpack.c.1.s8 %v1930_v62 }
 0x41b   :  { %5265 = vmatpush.bf16.msrb.mxu1 %v4410_v54  ;;  %v4538_v37 = vpack.c.bf16 %v3994_v19, %v3986_v26  ;;  %v3594_v38 = vcvt.s32.f32 %v2570_v24  ;;  %v2818_v18 = vunpack.c.0.s8 %v1962_v50  ;;  %v2826_v4 = vunpack.c.1.s8 %v1962_v50 }
 0x41c   :  { %5278 = vmatpush.bf16.msrb.mxu2 %v4474_v16  ;;  %v3714_v58 = vcvt.s32.f32 %v2690_v8  ;;  %v3722_v53 = vcvt.s32.f32 %v2698_v15  ;;  %v2946_v34 = vunpack.c.0.s8 %v1994_v51  ;;  %v2954_v22 = vunpack.c.1.s8 %v1994_v51  ;;  %v10459_v15 = vld [vmem:[#allocation2 + $0xf8] sm:$0xff] }
 0x41d   :  { %5291 = vmatpush.bf16.msrb.mxu3 %v4538_v37  ;;  %v4338_v30 = vpack.c.bf16 %v3594_v38, %v3586_v36  ;;  %v3842_v17 = vcvt.s32.f32 %v2818_v18  ;;  %v3850_v60 = vcvt.s32.f32 %v2826_v4  ;;  %v2546_v48 = vunpack.c.2.s8 %v1890_v63 }
 0x41e   :  { %v4402_v7 = vpack.c.bf16 %v3722_v53, %v3714_v58  ;;  %v3970_v62 = vcvt.s32.f32 %v2946_v34  ;;  %v3978_v40 = vcvt.s32.f32 %v2954_v22  ;;  %v2554_v52 = vunpack.c.3.s8 %v1890_v63 }
 0x41f   :  { %5253 = vmatpush.bf16.msrb.mxu0 %v4338_v30  ;;  %v4466_v61 = vpack.c.bf16 %v3850_v60, %v3842_v17  ;;  %v3570_v50 = vcvt.s32.f32 %v2546_v48  ;;  %v2674_v59 = vunpack.c.2.s8 %v1922_v5  ;;  %v2682_v47 = vunpack.c.3.s8 %v1922_v5  ;;  %v1819_v30 = vld [vmem:[#allocation2 + $0x1f8] sm:$0xff]  ;;  %v10461_v17 = vpop.f32.mrf.mxu0 }
 0x420   :  { %5266 = vmatpush.bf16.msrb.mxu1 %v4402_v7  ;;  %v4530_v51 = vpack.c.bf16 %v3978_v40, %v3970_v62  ;;  %v3578_v14 = vcvt.s32.f32 %v2554_v52  ;;  %v2802_v44 = vunpack.c.2.s8 %v1954_v0  ;;  %v2810_v41 = vunpack.c.3.s8 %v1954_v0  ;;  %v1851_v62 = vld [vmem:[#allocation2 + $0x2f8] sm:$0xff] }
 0x421   :  { %5279 = vmatpush.bf16.msrb.mxu2 %v4466_v61  ;;  %v3698_v33 = vcvt.s32.f32 %v2674_v59  ;;  %v3706_v28 = vcvt.s32.f32 %v2682_v47  ;;  %v2930_v23 = vunpack.c.2.s8 %v1986_v20  ;;  %v2938_v25 = vunpack.c.3.s8 %v1986_v20 }
 0x422   :  { %5292 = vmatpush.bf16.msrb.mxu3 %v4530_v51  ;;  %v4330_v10 = vpack.c.bf16 %v3578_v14, %v3570_v50  ;;  %v3826_v2 = vcvt.s32.f32 %v2802_v44  ;;  %v3834_v29 = vcvt.s32.f32 %v2810_v41  ;;  %v2530_v54 = vunpack.c.0.s8 %v1890_v63  ;;  %v1883_v50 = vld [vmem:[#allocation2 + $0x3f8] sm:$0xff] }
 0x423   :  { %v4394_v26 = vpack.c.bf16 %v3706_v28, %v3698_v33  ;;  %v3954_v19 = vcvt.s32.f32 %v2930_v23  ;;  %v3962_v24 = vcvt.s32.f32 %v2938_v25  ;;  %v2538_v31 = vunpack.c.1.s8 %v1890_v63  ;;  %v10463_v63 = vpop.f32.mrf.mxu1  ;;  %v10467_v25 = vpop.f32.mrf.mxu2 }
 0x424   :  { %5254 = vmatpush.bf16.msrb.mxu0 %v4330_v10  ;;  %v4458_v39 = vpack.c.bf16 %v3834_v29, %v3826_v2  ;;  %v3554_v16 = vcvt.s32.f32 %v2530_v54  ;;  %v2658_v36 = vunpack.c.0.s8 %v1922_v5  ;;  %v2666_v8 = vunpack.c.1.s8 %v1922_v5  ;;  %v10469_v10 = vpop.f32.mrf.mxu3 }
 0x425   :  { %5267 = vmatpush.bf16.msrb.mxu1 %v4394_v26  ;;  %v4522_v37 = vpack.c.bf16 %v3962_v24, %v3954_v19  ;;  %v3562_v38 = vcvt.s32.f32 %v2538_v31  ;;  %v2786_v18 = vunpack.c.0.s8 %v1954_v0  ;;  %v2794_v4 = vunpack.c.1.s8 %v1954_v0 }
 0x426   :  { %5280 = vmatpush.bf16.msrb.mxu2 %v4458_v39  ;;  %v3682_v58 = vcvt.s32.f32 %v2658_v36  ;;  %v3690_v53 = vcvt.s32.f32 %v2666_v8  ;;  %v2914_v34 = vunpack.c.0.s8 %v1986_v20  ;;  %v2922_v22 = vunpack.c.1.s8 %v1986_v20 }
 0x427   :  { %5293 = vmatpush.bf16.msrb.mxu3 %v4522_v37  ;;  %v4322_v60 = vpack.c.bf16 %v3562_v38, %v3554_v16  ;;  %v3810_v5 = vcvt.s32.f32 %v2786_v18  ;;  %v3818_v48 = vcvt.s32.f32 %v2794_v4  ;;  %v2131_v7 = vunpack.c.2.s8 %v10459_v15  ;;  %v5051_v38 = vpop.f32.mrf.mxu0 }
 0x428   :  { %v4386_v40 = vpack.c.bf16 %v3690_v53, %v3682_v58  ;;  %v3938_v52 = vcvt.s32.f32 %v2914_v34  ;;  %v3946_v0 = vcvt.s32.f32 %v2922_v22  ;;  %v2139_v61 = vunpack.c.3.s8 %v10459_v15  ;;  %v1779_v53 = vld [vmem:[#allocation2 + $0xb8] sm:$0xff] }
 0x429   :  { %5255 = vmatpush.bf16.msrb.mxu0 %v4322_v60  ;;  %v4450_v20 = vpack.c.bf16 %v3818_v48, %v3810_v5  ;;  %v3155_v59 = vcvt.s32.f32 %v2131_v7  ;;  %v2259_v47 = vunpack.c.2.s8 %v1819_v30  ;;  %v2267_v57 = vunpack.c.3.s8 %v1819_v30 }
 0x42a   :  { %5268 = vmatpush.bf16.msrb.mxu1 %v4386_v40  ;;  %v4514_v42 = vpack.c.bf16 %v3946_v0, %v3938_v52  ;;  %v3163_v51 = vcvt.s32.f32 %v2139_v61  ;;  %v2387_v14 = vunpack.c.2.s8 %v1851_v62  ;;  %v2395_v44 = vunpack.c.3.s8 %v1851_v62  ;;  %v1811_v40 = vld [vmem:[#allocation2 + $0x1b8] sm:$0xff] }
 0x42b   :  { %5281 = vmatpush.bf16.msrb.mxu2 %v4450_v20  ;;  %v3283_v41 = vcvt.s32.f32 %v2259_v47  ;;  %v3291_v33 = vcvt.s32.f32 %v2267_v57  ;;  %v2515_v28 = vunpack.c.2.s8 %v1883_v50  ;;  %v2523_v23 = vunpack.c.3.s8 %v1883_v50  ;;  %v5064_v18 = vpop.f32.mrf.mxu1  ;;  %v1843_v52 = vld [vmem:[#allocation2 + $0x2b8] sm:$0xff] }
 0x42c   :  { %5294 = vmatpush.bf16.msrb.mxu3 %v4514_v42  ;;  %v4123_v2 = vpack.c.bf16 %v3163_v51, %v3155_v59  ;;  %v3411_v29 = vcvt.s32.f32 %v2387_v14  ;;  %v3419_v54 = vcvt.s32.f32 %v2395_v44  ;;  %v5011_v26 = vadd.f32 %v10453_v56, %v10451_v13  ;;  %5256 = vmatmul.bf16.vlgmr.msrb.gmra.mxu0 %v10207_v9  ;;  %v1875_v59 = vld [vmem:[#allocation2 + $0x3b8] sm:$0xff]  ;;  %v5077_v14 = vpop.f32.mrf.mxu2  ;;  %v5090_v44 = vpop.f32.mrf.mxu3 }
 0x42d   :  { %v4187_v19 = vpack.c.bf16 %v3291_v33, %v3283_v41  ;;  %v3539_v24 = vcvt.s32.f32 %v2515_v28  ;;  %v3547_v31 = vcvt.s32.f32 %v2523_v23  ;;  %v2115_v39 = vunpack.c.0.s8 %v10459_v15  ;;  %5269 = vmatmul.bf16.vlgmr.msrb.gmra.mxu1 %v10222_v35  ;;  %v1867_v44 = vld [vmem:[#allocation2 + $0x378] sm:$0xff] }
 0x42e   :  { %5300 = vmatpush.bf16.msra.mxu0 %v4123_v2  ;;  %v4251_v16 = vpack.c.bf16 %v3419_v54, %v3411_v29  ;;  %v2123_v36 = vunpack.c.1.s8 %v10459_v15  ;;  %v2243_v8 = vunpack.c.0.s8 %v1819_v30  ;;  %v2251_v37 = vunpack.c.1.s8 %v1819_v30  ;;  %5282 = vmatmul.bf16.vlgmr.msrb.gmra.mxu2 %v10203_v3 }
 0x42f   :  { %5313 = vmatpush.bf16.msra.mxu1 %v4187_v19  ;;  %v4315_v13 = vpack.c.bf16 %v3547_v31, %v3539_v24  ;;  %v3139_v56 = vcvt.s32.f32 %v2115_v39  ;;  %v2371_v4 = vunpack.c.0.s8 %v1851_v62  ;;  %v2379_v58 = vunpack.c.1.s8 %v1851_v62  ;;  %5295 = vmatmul.bf16.vlgmr.msrb.gmra.mxu3 %v10214_v11 }
 0x430   :  { %5326 = vmatpush.bf16.msra.mxu2 %v4251_v16  ;;  %v3147_v34 = vcvt.s32.f32 %v2123_v36  ;;  %v3267_v22 = vcvt.s32.f32 %v2243_v8  ;;  %v3275_v60 = vcvt.s32.f32 %v2251_v37  ;;  %v2499_v5 = vunpack.c.0.s8 %v1883_v50 }
 0x431   :  { %5339 = vmatpush.bf16.msra.mxu3 %v4315_v13  ;;  %v3395_v15 = vcvt.s32.f32 %v2371_v4  ;;  %v3403_v30 = vcvt.s32.f32 %v2379_v58  ;;  %v2507_v48 = vunpack.c.1.s8 %v1883_v50  ;;  %v5024_v7 = vadd.f32 %v10455_v45, %v5011_v26  ;;  %v1771_v58 = vld [vmem:[#allocation2 + $0x78] sm:$0xff] }
 0x432   :  { %v4115_v0 = vpack.c.bf16 %v3147_v34, %v3139_v56  ;;  %v4179_v61 = vpack.c.bf16 %v3275_v60, %v3267_v22  ;;  %v3523_v20 = vcvt.s32.f32 %v2499_v5  ;;  %v2099_v62 = vunpack.c.2.s8 %v1779_v53 }
 0x433   :  { %v4243_v47 = vpack.c.bf16 %v3403_v30, %v3395_v15  ;;  %v3531_v57 = vcvt.s32.f32 %v2507_v48  ;;  %v10481_v42 = vadd.f32 %v10457_v12, %v5024_v7  ;;  %v2107_v51 = vunpack.c.3.s8 %v1779_v53  ;;  %v1803_v15 = vld [vmem:[#allocation2 + $0x178] sm:$0xff] }
 0x434   :  { %5301 = vmatpush.bf16.msra.mxu0 %v4115_v0  ;;  %5314 = vmatpush.bf16.msra.mxu1 %v4179_v61  ;;  %v3123_v50 = vcvt.s32.f32 %v2099_v62  ;;  %v2227_v41 = vunpack.c.2.s8 %v1811_v40  ;;  %v2235_v45 = vunpack.c.3.s8 %v1811_v40  ;;  %v2355_v33 = vunpack.c.2.s8 %v1843_v52 }
 0x435   :  { %5327 = vmatpush.bf16.msra.mxu2 %v4243_v47  ;;  %v4307_v28 = vpack.c.bf16 %v3531_v57, %v3523_v20  ;;  %v3131_v23 = vcvt.s32.f32 %v2107_v51  ;;  %v2363_v2 = vunpack.c.3.s8 %v1843_v52  ;;  %v2483_v29 = vunpack.c.2.s8 %v1875_v59  ;;  %v1835_v47 = vld [vmem:[#allocation2 + $0x278] sm:$0xff] }
 0x436   :  { %v3251_v54 = vcvt.s32.f32 %v2227_v41  ;;  %v3259_v26 = vcvt.s32.f32 %v2235_v45  ;;  %v3379_v19 = vcvt.s32.f32 %v2355_v33  ;;  %v2491_v24 = vunpack.c.3.s8 %v1875_v59 }
 0x437   :  { %5340 = vmatpush.bf16.msra.mxu3 %v4307_v28  ;;  %v4107_v12 = vpack.c.bf16 %v3131_v23, %v3123_v50  ;;  %v3387_v31 = vcvt.s32.f32 %v2363_v2  ;;  %v3507_v39 = vcvt.s32.f32 %v2483_v29  ;;  %v2083_v16 = vunpack.c.0.s8 %v1779_v53 }
 0x438   :  { %v4171_v36 = vpack.c.bf16 %v3259_v26, %v3251_v54  ;;  %v3515_v8 = vcvt.s32.f32 %v2491_v24  ;;  %v2091_v37 = vunpack.c.1.s8 %v1779_v53  ;;  %v2211_v38 = vunpack.c.0.s8 %v1811_v40 }
 0x439   :  { %5302 = vmatpush.bf16.msra.mxu0 %v4107_v12  ;;  %v4235_v18 = vpack.c.bf16 %v3387_v31, %v3379_v19  ;;  %v3107_v13 = vcvt.s32.f32 %v2083_v16  ;;  %v2219_v56 = vunpack.c.1.s8 %v1811_v40  ;;  %v2339_v4 = vunpack.c.0.s8 %v1843_v52 }
 0x43a   :  { %5315 = vmatpush.bf16.msra.mxu1 %v4171_v36  ;;  %v4299_v34 = vpack.c.bf16 %v3515_v8, %v3507_v39  ;;  %v3115_v22 = vcvt.s32.f32 %v2091_v37  ;;  %v3235_v60 = vcvt.s32.f32 %v2211_v38  ;;  %v2347_v5 = vunpack.c.1.s8 %v1843_v52 }
 0x43b   :  { %5328 = vmatpush.bf16.msra.mxu2 %v4235_v18  ;;  %v3243_v30 = vcvt.s32.f32 %v2219_v56  ;;  %v3363_v48 = vcvt.s32.f32 %v2339_v4  ;;  %v2467_v7 = vunpack.c.0.s8 %v1875_v59  ;;  %v2475_v0 = vunpack.c.1.s8 %v1875_v59 }
 0x43c   :  { %5341 = vmatpush.bf16.msra.mxu3 %v4299_v34  ;;  %v4099_v53 = vpack.c.bf16 %v3115_v22, %v3107_v13  ;;  %v3371_v61 = vcvt.s32.f32 %v2347_v5  ;;  %v2067_v20 = vunpack.c.2.s8 %v1771_v58  ;;  %v2075_v62 = vunpack.c.3.s8 %v1771_v58 }
 0x43d   :  { %v4163_v40 = vpack.c.bf16 %v3243_v30, %v3235_v60  ;;  %v3491_v57 = vcvt.s32.f32 %v2467_v7  ;;  %v3499_v51 = vcvt.s32.f32 %v2475_v0  ;;  %v2195_v14 = vunpack.c.2.s8 %v1803_v15  ;;  %v1763_v30 = vld [vmem:[#allocation2 + $0x38] sm:$0xff] }
 0x43e   :  { %5303 = vmatpush.bf16.msra.mxu0 %v4099_v53  ;;  %v4227_v50 = vpack.c.bf16 %v3371_v61, %v3363_v48  ;;  %v3091_v52 = vcvt.s32.f32 %v2067_v20  ;;  %v3099_v41 = vcvt.s32.f32 %v2075_v62  ;;  %v2203_v45 = vunpack.c.3.s8 %v1803_v15 }
 0x43f   :  { %5316 = vmatpush.bf16.msra.mxu1 %v4163_v40  ;;  %v4291_v33 = vpack.c.bf16 %v3499_v51, %v3491_v57  ;;  %v3219_v28 = vcvt.s32.f32 %v2195_v14  ;;  %v2323_v59 = vunpack.c.2.s8 %v1835_v47  ;;  %v2331_v23 = vunpack.c.3.s8 %v1835_v47  ;;  %v10494_v51 = vld [vmem:[#allocation17] sm:$0xff] }
 0x440   :  { %5329 = vmatpush.bf16.msra.mxu2 %v4227_v50  ;;  %v4091_v2 = vpack.c.bf16 %v3099_v41, %v3091_v52  ;;  %v3227_v29 = vcvt.s32.f32 %v2203_v45  ;;  %v2451_v54 = vunpack.c.2.s8 %v1867_v44  ;;  %v2459_v26 = vunpack.c.3.s8 %v1867_v44 }
 0x441   :  { %5342 = vmatpush.bf16.msra.mxu3 %v4291_v33  ;;  %v3347_v19 = vcvt.s32.f32 %v2323_v59  ;;  %v3355_v24 = vcvt.s32.f32 %v2331_v23  ;;  %v5050_v12 = vadd.f32 %v10461_v17, %v10481_v42  ;;  %v2051_v31 = vunpack.c.0.s8 %v1771_v58 }
 0x442   :  { %5304 = vmatpush.bf16.msra.mxu0 %v4091_v2  ;;  %v4155_v39 = vpack.c.bf16 %v3227_v29, %v3219_v28  ;;  %v3475_v16 = vcvt.s32.f32 %v2451_v54  ;;  %v3483_v36 = vcvt.s32.f32 %v2459_v26  ;;  %v2059_v8 = vunpack.c.1.s8 %v1771_v58 }
 0x443   :  { %v4219_v37 = vpack.c.bf16 %v3355_v24, %v3347_v19  ;;  %v5063_v38 = vadd.f32 %v10463_v63, %v5050_v12  ;;  %v3075_v18 = vcvt.s32.f32 %v2051_v31  ;;  %v2179_v13 = vunpack.c.0.s8 %v1803_v15  ;;  %v1795_v63 = vld [vmem:[#allocation2 + $0x138] sm:$0xff] }
 0x444   :  { %5317 = vmatpush.bf16.msra.mxu1 %v4155_v39  ;;  %v4283_v56 = vpack.c.bf16 %v3483_v36, %v3475_v16  ;;  %v3083_v4 = vcvt.s32.f32 %v2059_v8  ;;  %v2187_v34 = vunpack.c.1.s8 %v1803_v15  ;;  %v2307_v22 = vunpack.c.0.s8 %v1835_v47  ;;  %v10490_v15 = vld [vmem:[%s10751_s8] sm:$0xff] }
 0x445   :  { %5330 = vmatpush.bf16.msra.mxu2 %v4219_v37  ;;  %v3203_v60 = vcvt.s32.f32 %v2179_v13  ;;  %v2315_v5 = vunpack.c.1.s8 %v1835_v47  ;;  %v2435_v17 = vunpack.c.0.s8 %v1867_v44  ;;  %v2443_v42 = vunpack.c.1.s8 %v1867_v44  ;;  %v1827_v47 = vld [vmem:[#allocation2 + $0x238] sm:$0xff] }
 0x446   :  { %5343 = vmatpush.bf16.msra.mxu3 %v4283_v56  ;;  %v4083_v48 = vpack.c.bf16 %v3083_v4, %v3075_v18  ;;  %v3211_v7 = vcvt.s32.f32 %v2187_v34  ;;  %v3331_v58 = vcvt.s32.f32 %v2307_v22  ;;  %v5076_v0 = vadd.f32 %v10467_v25, %v5063_v38  ;;  %v1859_v44 = vld [vmem:[#allocation2 + $0x338] sm:$0xff] }
 0x447   :  { %v3339_v53 = vcvt.s32.f32 %v2315_v5  ;;  %v3459_v61 = vcvt.s32.f32 %v2435_v17  ;;  %v3467_v20 = vcvt.s32.f32 %v2443_v42  ;;  %v5410_v62 = vperm.slane %v10490_v15, 4  ;;  %v1915_v22 = vld [vmem:[#allocation2 + $0x4f8] sm:$0xff] }
 0x448   :  { %5305 = vmatpush.bf16.msra.mxu0 %v4083_v48  ;;  %v4147_v40 = vpack.c.bf16 %v3211_v7, %v3203_v60  ;;  %v5089_v57 = vadd.f32 %v10469_v10, %v5076_v0  ;;  %v5436_v25 = vperm.slane %v10494_v51, 4  ;;  %v2035_v14 = vunpack.c.2.s8 %v1763_v30  ;;  %v1947_v48 = vld [vmem:[#allocation2 + $0x5f8] sm:$0xff] }
 0x449   :  { %v4211_v50 = vpack.c.bf16 %v3339_v53, %v3331_v58  ;;  %v4275_v52 = vpack.c.bf16 %v3467_v20, %v3459_v61  ;;  %v2043_v41 = vunpack.c.3.s8 %v1763_v30  ;;  %v2163_v45 = vunpack.c.2.s8 %v1795_v63 }
 0x44a   :  { %5318 = vmatpush.bf16.msra.mxu1 %v4147_v40  ;;  %v5426_v33 = vmul.f32 %v5410_v62, %v5089_v57  ;;  %v3059_v28 = vcvt.s32.f32 %v2035_v14  ;;  %v2171_v59 = vunpack.c.3.s8 %v1795_v63  ;;  %v2291_v23 = vunpack.c.2.s8 %v1827_v47  ;;  %v1979_v40 = vld [vmem:[#allocation2 + $0x6f8] sm:$0xff] }
 0x44b   :  { %5331 = vmatpush.bf16.msra.mxu2 %v4211_v50  ;;  %5344 = vmatpush.bf16.msra.mxu3 %v4275_v52  ;;  %v3067_v2 = vcvt.s32.f32 %v2043_v41  ;;  %v3187_v29 = vcvt.s32.f32 %v2163_v45  ;;  %v2299_v10 = vunpack.c.3.s8 %v1827_v47  ;;  %v2419_v54 = vunpack.c.2.s8 %v1859_v44  ;;  %v2011_v50 = vld [vmem:[#allocation2 + $0x7f8] sm:$0xff] }
 0x44c   :  { %v10497_v26 = vadd.f32 %v5436_v25, %v5426_v33  ;;  %v3195_v19 = vcvt.s32.f32 %v2171_v59  ;;  %v3315_v24 = vcvt.s32.f32 %v2291_v23  ;;  %v2427_v12 = vunpack.c.3.s8 %v1859_v44 }
 0x44d   :  { %v4075_v31 = vpack.c.bf16 %v3067_v2, %v3059_v28  ;;  %v3323_v39 = vcvt.s32.f32 %v2299_v10  ;;  %v3443_v16 = vcvt.s32.f32 %v2419_v54  ;;  %v2019_v36 = vunpack.c.0.s8 %v1763_v30 }
 0x44e   :  { %v4139_v8 = vpack.c.bf16 %v3195_v19, %v3187_v29  ;;  %v3451_v37 = vcvt.s32.f32 %v2427_v12  ;;  %v2027_v38 = vunpack.c.1.s8 %v1763_v30  ;;  %v2147_v18 = vunpack.c.0.s8 %v1795_v63 }
 0x44f   :  { %5306 = vmatpush.bf16.msra.mxu0 %v4075_v31  ;;  %v4203_v13 = vpack.c.bf16 %v3323_v39, %v3315_v24  ;;  %v3043_v56 = vcvt.s32.f32 %v2019_v36  ;;  %v2155_v4 = vunpack.c.1.s8 %v1795_v63  ;;  %v2275_v34 = vunpack.c.0.s8 %v1827_v47 }
 0x450   :  { %5319 = vmatpush.bf16.msra.mxu1 %v4139_v8  ;;  %v4267_v60 = vpack.c.bf16 %v3451_v37, %v3443_v16  ;;  %v3051_v5 = vcvt.s32.f32 %v2027_v38  ;;  %v3171_v17 = vcvt.s32.f32 %v2147_v18  ;;  %v2283_v42 = vunpack.c.1.s8 %v1827_v47 }
 0x451   :  { %5332 = vmatpush.bf16.msra.mxu2 %v4203_v13  ;;  %v3179_v7 = vcvt.s32.f32 %v2155_v4  ;;  %v3299_v58 = vcvt.s32.f32 %v2275_v34  ;;  %v2403_v0 = vunpack.c.0.s8 %v1859_v44  ;;  %v2411_v53 = vunpack.c.1.s8 %v1859_v44  ;;  %v1907_v13 = vld [vmem:[#allocation2 + $0x4b8] sm:$0xff] }
 0x452   :  { %5345 = vmatpush.bf16.msra.mxu3 %v4267_v60  ;;  %v4067_v30 = vpack.c.bf16 %v3051_v5, %v3043_v56  ;;  %v3307_v61 = vcvt.s32.f32 %v2283_v42  ;;  %v2643_v20 = vunpack.c.2.s8 %v1915_v22  ;;  %v2651_v62 = vunpack.c.3.s8 %v1915_v22 }
 0x453   :  { %v4131_v63 = vpack.c.bf16 %v3179_v7, %v3171_v17  ;;  %v3427_v57 = vcvt.s32.f32 %v2403_v0  ;;  %v3435_v25 = vcvt.s32.f32 %v2411_v53  ;;  %v2771_v14 = vunpack.c.2.s8 %v1947_v48 }
 0x454   :  { %5307 = vmatpush.bf16.msra.mxu0 %v4067_v30  ;;  %v4195_v52 = vpack.c.bf16 %v3307_v61, %v3299_v58  ;;  %v3667_v47 = vcvt.s32.f32 %v2643_v20  ;;  %v3675_v41 = vcvt.s32.f32 %v2651_v62  ;;  %v2779_v45 = vunpack.c.3.s8 %v1947_v48  ;;  %v2003_v20 = vld [vmem:[#allocation2 + $0x7b8] sm:$0xff] }
 0x455   :  { %5320 = vmatpush.bf16.msra.mxu1 %v4131_v63  ;;  %v4259_v33 = vpack.c.bf16 %v3435_v25, %v3427_v57  ;;  %v3795_v28 = vcvt.s32.f32 %v2771_v14  ;;  %v2899_v44 = vunpack.c.2.s8 %v1979_v40  ;;  %v2907_v59 = vunpack.c.3.s8 %v1979_v40 }
 0x456   :  { %5333 = vmatpush.bf16.msra.mxu2 %v4195_v52  ;;  %v4379_v23 = vpack.c.bf16 %v3675_v41, %v3667_v47  ;;  %v3803_v2 = vcvt.s32.f32 %v2779_v45  ;;  %v3027_v29 = vunpack.c.2.s8 %v2011_v50  ;;  %v3035_v10 = vunpack.c.3.s8 %v2011_v50  ;;  %v10503_v52 = vpop.f32.mrf.mxu0 }
 0x457   :  { %5346 = vmatpush.bf16.msra.mxu3 %v4259_v33  ;;  %v3923_v54 = vcvt.s32.f32 %v2899_v44  ;;  %v3931_v19 = vcvt.s32.f32 %v2907_v59  ;;  %v2627_v24 = vunpack.c.0.s8 %v1915_v22  ;;  %v2635_v12 = vunpack.c.1.s8 %v1915_v22  ;;  %5308 = vmatmul.bf16.vlgmr.msra.gmra.mxu0 %v10188_v27  ;;  %v1939_v27 = vld [vmem:[#allocation2 + $0x5b8] sm:$0xff] }
 0x458   :  { %5352 = vmatpush.bf16.msrb.mxu0 %v4379_v23  ;;  %v4443_v31 = vpack.c.bf16 %v3803_v2, %v3795_v28  ;;  %v4051_v39 = vcvt.s32.f32 %v3027_v29  ;;  %v4059_v16 = vcvt.s32.f32 %v3035_v10  ;;  %v2755_v36 = vunpack.c.0.s8 %v1947_v48  ;;  %5321 = vmatmul.bf16.vlgmr.msra.gmra.mxu1 %v10197_v43 }
 0x459   :  { %v4507_v8 = vpack.c.bf16 %v3931_v19, %v3923_v54  ;;  %v3651_v37 = vcvt.s32.f32 %v2627_v24  ;;  %v3659_v38 = vcvt.s32.f32 %v2635_v12  ;;  %v2763_v18 = vunpack.c.1.s8 %v1947_v48  ;;  %5334 = vmatmul.bf16.vlgmr.msra.gmra.mxu2 %v10183_v6  ;;  %v1971_v6 = vld [vmem:[#allocation2 + $0x6b8] sm:$0xff]  ;;  %v10505_v19 = vpop.f32.mrf.mxu1  ;;  %v10507_v24 = vpop.f32.mrf.mxu2 }
 0x45a   :  { %5365 = vmatpush.bf16.msrb.mxu1 %v4443_v31  ;;  %v4571_v56 = vpack.c.bf16 %v4059_v16, %v4051_v39  ;;  %v3779_v4 = vcvt.s32.f32 %v2755_v36  ;;  %v2883_v34 = vunpack.c.0.s8 %v1979_v40  ;;  %v2891_v22 = vunpack.c.1.s8 %v1979_v40  ;;  %5347 = vmatmul.bf16.vlgmr.msra.gmra.mxu3 %v10192_v1  ;;  %v1899_v36 = vld [vmem:[#allocation2 + $0x478] sm:$0xff] }
 0x45b   :  { %5378 = vmatpush.bf16.msrb.mxu2 %v4507_v8  ;;  %v4371_v60 = vpack.c.bf16 %v3659_v38, %v3651_v37  ;;  %v3787_v5 = vcvt.s32.f32 %v2763_v18  ;;  %v3011_v17 = vunpack.c.0.s8 %v2011_v50  ;;  %v3019_v43 = vunpack.c.1.s8 %v2011_v50  ;;  %v10509_v8 = vpop.f32.mrf.mxu3 }
 0x45c   :  { %5391 = vmatpush.bf16.msrb.mxu3 %v4571_v56  ;;  %v3907_v42 = vcvt.s32.f32 %v2883_v34  ;;  %v3915_v7 = vcvt.s32.f32 %v2891_v22  ;;  %v2611_v48 = vunpack.c.2.s8 %v1907_v13  ;;  %v2619_v58 = vunpack.c.3.s8 %v1907_v13  ;;  %v1931_v56 = vld [vmem:[#allocation2 + $0x578] sm:$0xff] }
 0x45d   :  { %5353 = vmatpush.bf16.msrb.mxu0 %v4371_v60  ;;  %v4435_v0 = vpack.c.bf16 %v3787_v5, %v3779_v4  ;;  %v4035_v53 = vcvt.s32.f32 %v3011_v17  ;;  %v4043_v30 = vcvt.s32.f32 %v3019_v43  ;;  %v2739_v61 = vunpack.c.2.s8 %v1939_v27 }
 0x45e   :  { %v4499_v62 = vpack.c.bf16 %v3915_v7, %v3907_v42  ;;  %v3635_v1 = vcvt.s32.f32 %v2611_v48  ;;  %v3643_v40 = vcvt.s32.f32 %v2619_v58  ;;  %v2747_v63 = vunpack.c.3.s8 %v1939_v27 }
 0x45f   :  { %5366 = vmatpush.bf16.msrb.mxu1 %v4435_v0  ;;  %v4563_v57 = vpack.c.bf16 %v4043_v30, %v4035_v53  ;;  %v3763_v25 = vcvt.s32.f32 %v2739_v61  ;;  %v2867_v14 = vunpack.c.2.s8 %v1971_v6  ;;  %v2875_v50 = vunpack.c.3.s8 %v1971_v6  ;;  %v1995_v53 = vld [vmem:[#allocation2 + $0x778] sm:$0xff]  ;;  %v5103_v30 = vpop.f32.mrf.mxu0 }
 0x460   :  { %5379 = vmatpush.bf16.msrb.mxu2 %v4499_v62  ;;  %v4363_v47 = vpack.c.bf16 %v3643_v40, %v3635_v1  ;;  %v3771_v41 = vcvt.s32.f32 %v2747_v63  ;;  %v2995_v45 = vunpack.c.2.s8 %v2003_v20  ;;  %v3003_v33 = vunpack.c.3.s8 %v2003_v20 }
 0x461   :  { %5392 = vmatpush.bf16.msrb.mxu3 %v4563_v57  ;;  %v3891_v28 = vcvt.s32.f32 %v2867_v14  ;;  %v3899_v44 = vcvt.s32.f32 %v2875_v50  ;;  %v2595_v59 = vunpack.c.0.s8 %v1907_v13  ;;  %v2603_v23 = vunpack.c.1.s8 %v1907_v13 }
 0x462   :  { %5354 = vmatpush.bf16.msrb.mxu0 %v4363_v47  ;;  %v4427_v2 = vpack.c.bf16 %v3771_v41, %v3763_v25  ;;  %v4019_v29 = vcvt.s32.f32 %v2995_v45  ;;  %v4027_v10 = vcvt.s32.f32 %v3003_v33  ;;  %v2723_v54 = vunpack.c.0.s8 %v1939_v27  ;;  %v5116_v41 = vpop.f32.mrf.mxu1  ;;  %v5129_v45 = vpop.f32.mrf.mxu2 }
 0x463   :  { %v4491_v12 = vpack.c.bf16 %v3899_v44, %v3891_v28  ;;  %v3619_v31 = vcvt.s32.f32 %v2595_v59  ;;  %v3627_v39 = vcvt.s32.f32 %v2603_v23  ;;  %v2731_v16 = vunpack.c.1.s8 %v1939_v27  ;;  %v1963_v27 = vld [vmem:[#allocation2 + $0x678] sm:$0xff]  ;;  %v5142_v23 = vpop.f32.mrf.mxu3 }
 0x464   :  { %5367 = vmatpush.bf16.msrb.mxu1 %v4427_v2  ;;  %v4555_v37 = vpack.c.bf16 %v4027_v10, %v4019_v29  ;;  %v3747_v38 = vcvt.s32.f32 %v2723_v54  ;;  %v2851_v18 = vunpack.c.0.s8 %v1971_v6  ;;  %v2859_v13 = vunpack.c.1.s8 %v1971_v6 }
 0x465   :  { %5380 = vmatpush.bf16.msrb.mxu2 %v4491_v12  ;;  %v4355_v4 = vpack.c.bf16 %v3627_v39, %v3619_v31  ;;  %v3755_v34 = vcvt.s32.f32 %v2731_v16  ;;  %v2979_v22 = vunpack.c.0.s8 %v2003_v20  ;;  %v2987_v60 = vunpack.c.1.s8 %v2003_v20 }
 0x466   :  { %5393 = vmatpush.bf16.msrb.mxu3 %v4555_v37  ;;  %v3875_v5 = vcvt.s32.f32 %v2851_v18  ;;  %v3883_v17 = vcvt.s32.f32 %v2859_v13  ;;  %v2579_v43 = vunpack.c.2.s8 %v1899_v36  ;;  %v2587_v42 = vunpack.c.3.s8 %v1899_v36  ;;  %v1891_v37 = vld [vmem:[#allocation2 + $0x438] sm:$0xff] }
 0x467   :  { %5355 = vmatpush.bf16.msrb.mxu0 %v4355_v4  ;;  %v4419_v7 = vpack.c.bf16 %v3755_v34, %v3747_v38  ;;  %v4003_v48 = vcvt.s32.f32 %v2979_v22  ;;  %v4011_v58 = vcvt.s32.f32 %v2987_v60  ;;  %v2707_v0 = vunpack.c.2.s8 %v1931_v56  ;;  %v1923_v34 = vld [vmem:[#allocation2 + $0x538] sm:$0xff] }
 0x468   :  { %v4483_v6 = vpack.c.bf16 %v3883_v17, %v3875_v5  ;;  %v3603_v61 = vcvt.s32.f32 %v2579_v43  ;;  %v3611_v62 = vcvt.s32.f32 %v2587_v42  ;;  %v2715_v1 = vunpack.c.3.s8 %v1931_v56  ;;  %v10511_v17 = vpop.f32.mrf.mxu0 }
 0x469   :  { %5368 = vmatpush.bf16.msrb.mxu1 %v4419_v7  ;;  %v4547_v40 = vpack.c.bf16 %v4011_v58, %v4003_v48  ;;  %v3731_v20 = vcvt.s32.f32 %v2707_v0  ;;  %v2835_v63 = vunpack.c.2.s8 %v1963_v27  ;;  %v2843_v57 = vunpack.c.3.s8 %v1963_v27 }
 0x46a   :  { %5381 = vmatpush.bf16.msrb.mxu2 %v4483_v6  ;;  %v4347_v25 = vpack.c.bf16 %v3611_v62, %v3603_v61  ;;  %v3739_v14 = vcvt.s32.f32 %v2715_v1  ;;  %v2963_v50 = vunpack.c.2.s8 %v1995_v53  ;;  %v2971_v47 = vunpack.c.3.s8 %v1995_v53 }
 0x46b   :  { %5394 = vmatpush.bf16.msrb.mxu3 %v4547_v40  ;;  %v3859_v33 = vcvt.s32.f32 %v2835_v63  ;;  %v3867_v28 = vcvt.s32.f32 %v2843_v57  ;;  %v2563_v44 = vunpack.c.0.s8 %v1899_v36  ;;  %v2571_v59 = vunpack.c.1.s8 %v1899_v36 }
 0x46c   :  { %5356 = vmatpush.bf16.msrb.mxu0 %v4347_v25  ;;  %v4411_v2 = vpack.c.bf16 %v3739_v14, %v3731_v20  ;;  %v3987_v29 = vcvt.s32.f32 %v2963_v50  ;;  %v3995_v10 = vcvt.s32.f32 %v2971_v47  ;;  %v2691_v54 = vunpack.c.0.s8 %v1931_v56  ;;  %v5166_v20 = vpop.f32.mrf.mxu1  ;;  %v5192_v50 = vpop.f32.mrf.mxu3 }
 0x46d   :  { %v4475_v12 = vpack.c.bf16 %v3867_v28, %v3859_v33  ;;  %v3587_v31 = vcvt.s32.f32 %v2563_v44  ;;  %v3595_v39 = vcvt.s32.f32 %v2571_v59  ;;  %v2699_v16 = vunpack.c.1.s8 %v1931_v56  ;;  %v1955_v56 = vld [vmem:[#allocation2 + $0x638] sm:$0xff] }
 0x46e   :  { %5369 = vmatpush.bf16.msrb.mxu1 %v4411_v2  ;;  %v4539_v38 = vpack.c.bf16 %v3995_v10, %v3987_v29  ;;  %v3715_v18 = vcvt.s32.f32 %v2691_v54  ;;  %v2819_v13 = vunpack.c.0.s8 %v1963_v27  ;;  %v2827_v4 = vunpack.c.1.s8 %v1963_v27  ;;  %v1987_v27 = vld [vmem:[#allocation2 + $0x738] sm:$0xff] }
 0x46f   :  { %5382 = vmatpush.bf16.msrb.mxu2 %v4475_v12  ;;  %v4339_v22 = vpack.c.bf16 %v3595_v39, %v3587_v31  ;;  %v3723_v36 = vcvt.s32.f32 %v2699_v16  ;;  %v2947_v60 = vunpack.c.0.s8 %v1995_v53  ;;  %v2955_v5 = vunpack.c.1.s8 %v1995_v53  ;;  %v10513_v53 = vpop.f32.mrf.mxu2 }
 0x470   :  { %5395 = vmatpush.bf16.msrb.mxu3 %v4539_v38  ;;  %v3843_v43 = vcvt.s32.f32 %v2819_v13  ;;  %v3851_v42 = vcvt.s32.f32 %v2827_v4  ;;  %v2547_v7 = vunpack.c.2.s8 %v1891_v37  ;;  %v2555_v48 = vunpack.c.3.s8 %v1891_v37  ;;  %v5155_v38 = vpop.f32.mrf.mxu0 }
 0x471   :  { %5357 = vmatpush.bf16.msrb.mxu0 %v4339_v22  ;;  %v4403_v58 = vpack.c.bf16 %v3723_v36, %v3715_v18  ;;  %v3971_v0 = vcvt.s32.f32 %v2947_v60  ;;  %v3979_v30 = vcvt.s32.f32 %v2955_v5  ;;  %v2675_v6 = vunpack.c.2.s8 %v1923_v34 }
 0x472   :  { %v4467_v61 = vpack.c.bf16 %v3851_v42, %v3843_v43  ;;  %v3571_v62 = vcvt.s32.f32 %v2547_v7  ;;  %v3579_v1 = vcvt.s32.f32 %v2555_v48  ;;  %v2683_v40 = vunpack.c.3.s8 %v1923_v34 }
 0x473   :  { %5370 = vmatpush.bf16.msrb.mxu1 %v4403_v58  ;;  %v4531_v63 = vpack.c.bf16 %v3979_v30, %v3971_v0  ;;  %v3699_v57 = vcvt.s32.f32 %v2675_v6  ;;  %v2803_v25 = vunpack.c.2.s8 %v1955_v56  ;;  %v2811_v14 = vunpack.c.3.s8 %v1955_v56 }
 0x474   :  { %5383 = vmatpush.bf16.msrb.mxu2 %v4467_v61  ;;  %v4331_v47 = vpack.c.bf16 %v3579_v1, %v3571_v62  ;;  %v3707_v41 = vcvt.s32.f32 %v2683_v40  ;;  %v2931_v45 = vunpack.c.2.s8 %v1987_v27  ;;  %v2939_v33 = vunpack.c.3.s8 %v1987_v27  ;;  %v5168_v48 = vpop.f32.mrf.mxu1  ;;  %v5194_v6 = vpop.f32.mrf.mxu3 }
 0x475   :  { %5396 = vmatpush.bf16.msrb.mxu3 %v4531_v63  ;;  %v3827_v28 = vcvt.s32.f32 %v2803_v25  ;;  %v3835_v44 = vcvt.s32.f32 %v2811_v14  ;;  %v2531_v59 = vunpack.c.0.s8 %v1891_v37  ;;  %v2539_v23 = vunpack.c.1.s8 %v1891_v37 }
 0x476   :  { %5358 = vmatpush.bf16.msrb.mxu0 %v4331_v47  ;;  %v4395_v2 = vpack.c.bf16 %v3707_v41, %v3699_v57  ;;  %v3955_v29 = vcvt.s32.f32 %v2931_v45  ;;  %v3963_v10 = vcvt.s32.f32 %v2939_v33  ;;  %v2659_v54 = vunpack.c.0.s8 %v1923_v34 }
 0x477   :  { %v4459_v12 = vpack.c.bf16 %v3835_v44, %v3827_v28  ;;  %v3555_v31 = vcvt.s32.f32 %v2531_v59  ;;  %v3563_v39 = vcvt.s32.f32 %v2539_v23  ;;  %v2667_v16 = vunpack.c.1.s8 %v1923_v34  ;;  %v5181_v58 = vpop.f32.mrf.mxu2 }
 0x478   :  { %5371 = vmatpush.bf16.msrb.mxu1 %v4395_v2  ;;  %v4523_v18 = vpack.c.bf16 %v3963_v10, %v3955_v29  ;;  %v3683_v13 = vcvt.s32.f32 %v2659_v54  ;;  %v2787_v4 = vunpack.c.0.s8 %v1955_v56  ;;  %v2795_v22 = vunpack.c.1.s8 %v1955_v56 }
 0x479   :  { %5384 = vmatpush.bf16.msrb.mxu2 %v4459_v12  ;;  %v4323_v36 = vpack.c.bf16 %v3563_v39, %v3555_v31  ;;  %v3691_v60 = vcvt.s32.f32 %v2667_v16  ;;  %v2915_v5 = vunpack.c.0.s8 %v1987_v27  ;;  %v2923_v37 = vunpack.c.1.s8 %v1987_v27 }
 0x47a   :  { %5397 = vmatpush.bf16.msrb.mxu3 %v4523_v18  ;;  %v3811_v43 = vcvt.s32.f32 %v2787_v4  ;;  %v3819_v42 = vcvt.s32.f32 %v2795_v22  ;;  %v5115_v7 = vadd.f32 %v10505_v19, %v10503_v52  ;;  %v5411_v57 = vperm.slane %v10490_v15, 5 }
 0x47b   :  { %5359 = vmatpush.bf16.msrb.mxu0 %v4323_v36  ;;  %v4387_v34 = vpack.c.bf16 %v3691_v60, %v3683_v13  ;;  %v3939_v0 = vcvt.s32.f32 %v2915_v5  ;;  %v3947_v30 = vcvt.s32.f32 %v2923_v37  ;;  %v5412_v29 = vperm.slane %v10490_v15, 6 }
 0x47c   :  { %v4451_v61 = vpack.c.bf16 %v3819_v42, %v3811_v43  ;;  %v5128_v56 = vadd.f32 %v10507_v24, %v5115_v7  ;;  %v5438_v12 = vperm.slane %v10494_v51, 6 }
 0x47d   :  { %5372 = vmatpush.bf16.msrb.mxu1 %v4387_v34  ;;  %v4515_v62 = vpack.c.bf16 %v3947_v30, %v3939_v0 }
 0x47e   :  { %5385 = vmatpush.bf16.msrb.mxu2 %v4451_v61  ;;  %5360 = vmatmul.bf16.vlgmr.msrb.gmra.mxu0 %v10207_v9  ;;  %v5141_v27 = vadd.f32 %v10509_v8, %v5128_v56  ;;  %v5437_v8 = vperm.slane %v10494_v51, 5 }
 0x47f   :  { %5398 = vmatpush.bf16.msrb.mxu3 %v4515_v62  ;;  %v5413_v62 = vperm.slane %v10490_v15, 7 }
 0x480   :  { %5373 = vmatmul.bf16.vlgmr.msrb.gmra.mxu1 %v10222_v35  ;;  %v5154_v52 = vadd.f32 %v10511_v17, %v5141_v27 }
 0x481   :  { %5386 = vmatmul.bf16.vlgmr.msrb.gmra.mxu2 %v10203_v3  ;;  %v5205_v19 = vpop.f32.mrf.mxu0 }
 0x482   :  { %5399 = vmatmul.bf16.vlgmr.msrb.gmra.mxu3 %v10214_v11  ;;  %v5167_v1 = vadd.f32 %v5166_v20, %v5154_v52  ;;  %v5218_v40 = vpop.f32.mrf.mxu1 }
 0x483   :  { %v5219_v24 = vadd.f32 %v5218_v40, %v5205_v19  ;;  %v5439_v19 = vperm.slane %v10494_v51, 7 }
 0x484   :  { %v5180_v63 = vadd.f32 %v10513_v53, %v5167_v1 }
 0x486   :  { %v5193_v9 = vadd.f32 %v5192_v50, %v5180_v63 }
 0x488   :  { %v5427_v25 = vmul.f32 %v5411_v57, %v5193_v9 }
 0x489   :  { %v5231_v14 = vpop.f32.mrf.mxu2  ;;  %v5207_v35 = vpop.f32.mrf.mxu0 }
 0x48a   :  { %v10527_v47 = vadd.f32 %v5437_v8, %v5427_v25  ;;  %v5232_v17 = vadd.f32 %v5231_v14, %v5219_v24  ;;  %v5244_v3 = vpop.f32.mrf.mxu3  ;;  %v5220_v41 = vpop.f32.mrf.mxu1 }
 0x48c   :  { %v5245_v45 = vadd.f32 %v5244_v3, %v5232_v17 }
 0x491   :  { %v5233_v11 = vpop.f32.mrf.mxu2 }
 0x492   :  { %v5246_v20 = vpop.f32.mrf.mxu3 }
 0x4a9   :  { %v5257_v33 = vpop.f32.mrf.mxu0 }
 0x4aa   :  { %v5258_v28 = vadd.f32 %v5257_v33, %v5245_v45  ;;  %v5270_v44 = vpop.f32.mrf.mxu1 }
 0x4ac   :  { %v5271_v53 = vadd.f32 %v5270_v44, %v5258_v28 }
 0x4b1   :  { %v5283_v59 = vpop.f32.mrf.mxu2  ;;  %v5259_v23 = vpop.f32.mrf.mxu0 }
 0x4b2   :  { %v5284_v50 = vadd.f32 %v5283_v59, %v5271_v53  ;;  %v5296_v2 = vpop.f32.mrf.mxu3  ;;  %v5272_v10 = vpop.f32.mrf.mxu1 }
 0x4b4   :  { %v5297_v54 = vadd.f32 %v5296_v2, %v5284_v50 }
 0x4b6   :  { %v5428_v31 = vmul.f32 %v5412_v29, %v5297_v54 }
 0x4b8   :  { %v10531_v39 = vadd.f32 %v5438_v12, %v5428_v31 }
 0x4b9   :  { %v5285_v16 = vpop.f32.mrf.mxu2 }
 0x4ba   :  { %v5298_v38 = vpop.f32.mrf.mxu3 }
 0x4d4   :  { %v5309_v18 = vpop.f32.mrf.mxu0 }
 0x4d5   :  { %v5322_v13 = vpop.f32.mrf.mxu1 }
 0x4d6   :  { %v5323_v43 = vadd.f32 %v5322_v13, %v5309_v18 }
 0x4dc   :  { %v5335_v4 = vpop.f32.mrf.mxu2  ;;  %v5311_v22 = vpop.f32.mrf.mxu0 }
 0x4dd   :  { %v5348_v36 = vpop.f32.mrf.mxu3  ;;  %v5324_v60 = vpop.f32.mrf.mxu1  ;;  %v5336_v42 = vadd.f32 %v5335_v4, %v5323_v43 }
 0x4df   :  { %v5349_v48 = vadd.f32 %v5348_v36, %v5336_v42 }
 0x4e4   :  { %v5337_v5 = vpop.f32.mrf.mxu2 }
 0x4e5   :  { %v5350_v37 = vpop.f32.mrf.mxu3 }
 0x4fb   :  { %v5361_v7 = vpop.f32.mrf.mxu0 }
 0x4fc   :  { %v5362_v34 = vadd.f32 %v5361_v7, %v5349_v48 }
 0x4fd   :  { %v5374_v58 = vpop.f32.mrf.mxu1 }
 0x4fe   :  { %v5375_v0 = vadd.f32 %v5374_v58, %v5362_v34 }
 0x503   :  { %v5363_v30 = vpop.f32.mrf.mxu0 }
 0x504   :  { %v5387_v6 = vpop.f32.mrf.mxu2 }
 0x505   :  { %v5388_v61 = vadd.f32 %v5387_v6, %v5375_v0  ;;  %v5400_v56 = vpop.f32.mrf.mxu3  ;;  %v5376_v27 = vpop.f32.mrf.mxu1 }
 0x507   :  { %v5401_v52 = vadd.f32 %v5400_v56, %v5388_v61 }
 0x509   :  { %v5429_v1 = vmul.f32 %v5413_v62, %v5401_v52 }
 0x50b   :  { %v10535_v40 = vadd.f32 %v5439_v19, %v5429_v1 }
 0x50c   :  { %v5389_v24 = vpop.f32.mrf.mxu2 }
 0x50d   :  { %v5402_v63 = vpop.f32.mrf.mxu3 }
 0x50e   :  { %9723 = dma.done.wait [#allocation6 + $0x1], 16384 }
 0x50f   :  { %9724 = vsyncadd [#allocation6 + $0x1], 4294950912 }
 0x510   :  { %9725 = dma.done.wait [#allocation6 + $0x2], 4096 }
 0x511   :  { %9726 = vsyncadd [#allocation6 + $0x2], 4294963200  ;;  %v5483_v57 = vld [vmem:[#allocation3 + $0x60] sm:$0xff] }
 0x512   :  { %v5499_v9 = vld [vmem:[#allocation3 + $0xe0] sm:$0xff]  ;;  %v5655_v25 = vunpack.c.2.s8 %v5483_v57  ;;  %v5659_v14 = vunpack.c.3.s8 %v5483_v57  ;;  %v5647_v29 = vunpack.c.0.s8 %v5483_v57  ;;  %v5651_v10 = vunpack.c.1.s8 %v5483_v57 }
 0x513   :  { %v5515_v8 = vld [vmem:[#allocation3 + $0x160] sm:$0xff]  ;;  %v5719_v35 = vunpack.c.2.s8 %v5499_v9  ;;  %v5723_v15 = vunpack.c.3.s8 %v5499_v9  ;;  %v5711_v31 = vunpack.c.0.s8 %v5499_v9  ;;  %v5715_v16 = vunpack.c.1.s8 %v5499_v9 }
 0x514   :  { %v5531_v17 = vld [vmem:[#allocation3 + $0x1e0] sm:$0xff]  ;;  %v5783_v3 = vunpack.c.2.s8 %v5515_v8  ;;  %v5787_v41 = vunpack.c.3.s8 %v5515_v8  ;;  %v6167_v11 = vcvt.s32.f32 %v5655_v25  ;;  %v6171_v20 = vcvt.s32.f32 %v5659_v14 }
 0x515   :  { %v5847_v51 = vunpack.c.2.s8 %v5531_v17  ;;  %v5851_v45 = vunpack.c.3.s8 %v5531_v17  ;;  %v6231_v33 = vcvt.s32.f32 %v5719_v35  ;;  %v6235_v28 = vcvt.s32.f32 %v5723_v15  ;;  %v5479_v38 = vld [vmem:[#allocation3 + $0x40] sm:$0xff] }
 0x516   :  { %v6295_v44 = vcvt.s32.f32 %v5783_v3  ;;  %v6299_v53 = vcvt.s32.f32 %v5787_v41  ;;  %v6651_v50 = vpack.c.bf16 %v6171_v20, %v6167_v11  ;;  %v6159_v18 = vcvt.s32.f32 %v5647_v29  ;;  %v5495_v43 = vld [vmem:[#allocation3 + $0xc0] sm:$0xff] }
 0x517   :  { %v6359_v59 = vcvt.s32.f32 %v5847_v51  ;;  %v6363_v23 = vcvt.s32.f32 %v5851_v45  ;;  %v6683_v2 = vpack.c.bf16 %v6235_v28, %v6231_v33  ;;  %v6163_v13 = vcvt.s32.f32 %v5651_v10  ;;  %v5511_v34 = vld [vmem:[#allocation3 + $0x140] sm:$0xff] }
 0x518   :  { %v6715_v54 = vpack.c.bf16 %v6299_v53, %v6295_v44  ;;  %6879 = vmatpush.bf16.msra.mxu0 %v6651_v50  ;;  %v5775_v4 = vunpack.c.0.s8 %v5515_v8  ;;  %v5779_v22 = vunpack.c.1.s8 %v5515_v8  ;;  %v6223_v36 = vcvt.s32.f32 %v5711_v31  ;;  %v5527_v56 = vld [vmem:[#allocation3 + $0x1c0] sm:$0xff] }
 0x519   :  { %v6747_v12 = vpack.c.bf16 %v6363_v23, %v6359_v59  ;;  %6892 = vmatpush.bf16.msra.mxu1 %v6683_v2  ;;  %v6227_v60 = vcvt.s32.f32 %v5715_v16  ;;  %v5839_v5 = vunpack.c.0.s8 %v5531_v17  ;;  %v5843_v37 = vunpack.c.1.s8 %v5531_v17  ;;  %v5475_v53 = vld [vmem:[#allocation3 + $0x20] sm:$0xff] }
 0x51a   :  { %6905 = vmatpush.bf16.msra.mxu2 %v6715_v54  ;;  %v6647_v42 = vpack.c.bf16 %v6163_v13, %v6159_v18  ;;  %v6287_v7 = vcvt.s32.f32 %v5775_v4  ;;  %v6291_v48 = vcvt.s32.f32 %v5779_v22  ;;  %v5639_v58 = vunpack.c.2.s8 %v5479_v38  ;;  %v5491_v31 = vld [vmem:[#allocation3 + $0xa0] sm:$0xff] }
 0x51b   :  { %6918 = vmatpush.bf16.msra.mxu3 %v6747_v12  ;;  %v6679_v0 = vpack.c.bf16 %v6227_v60, %v6223_v36  ;;  %v6351_v30 = vcvt.s32.f32 %v5839_v5  ;;  %v6355_v6 = vcvt.s32.f32 %v5843_v37  ;;  %v5643_v61 = vunpack.c.3.s8 %v5479_v38  ;;  %v5507_v4 = vld [vmem:[#allocation3 + $0x120] sm:$0xff] }
 0x51c   :  { %6880 = vmatpush.bf16.msra.mxu0 %v6647_v42  ;;  %v6711_v62 = vpack.c.bf16 %v6291_v48, %v6287_v7  ;;  %v6151_v27 = vcvt.s32.f32 %v5639_v58  ;;  %v5703_v52 = vunpack.c.2.s8 %v5495_v43  ;;  %v5707_v19 = vunpack.c.3.s8 %v5495_v43  ;;  %v5523_v37 = vld [vmem:[#allocation3 + $0x1a0] sm:$0xff] }
 0x51d   :  { %6893 = vmatpush.bf16.msra.mxu1 %v6679_v0  ;;  %v6743_v1 = vpack.c.bf16 %v6355_v6, %v6351_v30  ;;  %v6155_v24 = vcvt.s32.f32 %v5643_v61  ;;  %v5767_v63 = vunpack.c.2.s8 %v5511_v34  ;;  %v5771_v57 = vunpack.c.3.s8 %v5511_v34 }
 0x51e   :  { %6906 = vmatpush.bf16.msra.mxu2 %v6711_v62  ;;  %v6215_v9 = vcvt.s32.f32 %v5703_v52  ;;  %v6219_v8 = vcvt.s32.f32 %v5707_v19  ;;  %v5831_v25 = vunpack.c.2.s8 %v5527_v56  ;;  %v5835_v14 = vunpack.c.3.s8 %v5527_v56 }
 0x51f   :  { %6919 = vmatpush.bf16.msra.mxu3 %v6743_v1  ;;  %v6643_v35 = vpack.c.bf16 %v6155_v24, %v6151_v27  ;;  %v6279_v15 = vcvt.s32.f32 %v5767_v63  ;;  %v6283_v17 = vcvt.s32.f32 %v5771_v57  ;;  %v5631_v3 = vunpack.c.0.s8 %v5479_v38 }
 0x520   :  { %v6675_v41 = vpack.c.bf16 %v6219_v8, %v6215_v9  ;;  %v6343_v51 = vcvt.s32.f32 %v5831_v25  ;;  %v6347_v45 = vcvt.s32.f32 %v5835_v14  ;;  %v5635_v11 = vunpack.c.1.s8 %v5479_v38 }
 0x521   :  { %6881 = vmatpush.bf16.msra.mxu0 %v6643_v35  ;;  %v6707_v20 = vpack.c.bf16 %v6283_v17, %v6279_v15  ;;  %v6143_v33 = vcvt.s32.f32 %v5631_v3  ;;  %v5695_v28 = vunpack.c.0.s8 %v5495_v43  ;;  %v5699_v44 = vunpack.c.1.s8 %v5495_v43  ;;  %v5471_v15 = vld [vmem:[#allocation3] sm:$0xff] }
 0x522   :  { %6894 = vmatpush.bf16.msra.mxu1 %v6675_v41  ;;  %v6739_v59 = vpack.c.bf16 %v6347_v45, %v6343_v51  ;;  %v6147_v23 = vcvt.s32.f32 %v5635_v11  ;;  %v5759_v50 = vunpack.c.0.s8 %v5511_v34  ;;  %v5763_v2 = vunpack.c.1.s8 %v5511_v34 }
 0x523   :  { %6907 = vmatpush.bf16.msra.mxu2 %v6707_v20  ;;  %v6207_v29 = vcvt.s32.f32 %v5695_v28  ;;  %v6211_v10 = vcvt.s32.f32 %v5699_v44  ;;  %v5823_v54 = vunpack.c.0.s8 %v5527_v56  ;;  %v5827_v12 = vunpack.c.1.s8 %v5527_v56  ;;  %v5487_v28 = vld [vmem:[#allocation3 + $0x80] sm:$0xff] }
 0x524   :  { %6920 = vmatpush.bf16.msra.mxu3 %v6739_v59  ;;  %v6639_v16 = vpack.c.bf16 %v6147_v23, %v6143_v33  ;;  %v6271_v38 = vcvt.s32.f32 %v5759_v50  ;;  %v6275_v18 = vcvt.s32.f32 %v5763_v2  ;;  %v5623_v13 = vunpack.c.2.s8 %v5475_v53  ;;  %v5503_v50 = vld [vmem:[#allocation3 + $0x100] sm:$0xff] }
 0x525   :  { %v6671_v22 = vpack.c.bf16 %v6211_v10, %v6207_v29  ;;  %v6335_v36 = vcvt.s32.f32 %v5823_v54  ;;  %v6339_v60 = vcvt.s32.f32 %v5827_v12  ;;  %v5627_v5 = vunpack.c.3.s8 %v5475_v53  ;;  %v5519_v12 = vld [vmem:[#allocation3 + $0x180] sm:$0xff] }
 0x526   :  { %6882 = vmatpush.bf16.msra.mxu0 %v6639_v16  ;;  %v6703_v43 = vpack.c.bf16 %v6275_v18, %v6271_v38  ;;  %v6135_v42 = vcvt.s32.f32 %v5623_v13  ;;  %v5687_v7 = vunpack.c.2.s8 %v5491_v31  ;;  %v5691_v48 = vunpack.c.3.s8 %v5491_v31 }
 0x527   :  { %6895 = vmatpush.bf16.msra.mxu1 %v6671_v22  ;;  %v6735_v58 = vpack.c.bf16 %v6339_v60, %v6335_v36  ;;  %v6139_v34 = vcvt.s32.f32 %v5627_v5  ;;  %v5751_v0 = vunpack.c.2.s8 %v5507_v4  ;;  %v5755_v30 = vunpack.c.3.s8 %v5507_v4 }
 0x528   :  { %6908 = vmatpush.bf16.msra.mxu2 %v6703_v43  ;;  %v6199_v6 = vcvt.s32.f32 %v5687_v7  ;;  %v6203_v61 = vcvt.s32.f32 %v5691_v48  ;;  %v5815_v56 = vunpack.c.2.s8 %v5523_v37  ;;  %v5819_v62 = vunpack.c.3.s8 %v5523_v37 }
 0x529   :  { %6921 = vmatpush.bf16.msra.mxu3 %v6735_v58  ;;  %v6635_v27 = vpack.c.bf16 %v6139_v34, %v6135_v42  ;;  %v6263_v52 = vcvt.s32.f32 %v5751_v0  ;;  %v6267_v19 = vcvt.s32.f32 %v5755_v30  ;;  %v5615_v1 = vunpack.c.0.s8 %v5475_v53 }
 0x52a   :  { %v6667_v24 = vpack.c.bf16 %v6203_v61, %v6199_v6  ;;  %v6327_v63 = vcvt.s32.f32 %v5815_v56  ;;  %v6331_v57 = vcvt.s32.f32 %v5819_v62  ;;  %v5619_v9 = vunpack.c.1.s8 %v5475_v53 }
 0x52b   :  { %6883 = vmatpush.bf16.msra.mxu0 %v6635_v27  ;;  %v6699_v8 = vpack.c.bf16 %v6267_v19, %v6263_v52  ;;  %v6127_v25 = vcvt.s32.f32 %v5615_v1  ;;  %v5679_v14 = vunpack.c.0.s8 %v5491_v31  ;;  %v5683_v35 = vunpack.c.1.s8 %v5491_v31  ;;  %v5547_v52 = vld [vmem:[#allocation3 + $0x260] sm:$0xff] }
 0x52c   :  { %6896 = vmatpush.bf16.msra.mxu1 %v6667_v24  ;;  %v6731_v17 = vpack.c.bf16 %v6331_v57, %v6327_v63  ;;  %v6131_v3 = vcvt.s32.f32 %v5619_v9  ;;  %v5743_v41 = vunpack.c.0.s8 %v5507_v4  ;;  %v5747_v51 = vunpack.c.1.s8 %v5507_v4 }
 0x52d   :  { %6909 = vmatpush.bf16.msra.mxu2 %v6699_v8  ;;  %v6191_v45 = vcvt.s32.f32 %v5679_v14  ;;  %v6195_v11 = vcvt.s32.f32 %v5683_v35  ;;  %v5807_v20 = vunpack.c.0.s8 %v5523_v37  ;;  %v5811_v33 = vunpack.c.1.s8 %v5523_v37  ;;  %v5563_v14 = vld [vmem:[#allocation3 + $0x2e0] sm:$0xff] }
 0x52e   :  { %6922 = vmatpush.bf16.msra.mxu3 %v6731_v17  ;;  %v6631_v44 = vpack.c.bf16 %v6131_v3, %v6127_v25  ;;  %v6255_v53 = vcvt.s32.f32 %v5743_v41  ;;  %v6259_v59 = vcvt.s32.f32 %v5747_v51  ;;  %v5607_v23 = vunpack.c.2.s8 %v5471_v15  ;;  %v5579_v41 = vld [vmem:[#allocation3 + $0x360] sm:$0xff] }
 0x52f   :  { %v6663_v2 = vpack.c.bf16 %v6195_v11, %v6191_v45  ;;  %v6319_v29 = vcvt.s32.f32 %v5807_v20  ;;  %v6323_v10 = vcvt.s32.f32 %v5811_v33  ;;  %v5611_v54 = vunpack.c.3.s8 %v5471_v15  ;;  %v5595_v33 = vld [vmem:[#allocation3 + $0x3e0] sm:$0xff] }
 0x530   :  { %6884 = vmatpush.bf16.msra.mxu0 %v6631_v44  ;;  %v6695_v31 = vpack.c.bf16 %v6259_v59, %v6255_v53  ;;  %v6119_v16 = vcvt.s32.f32 %v5607_v23  ;;  %v5671_v38 = vunpack.c.2.s8 %v5487_v28  ;;  %v5675_v18 = vunpack.c.3.s8 %v5487_v28 }
 0x531   :  { %6897 = vmatpush.bf16.msra.mxu1 %v6663_v2  ;;  %v6727_v13 = vpack.c.bf16 %v6323_v10, %v6319_v29  ;;  %v6123_v4 = vcvt.s32.f32 %v5611_v54  ;;  %v5735_v22 = vunpack.c.2.s8 %v5503_v50  ;;  %v5739_v36 = vunpack.c.3.s8 %v5503_v50 }
 0x532   :  { %6910 = vmatpush.bf16.msra.mxu2 %v6695_v31  ;;  %v6183_v60 = vcvt.s32.f32 %v5671_v38  ;;  %v6187_v5 = vcvt.s32.f32 %v5675_v18  ;;  %v5799_v37 = vunpack.c.2.s8 %v5519_v12  ;;  %v5803_v43 = vunpack.c.3.s8 %v5519_v12 }
 0x533   :  { %6923 = vmatpush.bf16.msra.mxu3 %v6727_v13  ;;  %v6627_v42 = vpack.c.bf16 %v6123_v4, %v6119_v16  ;;  %v6247_v7 = vcvt.s32.f32 %v5735_v22  ;;  %v6251_v48 = vcvt.s32.f32 %v5739_v36  ;;  %v5599_v58 = vunpack.c.0.s8 %v5471_v15 }
 0x534   :  { %v6659_v34 = vpack.c.bf16 %v6187_v5, %v6183_v60  ;;  %v6311_v0 = vcvt.s32.f32 %v5799_v37  ;;  %v6315_v30 = vcvt.s32.f32 %v5803_v43  ;;  %v5603_v6 = vunpack.c.1.s8 %v5471_v15 }
 0x535   :  { %6885 = vmatpush.bf16.msra.mxu0 %v6627_v42  ;;  %v6691_v61 = vpack.c.bf16 %v6251_v48, %v6247_v7  ;;  %v6111_v56 = vcvt.s32.f32 %v5599_v58  ;;  %v5663_v62 = vunpack.c.0.s8 %v5487_v28  ;;  %v5667_v27 = vunpack.c.1.s8 %v5487_v28  ;;  %v5543_v7 = vld [vmem:[#allocation3 + $0x240] sm:$0xff] }
 0x536   :  { %6898 = vmatpush.bf16.msra.mxu1 %v6659_v34  ;;  %v6723_v19 = vpack.c.bf16 %v6315_v30, %v6311_v0  ;;  %v6115_v1 = vcvt.s32.f32 %v5603_v6  ;;  %v5727_v24 = vunpack.c.0.s8 %v5503_v50  ;;  %v5731_v63 = vunpack.c.1.s8 %v5503_v50 }
 0x537   :  { %6911 = vmatpush.bf16.msra.mxu2 %v6691_v61  ;;  %v6175_v57 = vcvt.s32.f32 %v5663_v62  ;;  %v6179_v9 = vcvt.s32.f32 %v5667_v27  ;;  %v5791_v8 = vunpack.c.0.s8 %v5519_v12  ;;  %v5795_v25 = vunpack.c.1.s8 %v5519_v12  ;;  %v5559_v62 = vld [vmem:[#allocation3 + $0x2c0] sm:$0xff] }
 0x538   :  { %6924 = vmatpush.bf16.msra.mxu3 %v6723_v19  ;;  %v6623_v35 = vpack.c.bf16 %v6115_v1, %v6111_v56  ;;  %v6239_v15 = vcvt.s32.f32 %v5727_v24  ;;  %v6243_v17 = vcvt.s32.f32 %v5731_v63  ;;  %v5911_v3 = vunpack.c.2.s8 %v5547_v52  ;;  %v5575_v24 = vld [vmem:[#allocation3 + $0x340] sm:$0xff] }
 0x539   :  { %v6655_v51 = vpack.c.bf16 %v6179_v9, %v6175_v57  ;;  %v6303_v45 = vcvt.s32.f32 %v5791_v8  ;;  %v6307_v11 = vcvt.s32.f32 %v5795_v25  ;;  %v5915_v20 = vunpack.c.3.s8 %v5547_v52  ;;  %v5591_v25 = vld [vmem:[#allocation3 + $0x3c0] sm:$0xff] }
 0x53a   :  { %6886 = vmatpush.bf16.msra.mxu0 %v6623_v35  ;;  %v6687_v28 = vpack.c.bf16 %v6243_v17, %v6239_v15  ;;  %v6423_v44 = vcvt.s32.f32 %v5911_v3  ;;  %v5975_v53 = vunpack.c.2.s8 %v5563_v14  ;;  %v5979_v59 = vunpack.c.3.s8 %v5563_v14 }
 0x53b   :  { %6899 = vmatpush.bf16.msra.mxu1 %v6655_v51  ;;  %v6719_v23 = vpack.c.bf16 %v6307_v11, %v6303_v45  ;;  %v6427_v50 = vcvt.s32.f32 %v5915_v20  ;;  %v6039_v2 = vunpack.c.2.s8 %v5579_v41  ;;  %v6043_v29 = vunpack.c.3.s8 %v5579_v41 }
 0x53c   :  { %6912 = vmatpush.bf16.msra.mxu2 %v6687_v28  ;;  %v6487_v10 = vcvt.s32.f32 %v5975_v53  ;;  %v6491_v54 = vcvt.s32.f32 %v5979_v59  ;;  %v6103_v12 = vunpack.c.2.s8 %v5595_v33  ;;  %v6107_v31 = vunpack.c.3.s8 %v5595_v33 }
 0x53d   :  { %6925 = vmatpush.bf16.msra.mxu3 %v6719_v23  ;;  %v6779_v16 = vpack.c.bf16 %v6427_v50, %v6423_v44  ;;  %v6551_v38 = vcvt.s32.f32 %v6039_v2  ;;  %v6555_v18 = vcvt.s32.f32 %v6043_v29  ;;  %v5903_v13 = vunpack.c.0.s8 %v5547_v52 }
 0x53e   :  { %v6811_v4 = vpack.c.bf16 %v6491_v54, %v6487_v10  ;;  %v6615_v22 = vcvt.s32.f32 %v6103_v12  ;;  %v6619_v36 = vcvt.s32.f32 %v6107_v31  ;;  %v5907_v60 = vunpack.c.1.s8 %v5547_v52 }
 0x53f   :  { %6931 = vmatpush.bf16.msrb.mxu0 %v6779_v16  ;;  %v6843_v5 = vpack.c.bf16 %v6555_v18, %v6551_v38  ;;  %v6415_v37 = vcvt.s32.f32 %v5903_v13  ;;  %v5967_v43 = vunpack.c.0.s8 %v5563_v14  ;;  %v5971_v42 = vunpack.c.1.s8 %v5563_v14  ;;  %v5539_v38 = vld [vmem:[#allocation3 + $0x220] sm:$0xff] }
 0x540   :  { %6944 = vmatpush.bf16.msrb.mxu1 %v6811_v4  ;;  %v6875_v48 = vpack.c.bf16 %v6619_v36, %v6615_v22  ;;  %v6419_v58 = vcvt.s32.f32 %v5907_v60  ;;  %v6031_v34 = vunpack.c.0.s8 %v5579_v41  ;;  %v6035_v0 = vunpack.c.1.s8 %v5579_v41 }
 0x541   :  { %6957 = vmatpush.bf16.msrb.mxu2 %v6843_v5  ;;  %v6479_v30 = vcvt.s32.f32 %v5967_v43  ;;  %v6483_v6 = vcvt.s32.f32 %v5971_v42  ;;  %v6095_v61 = vunpack.c.0.s8 %v5595_v33  ;;  %v6099_v56 = vunpack.c.1.s8 %v5595_v33  ;;  %v5555_v43 = vld [vmem:[#allocation3 + $0x2a0] sm:$0xff] }
 0x542   :  { %6970 = vmatpush.bf16.msrb.mxu3 %v6875_v48  ;;  %v6775_v27 = vpack.c.bf16 %v6419_v58, %v6415_v37  ;;  %v6543_v52 = vcvt.s32.f32 %v6031_v34  ;;  %v6547_v19 = vcvt.s32.f32 %v6035_v0  ;;  %v5895_v1 = vunpack.c.2.s8 %v5543_v7  ;;  %v5571_v34 = vld [vmem:[#allocation3 + $0x320] sm:$0xff] }
 0x543   :  { %v6807_v63 = vpack.c.bf16 %v6483_v6, %v6479_v30  ;;  %v6607_v57 = vcvt.s32.f32 %v6095_v61  ;;  %v6611_v9 = vcvt.s32.f32 %v6099_v56  ;;  %v5899_v8 = vunpack.c.3.s8 %v5543_v7  ;;  %v5587_v56 = vld [vmem:[#allocation3 + $0x3a0] sm:$0xff] }
 0x544   :  { %6932 = vmatpush.bf16.msrb.mxu0 %v6775_v27  ;;  %v6839_v14 = vpack.c.bf16 %v6547_v19, %v6543_v52  ;;  %v6407_v35 = vcvt.s32.f32 %v5895_v1  ;;  %v5959_v15 = vunpack.c.2.s8 %v5559_v62  ;;  %v5963_v17 = vunpack.c.3.s8 %v5559_v62 }
 0x545   :  { %6945 = vmatpush.bf16.msrb.mxu1 %v6807_v63  ;;  %v6871_v3 = vpack.c.bf16 %v6611_v9, %v6607_v57  ;;  %v6411_v41 = vcvt.s32.f32 %v5899_v8  ;;  %v6023_v51 = vunpack.c.2.s8 %v5575_v24  ;;  %v6027_v45 = vunpack.c.3.s8 %v5575_v24 }
 0x546   :  { %6958 = vmatpush.bf16.msrb.mxu2 %v6839_v14  ;;  %v6471_v11 = vcvt.s32.f32 %v5959_v15  ;;  %v6475_v20 = vcvt.s32.f32 %v5963_v17  ;;  %v6087_v33 = vunpack.c.2.s8 %v5591_v25  ;;  %v6091_v28 = vunpack.c.3.s8 %v5591_v25 }
 0x547   :  { %6971 = vmatpush.bf16.msrb.mxu3 %v6871_v3  ;;  %v6771_v44 = vpack.c.bf16 %v6411_v41, %v6407_v35  ;;  %v6535_v53 = vcvt.s32.f32 %v6023_v51  ;;  %v6539_v59 = vcvt.s32.f32 %v6027_v45  ;;  %v5887_v23 = vunpack.c.0.s8 %v5543_v7 }
 0x548   :  { %v6803_v50 = vpack.c.bf16 %v6475_v20, %v6471_v11  ;;  %v6599_v2 = vcvt.s32.f32 %v6087_v33  ;;  %v6603_v29 = vcvt.s32.f32 %v6091_v28  ;;  %v5891_v10 = vunpack.c.1.s8 %v5543_v7 }
 0x549   :  { %6933 = vmatpush.bf16.msrb.mxu0 %v6771_v44  ;;  %v6835_v54 = vpack.c.bf16 %v6539_v59, %v6535_v53  ;;  %v6399_v12 = vcvt.s32.f32 %v5887_v23  ;;  %v5951_v31 = vunpack.c.0.s8 %v5559_v62  ;;  %v5955_v16 = vunpack.c.1.s8 %v5559_v62 }
 0x54a   :  { %6946 = vmatpush.bf16.msrb.mxu1 %v6803_v50  ;;  %v6867_v18 = vpack.c.bf16 %v6603_v29, %v6599_v2  ;;  %v6403_v13 = vcvt.s32.f32 %v5891_v10  ;;  %v6015_v4 = vunpack.c.0.s8 %v5575_v24  ;;  %v6019_v22 = vunpack.c.1.s8 %v5575_v24 }
 0x54b   :  { %6959 = vmatpush.bf16.msrb.mxu2 %v6835_v54  ;;  %v6463_v36 = vcvt.s32.f32 %v5951_v31  ;;  %v6467_v60 = vcvt.s32.f32 %v5955_v16  ;;  %v6079_v5 = vunpack.c.0.s8 %v5591_v25  ;;  %v6083_v37 = vunpack.c.1.s8 %v5591_v25  ;;  %v5535_v54 = vld [vmem:[#allocation3 + $0x200] sm:$0xff] }
 0x54c   :  { %6972 = vmatpush.bf16.msrb.mxu3 %v6867_v18  ;;  %v6767_v42 = vpack.c.bf16 %v6403_v13, %v6399_v12  ;;  %v6527_v7 = vcvt.s32.f32 %v6015_v4  ;;  %v6531_v48 = vcvt.s32.f32 %v6019_v22  ;;  %v5879_v58 = vunpack.c.2.s8 %v5539_v38  ;;  %v5551_v18 = vld [vmem:[#allocation3 + $0x280] sm:$0xff] }
 0x54d   :  { %v6799_v0 = vpack.c.bf16 %v6467_v60, %v6463_v36  ;;  %v6591_v30 = vcvt.s32.f32 %v6079_v5  ;;  %v6595_v6 = vcvt.s32.f32 %v6083_v37  ;;  %v5883_v61 = vunpack.c.3.s8 %v5539_v38  ;;  %v5567_v13 = vld [vmem:[#allocation3 + $0x300] sm:$0xff] }
 0x54e   :  { %6934 = vmatpush.bf16.msrb.mxu0 %v6767_v42  ;;  %v6831_v62 = vpack.c.bf16 %v6531_v48, %v6527_v7  ;;  %v6391_v27 = vcvt.s32.f32 %v5879_v58  ;;  %v5943_v52 = vunpack.c.2.s8 %v5555_v43  ;;  %v5947_v19 = vunpack.c.3.s8 %v5555_v43  ;;  %v5583_v5 = vld [vmem:[#allocation3 + $0x380] sm:$0xff] }
 0x54f   :  { %6947 = vmatpush.bf16.msrb.mxu1 %v6799_v0  ;;  %v6863_v1 = vpack.c.bf16 %v6595_v6, %v6591_v30  ;;  %v6395_v24 = vcvt.s32.f32 %v5883_v61  ;;  %v6007_v63 = vunpack.c.2.s8 %v5571_v34  ;;  %v6011_v57 = vunpack.c.3.s8 %v5571_v34 }
 0x550   :  { %6960 = vmatpush.bf16.msrb.mxu2 %v6831_v62  ;;  %v6455_v9 = vcvt.s32.f32 %v5943_v52  ;;  %v6459_v8 = vcvt.s32.f32 %v5947_v19  ;;  %v6071_v25 = vunpack.c.2.s8 %v5587_v56  ;;  %v6075_v14 = vunpack.c.3.s8 %v5587_v56 }
 0x551   :  { %6973 = vmatpush.bf16.msrb.mxu3 %v6863_v1  ;;  %v6763_v35 = vpack.c.bf16 %v6395_v24, %v6391_v27  ;;  %v6519_v15 = vcvt.s32.f32 %v6007_v63  ;;  %v6523_v17 = vcvt.s32.f32 %v6011_v57  ;;  %v10539_v3 = vpack.c.bf16 %v10400_v32, %v10400_v32 }
 0x552   :  { %v6795_v41 = vpack.c.bf16 %v6459_v8, %v6455_v9  ;;  %v6583_v51 = vcvt.s32.f32 %v6071_v25  ;;  %v6587_v45 = vcvt.s32.f32 %v6075_v14  ;;  %v5871_v11 = vunpack.c.0.s8 %v5539_v38 }
 0x553   :  { %6935 = vmatpush.bf16.msrb.mxu0 %v6763_v35  ;;  %v6827_v20 = vpack.c.bf16 %v6523_v17, %v6519_v15  ;;  %6913 = vmatmul.bf16.vlgmr.msra.gmra.mxu2 %v10539_v3  ;;  %v5875_v33 = vunpack.c.1.s8 %v5539_v38  ;;  %v5935_v28 = vunpack.c.0.s8 %v5555_v43  ;;  %v5939_v44 = vunpack.c.1.s8 %v5555_v43  ;;  %v5484_v15 = vld [vmem:[#allocation3 + $0x68] sm:$0xff] }
 0x554   :  { %6948 = vmatpush.bf16.msrb.mxu1 %v6795_v41  ;;  %v6859_v53 = vpack.c.bf16 %v6587_v45, %v6583_v51  ;;  %v6383_v59 = vcvt.s32.f32 %v5871_v11  ;;  %v5999_v23 = vunpack.c.0.s8 %v5571_v34  ;;  %v6003_v50 = vunpack.c.1.s8 %v5571_v34 }
 0x555   :  { %6961 = vmatpush.bf16.msrb.mxu2 %v6827_v20  ;;  %v6387_v2 = vcvt.s32.f32 %v5875_v33  ;;  %v6447_v32 = vcvt.s32.f32 %v5935_v28  ;;  %v6451_v29 = vcvt.s32.f32 %v5939_v44  ;;  %v6063_v10 = vunpack.c.0.s8 %v5587_v56  ;;  %v5500_v44 = vld [vmem:[#allocation3 + $0xe8] sm:$0xff] }
 0x556   :  { %6974 = vmatpush.bf16.msrb.mxu3 %v6859_v53  ;;  %v6511_v12 = vcvt.s32.f32 %v5999_v23  ;;  %v6515_v31 = vcvt.s32.f32 %v6003_v50  ;;  %v6067_v16 = vunpack.c.1.s8 %v5587_v56  ;;  %v10544_v38 = vpack.c.bf16 %v10285_v55, %v10285_v55 }
 0x557   :  { %v6759_v4 = vpack.c.bf16 %v6387_v2, %v6383_v59  ;;  %v6791_v22 = vpack.c.bf16 %v6451_v29, %v6447_v32  ;;  %v6575_v36 = vcvt.s32.f32 %v6063_v10  ;;  %v10548_v60 = vpack.c.bf16 %v10445_v49, %v10445_v49  ;;  %v5516_v2 = vld [vmem:[#allocation3 + $0x168] sm:$0xff] }
 0x558   :  { %v6823_v37 = vpack.c.bf16 %v6515_v31, %v6511_v12  ;;  %v6579_v43 = vcvt.s32.f32 %v6067_v16  ;;  %6887 = vmatmul.bf16.vlgmr.msra.gmra.mxu0 %v10544_v38  ;;  %v10553_v42 = vpack.c.bf16 %v10336_v21, %v10336_v21  ;;  %v5863_v55 = vunpack.c.2.s8 %v5535_v54  ;;  %v5532_v12 = vld [vmem:[#allocation3 + $0x1e8] sm:$0xff] }
 0x559   :  { %6936 = vmatpush.bf16.msrb.mxu0 %v6759_v4  ;;  %6949 = vmatpush.bf16.msrb.mxu1 %v6791_v22  ;;  %v5867_v7 = vunpack.c.3.s8 %v5535_v54  ;;  %v5927_v48 = vunpack.c.2.s8 %v5551_v18  ;;  %v5931_v58 = vunpack.c.3.s8 %v5551_v18  ;;  %v5991_v34 = vunpack.c.2.s8 %v5567_v13 }
 0x55a   :  { %6962 = vmatpush.bf16.msrb.mxu2 %v6823_v37  ;;  %v6855_v0 = vpack.c.bf16 %v6579_v43, %v6575_v36  ;;  %6926 = vmatmul.bf16.vlgmr.msra.gmra.mxu3 %v10548_v60  ;;  %v6375_v49 = vcvt.s32.f32 %v5863_v55  ;;  %v5995_v30 = vunpack.c.3.s8 %v5567_v13  ;;  %v6055_v6 = vunpack.c.2.s8 %v5583_v5 }
 0x55b   :  { %6900 = vmatmul.bf16.vlgmr.msra.gmra.mxu1 %v10553_v42  ;;  %v6379_v61 = vcvt.s32.f32 %v5867_v7  ;;  %v6439_v56 = vcvt.s32.f32 %v5927_v48  ;;  %v6443_v21 = vcvt.s32.f32 %v5931_v58  ;;  %v6503_v62 = vcvt.s32.f32 %v5991_v34 }
 0x55c   :  { %6975 = vmatpush.bf16.msrb.mxu3 %v6855_v0  ;;  %v6507_v27 = vcvt.s32.f32 %v5995_v30  ;;  %v6059_v52 = vunpack.c.3.s8 %v5583_v5  ;;  %v6567_v19 = vcvt.s32.f32 %v6055_v6  ;;  %v5855_v1 = vunpack.c.0.s8 %v5535_v54 }
 0x55d   :  { %v6755_v24 = vpack.c.bf16 %v6379_v61, %v6375_v49  ;;  %v6787_v63 = vpack.c.bf16 %v6443_v21, %v6439_v56  ;;  %v5859_v57 = vunpack.c.1.s8 %v5535_v54  ;;  %v5919_v9 = vunpack.c.0.s8 %v5551_v18 }
 0x55e   :  { %v6819_v8 = vpack.c.bf16 %v6507_v27, %v6503_v62  ;;  %v6571_v25 = vcvt.s32.f32 %v6059_v52  ;;  %v6367_v14 = vcvt.s32.f32 %v5855_v1  ;;  %v5923_v35 = vunpack.c.1.s8 %v5551_v18 }
 0x55f   :  { %6937 = vmatpush.bf16.msrb.mxu0 %v6755_v24  ;;  %6950 = vmatpush.bf16.msrb.mxu1 %v6787_v63  ;;  %v6371_v17 = vcvt.s32.f32 %v5859_v57  ;;  %v6431_v41 = vcvt.s32.f32 %v5919_v9  ;;  %v5983_v51 = vunpack.c.0.s8 %v5567_v13  ;;  %v5987_v45 = vunpack.c.1.s8 %v5567_v13 }
 0x560   :  { %6963 = vmatpush.bf16.msrb.mxu2 %v6819_v8  ;;  %v6851_v11 = vpack.c.bf16 %v6571_v25, %v6567_v19  ;;  %v6435_v20 = vcvt.s32.f32 %v5923_v35  ;;  %v6047_v33 = vunpack.c.0.s8 %v5583_v5  ;;  %v6051_v28 = vunpack.c.1.s8 %v5583_v5  ;;  %v5480_v25 = vld [vmem:[#allocation3 + $0x48] sm:$0xff] }
 0x561   :  { %v6751_v53 = vpack.c.bf16 %v6371_v17, %v6367_v14  ;;  %v6495_v59 = vcvt.s32.f32 %v5983_v51  ;;  %v6499_v23 = vcvt.s32.f32 %v5987_v45  ;;  %v5656_v50 = vunpack.c.2.s8 %v5484_v15  ;;  %v5512_v51 = vld [vmem:[#allocation3 + $0x148] sm:$0xff] }
 0x562   :  { %6976 = vmatpush.bf16.msrb.mxu3 %v6851_v11  ;;  %v6783_v32 = vpack.c.bf16 %v6435_v20, %v6431_v41  ;;  %v6559_v29 = vcvt.s32.f32 %v6047_v33  ;;  %v6563_v10 = vcvt.s32.f32 %v6051_v28  ;;  %v5660_v54 = vunpack.c.3.s8 %v5484_v15  ;;  %v5496_v41 = vld [vmem:[#allocation3 + $0xc8] sm:$0xff] }
 0x563   :  { %6938 = vmatpush.bf16.msrb.mxu0 %v6751_v53  ;;  %v6815_v31 = vpack.c.bf16 %v6499_v23, %v6495_v59  ;;  %v6168_v16 = vcvt.s32.f32 %v5656_v50  ;;  %v5720_v18 = vunpack.c.2.s8 %v5500_v44  ;;  %v5724_v13 = vunpack.c.3.s8 %v5500_v44  ;;  %v10565_v28 = vld [vmem:[#allocation3 + $0x1c8] sm:$0xff] }
 0x564   :  { %6951 = vmatpush.bf16.msrb.mxu1 %v6783_v32  ;;  %v6847_v4 = vpack.c.bf16 %v6563_v10, %v6559_v29  ;;  %v6172_v22 = vcvt.s32.f32 %v5660_v54  ;;  %v5784_v36 = vunpack.c.2.s8 %v5516_v2  ;;  %v5788_v5 = vunpack.c.3.s8 %v5516_v2 }
 0x565   :  { %6964 = vmatpush.bf16.msrb.mxu2 %v6815_v31  ;;  %v6232_v37 = vcvt.s32.f32 %v5720_v18  ;;  %v6236_v43 = vcvt.s32.f32 %v5724_v13  ;;  %v5848_v55 = vunpack.c.2.s8 %v5532_v12  ;;  %v5852_v7 = vunpack.c.3.s8 %v5532_v12 }
 0x566   :  { %6977 = vmatpush.bf16.msrb.mxu3 %v6847_v4  ;;  %v6652_v48 = vpack.c.bf16 %v6172_v22, %v6168_v16  ;;  %v6296_v58 = vcvt.s32.f32 %v5784_v36  ;;  %v6300_v34 = vcvt.s32.f32 %v5788_v5  ;;  %v5648_v0 = vunpack.c.0.s8 %v5484_v15 }
 0x567   :  { %v6684_v49 = vpack.c.bf16 %v6236_v43, %v6232_v37  ;;  %v6360_v30 = vcvt.s32.f32 %v5848_v55  ;;  %v6364_v6 = vcvt.s32.f32 %v5852_v7  ;;  %v5652_v61 = vunpack.c.1.s8 %v5484_v15 }
 0x568   :  { %6983 = vmatpush.bf16.msra.mxu0 %v6652_v48  ;;  %v6716_v56 = vpack.c.bf16 %v6300_v34, %v6296_v58  ;;  %v6160_v21 = vcvt.s32.f32 %v5648_v0  ;;  %v5712_v62 = vunpack.c.0.s8 %v5500_v44  ;;  %v5716_v27 = vunpack.c.1.s8 %v5500_v44  ;;  %v5476_v34 = vld [vmem:[#allocation3 + $0x28] sm:$0xff] }
 0x569   :  { %6996 = vmatpush.bf16.msra.mxu1 %v6684_v49  ;;  %v6748_v52 = vpack.c.bf16 %v6364_v6, %v6360_v30  ;;  %v6164_v19 = vcvt.s32.f32 %v5652_v61  ;;  %v5776_v1 = vunpack.c.0.s8 %v5516_v2  ;;  %v5780_v24 = vunpack.c.1.s8 %v5516_v2  ;;  %v5492_v61 = vld [vmem:[#allocation3 + $0xa8] sm:$0xff] }
 0x56a   :  { %7009 = vmatpush.bf16.msra.mxu2 %v6716_v56  ;;  %v6224_v63 = vcvt.s32.f32 %v5712_v62  ;;  %v6228_v57 = vcvt.s32.f32 %v5716_v27  ;;  %v5840_v9 = vunpack.c.0.s8 %v5532_v12  ;;  %v5844_v8 = vunpack.c.1.s8 %v5532_v12 }
 0x56b   :  { %7022 = vmatpush.bf16.msra.mxu3 %v6748_v52  ;;  %v6648_v14 = vpack.c.bf16 %v6164_v19, %v6160_v21  ;;  %v6288_v35 = vcvt.s32.f32 %v5776_v1  ;;  %v6292_v15 = vcvt.s32.f32 %v5780_v24  ;;  %v10559_v17 = vpack.c.bf16 %v10531_v39, %v10531_v39  ;;  %v5508_v24 = vld [vmem:[#allocation3 + $0x128] sm:$0xff] }
 0x56c   :  { %v6680_v45 = vpack.c.bf16 %v6228_v57, %v6224_v63  ;;  %v6352_v11 = vcvt.s32.f32 %v5840_v9  ;;  %v6356_v20 = vcvt.s32.f32 %v5844_v8  ;;  %v10563_v33 = vpack.c.bf16 %v10497_v26, %v10497_v26 }
 0x56d   :  { %6984 = vmatpush.bf16.msra.mxu0 %v6648_v14  ;;  %v6712_v44 = vpack.c.bf16 %v6292_v15, %v6288_v35  ;;  %6965 = vmatmul.bf16.vlgmr.msrb.gmra.mxu2 %v10559_v17  ;;  %v10570_v53 = vpack.c.bf16 %v10535_v40, %v10535_v40  ;;  %v5640_v39 = vunpack.c.2.s8 %v5480_v25  ;;  %v5644_v59 = vunpack.c.3.s8 %v5480_v25 }
 0x56e   :  { %6997 = vmatpush.bf16.msra.mxu1 %v6680_v45  ;;  %v6744_v23 = vpack.c.bf16 %v6356_v20, %v6352_v11  ;;  %6939 = vmatmul.bf16.vlgmr.msrb.gmra.mxu0 %v10563_v33  ;;  %v5704_v50 = vunpack.c.2.s8 %v5496_v41  ;;  %v5708_v2 = vunpack.c.3.s8 %v5496_v41  ;;  %v5768_v26 = vunpack.c.2.s8 %v5512_v51 }
 0x56f   :  { %7010 = vmatpush.bf16.msra.mxu2 %v6712_v44  ;;  %6978 = vmatmul.bf16.vlgmr.msrb.gmra.mxu3 %v10570_v53  ;;  %v6152_v32 = vcvt.s32.f32 %v5640_v39  ;;  %v6156_v29 = vcvt.s32.f32 %v5644_v59  ;;  %v5772_v10 = vunpack.c.3.s8 %v5512_v51  ;;  %v5832_v54 = vunpack.c.2.s8 %v10565_v28 }
 0x570   :  { %7023 = vmatpush.bf16.msra.mxu3 %v6744_v23  ;;  %v6216_v40 = vcvt.s32.f32 %v5704_v50  ;;  %v6220_v12 = vcvt.s32.f32 %v5708_v2  ;;  %v6280_v31 = vcvt.s32.f32 %v5768_v26  ;;  %v5836_v16 = vunpack.c.3.s8 %v10565_v28 }
 0x571   :  { %v6644_v18 = vpack.c.bf16 %v6156_v29, %v6152_v32  ;;  %v6284_v13 = vcvt.s32.f32 %v5772_v10  ;;  %v6344_v4 = vcvt.s32.f32 %v5832_v54  ;;  %v10578_v22 = vpack.c.bf16 %v10527_v47, %v10527_v47 }
 0x572   :  { %v6676_v36 = vpack.c.bf16 %v6220_v12, %v6216_v40  ;;  %v6348_v5 = vcvt.s32.f32 %v5836_v16  ;;  %v5632_v37 = vunpack.c.0.s8 %v5480_v25  ;;  %v5636_v43 = vunpack.c.1.s8 %v5480_v25  ;;  %v5524_v25 = vld [vmem:[#allocation3 + $0x1a8] sm:$0xff] }
 0x573   :  { %6985 = vmatpush.bf16.msra.mxu0 %v6644_v18  ;;  %v6708_v55 = vpack.c.bf16 %v6284_v13, %v6280_v31  ;;  %6952 = vmatmul.bf16.vlgmr.msrb.gmra.mxu1 %v10578_v22  ;;  %v5696_v7 = vunpack.c.0.s8 %v5496_v41  ;;  %v5700_v48 = vunpack.c.1.s8 %v5496_v41  ;;  %v5760_v58 = vunpack.c.0.s8 %v5512_v51  ;;  %v5472_v18 = vld [vmem:[#allocation3 + $0x8] sm:$0xff] }
 0x574   :  { %6998 = vmatpush.bf16.msra.mxu1 %v6676_v36  ;;  %v6740_v0 = vpack.c.bf16 %v6348_v5, %v6344_v4  ;;  %v6144_v49 = vcvt.s32.f32 %v5632_v37  ;;  %v6148_v30 = vcvt.s32.f32 %v5636_v43  ;;  %v5764_v6 = vunpack.c.1.s8 %v5512_v51 }
 0x575   :  { %7011 = vmatpush.bf16.msra.mxu2 %v6708_v55  ;;  %v6208_v47 = vcvt.s32.f32 %v5696_v7  ;;  %v6212_v56 = vcvt.s32.f32 %v5700_v48  ;;  %v6272_v21 = vcvt.s32.f32 %v5760_v58  ;;  %v5824_v62 = vunpack.c.0.s8 %v10565_v28  ;;  %v5488_v48 = vld [vmem:[#allocation3 + $0x88] sm:$0xff] }
 0x576   :  { %7024 = vmatpush.bf16.msra.mxu3 %v6740_v0  ;;  %v6640_v27 = vpack.c.bf16 %v6148_v30, %v6144_v49  ;;  %v6276_v52 = vcvt.s32.f32 %v5764_v6  ;;  %v5828_v19 = vunpack.c.1.s8 %v10565_v28  ;;  %v5624_v1 = vunpack.c.2.s8 %v5476_v34  ;;  %v5504_v30 = vld [vmem:[#allocation3 + $0x108] sm:$0xff] }
 0x577   :  { %v6672_v63 = vpack.c.bf16 %v6212_v56, %v6208_v47  ;;  %v6336_v57 = vcvt.s32.f32 %v5824_v62  ;;  %v5628_v9 = vunpack.c.3.s8 %v5476_v34  ;;  %v5688_v8 = vunpack.c.2.s8 %v5492_v61 }
 0x578   :  { %6986 = vmatpush.bf16.msra.mxu0 %v6640_v27  ;;  %v6704_v14 = vpack.c.bf16 %v6276_v52, %v6272_v21  ;;  %v6340_v35 = vcvt.s32.f32 %v5828_v19  ;;  %v6136_v15 = vcvt.s32.f32 %v5624_v1  ;;  %v5692_v41 = vunpack.c.3.s8 %v5492_v61  ;;  %v5520_v21 = vld [vmem:[#allocation3 + $0x188] sm:$0xff] }
 0x579   :  { %6999 = vmatpush.bf16.msra.mxu1 %v6672_v63  ;;  %v6140_v51 = vcvt.s32.f32 %v5628_v9  ;;  %v6200_v45 = vcvt.s32.f32 %v5688_v8  ;;  %v5752_v11 = vunpack.c.2.s8 %v5508_v24  ;;  %v5756_v20 = vunpack.c.3.s8 %v5508_v24 }
 0x57a   :  { %7012 = vmatpush.bf16.msra.mxu2 %v6704_v14  ;;  %v6736_v44 = vpack.c.bf16 %v6340_v35, %v6336_v57  ;;  %v6204_v28 = vcvt.s32.f32 %v5692_v41  ;;  %v5816_v39 = vunpack.c.2.s8 %v5524_v25  ;;  %v5820_v59 = vunpack.c.3.s8 %v5524_v25 }
 0x57b   :  { %v6636_v23 = vpack.c.bf16 %v6140_v51, %v6136_v15  ;;  %v6264_v50 = vcvt.s32.f32 %v5752_v11  ;;  %v6268_v2 = vcvt.s32.f32 %v5756_v20  ;;  %v5616_v26 = vunpack.c.0.s8 %v5476_v34 }
 0x57c   :  { %7025 = vmatpush.bf16.msra.mxu3 %v6736_v44  ;;  %v6668_v32 = vpack.c.bf16 %v6204_v28, %v6200_v45  ;;  %v6328_v29 = vcvt.s32.f32 %v5816_v39  ;;  %v6332_v10 = vcvt.s32.f32 %v5820_v59  ;;  %v5620_v54 = vunpack.c.1.s8 %v5476_v34 }
 0x57d   :  { %6987 = vmatpush.bf16.msra.mxu0 %v6636_v23  ;;  %v6700_v40 = vpack.c.bf16 %v6268_v2, %v6264_v50  ;;  %v6128_v12 = vcvt.s32.f32 %v5616_v26  ;;  %v5680_v31 = vunpack.c.0.s8 %v5492_v61  ;;  %v5684_v16 = vunpack.c.1.s8 %v5492_v61  ;;  %v5548_v50 = vld [vmem:[#allocation3 + $0x268] sm:$0xff] }
 0x57e   :  { %7000 = vmatpush.bf16.msra.mxu1 %v6668_v32  ;;  %v6732_v13 = vpack.c.bf16 %v6332_v10, %v6328_v29  ;;  %v6132_v4 = vcvt.s32.f32 %v5620_v54  ;;  %v5744_v36 = vunpack.c.0.s8 %v5508_v24  ;;  %v5748_v5 = vunpack.c.1.s8 %v5508_v24 }
 0x57f   :  { %7013 = vmatpush.bf16.msra.mxu2 %v6700_v40  ;;  %v6192_v37 = vcvt.s32.f32 %v5680_v31  ;;  %v6196_v43 = vcvt.s32.f32 %v5684_v16  ;;  %v5808_v55 = vunpack.c.0.s8 %v5524_v25  ;;  %v5812_v7 = vunpack.c.1.s8 %v5524_v25  ;;  %v5564_v31 = vld [vmem:[#allocation3 + $0x2e8] sm:$0xff] }
 0x580   :  { %7026 = vmatpush.bf16.msra.mxu3 %v6732_v13  ;;  %v6632_v58 = vpack.c.bf16 %v6132_v4, %v6128_v12  ;;  %v6256_v34 = vcvt.s32.f32 %v5744_v36  ;;  %v6260_v0 = vcvt.s32.f32 %v5748_v5  ;;  %v5608_v49 = vunpack.c.2.s8 %v5472_v18  ;;  %v5580_v36 = vld [vmem:[#allocation3 + $0x368] sm:$0xff] }
 0x581   :  { %v6664_v6 = vpack.c.bf16 %v6196_v43, %v6192_v37  ;;  %v6320_v61 = vcvt.s32.f32 %v5808_v55  ;;  %v6324_v47 = vcvt.s32.f32 %v5812_v7  ;;  %v5612_v56 = vunpack.c.3.s8 %v5472_v18  ;;  %v5596_v7 = vld [vmem:[#allocation3 + $0x3e8] sm:$0xff] }
 0x582   :  { %6988 = vmatpush.bf16.msra.mxu0 %v6632_v58  ;;  %v6696_v62 = vpack.c.bf16 %v6260_v0, %v6256_v34  ;;  %v6120_v27 = vcvt.s32.f32 %v5608_v49  ;;  %v5672_v52 = vunpack.c.2.s8 %v5488_v48  ;;  %v5676_v19 = vunpack.c.3.s8 %v5488_v48 }
 0x583   :  { %7001 = vmatpush.bf16.msra.mxu1 %v6664_v6  ;;  %v6728_v1 = vpack.c.bf16 %v6324_v47, %v6320_v61  ;;  %v6124_v24 = vcvt.s32.f32 %v5612_v56  ;;  %v5736_v63 = vunpack.c.2.s8 %v5504_v30  ;;  %v5740_v57 = vunpack.c.3.s8 %v5504_v30 }
 0x584   :  { %7014 = vmatpush.bf16.msra.mxu2 %v6696_v62  ;;  %v6184_v9 = vcvt.s32.f32 %v5672_v52  ;;  %v6188_v8 = vcvt.s32.f32 %v5676_v19  ;;  %v5800_v25 = vunpack.c.2.s8 %v5520_v21  ;;  %v5804_v14 = vunpack.c.3.s8 %v5520_v21 }
 0x585   :  { %7027 = vmatpush.bf16.msra.mxu3 %v6728_v1  ;;  %v6628_v35 = vpack.c.bf16 %v6124_v24, %v6120_v27  ;;  %v6248_v15 = vcvt.s32.f32 %v5736_v63  ;;  %v6252_v41 = vcvt.s32.f32 %v5740_v57  ;;  %v5600_v51 = vunpack.c.0.s8 %v5472_v18 }
 0x586   :  { %v6660_v45 = vpack.c.bf16 %v6188_v8, %v6184_v9  ;;  %v6312_v11 = vcvt.s32.f32 %v5800_v25  ;;  %v6316_v20 = vcvt.s32.f32 %v5804_v14  ;;  %v5604_v44 = vunpack.c.1.s8 %v5472_v18 }
 0x587   :  { %6989 = vmatpush.bf16.msra.mxu0 %v6628_v35  ;;  %v6692_v28 = vpack.c.bf16 %v6252_v41, %v6248_v15  ;;  %v6112_v39 = vcvt.s32.f32 %v5600_v51  ;;  %v5664_v59 = vunpack.c.0.s8 %v5488_v48  ;;  %v5668_v23 = vunpack.c.1.s8 %v5488_v48  ;;  %v5544_v15 = vld [vmem:[#allocation3 + $0x248] sm:$0xff] }
 0x588   :  { %7002 = vmatpush.bf16.msra.mxu1 %v6660_v45  ;;  %v6724_v2 = vpack.c.bf16 %v6316_v20, %v6312_v11  ;;  %v6116_v26 = vcvt.s32.f32 %v5604_v44  ;;  %v5728_v32 = vunpack.c.0.s8 %v5504_v30  ;;  %v5732_v29 = vunpack.c.1.s8 %v5504_v30 }
 0x589   :  { %7015 = vmatpush.bf16.msra.mxu2 %v6692_v28  ;;  %v6176_v10 = vcvt.s32.f32 %v5664_v59  ;;  %v6180_v54 = vcvt.s32.f32 %v5668_v23  ;;  %v5792_v40 = vunpack.c.0.s8 %v5520_v21  ;;  %v5796_v12 = vunpack.c.1.s8 %v5520_v21  ;;  %v5560_v59 = vld [vmem:[#allocation3 + $0x2c8] sm:$0xff] }
 0x58a   :  { %7028 = vmatpush.bf16.msra.mxu3 %v6724_v2  ;;  %v6624_v16 = vpack.c.bf16 %v6116_v26, %v6112_v39  ;;  %v6240_v18 = vcvt.s32.f32 %v5728_v32  ;;  %v6244_v13 = vcvt.s32.f32 %v5732_v29  ;;  %v5912_v4 = vunpack.c.2.s8 %v5548_v50  ;;  %v5576_v32 = vld [vmem:[#allocation3 + $0x348] sm:$0xff] }
 0x58b   :  { %v6656_v5 = vpack.c.bf16 %v6180_v54, %v6176_v10  ;;  %v6304_v37 = vcvt.s32.f32 %v5792_v40  ;;  %v6308_v43 = vcvt.s32.f32 %v5796_v12  ;;  %v5916_v55 = vunpack.c.3.s8 %v5548_v50  ;;  %v5592_v12 = vld [vmem:[#allocation3 + $0x3c8] sm:$0xff] }
 0x58c   :  { %6990 = vmatpush.bf16.msra.mxu0 %v6624_v16  ;;  %v6688_v48 = vpack.c.bf16 %v6244_v13, %v6240_v18  ;;  %v6424_v58 = vcvt.s32.f32 %v5912_v4  ;;  %v5976_v34 = vunpack.c.2.s8 %v5564_v31  ;;  %v5980_v0 = vunpack.c.3.s8 %v5564_v31 }
 0x58d   :  { %7003 = vmatpush.bf16.msra.mxu1 %v6656_v5  ;;  %v6720_v49 = vpack.c.bf16 %v6308_v43, %v6304_v37  ;;  %v6428_v30 = vcvt.s32.f32 %v5916_v55  ;;  %v6040_v6 = vunpack.c.2.s8 %v5580_v36  ;;  %v6044_v61 = vunpack.c.3.s8 %v5580_v36 }
 0x58e   :  { %7016 = vmatpush.bf16.msra.mxu2 %v6688_v48  ;;  %v6488_v47 = vcvt.s32.f32 %v5976_v34  ;;  %v6492_v56 = vcvt.s32.f32 %v5980_v0  ;;  %v6104_v21 = vunpack.c.2.s8 %v5596_v7  ;;  %v6108_v62 = vunpack.c.3.s8 %v5596_v7 }
 0x58f   :  { %7029 = vmatpush.bf16.msra.mxu3 %v6720_v49  ;;  %v6780_v27 = vpack.c.bf16 %v6428_v30, %v6424_v58  ;;  %v6552_v52 = vcvt.s32.f32 %v6040_v6  ;;  %v6556_v19 = vcvt.s32.f32 %v6044_v61  ;;  %v5904_v1 = vunpack.c.0.s8 %v5548_v50  ;;  %6991 = vmatmul.bf16.vlgmr.msra.gmra.mxu0 %v10544_v38 }
 0x590   :  { %v6812_v24 = vpack.c.bf16 %v6492_v56, %v6488_v47  ;;  %v6616_v63 = vcvt.s32.f32 %v6104_v21  ;;  %v6620_v57 = vcvt.s32.f32 %v6108_v62  ;;  %v5908_v9 = vunpack.c.1.s8 %v5548_v50  ;;  %7004 = vmatmul.bf16.vlgmr.msra.gmra.mxu1 %v10553_v42 }
 0x591   :  { %7035 = vmatpush.bf16.msrb.mxu0 %v6780_v27  ;;  %v6844_v8 = vpack.c.bf16 %v6556_v19, %v6552_v52  ;;  %v6416_v25 = vcvt.s32.f32 %v5904_v1  ;;  %v5968_v14 = vunpack.c.0.s8 %v5564_v31  ;;  %v5972_v35 = vunpack.c.1.s8 %v5564_v31  ;;  %7017 = vmatmul.bf16.vlgmr.msra.gmra.mxu2 %v10539_v3  ;;  %v5540_v52 = vld [vmem:[#allocation3 + $0x228] sm:$0xff] }
 0x592   :  { %7048 = vmatpush.bf16.msrb.mxu1 %v6812_v24  ;;  %v6876_v41 = vpack.c.bf16 %v6620_v57, %v6616_v63  ;;  %v6420_v51 = vcvt.s32.f32 %v5908_v9  ;;  %v6032_v45 = vunpack.c.0.s8 %v5580_v36  ;;  %v6036_v11 = vunpack.c.1.s8 %v5580_v36  ;;  %7030 = vmatmul.bf16.vlgmr.msra.gmra.mxu3 %v10548_v60 }
 0x593   :  { %7061 = vmatpush.bf16.msrb.mxu2 %v6844_v8  ;;  %v6480_v20 = vcvt.s32.f32 %v5968_v14  ;;  %v6484_v44 = vcvt.s32.f32 %v5972_v35  ;;  %v6096_v28 = vunpack.c.0.s8 %v5596_v7  ;;  %v6100_v39 = vunpack.c.1.s8 %v5596_v7  ;;  %v5556_v14 = vld [vmem:[#allocation3 + $0x2a8] sm:$0xff] }
 0x594   :  { %7074 = vmatpush.bf16.msrb.mxu3 %v6876_v41  ;;  %v6776_v23 = vpack.c.bf16 %v6420_v51, %v6416_v25  ;;  %v6544_v50 = vcvt.s32.f32 %v6032_v45  ;;  %v6548_v2 = vcvt.s32.f32 %v6036_v11  ;;  %v5896_v26 = vunpack.c.2.s8 %v5544_v15  ;;  %v5572_v45 = vld [vmem:[#allocation3 + $0x328] sm:$0xff] }
 0x595   :  { %v6808_v29 = vpack.c.bf16 %v6484_v44, %v6480_v20  ;;  %v6608_v10 = vcvt.s32.f32 %v6096_v28  ;;  %v6612_v54 = vcvt.s32.f32 %v6100_v39  ;;  %v5900_v40 = vunpack.c.3.s8 %v5544_v15  ;;  %v5588_v39 = vld [vmem:[#allocation3 + $0x3a8] sm:$0xff] }
 0x596   :  { %7036 = vmatpush.bf16.msrb.mxu0 %v6776_v23  ;;  %v6840_v31 = vpack.c.bf16 %v6548_v2, %v6544_v50  ;;  %v6408_v16 = vcvt.s32.f32 %v5896_v26  ;;  %v5960_v18 = vunpack.c.2.s8 %v5560_v59  ;;  %v5964_v13 = vunpack.c.3.s8 %v5560_v59 }
 0x597   :  { %7049 = vmatpush.bf16.msrb.mxu1 %v6808_v29  ;;  %v6872_v4 = vpack.c.bf16 %v6612_v54, %v6608_v10  ;;  %v6412_v36 = vcvt.s32.f32 %v5900_v40  ;;  %v6024_v5 = vunpack.c.2.s8 %v5576_v32  ;;  %v6028_v37 = vunpack.c.3.s8 %v5576_v32 }
 0x598   :  { %7062 = vmatpush.bf16.msrb.mxu2 %v6840_v31  ;;  %v6472_v43 = vcvt.s32.f32 %v5960_v18  ;;  %v6476_v55 = vcvt.s32.f32 %v5964_v13  ;;  %v6088_v7 = vunpack.c.2.s8 %v5592_v12  ;;  %v6092_v48 = vunpack.c.3.s8 %v5592_v12 }
 0x599   :  { %7075 = vmatpush.bf16.msrb.mxu3 %v6872_v4  ;;  %v6772_v58 = vpack.c.bf16 %v6412_v36, %v6408_v16  ;;  %v6536_v34 = vcvt.s32.f32 %v6024_v5  ;;  %v6540_v0 = vcvt.s32.f32 %v6028_v37  ;;  %v5888_v49 = vunpack.c.0.s8 %v5544_v15 }
 0x59a   :  { %v6804_v30 = vpack.c.bf16 %v6476_v55, %v6472_v43  ;;  %v6600_v6 = vcvt.s32.f32 %v6088_v7  ;;  %v6604_v61 = vcvt.s32.f32 %v6092_v48  ;;  %v5892_v47 = vunpack.c.1.s8 %v5544_v15 }
 0x59b   :  { %7037 = vmatpush.bf16.msrb.mxu0 %v6772_v58  ;;  %v6836_v56 = vpack.c.bf16 %v6540_v0, %v6536_v34  ;;  %v6400_v21 = vcvt.s32.f32 %v5888_v49  ;;  %v5952_v62 = vunpack.c.0.s8 %v5560_v59  ;;  %v5956_v27 = vunpack.c.1.s8 %v5560_v59  ;;  %v5536_v34 = vld [vmem:[#allocation3 + $0x208] sm:$0xff] }
 0x59c   :  { %7050 = vmatpush.bf16.msrb.mxu1 %v6804_v30  ;;  %v6868_v19 = vpack.c.bf16 %v6604_v61, %v6600_v6  ;;  %v6404_v1 = vcvt.s32.f32 %v5892_v47  ;;  %v6016_v24 = vunpack.c.0.s8 %v5576_v32  ;;  %v6020_v63 = vunpack.c.1.s8 %v5576_v32 }
 0x59d   :  { %7063 = vmatpush.bf16.msrb.mxu2 %v6836_v56  ;;  %v6464_v57 = vcvt.s32.f32 %v5952_v62  ;;  %v6468_v9 = vcvt.s32.f32 %v5956_v27  ;;  %v6080_v8 = vunpack.c.0.s8 %v5592_v12  ;;  %v6084_v25 = vunpack.c.1.s8 %v5592_v12  ;;  %v5552_v62 = vld [vmem:[#allocation3 + $0x288] sm:$0xff] }
 0x59e   :  { %7076 = vmatpush.bf16.msrb.mxu3 %v6868_v19  ;;  %v6768_v35 = vpack.c.bf16 %v6404_v1, %v6400_v21  ;;  %v6528_v15 = vcvt.s32.f32 %v6016_v24  ;;  %v6532_v41 = vcvt.s32.f32 %v6020_v63  ;;  %v5880_v51 = vunpack.c.2.s8 %v5540_v52  ;;  %v5568_v24 = vld [vmem:[#allocation3 + $0x308] sm:$0xff] }
 0x59f   :  { %v6800_v11 = vpack.c.bf16 %v6468_v9, %v6464_v57  ;;  %v6592_v20 = vcvt.s32.f32 %v6080_v8  ;;  %v6596_v44 = vcvt.s32.f32 %v6084_v25  ;;  %v5884_v28 = vunpack.c.3.s8 %v5540_v52  ;;  %v5584_v25 = vld [vmem:[#allocation3 + $0x388] sm:$0xff] }
 0x5a0   :  { %7038 = vmatpush.bf16.msrb.mxu0 %v6768_v35  ;;  %v6832_v59 = vpack.c.bf16 %v6532_v41, %v6528_v15  ;;  %v6392_v23 = vcvt.s32.f32 %v5880_v51  ;;  %v5944_v50 = vunpack.c.2.s8 %v5556_v14  ;;  %v5948_v2 = vunpack.c.3.s8 %v5556_v14 }
 0x5a1   :  { %7051 = vmatpush.bf16.msrb.mxu1 %v6800_v11  ;;  %v6864_v26 = vpack.c.bf16 %v6596_v44, %v6592_v20  ;;  %v6396_v32 = vcvt.s32.f32 %v5884_v28  ;;  %v6008_v29 = vunpack.c.2.s8 %v5572_v45  ;;  %v6012_v10 = vunpack.c.3.s8 %v5572_v45 }
 0x5a2   :  { %7064 = vmatpush.bf16.msrb.mxu2 %v6832_v59  ;;  %v6456_v54 = vcvt.s32.f32 %v5944_v50  ;;  %v6460_v40 = vcvt.s32.f32 %v5948_v2  ;;  %v6072_v12 = vunpack.c.2.s8 %v5588_v39  ;;  %v6076_v31 = vunpack.c.3.s8 %v5588_v39 }
 0x5a3   :  { %7077 = vmatpush.bf16.msrb.mxu3 %v6864_v26  ;;  %v6764_v16 = vpack.c.bf16 %v6396_v32, %v6392_v23  ;;  %v6520_v18 = vcvt.s32.f32 %v6008_v29  ;;  %v6524_v13 = vcvt.s32.f32 %v6012_v10  ;;  %v5872_v4 = vunpack.c.0.s8 %v5540_v52 }
 0x5a4   :  { %v6796_v36 = vpack.c.bf16 %v6460_v40, %v6456_v54  ;;  %v6584_v5 = vcvt.s32.f32 %v6072_v12  ;;  %v6588_v37 = vcvt.s32.f32 %v6076_v31  ;;  %v5876_v43 = vunpack.c.1.s8 %v5540_v52 }
 0x5a5   :  { %7039 = vmatpush.bf16.msrb.mxu0 %v6764_v16  ;;  %v6828_v55 = vpack.c.bf16 %v6524_v13, %v6520_v18  ;;  %v6384_v7 = vcvt.s32.f32 %v5872_v4  ;;  %v5936_v48 = vunpack.c.0.s8 %v5556_v14  ;;  %v5940_v58 = vunpack.c.1.s8 %v5556_v14  ;;  %v5485_v18 = vld [vmem:[#allocation3 + $0x70] sm:$0xff] }
 0x5a6   :  { %7052 = vmatpush.bf16.msrb.mxu1 %v6796_v36  ;;  %v6860_v0 = vpack.c.bf16 %v6588_v37, %v6584_v5  ;;  %v6388_v49 = vcvt.s32.f32 %v5876_v43  ;;  %v6000_v30 = vunpack.c.0.s8 %v5572_v45  ;;  %v6004_v6 = vunpack.c.1.s8 %v5572_v45 }
 0x5a7   :  { %7065 = vmatpush.bf16.msrb.mxu2 %v6828_v55  ;;  %v6448_v61 = vcvt.s32.f32 %v5936_v48  ;;  %v6452_v47 = vcvt.s32.f32 %v5940_v58  ;;  %v6064_v56 = vunpack.c.0.s8 %v5588_v39  ;;  %v6068_v21 = vunpack.c.1.s8 %v5588_v39  ;;  %v5501_v48 = vld [vmem:[#allocation3 + $0xf0] sm:$0xff] }
 0x5a8   :  { %7078 = vmatpush.bf16.msrb.mxu3 %v6860_v0  ;;  %v6760_v27 = vpack.c.bf16 %v6388_v49, %v6384_v7  ;;  %v6512_v52 = vcvt.s32.f32 %v6000_v30  ;;  %v6516_v19 = vcvt.s32.f32 %v6004_v6  ;;  %v5864_v1 = vunpack.c.2.s8 %v5536_v34  ;;  %v5517_v30 = vld [vmem:[#allocation3 + $0x170] sm:$0xff] }
 0x5a9   :  { %v6792_v63 = vpack.c.bf16 %v6452_v47, %v6448_v61  ;;  %v6576_v57 = vcvt.s32.f32 %v6064_v56  ;;  %v6580_v9 = vcvt.s32.f32 %v6068_v21  ;;  %v5868_v8 = vunpack.c.3.s8 %v5536_v34  ;;  %v5533_v21 = vld [vmem:[#allocation3 + $0x1f0] sm:$0xff] }
 0x5aa   :  { %7040 = vmatpush.bf16.msrb.mxu0 %v6760_v27  ;;  %v6824_v14 = vpack.c.bf16 %v6516_v19, %v6512_v52  ;;  %v6376_v35 = vcvt.s32.f32 %v5864_v1  ;;  %v5928_v15 = vunpack.c.2.s8 %v5552_v62  ;;  %v5932_v41 = vunpack.c.3.s8 %v5552_v62 }
 0x5ab   :  { %7053 = vmatpush.bf16.msrb.mxu1 %v6792_v63  ;;  %v6856_v51 = vpack.c.bf16 %v6580_v9, %v6576_v57  ;;  %v6380_v45 = vcvt.s32.f32 %v5868_v8  ;;  %v5992_v11 = vunpack.c.2.s8 %v5568_v24  ;;  %v5996_v20 = vunpack.c.3.s8 %v5568_v24 }
 0x5ac   :  { %7066 = vmatpush.bf16.msrb.mxu2 %v6824_v14  ;;  %v6440_v44 = vcvt.s32.f32 %v5928_v15  ;;  %v6444_v28 = vcvt.s32.f32 %v5932_v41  ;;  %v6056_v39 = vunpack.c.2.s8 %v5584_v25  ;;  %v6060_v59 = vunpack.c.3.s8 %v5584_v25 }
 0x5ad   :  { %7079 = vmatpush.bf16.msrb.mxu3 %v6856_v51  ;;  %v6756_v23 = vpack.c.bf16 %v6380_v45, %v6376_v35  ;;  %v6504_v50 = vcvt.s32.f32 %v5992_v11  ;;  %v6508_v2 = vcvt.s32.f32 %v5996_v20  ;;  %v5856_v26 = vunpack.c.0.s8 %v5536_v34 }
 0x5ae   :  { %v6788_v32 = vpack.c.bf16 %v6444_v28, %v6440_v44  ;;  %v6568_v29 = vcvt.s32.f32 %v6056_v39  ;;  %v6572_v10 = vcvt.s32.f32 %v6060_v59  ;;  %v5860_v54 = vunpack.c.1.s8 %v5536_v34 }
 0x5af   :  { %7041 = vmatpush.bf16.msrb.mxu0 %v6756_v23  ;;  %v6820_v40 = vpack.c.bf16 %v6508_v2, %v6504_v50  ;;  %v6368_v12 = vcvt.s32.f32 %v5856_v26  ;;  %v5920_v31 = vunpack.c.0.s8 %v5552_v62  ;;  %v5924_v16 = vunpack.c.1.s8 %v5552_v62  ;;  %v5481_v50 = vld [vmem:[#allocation3 + $0x50] sm:$0xff] }
 0x5b0   :  { %7054 = vmatpush.bf16.msrb.mxu1 %v6788_v32  ;;  %v6852_v13 = vpack.c.bf16 %v6572_v10, %v6568_v29  ;;  %v6372_v4 = vcvt.s32.f32 %v5860_v54  ;;  %v5984_v36 = vunpack.c.0.s8 %v5568_v24  ;;  %v5988_v5 = vunpack.c.1.s8 %v5568_v24 }
 0x5b1   :  { %7067 = vmatpush.bf16.msrb.mxu2 %v6820_v40  ;;  %v6432_v37 = vcvt.s32.f32 %v5920_v31  ;;  %v6436_v43 = vcvt.s32.f32 %v5924_v16  ;;  %v6048_v55 = vunpack.c.0.s8 %v5584_v25  ;;  %v6052_v7 = vunpack.c.1.s8 %v5584_v25  ;;  %v5497_v31 = vld [vmem:[#allocation3 + $0xd0] sm:$0xff] }
 0x5b2   :  { %7080 = vmatpush.bf16.msrb.mxu3 %v6852_v13  ;;  %v6752_v58 = vpack.c.bf16 %v6372_v4, %v6368_v12  ;;  %v6496_v34 = vcvt.s32.f32 %v5984_v36  ;;  %v6500_v0 = vcvt.s32.f32 %v5988_v5  ;;  %v5657_v49 = vunpack.c.2.s8 %v5485_v18  ;;  %v5513_v36 = vld [vmem:[#allocation3 + $0x150] sm:$0xff] }
 0x5b3   :  { %v6784_v6 = vpack.c.bf16 %v6436_v43, %v6432_v37  ;;  %v6560_v61 = vcvt.s32.f32 %v6048_v55  ;;  %v6564_v47 = vcvt.s32.f32 %v6052_v7  ;;  %v5661_v56 = vunpack.c.3.s8 %v5485_v18  ;;  %v5529_v7 = vld [vmem:[#allocation3 + $0x1d0] sm:$0xff] }
 0x5b4   :  { %7042 = vmatpush.bf16.msrb.mxu0 %v6752_v58  ;;  %v6816_v62 = vpack.c.bf16 %v6500_v0, %v6496_v34  ;;  %v6169_v27 = vcvt.s32.f32 %v5657_v49  ;;  %v5721_v52 = vunpack.c.2.s8 %v5501_v48  ;;  %v5725_v19 = vunpack.c.3.s8 %v5501_v48 }
 0x5b5   :  { %7055 = vmatpush.bf16.msrb.mxu1 %v6784_v6  ;;  %v6848_v1 = vpack.c.bf16 %v6564_v47, %v6560_v61  ;;  %v6173_v24 = vcvt.s32.f32 %v5661_v56  ;;  %v5785_v63 = vunpack.c.2.s8 %v5517_v30  ;;  %v5789_v57 = vunpack.c.3.s8 %v5517_v30 }
 0x5b6   :  { %7068 = vmatpush.bf16.msrb.mxu2 %v6816_v62  ;;  %v6233_v9 = vcvt.s32.f32 %v5721_v52  ;;  %v6237_v8 = vcvt.s32.f32 %v5725_v19  ;;  %v5849_v25 = vunpack.c.2.s8 %v5533_v21  ;;  %v5853_v14 = vunpack.c.3.s8 %v5533_v21 }
 0x5b7   :  { %7081 = vmatpush.bf16.msrb.mxu3 %v6848_v1  ;;  %v6653_v35 = vpack.c.bf16 %v6173_v24, %v6169_v27  ;;  %v6297_v15 = vcvt.s32.f32 %v5785_v63  ;;  %v6301_v41 = vcvt.s32.f32 %v5789_v57  ;;  %v5649_v51 = vunpack.c.0.s8 %v5485_v18  ;;  %7043 = vmatmul.bf16.vlgmr.msrb.gmra.mxu0 %v10563_v33 }
 0x5b8   :  { %v6685_v45 = vpack.c.bf16 %v6237_v8, %v6233_v9  ;;  %v6361_v11 = vcvt.s32.f32 %v5849_v25  ;;  %v6365_v20 = vcvt.s32.f32 %v5853_v14  ;;  %v5653_v44 = vunpack.c.1.s8 %v5485_v18  ;;  %7056 = vmatmul.bf16.vlgmr.msrb.gmra.mxu1 %v10578_v22 }
 0x5b9   :  { %7087 = vmatpush.bf16.msra.mxu0 %v6653_v35  ;;  %v6717_v28 = vpack.c.bf16 %v6301_v41, %v6297_v15  ;;  %v6161_v39 = vcvt.s32.f32 %v5649_v51  ;;  %v5713_v59 = vunpack.c.0.s8 %v5501_v48  ;;  %v5717_v23 = vunpack.c.1.s8 %v5501_v48  ;;  %7069 = vmatmul.bf16.vlgmr.msrb.gmra.mxu2 %v10559_v17  ;;  %v5477_v15 = vld [vmem:[#allocation3 + $0x30] sm:$0xff] }
 0x5ba   :  { %7100 = vmatpush.bf16.msra.mxu1 %v6685_v45  ;;  %v6749_v2 = vpack.c.bf16 %v6365_v20, %v6361_v11  ;;  %v6165_v26 = vcvt.s32.f32 %v5653_v44  ;;  %v5777_v32 = vunpack.c.0.s8 %v5517_v30  ;;  %v5781_v29 = vunpack.c.1.s8 %v5517_v30  ;;  %7082 = vmatmul.bf16.vlgmr.msrb.gmra.mxu3 %v10570_v53 }
 0x5bb   :  { %7113 = vmatpush.bf16.msra.mxu2 %v6717_v28  ;;  %v6225_v10 = vcvt.s32.f32 %v5713_v59  ;;  %v6229_v54 = vcvt.s32.f32 %v5717_v23  ;;  %v5841_v40 = vunpack.c.0.s8 %v5533_v21  ;;  %v5845_v12 = vunpack.c.1.s8 %v5533_v21  ;;  %v5493_v59 = vld [vmem:[#allocation3 + $0xb0] sm:$0xff] }
 0x5bc   :  { %7126 = vmatpush.bf16.msra.mxu3 %v6749_v2  ;;  %v6649_v16 = vpack.c.bf16 %v6165_v26, %v6161_v39  ;;  %v6289_v18 = vcvt.s32.f32 %v5777_v32  ;;  %v6293_v13 = vcvt.s32.f32 %v5781_v29  ;;  %v5641_v4 = vunpack.c.2.s8 %v5481_v50  ;;  %v5509_v32 = vld [vmem:[#allocation3 + $0x130] sm:$0xff] }
 0x5bd   :  { %v6681_v5 = vpack.c.bf16 %v6229_v54, %v6225_v10  ;;  %v6353_v37 = vcvt.s32.f32 %v5841_v40  ;;  %v6357_v43 = vcvt.s32.f32 %v5845_v12  ;;  %v5645_v55 = vunpack.c.3.s8 %v5481_v50  ;;  %v5525_v12 = vld [vmem:[#allocation3 + $0x1b0] sm:$0xff] }
 0x5be   :  { %7088 = vmatpush.bf16.msra.mxu0 %v6649_v16  ;;  %v6713_v48 = vpack.c.bf16 %v6293_v13, %v6289_v18  ;;  %v6153_v58 = vcvt.s32.f32 %v5641_v4  ;;  %v5705_v34 = vunpack.c.2.s8 %v5497_v31  ;;  %v5709_v0 = vunpack.c.3.s8 %v5497_v31 }
 0x5bf   :  { %7101 = vmatpush.bf16.msra.mxu1 %v6681_v5  ;;  %v6745_v49 = vpack.c.bf16 %v6357_v43, %v6353_v37  ;;  %v6157_v30 = vcvt.s32.f32 %v5645_v55  ;;  %v5769_v6 = vunpack.c.2.s8 %v5513_v36  ;;  %v5773_v61 = vunpack.c.3.s8 %v5513_v36 }
 0x5c0   :  { %7114 = vmatpush.bf16.msra.mxu2 %v6713_v48  ;;  %v6217_v47 = vcvt.s32.f32 %v5705_v34  ;;  %v6221_v56 = vcvt.s32.f32 %v5709_v0  ;;  %v5833_v21 = vunpack.c.2.s8 %v5529_v7  ;;  %v5837_v62 = vunpack.c.3.s8 %v5529_v7 }
 0x5c1   :  { %7127 = vmatpush.bf16.msra.mxu3 %v6745_v49  ;;  %v6645_v27 = vpack.c.bf16 %v6157_v30, %v6153_v58  ;;  %v6281_v52 = vcvt.s32.f32 %v5769_v6  ;;  %v6285_v19 = vcvt.s32.f32 %v5773_v61  ;;  %v5633_v1 = vunpack.c.0.s8 %v5481_v50 }
 0x5c2   :  { %v6677_v24 = vpack.c.bf16 %v6221_v56, %v6217_v47  ;;  %v6345_v63 = vcvt.s32.f32 %v5833_v21  ;;  %v6349_v57 = vcvt.s32.f32 %v5837_v62  ;;  %v5637_v9 = vunpack.c.1.s8 %v5481_v50 }
 0x5c3   :  { %7089 = vmatpush.bf16.msra.mxu0 %v6645_v27  ;;  %v6709_v8 = vpack.c.bf16 %v6285_v19, %v6281_v52  ;;  %v6145_v25 = vcvt.s32.f32 %v5633_v1  ;;  %v5697_v14 = vunpack.c.0.s8 %v5497_v31  ;;  %v5701_v35 = vunpack.c.1.s8 %v5497_v31  ;;  %v5473_v52 = vld [vmem:[#allocation3 + $0x10] sm:$0xff] }
 0x5c4   :  { %7102 = vmatpush.bf16.msra.mxu1 %v6677_v24  ;;  %v6741_v41 = vpack.c.bf16 %v6349_v57, %v6345_v63  ;;  %v6149_v51 = vcvt.s32.f32 %v5637_v9  ;;  %v5761_v45 = vunpack.c.0.s8 %v5513_v36  ;;  %v5765_v11 = vunpack.c.1.s8 %v5513_v36 }
 0x5c5   :  { %7115 = vmatpush.bf16.msra.mxu2 %v6709_v8  ;;  %v6209_v20 = vcvt.s32.f32 %v5697_v14  ;;  %v6213_v44 = vcvt.s32.f32 %v5701_v35  ;;  %v5825_v28 = vunpack.c.0.s8 %v5529_v7  ;;  %v5829_v39 = vunpack.c.1.s8 %v5529_v7  ;;  %v5489_v14 = vld [vmem:[#allocation3 + $0x90] sm:$0xff] }
 0x5c6   :  { %7128 = vmatpush.bf16.msra.mxu3 %v6741_v41  ;;  %v6641_v23 = vpack.c.bf16 %v6149_v51, %v6145_v25  ;;  %v6273_v50 = vcvt.s32.f32 %v5761_v45  ;;  %v6277_v2 = vcvt.s32.f32 %v5765_v11  ;;  %v5625_v26 = vunpack.c.2.s8 %v5477_v15  ;;  %v5505_v45 = vld [vmem:[#allocation3 + $0x110] sm:$0xff] }
 0x5c7   :  { %v6673_v29 = vpack.c.bf16 %v6213_v44, %v6209_v20  ;;  %v6337_v10 = vcvt.s32.f32 %v5825_v28  ;;  %v6341_v54 = vcvt.s32.f32 %v5829_v39  ;;  %v5629_v40 = vunpack.c.3.s8 %v5477_v15  ;;  %v5521_v39 = vld [vmem:[#allocation3 + $0x190] sm:$0xff] }
 0x5c8   :  { %7090 = vmatpush.bf16.msra.mxu0 %v6641_v23  ;;  %v6705_v31 = vpack.c.bf16 %v6277_v2, %v6273_v50  ;;  %v6137_v16 = vcvt.s32.f32 %v5625_v26  ;;  %v5689_v18 = vunpack.c.2.s8 %v5493_v59  ;;  %v5693_v13 = vunpack.c.3.s8 %v5493_v59 }
 0x5c9   :  { %7103 = vmatpush.bf16.msra.mxu1 %v6673_v29  ;;  %v6737_v4 = vpack.c.bf16 %v6341_v54, %v6337_v10  ;;  %v6141_v36 = vcvt.s32.f32 %v5629_v40  ;;  %v5753_v5 = vunpack.c.2.s8 %v5509_v32  ;;  %v5757_v37 = vunpack.c.3.s8 %v5509_v32 }
 0x5ca   :  { %7116 = vmatpush.bf16.msra.mxu2 %v6705_v31  ;;  %v6201_v43 = vcvt.s32.f32 %v5689_v18  ;;  %v6205_v55 = vcvt.s32.f32 %v5693_v13  ;;  %v5817_v7 = vunpack.c.2.s8 %v5525_v12  ;;  %v5821_v48 = vunpack.c.3.s8 %v5525_v12 }
 0x5cb   :  { %7129 = vmatpush.bf16.msra.mxu3 %v6737_v4  ;;  %v6637_v58 = vpack.c.bf16 %v6141_v36, %v6137_v16  ;;  %v6265_v34 = vcvt.s32.f32 %v5753_v5  ;;  %v6269_v0 = vcvt.s32.f32 %v5757_v37  ;;  %v5617_v49 = vunpack.c.0.s8 %v5477_v15 }
 0x5cc   :  { %v6669_v30 = vpack.c.bf16 %v6205_v55, %v6201_v43  ;;  %v6329_v6 = vcvt.s32.f32 %v5817_v7  ;;  %v6333_v61 = vcvt.s32.f32 %v5821_v48  ;;  %v5621_v47 = vunpack.c.1.s8 %v5477_v15 }
 0x5cd   :  { %7091 = vmatpush.bf16.msra.mxu0 %v6637_v58  ;;  %v6701_v56 = vpack.c.bf16 %v6269_v0, %v6265_v34  ;;  %v6129_v21 = vcvt.s32.f32 %v5617_v49  ;;  %v5681_v62 = vunpack.c.0.s8 %v5493_v59  ;;  %v5685_v27 = vunpack.c.1.s8 %v5493_v59  ;;  %v5549_v34 = vld [vmem:[#allocation3 + $0x270] sm:$0xff] }
 0x5ce   :  { %7104 = vmatpush.bf16.msra.mxu1 %v6669_v30  ;;  %v6733_v19 = vpack.c.bf16 %v6333_v61, %v6329_v6  ;;  %v6133_v1 = vcvt.s32.f32 %v5621_v47  ;;  %v5745_v24 = vunpack.c.0.s8 %v5509_v32  ;;  %v5749_v63 = vunpack.c.1.s8 %v5509_v32 }
 0x5cf   :  { %7117 = vmatpush.bf16.msra.mxu2 %v6701_v56  ;;  %v6193_v57 = vcvt.s32.f32 %v5681_v62  ;;  %v6197_v9 = vcvt.s32.f32 %v5685_v27  ;;  %v5809_v8 = vunpack.c.0.s8 %v5525_v12  ;;  %v5813_v25 = vunpack.c.1.s8 %v5525_v12  ;;  %v5565_v62 = vld [vmem:[#allocation3 + $0x2f0] sm:$0xff] }
 0x5d0   :  { %7130 = vmatpush.bf16.msra.mxu3 %v6733_v19  ;;  %v6633_v35 = vpack.c.bf16 %v6133_v1, %v6129_v21  ;;  %v6257_v15 = vcvt.s32.f32 %v5745_v24  ;;  %v6261_v41 = vcvt.s32.f32 %v5749_v63  ;;  %v5609_v51 = vunpack.c.2.s8 %v5473_v52  ;;  %v5581_v24 = vld [vmem:[#allocation3 + $0x370] sm:$0xff] }
 0x5d1   :  { %v6665_v11 = vpack.c.bf16 %v6197_v9, %v6193_v57  ;;  %v6321_v20 = vcvt.s32.f32 %v5809_v8  ;;  %v6325_v44 = vcvt.s32.f32 %v5813_v25  ;;  %v5613_v28 = vunpack.c.3.s8 %v5473_v52  ;;  %v5597_v25 = vld [vmem:[#allocation3 + $0x3f0] sm:$0xff] }
 0x5d2   :  { %7092 = vmatpush.bf16.msra.mxu0 %v6633_v35  ;;  %v6697_v59 = vpack.c.bf16 %v6261_v41, %v6257_v15  ;;  %v6121_v23 = vcvt.s32.f32 %v5609_v51  ;;  %v5673_v50 = vunpack.c.2.s8 %v5489_v14  ;;  %v5677_v2 = vunpack.c.3.s8 %v5489_v14 }
 0x5d3   :  { %7105 = vmatpush.bf16.msra.mxu1 %v6665_v11  ;;  %v6729_v26 = vpack.c.bf16 %v6325_v44, %v6321_v20  ;;  %v6125_v32 = vcvt.s32.f32 %v5613_v28  ;;  %v5737_v29 = vunpack.c.2.s8 %v5505_v45  ;;  %v5741_v10 = vunpack.c.3.s8 %v5505_v45 }
 0x5d4   :  { %7118 = vmatpush.bf16.msra.mxu2 %v6697_v59  ;;  %v6185_v54 = vcvt.s32.f32 %v5673_v50  ;;  %v6189_v40 = vcvt.s32.f32 %v5677_v2  ;;  %v5801_v12 = vunpack.c.2.s8 %v5521_v39  ;;  %v5805_v31 = vunpack.c.3.s8 %v5521_v39 }
 0x5d5   :  { %7131 = vmatpush.bf16.msra.mxu3 %v6729_v26  ;;  %v6629_v16 = vpack.c.bf16 %v6125_v32, %v6121_v23  ;;  %v6249_v18 = vcvt.s32.f32 %v5737_v29  ;;  %v6253_v13 = vcvt.s32.f32 %v5741_v10  ;;  %v5601_v4 = vunpack.c.0.s8 %v5473_v52 }
 0x5d6   :  { %v6661_v36 = vpack.c.bf16 %v6189_v40, %v6185_v54  ;;  %v6313_v5 = vcvt.s32.f32 %v5801_v12  ;;  %v6317_v37 = vcvt.s32.f32 %v5805_v31  ;;  %v5605_v43 = vunpack.c.1.s8 %v5473_v52 }
 0x5d7   :  { %7093 = vmatpush.bf16.msra.mxu0 %v6629_v16  ;;  %v6693_v55 = vpack.c.bf16 %v6253_v13, %v6249_v18  ;;  %v6113_v7 = vcvt.s32.f32 %v5601_v4  ;;  %v5665_v48 = vunpack.c.0.s8 %v5489_v14  ;;  %v5669_v58 = vunpack.c.1.s8 %v5489_v14  ;;  %v5545_v18 = vld [vmem:[#allocation3 + $0x250] sm:$0xff] }
 0x5d8   :  { %7106 = vmatpush.bf16.msra.mxu1 %v6661_v36  ;;  %v6725_v0 = vpack.c.bf16 %v6317_v37, %v6313_v5  ;;  %v6117_v49 = vcvt.s32.f32 %v5605_v43  ;;  %v5729_v30 = vunpack.c.0.s8 %v5505_v45  ;;  %v5733_v6 = vunpack.c.1.s8 %v5505_v45 }
 0x5d9   :  { %7119 = vmatpush.bf16.msra.mxu2 %v6693_v55  ;;  %v6177_v61 = vcvt.s32.f32 %v5665_v48  ;;  %v6181_v47 = vcvt.s32.f32 %v5669_v58  ;;  %v5793_v56 = vunpack.c.0.s8 %v5521_v39  ;;  %v5797_v21 = vunpack.c.1.s8 %v5521_v39  ;;  %v5561_v48 = vld [vmem:[#allocation3 + $0x2d0] sm:$0xff] }
 0x5da   :  { %7132 = vmatpush.bf16.msra.mxu3 %v6725_v0  ;;  %v6625_v27 = vpack.c.bf16 %v6117_v49, %v6113_v7  ;;  %v6241_v52 = vcvt.s32.f32 %v5729_v30  ;;  %v6245_v19 = vcvt.s32.f32 %v5733_v6  ;;  %v5913_v1 = vunpack.c.2.s8 %v5549_v34  ;;  %v5577_v30 = vld [vmem:[#allocation3 + $0x350] sm:$0xff] }
 0x5db   :  { %v6657_v63 = vpack.c.bf16 %v6181_v47, %v6177_v61  ;;  %v6305_v57 = vcvt.s32.f32 %v5793_v56  ;;  %v6309_v9 = vcvt.s32.f32 %v5797_v21  ;;  %v5917_v8 = vunpack.c.3.s8 %v5549_v34  ;;  %v5593_v21 = vld [vmem:[#allocation3 + $0x3d0] sm:$0xff] }
 0x5dc   :  { %7094 = vmatpush.bf16.msra.mxu0 %v6625_v27  ;;  %v6689_v14 = vpack.c.bf16 %v6245_v19, %v6241_v52  ;;  %v6425_v35 = vcvt.s32.f32 %v5913_v1  ;;  %v5977_v15 = vunpack.c.2.s8 %v5565_v62  ;;  %v5981_v41 = vunpack.c.3.s8 %v5565_v62 }
 0x5dd   :  { %7107 = vmatpush.bf16.msra.mxu1 %v6657_v63  ;;  %v6721_v51 = vpack.c.bf16 %v6309_v9, %v6305_v57  ;;  %v6429_v45 = vcvt.s32.f32 %v5917_v8  ;;  %v6041_v11 = vunpack.c.2.s8 %v5581_v24  ;;  %v6045_v20 = vunpack.c.3.s8 %v5581_v24 }
 0x5de   :  { %7120 = vmatpush.bf16.msra.mxu2 %v6689_v14  ;;  %v6489_v44 = vcvt.s32.f32 %v5977_v15  ;;  %v6493_v28 = vcvt.s32.f32 %v5981_v41  ;;  %v6105_v39 = vunpack.c.2.s8 %v5597_v25  ;;  %v6109_v59 = vunpack.c.3.s8 %v5597_v25 }
 0x5df   :  { %7133 = vmatpush.bf16.msra.mxu3 %v6721_v51  ;;  %v6781_v23 = vpack.c.bf16 %v6429_v45, %v6425_v35  ;;  %v6553_v50 = vcvt.s32.f32 %v6041_v11  ;;  %v6557_v2 = vcvt.s32.f32 %v6045_v20  ;;  %v5905_v26 = vunpack.c.0.s8 %v5549_v34  ;;  %7095 = vmatmul.bf16.vlgmr.msra.gmra.mxu0 %v10544_v38 }
 0x5e0   :  { %v6813_v32 = vpack.c.bf16 %v6493_v28, %v6489_v44  ;;  %v6617_v29 = vcvt.s32.f32 %v6105_v39  ;;  %v6621_v10 = vcvt.s32.f32 %v6109_v59  ;;  %v5909_v54 = vunpack.c.1.s8 %v5549_v34  ;;  %7108 = vmatmul.bf16.vlgmr.msra.gmra.mxu1 %v10553_v42 }
 0x5e1   :  { %7139 = vmatpush.bf16.msrb.mxu0 %v6781_v23  ;;  %v6845_v40 = vpack.c.bf16 %v6557_v2, %v6553_v50  ;;  %v6417_v12 = vcvt.s32.f32 %v5905_v26  ;;  %v5969_v31 = vunpack.c.0.s8 %v5565_v62  ;;  %v5973_v16 = vunpack.c.1.s8 %v5565_v62  ;;  %7121 = vmatmul.bf16.vlgmr.msra.gmra.mxu2 %v10539_v3  ;;  %v5541_v50 = vld [vmem:[#allocation3 + $0x230] sm:$0xff] }
 0x5e2   :  { %7152 = vmatpush.bf16.msrb.mxu1 %v6813_v32  ;;  %v6877_v13 = vpack.c.bf16 %v6621_v10, %v6617_v29  ;;  %v6421_v4 = vcvt.s32.f32 %v5909_v54  ;;  %v6033_v36 = vunpack.c.0.s8 %v5581_v24  ;;  %v6037_v5 = vunpack.c.1.s8 %v5581_v24  ;;  %7134 = vmatmul.bf16.vlgmr.msra.gmra.mxu3 %v10548_v60  ;;  %v10595_v10 = vpop.f32.mrf.mxu0  ;;  %v10597_v54 = vpop.f32.mrf.mxu1 }
 0x5e3   :  { %7165 = vmatpush.bf16.msrb.mxu2 %v6845_v40  ;;  %v6481_v37 = vcvt.s32.f32 %v5969_v31  ;;  %v6485_v43 = vcvt.s32.f32 %v5973_v16  ;;  %v6097_v55 = vunpack.c.0.s8 %v5597_v25  ;;  %v6101_v7 = vunpack.c.1.s8 %v5597_v25 }
 0x5e4   :  { %7178 = vmatpush.bf16.msrb.mxu3 %v6877_v13  ;;  %v6777_v58 = vpack.c.bf16 %v6421_v4, %v6417_v12  ;;  %v6545_v34 = vcvt.s32.f32 %v6033_v36  ;;  %v6549_v0 = vcvt.s32.f32 %v6037_v5  ;;  %v5897_v49 = vunpack.c.2.s8 %v5545_v18 }
 0x5e5   :  { %v6809_v6 = vpack.c.bf16 %v6485_v43, %v6481_v37  ;;  %v6609_v61 = vcvt.s32.f32 %v6097_v55  ;;  %v6613_v47 = vcvt.s32.f32 %v6101_v7  ;;  %v5901_v56 = vunpack.c.3.s8 %v5545_v18  ;;  %v5573_v37 = vld [vmem:[#allocation3 + $0x330] sm:$0xff] }
 0x5e6   :  { %7140 = vmatpush.bf16.msrb.mxu0 %v6777_v58  ;;  %v6841_v62 = vpack.c.bf16 %v6549_v0, %v6545_v34  ;;  %v6409_v27 = vcvt.s32.f32 %v5897_v49  ;;  %v5961_v52 = vunpack.c.2.s8 %v5561_v48  ;;  %v5965_v19 = vunpack.c.3.s8 %v5561_v48  ;;  %v5589_v58 = vld [vmem:[#allocation3 + $0x3b0] sm:$0xff] }
 0x5e7   :  { %7153 = vmatpush.bf16.msrb.mxu1 %v6809_v6  ;;  %v6873_v1 = vpack.c.bf16 %v6613_v47, %v6609_v61  ;;  %v6413_v24 = vcvt.s32.f32 %v5901_v56  ;;  %v6025_v63 = vunpack.c.2.s8 %v5577_v30  ;;  %v6029_v57 = vunpack.c.3.s8 %v5577_v30 }
 0x5e8   :  { %7166 = vmatpush.bf16.msrb.mxu2 %v6841_v62  ;;  %v6473_v9 = vcvt.s32.f32 %v5961_v52  ;;  %v6477_v8 = vcvt.s32.f32 %v5965_v19  ;;  %v6089_v25 = vunpack.c.2.s8 %v5593_v21  ;;  %v6093_v14 = vunpack.c.3.s8 %v5593_v21  ;;  %v10599_v19 = vpop.f32.mrf.mxu2 }
 0x5e9   :  { %7179 = vmatpush.bf16.msrb.mxu3 %v6873_v1  ;;  %v6773_v35 = vpack.c.bf16 %v6413_v24, %v6409_v27  ;;  %v6537_v15 = vcvt.s32.f32 %v6025_v63  ;;  %v6541_v41 = vcvt.s32.f32 %v6029_v57  ;;  %v5889_v51 = vunpack.c.0.s8 %v5545_v18  ;;  %v10601_v1 = vpop.f32.mrf.mxu3 }
 0x5ea   :  { %v6805_v45 = vpack.c.bf16 %v6477_v8, %v6473_v9  ;;  %v6601_v11 = vcvt.s32.f32 %v6089_v25  ;;  %v6605_v20 = vcvt.s32.f32 %v6093_v14  ;;  %v5893_v44 = vunpack.c.1.s8 %v5545_v18  ;;  %v5557_v18 = vld [vmem:[#allocation3 + $0x2b0] sm:$0xff] }
 0x5eb   :  { %7141 = vmatpush.bf16.msrb.mxu0 %v6773_v35  ;;  %v6837_v28 = vpack.c.bf16 %v6541_v41, %v6537_v15  ;;  %v6401_v39 = vcvt.s32.f32 %v5889_v51  ;;  %v5953_v59 = vunpack.c.0.s8 %v5561_v48  ;;  %v5957_v23 = vunpack.c.1.s8 %v5561_v48  ;;  %v6890_v15 = vpop.f32.mrf.mxu0  ;;  %v6903_v41 = vpop.f32.mrf.mxu1 }
 0x5ec   :  { %7154 = vmatpush.bf16.msrb.mxu1 %v6805_v45  ;;  %v6869_v2 = vpack.c.bf16 %v6605_v20, %v6601_v11  ;;  %v6405_v26 = vcvt.s32.f32 %v5893_v44  ;;  %v6017_v32 = vunpack.c.0.s8 %v5577_v30  ;;  %v6021_v29 = vunpack.c.1.s8 %v5577_v30  ;;  %v5537_v44 = vld [vmem:[#allocation3 + $0x210] sm:$0xff]  ;;  %v10603_v41 = vld [vmem:[#allocation3 + $0x78] sm:$0xff] }
 0x5ed   :  { %7167 = vmatpush.bf16.msrb.mxu2 %v6837_v28  ;;  %v6465_v40 = vcvt.s32.f32 %v5953_v59  ;;  %v6469_v12 = vcvt.s32.f32 %v5957_v23  ;;  %v6081_v31 = vunpack.c.0.s8 %v5593_v21  ;;  %v6085_v16 = vunpack.c.1.s8 %v5593_v21 }
 0x5ee   :  { %7180 = vmatpush.bf16.msrb.mxu3 %v6869_v2  ;;  %v6769_v13 = vpack.c.bf16 %v6405_v26, %v6401_v39  ;;  %v6529_v4 = vcvt.s32.f32 %v6017_v32  ;;  %v6533_v36 = vcvt.s32.f32 %v6021_v29  ;;  %v5881_v5 = vunpack.c.2.s8 %v5541_v50 }
 0x5ef   :  { %v6801_v43 = vpack.c.bf16 %v6469_v12, %v6465_v40  ;;  %v6593_v55 = vcvt.s32.f32 %v6081_v31  ;;  %v6597_v7 = vcvt.s32.f32 %v6085_v16  ;;  %v5885_v48 = vunpack.c.3.s8 %v5541_v50  ;;  %v5553_v40 = vld [vmem:[#allocation3 + $0x290] sm:$0xff] }
 0x5f0   :  { %7142 = vmatpush.bf16.msrb.mxu0 %v6769_v13  ;;  %v6833_v34 = vpack.c.bf16 %v6533_v36, %v6529_v4  ;;  %v6393_v0 = vcvt.s32.f32 %v5881_v5  ;;  %v5945_v49 = vunpack.c.2.s8 %v5557_v18  ;;  %v5949_v30 = vunpack.c.3.s8 %v5557_v18  ;;  %v5569_v13 = vld [vmem:[#allocation3 + $0x310] sm:$0xff] }
 0x5f1   :  { %7155 = vmatpush.bf16.msrb.mxu1 %v6801_v43  ;;  %v6865_v6 = vpack.c.bf16 %v6597_v7, %v6593_v55  ;;  %v6397_v61 = vcvt.s32.f32 %v5885_v48  ;;  %v6009_v47 = vunpack.c.2.s8 %v5573_v37  ;;  %v6013_v56 = vunpack.c.3.s8 %v5573_v37  ;;  %v5585_v43 = vld [vmem:[#allocation3 + $0x390] sm:$0xff] }
 0x5f2   :  { %7168 = vmatpush.bf16.msrb.mxu2 %v6833_v34  ;;  %v6457_v21 = vcvt.s32.f32 %v5945_v49  ;;  %v6461_v62 = vcvt.s32.f32 %v5949_v30  ;;  %v6073_v27 = vunpack.c.2.s8 %v5589_v58  ;;  %v6077_v52 = vunpack.c.3.s8 %v5589_v58  ;;  %v6916_v34 = vpop.f32.mrf.mxu2 }
 0x5f3   :  { %7181 = vmatpush.bf16.msrb.mxu3 %v6865_v6  ;;  %v6765_v24 = vpack.c.bf16 %v6397_v61, %v6393_v0  ;;  %v6521_v63 = vcvt.s32.f32 %v6009_v47  ;;  %v6525_v57 = vcvt.s32.f32 %v6013_v56  ;;  %v5873_v9 = vunpack.c.0.s8 %v5541_v50  ;;  %v6929_v0 = vpop.f32.mrf.mxu3 }
 0x5f4   :  { %v6797_v8 = vpack.c.bf16 %v6461_v62, %v6457_v21  ;;  %v6585_v25 = vcvt.s32.f32 %v6073_v27  ;;  %v6589_v14 = vcvt.s32.f32 %v6077_v52  ;;  %v5877_v35 = vunpack.c.1.s8 %v5541_v50 }
 0x5f5   :  { %7143 = vmatpush.bf16.msrb.mxu0 %v6765_v24  ;;  %v6829_v51 = vpack.c.bf16 %v6525_v57, %v6521_v63  ;;  %v6385_v45 = vcvt.s32.f32 %v5873_v9  ;;  %v5937_v11 = vunpack.c.0.s8 %v5557_v18  ;;  %v5941_v20 = vunpack.c.1.s8 %v5557_v18 }
 0x5f6   :  { %7156 = vmatpush.bf16.msrb.mxu1 %v6797_v8  ;;  %v6861_v28 = vpack.c.bf16 %v6589_v14, %v6585_v25  ;;  %v6389_v39 = vcvt.s32.f32 %v5877_v35  ;;  %v6001_v59 = vunpack.c.0.s8 %v5573_v37  ;;  %v6005_v23 = vunpack.c.1.s8 %v5573_v37 }
 0x5f7   :  { %7169 = vmatpush.bf16.msrb.mxu2 %v6829_v51  ;;  %v6449_v2 = vcvt.s32.f32 %v5937_v11  ;;  %v6453_v26 = vcvt.s32.f32 %v5941_v20  ;;  %v6065_v32 = vunpack.c.0.s8 %v5589_v58  ;;  %v6069_v29 = vunpack.c.1.s8 %v5589_v58 }
 0x5f8   :  { %7182 = vmatpush.bf16.msrb.mxu3 %v6861_v28  ;;  %v6761_v50 = vpack.c.bf16 %v6389_v39, %v6385_v45  ;;  %v6513_v12 = vcvt.s32.f32 %v6001_v59  ;;  %v6517_v31 = vcvt.s32.f32 %v6005_v23  ;;  %v5865_v16 = vunpack.c.2.s8 %v5537_v44 }
 0x5f9   :  { %v6793_v4 = vpack.c.bf16 %v6453_v26, %v6449_v2  ;;  %v6577_v18 = vcvt.s32.f32 %v6065_v32  ;;  %v6581_v36 = vcvt.s32.f32 %v6069_v29  ;;  %v5869_v5 = vunpack.c.3.s8 %v5537_v44  ;;  %v5502_v2 = vld [vmem:[#allocation3 + $0xf8] sm:$0xff]  ;;  %v10605_v26 = vpop.f32.mrf.mxu0 }
 0x5fa   :  { %7144 = vmatpush.bf16.msrb.mxu0 %v6761_v50  ;;  %v6825_v55 = vpack.c.bf16 %v6517_v31, %v6513_v12  ;;  %v6377_v37 = vcvt.s32.f32 %v5865_v16  ;;  %v5929_v7 = vunpack.c.2.s8 %v5553_v40  ;;  %v5933_v48 = vunpack.c.3.s8 %v5553_v40  ;;  %v5518_v12 = vld [vmem:[#allocation3 + $0x178] sm:$0xff] }
 0x5fb   :  { %7157 = vmatpush.bf16.msrb.mxu1 %v6793_v4  ;;  %v6857_v58 = vpack.c.bf16 %v6581_v36, %v6577_v18  ;;  %v6381_v49 = vcvt.s32.f32 %v5869_v5  ;;  %v5993_v30 = vunpack.c.2.s8 %v5569_v13  ;;  %v5997_v6 = vunpack.c.3.s8 %v5569_v13  ;;  %v5534_v18 = vld [vmem:[#allocation3 + $0x1f8] sm:$0xff] }
 0x5fc   :  { %7170 = vmatpush.bf16.msrb.mxu2 %v6825_v55  ;;  %v6441_v61 = vcvt.s32.f32 %v5929_v7  ;;  %v6445_v47 = vcvt.s32.f32 %v5933_v48  ;;  %v6057_v56 = vunpack.c.2.s8 %v5585_v43  ;;  %v6061_v21 = vunpack.c.3.s8 %v5585_v43 }
 0x5fd   :  { %7183 = vmatpush.bf16.msrb.mxu3 %v6857_v58  ;;  %v6757_v62 = vpack.c.bf16 %v6381_v49, %v6377_v37  ;;  %v6505_v27 = vcvt.s32.f32 %v5993_v30  ;;  %v6509_v52 = vcvt.s32.f32 %v5997_v6  ;;  %v5857_v24 = vunpack.c.0.s8 %v5537_v44  ;;  %v10611_v6 = vpop.f32.mrf.mxu2 }
 0x5fe   :  { %v6789_v63 = vpack.c.bf16 %v6445_v47, %v6441_v61  ;;  %v6569_v57 = vcvt.s32.f32 %v6057_v56  ;;  %v6573_v9 = vcvt.s32.f32 %v6061_v21  ;;  %v5861_v8 = vunpack.c.1.s8 %v5537_v44  ;;  %v10607_v44 = vpop.f32.mrf.mxu1  ;;  %v10613_v61 = vpop.f32.mrf.mxu3 }
 0x5ff   :  { %7145 = vmatpush.bf16.msrb.mxu0 %v6757_v62  ;;  %v6821_v25 = vpack.c.bf16 %v6509_v52, %v6505_v27  ;;  %v6369_v14 = vcvt.s32.f32 %v5857_v24  ;;  %v5921_v35 = vunpack.c.0.s8 %v5553_v40  ;;  %v5925_v15 = vunpack.c.1.s8 %v5553_v40 }
 0x600   :  { %7158 = vmatpush.bf16.msrb.mxu1 %v6789_v63  ;;  %v6853_v51 = vpack.c.bf16 %v6573_v9, %v6569_v57  ;;  %v6373_v45 = vcvt.s32.f32 %v5861_v8  ;;  %v5985_v11 = vunpack.c.0.s8 %v5569_v13  ;;  %v5989_v20 = vunpack.c.1.s8 %v5569_v13 }
 0x601   :  { %7171 = vmatpush.bf16.msrb.mxu2 %v6821_v25  ;;  %v6433_v28 = vcvt.s32.f32 %v5921_v35  ;;  %v6437_v39 = vcvt.s32.f32 %v5925_v15  ;;  %v6049_v59 = vunpack.c.0.s8 %v5585_v43  ;;  %v6053_v23 = vunpack.c.1.s8 %v5585_v43 }
 0x602   :  { %7184 = vmatpush.bf16.msrb.mxu3 %v6853_v51  ;;  %v6753_v32 = vpack.c.bf16 %v6373_v45, %v6369_v14  ;;  %v6497_v29 = vcvt.s32.f32 %v5985_v11  ;;  %v6501_v40 = vcvt.s32.f32 %v5989_v20  ;;  %v5658_v50 = vunpack.c.2.s8 %v10603_v41  ;;  %v6942_v14 = vpop.f32.mrf.mxu0  ;;  %v5482_v45 = vld [vmem:[#allocation3 + $0x58] sm:$0xff] }
 0x603   :  { %v6785_v31 = vpack.c.bf16 %v6437_v39, %v6433_v28  ;;  %v6561_v16 = vcvt.s32.f32 %v6049_v59  ;;  %v6565_v13 = vcvt.s32.f32 %v6053_v23  ;;  %v5662_v4 = vunpack.c.3.s8 %v10603_v41 }
 0x604   :  { %7146 = vmatpush.bf16.msrb.mxu0 %v6753_v32  ;;  %v6817_v36 = vpack.c.bf16 %v6501_v40, %v6497_v29  ;;  %v6170_v5 = vcvt.s32.f32 %v5658_v50  ;;  %v5722_v43 = vunpack.c.2.s8 %v5502_v2  ;;  %v5726_v55 = vunpack.c.3.s8 %v5502_v2  ;;  %v5498_v32 = vld [vmem:[#allocation3 + $0xd8] sm:$0xff] }
 0x605   :  { %7159 = vmatpush.bf16.msrb.mxu1 %v6785_v31  ;;  %v6849_v37 = vpack.c.bf16 %v6565_v13, %v6561_v16  ;;  %v6174_v7 = vcvt.s32.f32 %v5662_v4  ;;  %v5786_v48 = vunpack.c.2.s8 %v5518_v12  ;;  %v5790_v34 = vunpack.c.3.s8 %v5518_v12  ;;  %v5514_v29 = vld [vmem:[#allocation3 + $0x158] sm:$0xff] }
 0x606   :  { %7172 = vmatpush.bf16.msrb.mxu2 %v6817_v36  ;;  %v6234_v0 = vcvt.s32.f32 %v5722_v43  ;;  %v6238_v58 = vcvt.s32.f32 %v5726_v55  ;;  %v5850_v49 = vunpack.c.2.s8 %v5534_v18  ;;  %v5854_v30 = vunpack.c.3.s8 %v5534_v18  ;;  %v6955_v35 = vpop.f32.mrf.mxu1  ;;  %v5530_v16 = vld [vmem:[#allocation3 + $0x1d8] sm:$0xff]  ;;  %v6968_v43 = vpop.f32.mrf.mxu2 }
 0x607   :  { %7185 = vmatpush.bf16.msrb.mxu3 %v6849_v37  ;;  %v6654_v47 = vpack.c.bf16 %v6174_v7, %v6170_v5  ;;  %v6298_v56 = vcvt.s32.f32 %v5786_v48  ;;  %v6302_v21 = vcvt.s32.f32 %v5790_v34  ;;  %v6902_v62 = vadd.f32 %v10597_v54, %v10595_v10  ;;  %7147 = vmatmul.bf16.vlgmr.msrb.gmra.mxu0 %v10563_v33  ;;  %v6981_v55 = vpop.f32.mrf.mxu3  ;;  %v5478_v35 = vld [vmem:[#allocation3 + $0x38] sm:$0xff] }
 0x608   :  { %v6686_v27 = vpack.c.bf16 %v6238_v58, %v6234_v0  ;;  %v6362_v52 = vcvt.s32.f32 %v5850_v49  ;;  %v6366_v24 = vcvt.s32.f32 %v5854_v30  ;;  %v5650_v63 = vunpack.c.0.s8 %v10603_v41  ;;  %7160 = vmatmul.bf16.vlgmr.msrb.gmra.mxu1 %v10578_v22 }
 0x609   :  { %7191 = vmatpush.bf16.msra.mxu0 %v6654_v47  ;;  %v6718_v57 = vpack.c.bf16 %v6302_v21, %v6298_v56  ;;  %v5654_v9 = vunpack.c.1.s8 %v10603_v41  ;;  %v5714_v8 = vunpack.c.0.s8 %v5502_v2  ;;  %v5718_v25 = vunpack.c.1.s8 %v5502_v2  ;;  %7173 = vmatmul.bf16.vlgmr.msrb.gmra.mxu2 %v10559_v17 }
 0x60a   :  { %7204 = vmatpush.bf16.msra.mxu1 %v6686_v27  ;;  %v6750_v10 = vpack.c.bf16 %v6366_v24, %v6362_v52  ;;  %v6162_v54 = vcvt.s32.f32 %v5650_v63  ;;  %v5778_v15 = vunpack.c.0.s8 %v5518_v12  ;;  %v5782_v51 = vunpack.c.1.s8 %v5518_v12  ;;  %7186 = vmatmul.bf16.vlgmr.msrb.gmra.mxu3 %v10570_v53 }
 0x60b   :  { %7217 = vmatpush.bf16.msra.mxu2 %v6718_v57  ;;  %v6166_v11 = vcvt.s32.f32 %v5654_v9  ;;  %v6226_v20 = vcvt.s32.f32 %v5714_v8  ;;  %v6230_v28 = vcvt.s32.f32 %v5718_v25  ;;  %v5842_v39 = vunpack.c.0.s8 %v5534_v18 }
 0x60c   :  { %7230 = vmatpush.bf16.msra.mxu3 %v6750_v10  ;;  %v6290_v41 = vcvt.s32.f32 %v5778_v15  ;;  %v6294_v59 = vcvt.s32.f32 %v5782_v51  ;;  %v5846_v23 = vunpack.c.1.s8 %v5534_v18  ;;  %v6915_v2 = vadd.f32 %v10599_v19, %v6902_v62 }
 0x60d   :  { %v6650_v40 = vpack.c.bf16 %v6166_v11, %v6162_v54  ;;  %v6682_v50 = vpack.c.bf16 %v6230_v28, %v6226_v20  ;;  %v6354_v31 = vcvt.s32.f32 %v5842_v39  ;;  %v5642_v12 = vunpack.c.2.s8 %v5482_v45  ;;  %v5494_v11 = vld [vmem:[#allocation3 + $0xb8] sm:$0xff] }
 0x60e   :  { %v6714_v13 = vpack.c.bf16 %v6294_v59, %v6290_v41  ;;  %v6358_v4 = vcvt.s32.f32 %v5846_v23  ;;  %v10625_v36 = vadd.f32 %v10601_v1, %v6915_v2  ;;  %v5646_v5 = vunpack.c.3.s8 %v5482_v45 }
 0x60f   :  { %7192 = vmatpush.bf16.msra.mxu0 %v6650_v40  ;;  %7205 = vmatpush.bf16.msra.mxu1 %v6682_v50  ;;  %v6154_v18 = vcvt.s32.f32 %v5642_v12  ;;  %v5706_v37 = vunpack.c.2.s8 %v5498_v32  ;;  %v5710_v19 = vunpack.c.3.s8 %v5498_v32  ;;  %v5770_v7 = vunpack.c.2.s8 %v5514_v29  ;;  %v5510_v40 = vld [vmem:[#allocation3 + $0x138] sm:$0xff] }
 0x610   :  { %7218 = vmatpush.bf16.msra.mxu2 %v6714_v13  ;;  %v6746_v48 = vpack.c.bf16 %v6358_v4, %v6354_v31  ;;  %v6158_v34 = vcvt.s32.f32 %v5646_v5  ;;  %v5774_v0 = vunpack.c.3.s8 %v5514_v29  ;;  %v5834_v58 = vunpack.c.2.s8 %v5530_v16  ;;  %v5526_v13 = vld [vmem:[#allocation3 + $0x1b8] sm:$0xff] }
 0x611   :  { %v6218_v49 = vcvt.s32.f32 %v5706_v37  ;;  %v6222_v30 = vcvt.s32.f32 %v5710_v19  ;;  %v6282_v47 = vcvt.s32.f32 %v5770_v7  ;;  %v5838_v56 = vunpack.c.3.s8 %v5530_v16 }
 0x612   :  { %7231 = vmatpush.bf16.msra.mxu3 %v6746_v48  ;;  %v6646_v1 = vpack.c.bf16 %v6158_v34, %v6154_v18  ;;  %v6286_v21 = vcvt.s32.f32 %v5774_v0  ;;  %v6346_v62 = vcvt.s32.f32 %v5834_v58  ;;  %v5634_v27 = vunpack.c.0.s8 %v5482_v45 }
 0x613   :  { %v6678_v52 = vpack.c.bf16 %v6222_v30, %v6218_v49  ;;  %v6350_v24 = vcvt.s32.f32 %v5838_v56  ;;  %v5638_v63 = vunpack.c.1.s8 %v5482_v45  ;;  %v5698_v57 = vunpack.c.0.s8 %v5498_v32 }
 0x614   :  { %7193 = vmatpush.bf16.msra.mxu0 %v6646_v1  ;;  %v6710_v9 = vpack.c.bf16 %v6286_v21, %v6282_v47  ;;  %v6146_v8 = vcvt.s32.f32 %v5634_v27  ;;  %v5702_v25 = vunpack.c.1.s8 %v5498_v32  ;;  %v5762_v14 = vunpack.c.0.s8 %v5514_v29 }
 0x615   :  { %7206 = vmatpush.bf16.msra.mxu1 %v6678_v52  ;;  %v6742_v10 = vpack.c.bf16 %v6350_v24, %v6346_v62  ;;  %v6150_v54 = vcvt.s32.f32 %v5638_v63  ;;  %v6210_v15 = vcvt.s32.f32 %v5698_v57  ;;  %v5766_v51 = vunpack.c.1.s8 %v5514_v29 }
 0x616   :  { %7219 = vmatpush.bf16.msra.mxu2 %v6710_v9  ;;  %v6214_v20 = vcvt.s32.f32 %v5702_v25  ;;  %v6274_v28 = vcvt.s32.f32 %v5762_v14  ;;  %v5826_v39 = vunpack.c.0.s8 %v5530_v16  ;;  %v5830_v41 = vunpack.c.1.s8 %v5530_v16  ;;  %v5474_v25 = vld [vmem:[#allocation3 + $0x18] sm:$0xff] }
 0x617   :  { %7232 = vmatpush.bf16.msra.mxu3 %v6742_v10  ;;  %v6642_v45 = vpack.c.bf16 %v6150_v54, %v6146_v8  ;;  %v6278_v59 = vcvt.s32.f32 %v5766_v51  ;;  %v5626_v23 = vunpack.c.2.s8 %v5478_v35  ;;  %v5630_v2 = vunpack.c.3.s8 %v5478_v35  ;;  %v5490_v54 = vld [vmem:[#allocation3 + $0x98] sm:$0xff] }
 0x618   :  { %v6674_v32 = vpack.c.bf16 %v6214_v20, %v6210_v15  ;;  %v6338_v50 = vcvt.s32.f32 %v5826_v39  ;;  %v6342_v31 = vcvt.s32.f32 %v5830_v41  ;;  %v5690_v12 = vunpack.c.2.s8 %v5494_v11 }
 0x619   :  { %7194 = vmatpush.bf16.msra.mxu0 %v6642_v45  ;;  %v6706_v4 = vpack.c.bf16 %v6278_v59, %v6274_v28  ;;  %v6138_v29 = vcvt.s32.f32 %v5626_v23  ;;  %v6142_v5 = vcvt.s32.f32 %v5630_v2  ;;  %v5694_v43 = vunpack.c.3.s8 %v5494_v11  ;;  %v5506_v45 = vld [vmem:[#allocation3 + $0x118] sm:$0xff] }
 0x61a   :  { %7207 = vmatpush.bf16.msra.mxu1 %v6674_v32  ;;  %v6738_v55 = vpack.c.bf16 %v6342_v31, %v6338_v50  ;;  %v6202_v18 = vcvt.s32.f32 %v5690_v12  ;;  %v5754_v16 = vunpack.c.2.s8 %v5510_v40  ;;  %v5758_v37 = vunpack.c.3.s8 %v5510_v40 }
 0x61b   :  { %7220 = vmatpush.bf16.msra.mxu2 %v6706_v4  ;;  %v6638_v19 = vpack.c.bf16 %v6142_v5, %v6138_v29  ;;  %v6206_v7 = vcvt.s32.f32 %v5694_v43  ;;  %v5818_v48 = vunpack.c.2.s8 %v5526_v13  ;;  %v5822_v34 = vunpack.c.3.s8 %v5526_v13 }
 0x61c   :  { %7233 = vmatpush.bf16.msra.mxu3 %v6738_v55  ;;  %v6266_v0 = vcvt.s32.f32 %v5754_v16  ;;  %v6270_v58 = vcvt.s32.f32 %v5758_v37  ;;  %v6941_v49 = vadd.f32 %v10605_v26, %v10625_v36  ;;  %v5618_v30 = vunpack.c.0.s8 %v5478_v35 }
 0x61d   :  { %7195 = vmatpush.bf16.msra.mxu0 %v6638_v19  ;;  %v6670_v47 = vpack.c.bf16 %v6206_v7, %v6202_v18  ;;  %v6330_v56 = vcvt.s32.f32 %v5818_v48  ;;  %v6334_v1 = vcvt.s32.f32 %v5822_v34  ;;  %v5622_v21 = vunpack.c.1.s8 %v5478_v35 }
 0x61e   :  { %v6702_v62 = vpack.c.bf16 %v6270_v58, %v6266_v0  ;;  %v6954_v27 = vadd.f32 %v10607_v44, %v6941_v49  ;;  %v6130_v52 = vcvt.s32.f32 %v5618_v30  ;;  %v5682_v24 = vunpack.c.0.s8 %v5494_v11 }
 0x61f   :  { %7208 = vmatpush.bf16.msra.mxu1 %v6670_v47  ;;  %v6734_v63 = vpack.c.bf16 %v6334_v1, %v6330_v56  ;;  %v6134_v57 = vcvt.s32.f32 %v5622_v21  ;;  %v5686_v9 = vunpack.c.1.s8 %v5494_v11  ;;  %v5746_v8 = vunpack.c.0.s8 %v5510_v40  ;;  %v5550_v56 = vld [vmem:[#allocation3 + $0x278] sm:$0xff] }
 0x620   :  { %7221 = vmatpush.bf16.msra.mxu2 %v6702_v62  ;;  %v6194_v14 = vcvt.s32.f32 %v5682_v24  ;;  %v5750_v26 = vunpack.c.1.s8 %v5510_v40  ;;  %v5810_v36 = vunpack.c.0.s8 %v5526_v13  ;;  %v5814_v10 = vunpack.c.1.s8 %v5526_v13  ;;  %v5522_v40 = vld [vmem:[#allocation3 + $0x198] sm:$0xff] }
 0x621   :  { %7234 = vmatpush.bf16.msra.mxu3 %v6734_v63  ;;  %v6634_v15 = vpack.c.bf16 %v6134_v57, %v6130_v52  ;;  %v6198_v35 = vcvt.s32.f32 %v5686_v9  ;;  %v6258_v51 = vcvt.s32.f32 %v5746_v8  ;;  %v6967_v44 = vadd.f32 %v10611_v6, %v6954_v27  ;;  %v5566_v52 = vld [vmem:[#allocation3 + $0x2f8] sm:$0xff] }
 0x622   :  { %v6262_v20 = vcvt.s32.f32 %v5750_v26  ;;  %v6322_v28 = vcvt.s32.f32 %v5810_v36  ;;  %v6326_v39 = vcvt.s32.f32 %v5814_v10  ;;  %v5610_v41 = vunpack.c.2.s8 %v5474_v25  ;;  %v5582_v8 = vld [vmem:[#allocation3 + $0x378] sm:$0xff] }
 0x623   :  { %7196 = vmatpush.bf16.msra.mxu0 %v6634_v15  ;;  %v6666_v11 = vpack.c.bf16 %v6198_v35, %v6194_v14  ;;  %v10632_v59 = vadd.f32 %v10613_v61, %v6967_v44  ;;  %v5614_v23 = vunpack.c.3.s8 %v5474_v25  ;;  %v5674_v2 = vunpack.c.2.s8 %v5490_v54 }
 0x624   :  { %v6698_v32 = vpack.c.bf16 %v6262_v20, %v6258_v51  ;;  %v6730_v50 = vpack.c.bf16 %v6326_v39, %v6322_v28  ;;  %v6122_v31 = vcvt.s32.f32 %v5610_v41  ;;  %v5678_v12 = vunpack.c.3.s8 %v5490_v54  ;;  %v5598_v51 = vld [vmem:[#allocation3 + $0x3f8] sm:$0xff] }
 0x625   :  { %7209 = vmatpush.bf16.msra.mxu1 %v6666_v11  ;;  %v6126_v13 = vcvt.s32.f32 %v5614_v23  ;;  %v6186_v6 = vcvt.s32.f32 %v5674_v2  ;;  %v5738_v4 = vunpack.c.2.s8 %v5506_v45  ;;  %v5742_v29 = vunpack.c.3.s8 %v5506_v45 }
 0x626   :  { %7222 = vmatpush.bf16.msra.mxu2 %v6698_v32  ;;  %7235 = vmatpush.bf16.msra.mxu3 %v6730_v50  ;;  %v6190_v5 = vcvt.s32.f32 %v5678_v12  ;;  %v5802_v43 = vunpack.c.2.s8 %v5522_v40  ;;  %v5806_v55 = vunpack.c.3.s8 %v5522_v40  ;;  %v5602_v18 = vunpack.c.0.s8 %v5474_v25 }
 0x627   :  { %v6630_v61 = vpack.c.bf16 %v6126_v13, %v6122_v31  ;;  %v6250_v16 = vcvt.s32.f32 %v5738_v4  ;;  %v6254_v37 = vcvt.s32.f32 %v5742_v29  ;;  %v5606_v19 = vunpack.c.1.s8 %v5474_v25 }
 0x628   :  { %v6662_v7 = vpack.c.bf16 %v6190_v5, %v6186_v6  ;;  %v6314_v48 = vcvt.s32.f32 %v5802_v43  ;;  %v6318_v34 = vcvt.s32.f32 %v5806_v55  ;;  %v6114_v0 = vcvt.s32.f32 %v5602_v18 }
 0x629   :  { %7197 = vmatpush.bf16.msra.mxu0 %v6630_v61  ;;  %v6694_v58 = vpack.c.bf16 %v6254_v37, %v6250_v16  ;;  %v6118_v49 = vcvt.s32.f32 %v5606_v19  ;;  %v5666_v30 = vunpack.c.0.s8 %v5490_v54  ;;  %v5670_v47 = vunpack.c.1.s8 %v5490_v54  ;;  %v5546_v37 = vld [vmem:[#allocation3 + $0x258] sm:$0xff] }
 0x62a   :  { %7210 = vmatpush.bf16.msra.mxu1 %v6662_v7  ;;  %v6726_v1 = vpack.c.bf16 %v6318_v34, %v6314_v48  ;;  %v5730_v21 = vunpack.c.0.s8 %v5506_v45  ;;  %v5734_v62 = vunpack.c.1.s8 %v5506_v45  ;;  %v5794_v27 = vunpack.c.0.s8 %v5522_v40  ;;  %v5562_v34 = vld [vmem:[#allocation3 + $0x2d8] sm:$0xff] }
 0x62b   :  { %7223 = vmatpush.bf16.msra.mxu2 %v6694_v58  ;;  %v6626_v24 = vpack.c.bf16 %v6118_v49, %v6114_v0  ;;  %v6178_v63 = vcvt.s32.f32 %v5666_v30  ;;  %v6182_v57 = vcvt.s32.f32 %v5670_v47  ;;  %v5798_v9 = vunpack.c.1.s8 %v5522_v40 }
 0x62c   :  { %7236 = vmatpush.bf16.msra.mxu3 %v6726_v1  ;;  %v6242_v25 = vcvt.s32.f32 %v5730_v21  ;;  %v6246_v14 = vcvt.s32.f32 %v5734_v62  ;;  %v6306_v26 = vcvt.s32.f32 %v5794_v27  ;;  %v5914_v36 = vunpack.c.2.s8 %v5550_v56  ;;  %v5578_v21 = vld [vmem:[#allocation3 + $0x358] sm:$0xff] }
 0x62d   :  { %7198 = vmatpush.bf16.msra.mxu0 %v6626_v24  ;;  %v6658_v10 = vpack.c.bf16 %v6182_v57, %v6178_v63  ;;  %v6310_v54 = vcvt.s32.f32 %v5798_v9  ;;  %v5918_v15 = vunpack.c.3.s8 %v5550_v56  ;;  %v5978_v35 = vunpack.c.2.s8 %v5566_v52  ;;  %v5594_v24 = vld [vmem:[#allocation3 + $0x3d8] sm:$0xff] }
 0x62e   :  { %v6690_v44 = vpack.c.bf16 %v6246_v14, %v6242_v25  ;;  %v6426_v20 = vcvt.s32.f32 %v5914_v36  ;;  %v5982_v28 = vunpack.c.3.s8 %v5566_v52  ;;  %v6042_v39 = vunpack.c.2.s8 %v5582_v8 }
 0x62f   :  { %7211 = vmatpush.bf16.msra.mxu1 %v6658_v10  ;;  %v6722_v41 = vpack.c.bf16 %v6310_v54, %v6306_v26  ;;  %v6430_v45 = vcvt.s32.f32 %v5918_v15  ;;  %v6490_v11 = vcvt.s32.f32 %v5978_v35  ;;  %v6046_v23 = vunpack.c.3.s8 %v5582_v8  ;;  %v10638_v35 = vpop.f32.mrf.mxu0 }
 0x630   :  { %7224 = vmatpush.bf16.msra.mxu2 %v6690_v44  ;;  %v6494_v2 = vcvt.s32.f32 %v5982_v28  ;;  %v6554_v40 = vcvt.s32.f32 %v6042_v39  ;;  %v6106_v32 = vunpack.c.2.s8 %v5598_v51  ;;  %v6110_v50 = vunpack.c.3.s8 %v5598_v51  ;;  %7199 = vmatmul.bf16.vlgmr.msra.gmra.mxu0 %v10544_v38 }
 0x631   :  { %7237 = vmatpush.bf16.msra.mxu3 %v6722_v41  ;;  %v6782_v31 = vpack.c.bf16 %v6430_v45, %v6426_v20  ;;  %v6558_v12 = vcvt.s32.f32 %v6046_v23  ;;  %v5906_v13 = vunpack.c.0.s8 %v5550_v56  ;;  %v5910_v6 = vunpack.c.1.s8 %v5550_v56 }
 0x632   :  { %v6814_v4 = vpack.c.bf16 %v6494_v2, %v6490_v11  ;;  %v6618_v29 = vcvt.s32.f32 %v6106_v32  ;;  %v6622_v5 = vcvt.s32.f32 %v6110_v50  ;;  %v5970_v43 = vunpack.c.0.s8 %v5566_v52  ;;  %7212 = vmatmul.bf16.vlgmr.msra.gmra.mxu1 %v10553_v42 }
 0x633   :  { %7243 = vmatpush.bf16.msrb.mxu0 %v6782_v31  ;;  %v6846_v55 = vpack.c.bf16 %v6558_v12, %v6554_v40  ;;  %v6418_v18 = vcvt.s32.f32 %v5906_v13  ;;  %v6422_v61 = vcvt.s32.f32 %v5910_v6  ;;  %v5974_v16 = vunpack.c.1.s8 %v5566_v52  ;;  %7225 = vmatmul.bf16.vlgmr.msra.gmra.mxu2 %v10539_v3  ;;  %v5542_v31 = vld [vmem:[#allocation3 + $0x238] sm:$0xff] }
 0x634   :  { %7256 = vmatpush.bf16.msrb.mxu1 %v6814_v4  ;;  %v6878_v38 = vpack.c.bf16 %v6622_v5, %v6618_v29  ;;  %v6482_v19 = vcvt.s32.f32 %v5970_v43  ;;  %v6034_v7 = vunpack.c.0.s8 %v5582_v8  ;;  %v6038_v48 = vunpack.c.1.s8 %v5582_v8  ;;  %7238 = vmatmul.bf16.vlgmr.msra.gmra.mxu3 %v10548_v60  ;;  %v5558_v29 = vld [vmem:[#allocation3 + $0x2b8] sm:$0xff]  ;;  %v10642_v5 = vpop.f32.mrf.mxu2  ;;  %v10644_v43 = vpop.f32.mrf.mxu3 }
 0x635   :  { %7269 = vmatpush.bf16.msrb.mxu2 %v6846_v55  ;;  %v6778_v0 = vpack.c.bf16 %v6422_v61, %v6418_v18  ;;  %v6486_v58 = vcvt.s32.f32 %v5974_v16  ;;  %v6098_v42 = vunpack.c.0.s8 %v5598_v51  ;;  %v6102_v49 = vunpack.c.1.s8 %v5598_v51  ;;  %v10640_v51 = vpop.f32.mrf.mxu1 }
 0x636   :  { %7282 = vmatpush.bf16.msrb.mxu3 %v6878_v38  ;;  %v6546_v30 = vcvt.s32.f32 %v6034_v7  ;;  %v6550_v47 = vcvt.s32.f32 %v6038_v48  ;;  %v5898_v56 = vunpack.c.2.s8 %v5546_v37  ;;  %v5902_v1 = vunpack.c.3.s8 %v5546_v37  ;;  %v5574_v48 = vld [vmem:[#allocation3 + $0x338] sm:$0xff] }
 0x637   :  { %7244 = vmatpush.bf16.msrb.mxu0 %v6778_v0  ;;  %v6810_v3 = vpack.c.bf16 %v6486_v58, %v6482_v19  ;;  %v6610_v62 = vcvt.s32.f32 %v6098_v42  ;;  %v6614_v27 = vcvt.s32.f32 %v6102_v49  ;;  %v5962_v52 = vunpack.c.2.s8 %v5562_v34  ;;  %v5590_v49 = vld [vmem:[#allocation3 + $0x3b8] sm:$0xff] }
 0x638   :  { %v6842_v63 = vpack.c.bf16 %v6550_v47, %v6546_v30  ;;  %v6410_v57 = vcvt.s32.f32 %v5898_v56  ;;  %v6414_v60 = vcvt.s32.f32 %v5902_v1  ;;  %v5966_v9 = vunpack.c.3.s8 %v5562_v34 }
 0x639   :  { %7257 = vmatpush.bf16.msrb.mxu1 %v6810_v3  ;;  %v6874_v8 = vpack.c.bf16 %v6614_v27, %v6610_v62  ;;  %v6474_v25 = vcvt.s32.f32 %v5962_v52  ;;  %v6026_v14 = vunpack.c.2.s8 %v5578_v21  ;;  %v6030_v26 = vunpack.c.3.s8 %v5578_v21 }
 0x63a   :  { %7270 = vmatpush.bf16.msrb.mxu2 %v6842_v63  ;;  %v6774_v36 = vpack.c.bf16 %v6414_v60, %v6410_v57  ;;  %v6478_v10 = vcvt.s32.f32 %v5966_v9  ;;  %v6090_v54 = vunpack.c.2.s8 %v5594_v24  ;;  %v6094_v15 = vunpack.c.3.s8 %v5594_v24 }
 0x63b   :  { %7283 = vmatpush.bf16.msrb.mxu3 %v6874_v8  ;;  %v6538_v44 = vcvt.s32.f32 %v6026_v14  ;;  %v6542_v20 = vcvt.s32.f32 %v6030_v26  ;;  %v5890_v28 = vunpack.c.0.s8 %v5546_v37  ;;  %v5894_v39 = vunpack.c.1.s8 %v5546_v37 }
 0x63c   :  { %7245 = vmatpush.bf16.msrb.mxu0 %v6774_v36  ;;  %v6806_v41 = vpack.c.bf16 %v6478_v10, %v6474_v25  ;;  %v6602_v45 = vcvt.s32.f32 %v6090_v54  ;;  %v6606_v11 = vcvt.s32.f32 %v6094_v15  ;;  %v5954_v23 = vunpack.c.0.s8 %v5562_v34 }
 0x63d   :  { %v6838_v2 = vpack.c.bf16 %v6542_v20, %v6538_v44  ;;  %v6402_v40 = vcvt.s32.f32 %v5890_v28  ;;  %v6406_v32 = vcvt.s32.f32 %v5894_v39  ;;  %v5958_v50 = vunpack.c.1.s8 %v5562_v34  ;;  %v7007_v3 = vpop.f32.mrf.mxu1  ;;  %v7020_v44 = vpop.f32.mrf.mxu2 }
 0x63e   :  { %7258 = vmatpush.bf16.msrb.mxu1 %v6806_v41  ;;  %v6870_v12 = vpack.c.bf16 %v6606_v11, %v6602_v45  ;;  %v6466_v13 = vcvt.s32.f32 %v5954_v23  ;;  %v6018_v6 = vunpack.c.0.s8 %v5578_v21  ;;  %v6022_v4 = vunpack.c.1.s8 %v5578_v21  ;;  %v6994_v21 = vpop.f32.mrf.mxu0  ;;  %v7033_v20 = vpop.f32.mrf.mxu3  ;;  %v5538_v11 = vld [vmem:[#allocation3 + $0x218] sm:$0xff] }
 0x63f   :  { %7271 = vmatpush.bf16.msrb.mxu2 %v6838_v2  ;;  %v6770_v55 = vpack.c.bf16 %v6406_v32, %v6402_v40  ;;  %v6470_v18 = vcvt.s32.f32 %v5958_v50  ;;  %v6082_v61 = vunpack.c.0.s8 %v5594_v24  ;;  %v6086_v16 = vunpack.c.1.s8 %v5594_v24  ;;  %v10646_v50 = vld [vmem:[#allocation3 + $0x298] sm:$0xff]  ;;  %v9294_v20 = vld [vmem:[#allocation4 + $0xec] sm:$0xf0] }
 0x640   :  { %7284 = vmatpush.bf16.msrb.mxu3 %v6870_v12  ;;  %v6530_v37 = vcvt.s32.f32 %v6018_v6  ;;  %v6534_v38 = vcvt.s32.f32 %v6022_v4  ;;  %v5882_v19 = vunpack.c.2.s8 %v5542_v31  ;;  %v5886_v7 = vunpack.c.3.s8 %v5542_v31 }
 0x641   :  { %7246 = vmatpush.bf16.msrb.mxu0 %v6770_v55  ;;  %v6802_v34 = vpack.c.bf16 %v6470_v18, %v6466_v13  ;;  %v6594_v0 = vcvt.s32.f32 %v6082_v61  ;;  %v6598_v58 = vcvt.s32.f32 %v6086_v16  ;;  %v5946_v42 = vunpack.c.2.s8 %v5558_v29  ;;  %v10648_v16 = vld [vmem:[#allocation3 + $0x318] sm:$0xff] }
 0x642   :  { %v6834_v30 = vpack.c.bf16 %v6534_v38, %v6530_v37  ;;  %v6394_v47 = vcvt.s32.f32 %v5882_v19  ;;  %v6398_v56 = vcvt.s32.f32 %v5886_v7  ;;  %v5950_v1 = vunpack.c.3.s8 %v5558_v29 }
 0x643   :  { %7259 = vmatpush.bf16.msrb.mxu1 %v6802_v34  ;;  %v6866_v62 = vpack.c.bf16 %v6598_v58, %v6594_v0  ;;  %v6458_v27 = vcvt.s32.f32 %v5946_v42  ;;  %v6010_v52 = vunpack.c.2.s8 %v5574_v48  ;;  %v6014_v24 = vunpack.c.3.s8 %v5574_v48  ;;  %v5586_v34 = vld [vmem:[#allocation3 + $0x398] sm:$0xff] }
 0x644   :  { %7272 = vmatpush.bf16.msrb.mxu2 %v6834_v30  ;;  %v6766_v63 = vpack.c.bf16 %v6398_v56, %v6394_v47  ;;  %v6462_v57 = vcvt.s32.f32 %v5950_v1  ;;  %v6074_v60 = vunpack.c.2.s8 %v5590_v49  ;;  %v6078_v9 = vunpack.c.3.s8 %v5590_v49 }
 0x645   :  { %7285 = vmatpush.bf16.msrb.mxu3 %v6866_v62  ;;  %v6522_v8 = vcvt.s32.f32 %v6010_v52  ;;  %v6526_v25 = vcvt.s32.f32 %v6014_v24  ;;  %v5874_v14 = vunpack.c.0.s8 %v5542_v31  ;;  %v5878_v26 = vunpack.c.1.s8 %v5542_v31  ;;  %v10652_v37 = vpop.f32.mrf.mxu1  ;;  %v10658_v52 = vpop.f32.mrf.mxu2 }
 0x646   :  { %7247 = vmatpush.bf16.msrb.mxu0 %v6766_v63  ;;  %v6798_v36 = vpack.c.bf16 %v6462_v57, %v6458_v27  ;;  %v6586_v10 = vcvt.s32.f32 %v6074_v60  ;;  %v6590_v54 = vcvt.s32.f32 %v6078_v9  ;;  %v5938_v15 = vunpack.c.0.s8 %v5558_v29  ;;  %v10660_v24 = vpop.f32.mrf.mxu3 }
 0x647   :  { %v6830_v28 = vpack.c.bf16 %v6526_v25, %v6522_v8  ;;  %v6386_v39 = vcvt.s32.f32 %v5874_v14  ;;  %v6390_v41 = vcvt.s32.f32 %v5878_v26  ;;  %v5942_v45 = vunpack.c.1.s8 %v5558_v29  ;;  %v10650_v29 = vpop.f32.mrf.mxu0 }
 0x648   :  { %7260 = vmatpush.bf16.msrb.mxu1 %v6798_v36  ;;  %v6862_v23 = vpack.c.bf16 %v6590_v54, %v6586_v10  ;;  %v6450_v2 = vcvt.s32.f32 %v5938_v15  ;;  %v6002_v40 = vunpack.c.0.s8 %v5574_v48  ;;  %v6006_v32 = vunpack.c.1.s8 %v5574_v48  ;;  %v8858_v36 = vld [vmem:[#allocation4 + $0xe0] sm:$0xf] }
 0x649   :  { %7273 = vmatpush.bf16.msrb.mxu2 %v6830_v28  ;;  %v6762_v31 = vpack.c.bf16 %v6390_v41, %v6386_v39  ;;  %v6454_v12 = vcvt.s32.f32 %v5942_v45  ;;  %v6066_v13 = vunpack.c.0.s8 %v5590_v49  ;;  %v6070_v6 = vunpack.c.1.s8 %v5590_v49  ;;  %v9292_v28 = vld [vmem:[#allocation4 + $0xe4] sm:$0xf]  ;;  %v8860_v39 = vld [vmem:[#allocation4 + $0xf0] sm:$0xf0] }
 0x64a   :  { %7286 = vmatpush.bf16.msrb.mxu3 %v6862_v23  ;;  %v6514_v4 = vcvt.s32.f32 %v6002_v40  ;;  %v6518_v55 = vcvt.s32.f32 %v6006_v32  ;;  %v5866_v18 = vunpack.c.2.s8 %v5538_v11  ;;  %v5870_v61 = vunpack.c.3.s8 %v5538_v11  ;;  %v9295_v40 = vld [vmem:[#allocation4 + $0xf4] sm:$0xf0]  ;;  %v9293_v32 = vld [vmem:[#allocation4 + $0xec] sm:$0xf] }
 0x64b   :  { %7248 = vmatpush.bf16.msrb.mxu0 %v6762_v31  ;;  %v6794_v38 = vpack.c.bf16 %v6454_v12, %v6450_v2  ;;  %v6578_v19 = vcvt.s32.f32 %v6066_v13  ;;  %v6582_v7 = vcvt.s32.f32 %v6070_v6  ;;  %v5930_v48 = vunpack.c.2.s8 %v10646_v50  ;;  %v8866_v2 = vld [vmem:[#allocation4 + $0xe8] sm:$0xf] }
 0x64c   :  { %v6826_v0 = vpack.c.bf16 %v6518_v55, %v6514_v4  ;;  %v6378_v58 = vcvt.s32.f32 %v5866_v18  ;;  %v6382_v42 = vcvt.s32.f32 %v5870_v61  ;;  %v5934_v49 = vunpack.c.3.s8 %v10646_v50  ;;  %v8868_v55 = vld [vmem:[#allocation4 + $0xf8] sm:$0xf0]  ;;  %v8842_v18 = vld [vmem:[#allocation4 + $0xc0] sm:$0xf]  ;;  %v9290_v61 = vld [vmem:[#allocation4 + $0xcc] sm:$0xf0] }
 0x64d   :  { %7261 = vmatpush.bf16.msrb.mxu1 %v6794_v38  ;;  %v6858_v30 = vpack.c.bf16 %v6582_v7, %v6578_v19  ;;  %v6442_v47 = vcvt.s32.f32 %v5930_v48  ;;  %v5994_v56 = vunpack.c.2.s8 %v10648_v16  ;;  %v5998_v1 = vunpack.c.3.s8 %v10648_v16  ;;  %v7059_v12 = vpop.f32.mrf.mxu1 }
 0x64e   :  { %7274 = vmatpush.bf16.msrb.mxu2 %v6826_v0  ;;  %v6758_v21 = vpack.c.bf16 %v6382_v42, %v6378_v58  ;;  %v6446_v3 = vcvt.s32.f32 %v5934_v49  ;;  %v6058_v62 = vunpack.c.2.s8 %v5586_v34  ;;  %v6062_v27 = vunpack.c.3.s8 %v5586_v34  ;;  %v9288_v49 = vld [vmem:[#allocation4 + $0xc4] sm:$0xf]  ;;  %v9281_v12 = vld [vmem:[#allocation4 + $0x8c] sm:$0xf] }
 0x64f   :  { %7287 = vmatpush.bf16.msrb.mxu3 %v6858_v30  ;;  %v6506_v63 = vcvt.s32.f32 %v5994_v56  ;;  %v6510_v57 = vcvt.s32.f32 %v5998_v1  ;;  %v5858_v60 = vunpack.c.0.s8 %v5538_v11  ;;  %v5862_v9 = vunpack.c.1.s8 %v5538_v11  ;;  %v7046_v31 = vpop.f32.mrf.mxu0  ;;  %v8844_v30 = vld [vmem:[#allocation4 + $0xd0] sm:$0xf0] }
 0x650   :  { %7249 = vmatpush.bf16.msrb.mxu0 %v6758_v21  ;;  %v6790_v8 = vpack.c.bf16 %v6446_v3, %v6442_v47  ;;  %v6570_v25 = vcvt.s32.f32 %v6058_v62  ;;  %v6574_v14 = vcvt.s32.f32 %v6062_v27  ;;  %v5922_v26 = vunpack.c.0.s8 %v10646_v50  ;;  %v8850_v21 = vld [vmem:[#allocation4 + $0xc8] sm:$0xf]  ;;  %v9291_v3 = vld [vmem:[#allocation4 + $0xd4] sm:$0xf0]  ;;  %v9289_v62 = vld [vmem:[#allocation4 + $0xcc] sm:$0xf]  ;;  %v7072_v27 = vpop.f32.mrf.mxu2 }
 0x651   :  { %v6822_v10 = vpack.c.bf16 %v6510_v57, %v6506_v63  ;;  %v6370_v54 = vcvt.s32.f32 %v5858_v60  ;;  %v6374_v15 = vcvt.s32.f32 %v5862_v9  ;;  %v5926_v44 = vunpack.c.1.s8 %v10646_v50  ;;  %v7085_v63 = vpop.f32.mrf.mxu3  ;;  %v8852_v60 = vld [vmem:[#allocation4 + $0xd8] sm:$0xf0]  ;;  %v8826_v9 = vld [vmem:[#allocation4 + $0xa0] sm:$0xf]  ;;  %v9283_v31 = vld [vmem:[#allocation4 + $0x94] sm:$0xf0] }
 0x652   :  { %7262 = vmatpush.bf16.msrb.mxu1 %v6790_v8  ;;  %v6854_v41 = vpack.c.bf16 %v6574_v14, %v6570_v25  ;;  %v6434_v45 = vcvt.s32.f32 %v5922_v26  ;;  %v5986_v11 = vunpack.c.0.s8 %v10648_v16  ;;  %v5990_v23 = vunpack.c.1.s8 %v10648_v16  ;;  %v9286_v8 = vld [vmem:[#allocation4 + $0xac] sm:$0xf0]  ;;  %v9275_v63 = vld [vmem:[#allocation4 + $0x54] sm:$0xf0] }
 0x653   :  { %7275 = vmatpush.bf16.msrb.mxu2 %v6822_v10  ;;  %v6754_v13 = vpack.c.bf16 %v6374_v15, %v6370_v54  ;;  %v6438_v6 = vcvt.s32.f32 %v5926_v44  ;;  %v6050_v4 = vunpack.c.0.s8 %v5586_v34  ;;  %v6054_v50 = vunpack.c.1.s8 %v5586_v34  ;;  %v8834_v15 = vld [vmem:[#allocation4 + $0xa8] sm:$0xf]  ;;  %v9287_v44 = vld [vmem:[#allocation4 + $0xb4] sm:$0xf0] }
 0x654   :  { %7288 = vmatpush.bf16.msrb.mxu3 %v6854_v41  ;;  %v6498_v38 = vcvt.s32.f32 %v5986_v11  ;;  %v6502_v19 = vcvt.s32.f32 %v5990_v23  ;;  %v8859_v7 = vor.u32 %v9294_v20, %v8858_v36  ;;  %v8863_v48 = vor.u32 %v9292_v28, %v8860_v39  ;;  %v9285_v20 = vld [vmem:[#allocation4 + $0xac] sm:$0xf]  ;;  %v8836_v28 = vld [vmem:[#allocation4 + $0xb8] sm:$0xf0]  ;;  %v9282_v39 = vld [vmem:[#allocation4 + $0x8c] sm:$0xf0] }
 0x655   :  { %7250 = vmatpush.bf16.msrb.mxu0 %v6754_v13  ;;  %v6786_v16 = vpack.c.bf16 %v6438_v6, %v6434_v45  ;;  %v6562_v0 = vcvt.s32.f32 %v6050_v4  ;;  %v6566_v58 = vcvt.s32.f32 %v6054_v50  ;;  %v8867_v42 = vor.u32 %v9295_v40, %v8866_v2  ;;  %v9280_v23 = vld [vmem:[#allocation4 + $0x84] sm:$0xf]  ;;  %v8812_v2 = vld [vmem:[#allocation4 + $0x90] sm:$0xf0]  ;;  %v8820_v13 = vld [vmem:[#allocation4 + $0x98] sm:$0xf0] }
 0x656   :  { %v6818_v47 = vpack.c.bf16 %v6502_v19, %v6498_v38  ;;  %v8871_v56 = vor.u32 %v9293_v32, %v8868_v55  ;;  %v7006_v34 = vadd.f32 %v10640_v51, %v10638_v35  ;;  %v8843_v1 = vor.u32 %v9290_v61, %v8842_v18  ;;  %v9284_v35 = vld [vmem:[#allocation4 + $0xa4] sm:$0xf]  ;;  %v8828_v51 = vld [vmem:[#allocation4 + $0xb0] sm:$0xf0]  ;;  %v8818_v32 = vld [vmem:[#allocation4 + $0x88] sm:$0xf] }
 0x657   :  { %7263 = vmatpush.bf16.msrb.mxu1 %v6786_v16  ;;  %v6850_v57 = vpack.c.bf16 %v6566_v58, %v6562_v0  ;;  %v8847_v25 = vor.u32 %v9288_v49, %v8844_v30  ;;  %v8851_v26 = vor.u32 %v9291_v3, %v8850_v21  ;;  %v8855_v36 = vor.u32 %v9289_v62, %v8852_v60  ;;  %v8794_v6 = vld [vmem:[#allocation4 + $0x60] sm:$0xf]  ;;  %v9276_v55 = vld [vmem:[#allocation4 + $0x64] sm:$0xf]  ;;  %v8796_v18 = vld [vmem:[#allocation4 + $0x70] sm:$0xf0] }
 0x658   :  { %7276 = vmatpush.bf16.msrb.mxu2 %v6818_v47  ;;  %v7019_v14 = vadd.f32 %v10642_v5, %v7006_v34  ;;  %v8827_v54 = vor.u32 %v9286_v8, %v8826_v9  ;;  %7251 = vmatmul.bf16.vlgmr.msrb.gmra.mxu0 %v10563_v33  ;;  %v8810_v5 = vld [vmem:[#allocation4 + $0x80] sm:$0xf]  ;;  %v8831_v41 = vor.u32 %v9284_v35, %v8828_v51  ;;  %v9277_v16 = vld [vmem:[#allocation4 + $0x6c] sm:$0xf]  ;;  %v8804_v0 = vld [vmem:[#allocation4 + $0x78] sm:$0xf0] }
 0x659   :  { %7501 = vmatpush.bf16.msra.mxu0 %v8859_v7  ;;  %7289 = vmatpush.bf16.msrb.mxu3 %v6850_v57  ;;  %v8811_v33 = vor.u32 %v9282_v39, %v8810_v5  ;;  %v8815_v4 = vor.u32 %v9280_v23, %v8812_v2  ;;  %v8823_v38 = vor.u32 %v9281_v12, %v8820_v13  ;;  %v8802_v7 = vld [vmem:[#allocation4 + $0x68] sm:$0xf]  ;;  %v8778_v58 = vld [vmem:[#allocation4 + $0x40] sm:$0xf]  ;;  %v8780_v34 = vld [vmem:[#allocation4 + $0x50] sm:$0xf0] }
 0x65a   :  { %v7032_v10 = vadd.f32 %v10644_v43, %v7019_v14  ;;  %v8835_v43 = vor.u32 %v9287_v44, %v8834_v15  ;;  %7264 = vmatmul.bf16.vlgmr.msrb.gmra.mxu1 %v10578_v22  ;;  %v8819_v22 = vor.u32 %v9283_v31, %v8818_v32  ;;  %v8807_v62 = vor.u32 %v9277_v16, %v8804_v0  ;;  %v9273_v57 = vld [vmem:[#allocation4 + $0x4c] sm:$0xf]  ;;  %v8788_v60 = vld [vmem:[#allocation4 + $0x58] sm:$0xf0]  ;;  %v8762_v9 = vld [vmem:[#allocation4 + $0x20] sm:$0xf] }
 0x65b   :  { %7514 = vmatpush.bf16.msra.mxu1 %v8863_v48  ;;  %7277 = vmatmul.bf16.vlgmr.msrb.gmra.mxu2 %v10559_v17  ;;  %v8839_v17 = vor.u32 %v9285_v20, %v8836_v28  ;;  %v9279_v48 = vld [vmem:[#allocation4 + $0x74] sm:$0xf0]  ;;  %v9270_v8 = vld [vmem:[#allocation4 + $0x2c] sm:$0xf0]  ;;  %v9268_v35 = vld [vmem:[#allocation4 + $0x24] sm:$0xf] }
 0x65c   :  { %7527 = vmatpush.bf16.msra.mxu2 %v8867_v42  ;;  %7290 = vmatmul.bf16.vlgmr.msrb.gmra.mxu3 %v10570_v53  ;;  %v7045_v45 = vadd.f32 %v10650_v29, %v7032_v10  ;;  %v7096_v11 = vpop.f32.mrf.mxu0  ;;  %v9278_v29 = vld [vmem:[#allocation4 + $0x6c] sm:$0xf0]  ;;  %v8803_v47 = vor.u32 %v9279_v48, %v8802_v7  ;;  %v8764_v51 = vld [vmem:[#allocation4 + $0x30] sm:$0xf0]  ;;  %v8763_v10 = vor.u32 %v9270_v8, %v8762_v9  ;;  %v9271_v15 = vld [vmem:[#allocation4 + $0x34] sm:$0xf0] }
 0x65d   :  { %7540 = vmatpush.bf16.msra.mxu3 %v8871_v56  ;;  %7502 = vmatpush.bf16.msra.mxu0 %v8843_v1  ;;  %v7109_v40 = vpop.f32.mrf.mxu1  ;;  %v8795_v19 = vor.u32 %v9278_v29, %v8794_v6  ;;  %v9274_v42 = vld [vmem:[#allocation4 + $0x4c] sm:$0xf0]  ;;  %v9272_v56 = vld [vmem:[#allocation4 + $0x44] sm:$0xf]  ;;  %v9269_v44 = vld [vmem:[#allocation4 + $0x2c] sm:$0xf]  ;;  %v8767_v39 = vor.u32 %v9268_v35, %v8764_v51 }
 0x65e   :  { %v7058_v53 = vadd.f32 %v10652_v37, %v7045_v45  ;;  %v7110_v61 = vadd.f32 %v7109_v40, %v7096_v11  ;;  %v8779_v27 = vor.u32 %v9274_v42, %v8778_v58  ;;  %v8783_v14 = vor.u32 %v9272_v56, %v8780_v34  ;;  %v8772_v20 = vld [vmem:[#allocation4 + $0x38] sm:$0xf0]  ;;  %v8746_v28 = vld [vmem:[#allocation4] sm:$0xf]  ;;  %v9266_v5 = vld [vmem:[#allocation4 + $0xc] sm:$0xf0] }
 0x65f   :  { %7515 = vmatpush.bf16.msra.mxu1 %v8847_v25  ;;  %v9264_v11 = vld [vmem:[#allocation4 + $0x4] sm:$0xf]  ;;  %v8775_v2 = vor.u32 %v9269_v44, %v8772_v20  ;;  %v8747_v40 = vor.u32 %v9266_v5, %v8746_v28  ;;  %v9265_v32 = vld [vmem:[#allocation4 + $0xc] sm:$0xf]  ;;  %v8756_v31 = vld [vmem:[#allocation4 + $0x18] sm:$0xf0] }
 0x660   :  { %7528 = vmatpush.bf16.msra.mxu2 %v8851_v26  ;;  %v7071_v50 = vadd.f32 %v10658_v52, %v7058_v53  ;;  %v8799_v52 = vor.u32 %v9276_v55, %v8796_v18  ;;  %v8759_v13 = vor.u32 %v9265_v32, %v8756_v31 }
 0x661   :  { %7541 = vmatpush.bf16.msra.mxu3 %v8855_v36  ;;  %7503 = vmatpush.bf16.msra.mxu0 %v8827_v54  ;;  %v8791_v36 = vor.u32 %v9273_v57, %v8788_v60  ;;  %v8770_v54 = vld [vmem:[#allocation4 + $0x28] sm:$0xf]  ;;  %v7295_v60 = vld [vmem:[#allocation18] sm:$0xf] }
 0x662   :  { %v10678_v37 = vadd.f32 %v10660_v24, %v7071_v50  ;;  %v8786_v24 = vld [vmem:[#allocation4 + $0x48] sm:$0xf]  ;;  %v8771_v45 = vor.u32 %v9271_v15, %v8770_v54  ;;  %v7297_v8 = vperm.slane %v7295_v60, 0 }
 0x663   :  { %7516 = vmatpush.bf16.msra.mxu1 %v8831_v41  ;;  %v8787_v26 = vor.u32 %v9275_v63, %v8786_v24 }
 0x664   :  { %7529 = vmatpush.bf16.msra.mxu2 %v8835_v43  ;;  %v7122_v49 = vpop.f32.mrf.mxu2  ;;  %v7098_v30 = vpop.f32.mrf.mxu0  ;;  %v8748_v43 = vld [vmem:[#allocation4 + $0x10] sm:$0xf0]  ;;  %v7305_v35 = vmul.f32 %v7297_v8, %v10632_v59 }
 0x665   :  { %7542 = vmatpush.bf16.msra.mxu3 %v8839_v17  ;;  %7504 = vmatpush.bf16.msra.mxu0 %v8811_v33  ;;  %v7123_v1 = vadd.f32 %v7122_v49, %v7110_v61  ;;  %v7135_v21 = vpop.f32.mrf.mxu3  ;;  %v7111_v3 = vpop.f32.mrf.mxu1  ;;  %v8754_v17 = vld [vmem:[#allocation4 + $0x8] sm:$0xf]  ;;  %v9267_v33 = vld [vmem:[#allocation4 + $0x14] sm:$0xf0]  ;;  %v8751_v12 = vor.u32 %v9264_v11, %v8748_v43  ;;  %v7300_v43 = vperm.slane %v7295_v60, 3 }
 0x666   :  { %v8755_v53 = vor.u32 %v9267_v33, %v8754_v17 }
 0x667   :  { %7517 = vmatpush.bf16.msra.mxu1 %v8815_v4  ;;  %v7136_v25 = vadd.f32 %v7135_v21, %v7123_v1 }
 0x668   :  { %7530 = vmatpush.bf16.msra.mxu2 %v8819_v22 }
 0x669   :  { %7543 = vmatpush.bf16.msra.mxu3 %v8823_v38  ;;  %7505 = vmatpush.bf16.msra.mxu0 %v8795_v19 }
 0x66b   :  { %7518 = vmatpush.bf16.msra.mxu1 %v8799_v52 }
 0x66c   :  { %7531 = vmatpush.bf16.msra.mxu2 %v8803_v47  ;;  %v7124_v41 = vpop.f32.mrf.mxu2 }
 0x66d   :  { %7544 = vmatpush.bf16.msra.mxu3 %v8807_v62  ;;  %7506 = vmatpush.bf16.msra.mxu0 %v8779_v27  ;;  %v7137_v23 = vpop.f32.mrf.mxu3 }
 0x66f   :  { %7519 = vmatpush.bf16.msra.mxu1 %v8783_v14  ;;  %v7298_v14 = vperm.slane %v7295_v60, 1 }
 0x670   :  { %7532 = vmatpush.bf16.msra.mxu2 %v8787_v26 }
 0x671   :  { %7545 = vmatpush.bf16.msra.mxu3 %v8791_v36  ;;  %7507 = vmatpush.bf16.msra.mxu0 %v8763_v10  ;;  %v7306_v54 = vmul.f32 %v7298_v14, %v10678_v37 }
 0x673   :  { %7520 = vmatpush.bf16.msra.mxu1 %v8767_v39  ;;  %v7299_v39 = vperm.slane %v7295_v60, 2 }
 0x674   :  { %7533 = vmatpush.bf16.msra.mxu2 %v8771_v45 }
 0x675   :  { %7546 = vmatpush.bf16.msra.mxu3 %v8775_v2  ;;  %7508 = vmatpush.bf16.msra.mxu0 %v8747_v40 }
 0x677   :  { %7521 = vmatpush.bf16.msra.mxu1 %v8751_v12 }
 0x678   :  { %7534 = vmatpush.bf16.msra.mxu2 %v8755_v53  ;;  %7509 = vmatmul.bf16.vlgmr.msra.gmra.mxu0 %v10004_v46 }
 0x679   :  { %7547 = vmatpush.bf16.msra.mxu3 %v8759_v13 }
 0x67a   :  { %7522 = vmatmul.bf16.vlgmr.msra.gmra.mxu1 %v10004_v46 }
 0x67b   :  { %7535 = vmatmul.bf16.vlgmr.msra.gmra.mxu2 %v10004_v46 }
 0x67c   :  { %7548 = vmatmul.bf16.vlgmr.msra.gmra.mxu3 %v10004_v46 }
 0x684   :  { %v7148_v6 = vpop.f32.mrf.mxu0 }
 0x685   :  { %v7149_v29 = vadd.f32 %v7148_v6, %v7136_v25  ;;  %v7161_v4 = vpop.f32.mrf.mxu1  ;;  %v7557_v25 = vld [vmem:[%s10756_s13] sm:$0xf] }
 0x686   :  { %v7559_v51 = vperm.slane %v7557_v25, 0  ;;  %v7560_v15 = vperm.slane %v7557_v25, 1  ;;  %v7561_v2 = vperm.slane %v7557_v25, 2  ;;  %v7562_v12 = vperm.slane %v7557_v25, 3 }
 0x687   :  { %v7162_v50 = vadd.f32 %v7161_v4, %v7149_v29 }
 0x68c   :  { %v7174_v22 = vpop.f32.mrf.mxu2  ;;  %v7150_v55 = vpop.f32.mrf.mxu0 }
 0x68d   :  { %v7175_v18 = vadd.f32 %v7174_v22, %v7162_v50  ;;  %v7187_v61 = vpop.f32.mrf.mxu3  ;;  %v7163_v38 = vpop.f32.mrf.mxu1 }
 0x68f   :  { %v7188_v19 = vadd.f32 %v7187_v61, %v7175_v18 }
 0x691   :  { %v7307_v23 = vmul.f32 %v7299_v39, %v7188_v19 }
 0x694   :  { %v7176_v7 = vpop.f32.mrf.mxu2 }
 0x695   :  { %v7189_v48 = vpop.f32.mrf.mxu3 }
 0x6ad   :  { %v7200_v16 = vpop.f32.mrf.mxu0 }
 0x6af   :  { %v7213_v0 = vpop.f32.mrf.mxu1 }
 0x6b0   :  { %v7214_v58 = vadd.f32 %v7213_v0, %v7200_v16 }
 0x6b5   :  { %v7202_v42 = vpop.f32.mrf.mxu0 }
 0x6b6   :  { %v7226_v52 = vpop.f32.mrf.mxu2 }
 0x6b7   :  { %v7239_v49 = vpop.f32.mrf.mxu3  ;;  %v7215_v30 = vpop.f32.mrf.mxu1  ;;  %v7227_v27 = vadd.f32 %v7226_v52, %v7214_v58 }
 0x6b9   :  { %v7240_v57 = vadd.f32 %v7239_v49, %v7227_v27 }
 0x6be   :  { %v7228_v46 = vpop.f32.mrf.mxu2 }
 0x6bf   :  { %v7241_v47 = vpop.f32.mrf.mxu3 }
 0x6d5   :  { %v7252_v56 = vpop.f32.mrf.mxu0 }
 0x6d6   :  { %v7253_v9 = vadd.f32 %v7252_v56, %v7240_v57 }
 0x6d7   :  { %v7265_v34 = vpop.f32.mrf.mxu1 }
 0x6d8   :  { %v7266_v26 = vadd.f32 %v7265_v34, %v7253_v9 }
 0x6dd   :  { %v7254_v3 = vpop.f32.mrf.mxu0 }
 0x6de   :  { %v7278_v1 = vpop.f32.mrf.mxu2 }
 0x6df   :  { %v7291_v21 = vpop.f32.mrf.mxu3  ;;  %v7267_v62 = vpop.f32.mrf.mxu1  ;;  %v7279_v44 = vadd.f32 %v7278_v1, %v7266_v26 }
 0x6e1   :  { %v7292_v11 = vadd.f32 %v7291_v21, %v7279_v44 }
 0x6e3   :  { %v7308_v33 = vmul.f32 %v7300_v43, %v7292_v11 }
 0x6e6   :  { %v7280_v24 = vpop.f32.mrf.mxu2 }
 0x6e7   :  { %v7293_v63 = vpop.f32.mrf.mxu3 }
 0x6f5   :  { %v7510_v36 = vpop.f32.mrf.mxu0 }
 0x6f6   :  { %v7553_v10 = vadd.f32 %v7510_v36, %v7305_v35 }
 0x6f7   :  { %v7523_v20 = vpop.f32.mrf.mxu1 }
 0x6f8   :  { %v10689_v28 = vadd.f32 %v7559_v51, %v7553_v10  ;;  %v7554_v5 = vadd.f32 %v7523_v20, %v7306_v54 }
 0x6fa   :  { %v8872_v41 = vmul.f32 -1.442695, %v10689_v28  ;;  %v10692_v45 = vadd.f32 %v7560_v15, %v7554_v5 }
 0x6fc   :  { %9419 = vpow2.f32 %v8872_v41  ;;  %v8873_v59 = vmul.f32 -1.442695, %v10692_v45 }
 0x6fd   :  { %v7512_v40 = vpop.f32.mrf.mxu0 }
 0x6fe   :  { %9421 = vpow2.f32 %v8873_v59  ;;  %v7536_v37 = vpop.f32.mrf.mxu2 }
 0x6ff   :  { %v7555_v17 = vadd.f32 %v7536_v37, %v7307_v23  ;;  %v7525_v32 = vpop.f32.mrf.mxu1  ;;  %v7549_v31 = vpop.f32.mrf.mxu3 }
 0x700   :  { %v7556_v13 = vadd.f32 %v7549_v31, %v7308_v33 }
 0x701   :  { %v10695_v53 = vadd.f32 %v7561_v2, %v7555_v17 }
 0x702   :  { %v9420_v6 = vpop.eup %9419  ;;  %v10698_v50 = vadd.f32 %v7562_v12, %v7556_v13 }
 0x703   :  { %v7583_v29 = vadd.f32 1.0, %v9420_v6  ;;  %v8874_v4 = vmul.f32 -1.442695, %v10695_v53 }
 0x704   :  { %v9422_v22 = vpop.eup %9421  ;;  %v8875_v18 = vmul.f32 -1.442695, %v10698_v50 }
 0x705   :  { %9423 = vrcp.f32 %v7583_v29  ;;  %v7584_v55 = vadd.f32 1.0, %v9422_v22  ;;  %v7598_v52 = vand.u32 2147483648, %v7583_v29  ;;  %v7596_v46 = vand.u32 2147483647, %v7583_v29 }
 0x706   :  { %9425 = vpow2.f32 %v8874_v4  ;;  %v7538_v61 = vpop.f32.mrf.mxu2  ;;  %vm7592_vm13 = vweird.f32 %v7583_v29 }
 0x707   :  { %9427 = vrcp.f32 %v7584_v55  ;;  %v7551_v38 = vpop.f32.mrf.mxu3  ;;  %v7613_v1 = vand.u32 2147483648, %v7584_v55  ;;  %v7599_v21 = vor.u32 1.1754944e-38, %v7598_v52  ;;  %v7611_v62 = vand.u32 2147483647, %v7584_v55 }
 0x708   :  { %9429 = vpow2.f32 %v8875_v18  ;;  %vm7597_vm0 = vcmp.eq.f32.partialorder %v7596_v46, 8.507059e+37  ;;  %vm7607_vm1 = vweird.f32 %v7584_v55 }
 0x709   :  { %v7614_v9 = vor.u32 1.1754944e-38, %v7613_v1  ;;  %vm7612_vm3 = vcmp.eq.f32.partialorder %v7611_v62, 8.507059e+37 }
 0x70b   :  { %v9424_v19 = vpop.eup %9423 }
 0x70c   :  { %v9426_v7 = vpop.eup %9425  ;;  %v7588_v48 = vmul.f32 %v9424_v19, %v7583_v29  ;;  %vm7593_vm12 = vweird.f32 %v9424_v19 }
 0x70d   :  { %v7585_v16 = vadd.f32 1.0, %v9426_v7  ;;  %v9428_v0 = vpop.eup %9427  ;;  %vm7594_vm14 = vmor %vm7592_vm13, %vm7593_vm12 }
 0x70e   :  { %v7589_v58 = vsub.f32 1.0, %v7588_v48  ;;  %v9430_v42 = vpop.eup %9429  ;;  %v7603_v49 = vmul.f32 %v9428_v0, %v7584_v55  ;;  %vm7608_vm15 = vweird.f32 %v9428_v0 }
 0x70f   :  { %9431 = vrcp.f32 %v7585_v16  ;;  %v7586_v47 = vadd.f32 1.0, %v9430_v42  ;;  %vm7609_vm2 = vmor %vm7607_vm1, %vm7608_vm15  ;;  %v7628_v36 = vand.u32 2147483648, %v7585_v16  ;;  %v7626_v15 = vand.u32 2147483647, %v7585_v16 }
 0x710   :  { %v7590_v30 = vmul.f32 %v9424_v19, %v7589_v58  ;;  %v7604_v56 = vsub.f32 1.0, %v7603_v49  ;;  %vm7622_vm5 = vweird.f32 %v7585_v16 }
 0x711   :  { %9433 = vrcp.f32 %v7586_v47  ;;  %v7629_v5 = vor.u32 1.1754944e-38, %v7628_v36  ;;  %v7641_v41 = vand.u32 2147483647, %v7586_v47  ;;  %vm7627_vm8 = vcmp.eq.f32.partialorder %v7626_v15, 8.507059e+37 }
 0x712   :  { %v7591_v34 = vadd.f32 %v9424_v19, %v7590_v30  ;;  %v7605_v3 = vmul.f32 %v9428_v0, %v7604_v56  ;;  %vm7637_vm9 = vweird.f32 %v7586_v47 }
 0x713   :  { %vm7642_vm11 = vcmp.eq.f32.partialorder %v7641_v41, 8.507059e+37 }
 0x714   :  { %v7595_v27 = vsel %vm7594_vm14, %v9424_v19, %v7591_v34  ;;  %v7606_v57 = vadd.f32 %v9428_v0, %v7605_v3 }
 0x715   :  { %v9432_v24 = vpop.eup %9431  ;;  %v7600_v63 = vsel %vm7597_vm0, %v7599_v21, %v7595_v27 }
 0x716   :  { %v10702_v60 = vmul.f32 %v7600_v63, %v10689_v28  ;;  %v7618_v8 = vmul.f32 %v9432_v24, %v7585_v16  ;;  %v7610_v25 = vsel %vm7609_vm2, %v9428_v0, %v7606_v57  ;;  %vm7623_vm4 = vweird.f32 %v9432_v24 }
 0x717   :  { %v9434_v14 = vpop.eup %9433  ;;  %v7615_v26 = vsel %vm7612_vm3, %v7614_v9, %v7610_v25  ;;  %v7643_v28 = vand.u32 2147483648, %v7586_v47  ;;  %vm7624_vm6 = vmor %vm7622_vm5, %vm7623_vm4 }
 0x718   :  { %v7619_v35 = vsub.f32 1.0, %v7618_v8  ;;  %v10705_v51 = vmul.f32 %v7615_v26, %v10692_v45  ;;  %v7633_v10 = vmul.f32 %v9434_v14, %v7586_v47  ;;  %vm7638_vm7 = vweird.f32 %v9434_v14 }
 0x719   :  { %vm7639_vm10 = vmor %vm7637_vm9, %vm7638_vm7  ;;  %v7644_v23 = vor.u32 1.1754944e-38, %v7643_v28 }
 0x71a   :  { %v7620_v54 = vmul.f32 %v9432_v24, %v7619_v35  ;;  %v7634_v44 = vsub.f32 1.0, %v7633_v10 }
 0x71c   :  { %v7621_v20 = vadd.f32 %v9432_v24, %v7620_v54  ;;  %v7635_v39 = vmul.f32 %v9434_v14, %v7634_v44 }
 0x71e   :  { %v7625_v11 = vsel %vm7624_vm6, %v9432_v24, %v7621_v20  ;;  %v7636_v59 = vadd.f32 %v9434_v14, %v7635_v39 }
 0x71f   :  { %v7630_v43 = vsel %vm7627_vm8, %v7629_v5, %v7625_v11 }
 0x720   :  { %v10708_v45 = vmul.f32 %v7630_v43, %v10695_v53  ;;  %v7640_v2 = vsel %vm7639_vm10, %v9434_v14, %v7636_v59 }
 0x721   :  { %v7645_v40 = vsel %vm7642_vm11, %v7644_v23, %v7640_v2 }
 0x722   :  { %v10711_v37 = vmul.f32 %v7645_v40, %v10698_v50 }
 0x723   :  { %9727 = dma.done.wait [#allocation6 + $0x3], 8192 }
 0x724   :  { %9728 = vsyncadd [#allocation6 + $0x3], 4294959104  ;;  %v8934_v17 = vld [vmem:[#allocation5 + $0x70] sm:$0xf]  ;;  %v9311_v33 = vld [vmem:[#allocation5 + $0x74] sm:$0xf0] }
 0x725   :  { %v8998_v32 = vld [vmem:[#allocation5 + $0xf0] sm:$0xf]  ;;  %v8935_v31 = vor.u32 %v9311_v33, %v8934_v17  ;;  %v9327_v12 = vld [vmem:[#allocation5 + $0xf4] sm:$0xf0]  ;;  %v8926_v55 = vld [vmem:[#allocation5 + $0x60] sm:$0xf] }
 0x726   :  { %v9062_v13 = vld [vmem:[#allocation5 + $0x170] sm:$0xf]  ;;  %v9343_v6 = vld [vmem:[#allocation5 + $0x174] sm:$0xf0]  ;;  %v8999_v29 = vor.u32 %v9327_v12, %v8998_v32  ;;  %v9309_v61 = vld [vmem:[#allocation5 + $0x64] sm:$0xf0] }
 0x727   :  { %v9063_v53 = vor.u32 %v9343_v6, %v9062_v13  ;;  %v9126_v4 = vld [vmem:[#allocation5 + $0x1f0] sm:$0xf]  ;;  %v9359_v22 = vld [vmem:[#allocation5 + $0x1f4] sm:$0xf0]  ;;  %8049 = vmatpush.bf16.msrb.mxu0 %v8935_v31  ;;  %v8990_v38 = vld [vmem:[#allocation5 + $0xe0] sm:$0xf]  ;;  %v8927_v19 = vor.u32 %v9309_v61, %v8926_v55 }
 0x728   :  { %v9127_v18 = vor.u32 %v9359_v22, %v9126_v4  ;;  %v9325_v50 = vld [vmem:[#allocation5 + $0xe4] sm:$0xf0]  ;;  %8062 = vmatpush.bf16.msrb.mxu1 %v8999_v29  ;;  %v9054_v48 = vld [vmem:[#allocation5 + $0x160] sm:$0xf]  ;;  %v8918_v52 = vld [vmem:[#allocation5 + $0x50] sm:$0xf] }
 0x729   :  { %8075 = vmatpush.bf16.msrb.mxu2 %v9063_v53  ;;  %v8991_v7 = vor.u32 %v9325_v50, %v8990_v38  ;;  %v9341_v16 = vld [vmem:[#allocation5 + $0x164] sm:$0xf0]  ;;  %v9118_v0 = vld [vmem:[#allocation5 + $0x1e0] sm:$0xf]  ;;  %v9307_v49 = vld [vmem:[#allocation5 + $0x54] sm:$0xf0] }
 0x72a   :  { %8088 = vmatpush.bf16.msrb.mxu3 %v9127_v18  ;;  %v9055_v58 = vor.u32 %v9341_v16, %v9054_v48  ;;  %v9357_v42 = vld [vmem:[#allocation5 + $0x1e4] sm:$0xf0]  ;;  %v8982_v46 = vld [vmem:[#allocation5 + $0xd0] sm:$0xf]  ;;  %v9323_v47 = vld [vmem:[#allocation5 + $0xd4] sm:$0xf0]  ;;  %v8919_v34 = vor.u32 %v9307_v49, %v8918_v52 }
 0x72b   :  { %v9119_v30 = vor.u32 %v9357_v42, %v9118_v0  ;;  %v9046_v56 = vld [vmem:[#allocation5 + $0x150] sm:$0xf]  ;;  %8050 = vmatpush.bf16.msrb.mxu0 %v8927_v19  ;;  %v9339_v1 = vld [vmem:[#allocation5 + $0x154] sm:$0xf0]  ;;  %v8983_v62 = vor.u32 %v9323_v47, %v8982_v46  ;;  %v8910_v24 = vld [vmem:[#allocation5 + $0x40] sm:$0xf] }
 0x72c   :  { %v9110_v21 = vld [vmem:[#allocation5 + $0x1d0] sm:$0xf]  ;;  %v9355_v3 = vld [vmem:[#allocation5 + $0x1d4] sm:$0xf0]  ;;  %8063 = vmatpush.bf16.msrb.mxu1 %v8991_v7  ;;  %v9047_v27 = vor.u32 %v9339_v1, %v9046_v56  ;;  %v9305_v63 = vld [vmem:[#allocation5 + $0x44] sm:$0xf0] }
 0x72d   :  { %8076 = vmatpush.bf16.msrb.mxu2 %v9055_v58  ;;  %v8974_v57 = vld [vmem:[#allocation5 + $0xc0] sm:$0xf]  ;;  %v9111_v9 = vor.u32 %v9355_v3, %v9110_v21  ;;  %v9321_v8 = vld [vmem:[#allocation5 + $0xc4] sm:$0xf0]  ;;  %v8911_v36 = vor.u32 %v9305_v63, %v8910_v24  ;;  %v8902_v15 = vld [vmem:[#allocation5 + $0x30] sm:$0xf] }
 0x72e   :  { %8089 = vmatpush.bf16.msrb.mxu3 %v9119_v30  ;;  %v9038_v25 = vld [vmem:[#allocation5 + $0x140] sm:$0xf]  ;;  %v9337_v14 = vld [vmem:[#allocation5 + $0x144] sm:$0xf0]  ;;  %v8975_v10 = vor.u32 %v9321_v8, %v8974_v57  ;;  %v9303_v44 = vld [vmem:[#allocation5 + $0x34] sm:$0xf0] }
 0x72f   :  { %v9102_v26 = vld [vmem:[#allocation5 + $0x1c0] sm:$0xf]  ;;  %v9353_v35 = vld [vmem:[#allocation5 + $0x1c4] sm:$0xf0]  ;;  %8051 = vmatpush.bf16.msrb.mxu0 %v8919_v34  ;;  %v9039_v54 = vor.u32 %v9337_v14, %v9038_v25  ;;  %v8966_v20 = vld [vmem:[#allocation5 + $0xb0] sm:$0xf]  ;;  %v8903_v59 = vor.u32 %v9303_v44, %v8902_v15 }
 0x730   :  { %8064 = vmatpush.bf16.msrb.mxu1 %v8983_v62  ;;  %v9103_v28 = vor.u32 %v9353_v35, %v9102_v26  ;;  %v9319_v5 = vld [vmem:[#allocation5 + $0xb4] sm:$0xf0]  ;;  %v9030_v39 = vld [vmem:[#allocation5 + $0x130] sm:$0xf]  ;;  %v8894_v40 = vld [vmem:[#allocation5 + $0x20] sm:$0xf] }
 0x731   :  { %8077 = vmatpush.bf16.msrb.mxu2 %v9047_v27  ;;  %v9335_v41 = vld [vmem:[#allocation5 + $0x134] sm:$0xf0]  ;;  %v9094_v11 = vld [vmem:[#allocation5 + $0x1b0] sm:$0xf]  ;;  %v8967_v23 = vor.u32 %v9319_v5, %v8966_v20  ;;  %v9301_v17 = vld [vmem:[#allocation5 + $0x24] sm:$0xf0] }
 0x732   :  { %8090 = vmatpush.bf16.msrb.mxu3 %v9111_v9  ;;  %v9351_v43 = vld [vmem:[#allocation5 + $0x1b4] sm:$0xf0]  ;;  %v9031_v2 = vor.u32 %v9335_v41, %v9030_v39  ;;  %v8958_v33 = vld [vmem:[#allocation5 + $0xa0] sm:$0xf]  ;;  %v9317_v31 = vld [vmem:[#allocation5 + $0xa4] sm:$0xf0]  ;;  %v8895_v53 = vor.u32 %v9301_v17, %v8894_v40  ;;  %v10727_v17 = vpack.c.bf16 %v10705_v51, %v10705_v51 }
 0x733   :  { %8052 = vmatpush.bf16.msrb.mxu0 %v8911_v36  ;;  %v9095_v32 = vor.u32 %v9351_v43, %v9094_v11  ;;  %v9022_v12 = vld [vmem:[#allocation5 + $0x120] sm:$0xf]  ;;  %v9333_v13 = vld [vmem:[#allocation5 + $0x124] sm:$0xf0]  ;;  %v8959_v4 = vor.u32 %v9317_v31, %v8958_v33  ;;  %v8886_v55 = vld [vmem:[#allocation5 + $0x10] sm:$0xf]  ;;  %v10715_v11 = vpack.c.bf16 %v10708_v45, %v10708_v45 }
 0x734   :  { %8065 = vmatpush.bf16.msrb.mxu1 %v8975_v10  ;;  %v9086_v6 = vld [vmem:[#allocation5 + $0x1a0] sm:$0xf]  ;;  %v9349_v29 = vld [vmem:[#allocation5 + $0x1a4] sm:$0xf0]  ;;  %v9023_v22 = vor.u32 %v9333_v13, %v9022_v12  ;;  %v9299_v18 = vld [vmem:[#allocation5 + $0x14] sm:$0xf0] }
 0x735   :  { %8078 = vmatpush.bf16.msrb.mxu2 %v9039_v54  ;;  %v8950_v61 = vld [vmem:[#allocation5 + $0x90] sm:$0xf]  ;;  %v9087_v38 = vor.u32 %v9349_v29, %v9086_v6  ;;  %v9315_v50 = vld [vmem:[#allocation5 + $0x94] sm:$0xf0]  ;;  %v8887_v0 = vor.u32 %v9299_v18, %v8886_v55  ;;  %v8878_v58 = vld [vmem:[#allocation5] sm:$0xf] }
 0x736   :  { %8091 = vmatpush.bf16.msrb.mxu3 %v9103_v28  ;;  %v9014_v19 = vld [vmem:[#allocation5 + $0x110] sm:$0xf]  ;;  %v9331_v7 = vld [vmem:[#allocation5 + $0x114] sm:$0xf0]  ;;  %v9297_v42 = vld [vmem:[#allocation5 + $0x4] sm:$0xf0]  ;;  %v8951_v52 = vor.u32 %v9315_v50, %v8950_v61 }
 0x737   :  { %8053 = vmatpush.bf16.msrb.mxu0 %v8903_v59  ;;  %v9078_v48 = vld [vmem:[#allocation5 + $0x190] sm:$0xf]  ;;  %v9347_v16 = vld [vmem:[#allocation5 + $0x194] sm:$0xf0]  ;;  %v9015_v49 = vor.u32 %v9331_v7, %v9014_v19  ;;  %v8942_v30 = vld [vmem:[#allocation5 + $0x80] sm:$0xf]  ;;  %v8879_v24 = vor.u32 %v9297_v42, %v8878_v58 }
 0x738   :  { %8066 = vmatpush.bf16.msrb.mxu1 %v8967_v23  ;;  %v9313_v46 = vld [vmem:[#allocation5 + $0x84] sm:$0xf0]  ;;  %v9006_v47 = vld [vmem:[#allocation5 + $0x100] sm:$0xf]  ;;  %v9079_v56 = vor.u32 %v9347_v16, %v9078_v48  ;;  %v9310_v3 = vld [vmem:[#allocation5 + $0x74] sm:$0xf]  ;;  %v10719_v23 = vpack.c.bf16 %v10711_v37, %v10711_v37 }
 0x739   :  { %8079 = vmatpush.bf16.msrb.mxu2 %v9031_v2  ;;  %v9329_v34 = vld [vmem:[#allocation5 + $0x104] sm:$0xf0]  ;;  %v9070_v1 = vld [vmem:[#allocation5 + $0x180] sm:$0xf]  ;;  %v8936_v62 = vld [vmem:[#allocation5 + $0x78] sm:$0xf0]  ;;  %v8943_v8 = vor.u32 %v9313_v46, %v8942_v30  ;;  %v10723_v2 = vpack.c.bf16 %v10702_v60, %v10702_v60 }
 0x73a   :  { %8092 = vmatpush.bf16.msrb.mxu3 %v9095_v32  ;;  %v9345_v21 = vld [vmem:[#allocation5 + $0x184] sm:$0xf0]  ;;  %v9326_v27 = vld [vmem:[#allocation5 + $0xf4] sm:$0xf]  ;;  %v9000_v63 = vld [vmem:[#allocation5 + $0xf8] sm:$0xf0]  ;;  %v9007_v25 = vor.u32 %v9329_v34, %v9006_v47  ;;  %v8939_v36 = vor.u32 %v9310_v3, %v8936_v62 }
 0x73b   :  { %8054 = vmatpush.bf16.msrb.mxu0 %v8895_v53  ;;  %v9342_v57 = vld [vmem:[#allocation5 + $0x174] sm:$0xf]  ;;  %v9064_v9 = vld [vmem:[#allocation5 + $0x178] sm:$0xf0]  ;;  %v9071_v35 = vor.u32 %v9345_v21, %v9070_v1  ;;  %v9003_v10 = vor.u32 %v9326_v27, %v9000_v63  ;;  %v9308_v15 = vld [vmem:[#allocation5 + $0x64] sm:$0xf] }
 0x73c   :  { %8067 = vmatpush.bf16.msrb.mxu1 %v8959_v4  ;;  %v9358_v14 = vld [vmem:[#allocation5 + $0x1f4] sm:$0xf]  ;;  %v9128_v26 = vld [vmem:[#allocation5 + $0x1f8] sm:$0xf0]  ;;  %v9067_v54 = vor.u32 %v9342_v57, %v9064_v9  ;;  %v8928_v44 = vld [vmem:[#allocation5 + $0x68] sm:$0xf0] }
 0x73d   :  { %8080 = vmatpush.bf16.msrb.mxu2 %v9023_v22  ;;  %v9324_v20 = vld [vmem:[#allocation5 + $0xe4] sm:$0xf]  ;;  %v9131_v28 = vor.u32 %v9358_v14, %v9128_v26  ;;  %v8992_v5 = vld [vmem:[#allocation5 + $0xe8] sm:$0xf0]  ;;  %v8931_v40 = vor.u32 %v9308_v15, %v8928_v44  ;;  %v9306_v32 = vld [vmem:[#allocation5 + $0x54] sm:$0xf] }
 0x73e   :  { %8093 = vmatpush.bf16.msrb.mxu3 %v9087_v38  ;;  %v9340_v39 = vld [vmem:[#allocation5 + $0x164] sm:$0xf]  ;;  %v9056_v41 = vld [vmem:[#allocation5 + $0x168] sm:$0xf0]  ;;  %v8995_v45 = vor.u32 %v9324_v20, %v8992_v5  ;;  %v8920_v31 = vld [vmem:[#allocation5 + $0x58] sm:$0xf0] }
 0x73f   :  { %8055 = vmatpush.bf16.msrb.mxu0 %v8887_v0  ;;  %v9356_v43 = vld [vmem:[#allocation5 + $0x1e4] sm:$0xf]  ;;  %v9120_v59 = vld [vmem:[#allocation5 + $0x1e8] sm:$0xf0]  ;;  %v9059_v33 = vor.u32 %v9340_v39, %v9056_v41  ;;  %v9322_v12 = vld [vmem:[#allocation5 + $0xd4] sm:$0xf]  ;;  %v8923_v51 = vor.u32 %v9306_v32, %v8920_v31 }
 0x740   :  { %8068 = vmatpush.bf16.msrb.mxu1 %v8951_v52  ;;  %v9123_v37 = vor.u32 %v9356_v43, %v9120_v59  ;;  %v8984_v60 = vld [vmem:[#allocation5 + $0xd8] sm:$0xf0]  ;;  %v9338_v13 = vld [vmem:[#allocation5 + $0x154] sm:$0xf]  ;;  %v9304_v55 = vld [vmem:[#allocation5 + $0x44] sm:$0xf] }
 0x741   :  { %8081 = vmatpush.bf16.msrb.mxu2 %v9015_v49  ;;  %v9048_v6 = vld [vmem:[#allocation5 + $0x158] sm:$0xf0]  ;;  %v9354_v29 = vld [vmem:[#allocation5 + $0x1d4] sm:$0xf]  ;;  %v8987_v4 = vor.u32 %v9322_v12, %v8984_v60  ;;  %v8912_v18 = vld [vmem:[#allocation5 + $0x48] sm:$0xf0] }
 0x742   :  { %8094 = vmatpush.bf16.msrb.mxu3 %v9079_v56  ;;  %v9112_v53 = vld [vmem:[#allocation5 + $0x1d8] sm:$0xf0]  ;;  %v9051_v22 = vor.u32 %v9338_v13, %v9048_v6  ;;  %v9320_v61 = vld [vmem:[#allocation5 + $0xc4] sm:$0xf]  ;;  %v8976_v50 = vld [vmem:[#allocation5 + $0xc8] sm:$0xf0]  ;;  %v8915_v0 = vor.u32 %v9304_v55, %v8912_v18 }
 0x743   :  { %8056 = vmatpush.bf16.msrb.mxu0 %v8879_v24  ;;  %v9115_v38 = vor.u32 %v9354_v29, %v9112_v53  ;;  %v9336_v19 = vld [vmem:[#allocation5 + $0x144] sm:$0xf]  ;;  %v9040_v7 = vld [vmem:[#allocation5 + $0x148] sm:$0xf0]  ;;  %v8979_v58 = vor.u32 %v9320_v61, %v8976_v50  ;;  %v9302_v52 = vld [vmem:[#allocation5 + $0x34] sm:$0xf] }
 0x744   :  { %8069 = vmatpush.bf16.msrb.mxu1 %v8943_v8  ;;  %v9352_v48 = vld [vmem:[#allocation5 + $0x1c4] sm:$0xf]  ;;  %v9104_v16 = vld [vmem:[#allocation5 + $0x1c8] sm:$0xf0]  ;;  %v9043_v42 = vor.u32 %v9336_v19, %v9040_v7  ;;  %v8904_v49 = vld [vmem:[#allocation5 + $0x38] sm:$0xf0] }
 0x745   :  { %8082 = vmatpush.bf16.msrb.mxu2 %v9007_v25  ;;  %v9318_v30 = vld [vmem:[#allocation5 + $0xb4] sm:$0xf]  ;;  %v9107_v46 = vor.u32 %v9352_v48, %v9104_v16  ;;  %v8968_v47 = vld [vmem:[#allocation5 + $0xb8] sm:$0xf0]  ;;  %v8907_v3 = vor.u32 %v9302_v52, %v8904_v49  ;;  %v9300_v24 = vld [vmem:[#allocation5 + $0x24] sm:$0xf] }
 0x746   :  { %8095 = vmatpush.bf16.msrb.mxu3 %v9071_v35  ;;  %8057 = vmatmul.bf16.vlgmr.msrb.gmra.mxu0 %v10723_v2  ;;  %v9334_v56 = vld [vmem:[#allocation5 + $0x134] sm:$0xf]  ;;  %v9032_v34 = vld [vmem:[#allocation5 + $0x138] sm:$0xf0]  ;;  %v8971_v62 = vor.u32 %v9318_v30, %v8968_v47  ;;  %v8896_v63 = vld [vmem:[#allocation5 + $0x28] sm:$0xf0] }
 0x747   :  { %8101 = vmatpush.bf16.msra.mxu0 %v8939_v36  ;;  %8070 = vmatmul.bf16.vlgmr.msrb.gmra.mxu1 %v10727_v17  ;;  %v9350_v1 = vld [vmem:[#allocation5 + $0x1b4] sm:$0xf]  ;;  %v9096_v21 = vld [vmem:[#allocation5 + $0x1b8] sm:$0xf0]  ;;  %v9035_v27 = vor.u32 %v9334_v56, %v9032_v34  ;;  %v9316_v57 = vld [vmem:[#allocation5 + $0xa4] sm:$0xf]  ;;  %v8899_v36 = vor.u32 %v9300_v24, %v8896_v63 }
 0x748   :  { %8114 = vmatpush.bf16.msra.mxu1 %v9003_v10  ;;  %8083 = vmatmul.bf16.vlgmr.msrb.gmra.mxu2 %v10715_v11  ;;  %v9099_v9 = vor.u32 %v9350_v1, %v9096_v21  ;;  %v8960_v8 = vld [vmem:[#allocation5 + $0xa8] sm:$0xf0]  ;;  %v9332_v25 = vld [vmem:[#allocation5 + $0x124] sm:$0xf]  ;;  %v9298_v15 = vld [vmem:[#allocation5 + $0x14] sm:$0xf] }
 0x749   :  { %8127 = vmatpush.bf16.msra.mxu2 %v9067_v54  ;;  %8096 = vmatmul.bf16.vlgmr.msrb.gmra.mxu3 %v10719_v23  ;;  %v9024_v14 = vld [vmem:[#allocation5 + $0x128] sm:$0xf0]  ;;  %v9348_v26 = vld [vmem:[#allocation5 + $0x1a4] sm:$0xf]  ;;  %v8963_v10 = vor.u32 %v9316_v57, %v8960_v8  ;;  %v8888_v44 = vld [vmem:[#allocation5 + $0x18] sm:$0xf0] }
 0x74a   :  { %8140 = vmatpush.bf16.msra.mxu3 %v9131_v28  ;;  %v9088_v35 = vld [vmem:[#allocation5 + $0x1a8] sm:$0xf0]  ;;  %v9027_v54 = vor.u32 %v9332_v25, %v9024_v14  ;;  %v9314_v20 = vld [vmem:[#allocation5 + $0x94] sm:$0xf]  ;;  %v8952_v5 = vld [vmem:[#allocation5 + $0x98] sm:$0xf0] }
 0x74b   :  { %8102 = vmatpush.bf16.msra.mxu0 %v8931_v40  ;;  %v9091_v28 = vor.u32 %v9348_v26, %v9088_v35  ;;  %v9330_v39 = vld [vmem:[#allocation5 + $0x114] sm:$0xf]  ;;  %v9016_v41 = vld [vmem:[#allocation5 + $0x118] sm:$0xf0]  ;;  %v8891_v40 = vor.u32 %v9298_v15, %v8888_v44  ;;  %v9296_v32 = vld [vmem:[#allocation5 + $0x4] sm:$0xf] }
 0x74c   :  { %8115 = vmatpush.bf16.msra.mxu1 %v8995_v45  ;;  %v9346_v43 = vld [vmem:[#allocation5 + $0x194] sm:$0xf]  ;;  %v9080_v59 = vld [vmem:[#allocation5 + $0x198] sm:$0xf0]  ;;  %v8955_v45 = vor.u32 %v9314_v20, %v8952_v5  ;;  %v8880_v31 = vld [vmem:[#allocation5 + $0x8] sm:$0xf0] }
 0x74d   :  { %8128 = vmatpush.bf16.msra.mxu2 %v9059_v33  ;;  %v9019_v33 = vor.u32 %v9330_v39, %v9016_v41  ;;  %v9312_v12 = vld [vmem:[#allocation5 + $0x84] sm:$0xf]  ;;  %v8944_v60 = vld [vmem:[#allocation5 + $0x88] sm:$0xf0]  ;;  %v7723_v18 = vld [vmem:[%s10758_s15] sm:$0x3] }
 0x74e   :  { %8141 = vmatpush.bf16.msra.mxu3 %v9123_v37  ;;  %v9083_v37 = vor.u32 %v9346_v43, %v9080_v59  ;;  %v9328_v13 = vld [vmem:[#allocation5 + $0x104] sm:$0xf]  ;;  %v9008_v6 = vld [vmem:[#allocation5 + $0x108] sm:$0xf0]  ;;  %v7725_v61 = vperm.slane %v7723_v18, 0  ;;  %v7726_v52 = vperm.slane %v7723_v18, 1 }
 0x74f   :  { %8103 = vmatpush.bf16.msra.mxu0 %v8923_v51  ;;  %v9344_v29 = vld [vmem:[#allocation5 + $0x184] sm:$0xf]  ;;  %v9072_v53 = vld [vmem:[#allocation5 + $0x188] sm:$0xf0]  ;;  %v8883_v51 = vor.u32 %v9296_v32, %v8880_v31  ;;  %s9751_s15 = smov [#allocation20]   ;;  %s8162_s19 = sshll.u32 %s10759_s16, 4  ;;  %s8163_s19 = int_to_ptr.hbm [resolvable:$true] %s8162_s19 }
 0x750   :  { %8116 = vmatpush.bf16.msra.mxu1 %v8987_v4  ;;  %v8947_v4 = vor.u32 %v9312_v12, %v8944_v60  ;;  %v9075_v55 = vor.u32 %v9344_v29, %v9072_v53  ;;  %s8160_s9 = sshll.u32 %s9751_s15, 4  ;;  %s8161_s9 = int_to_ptr.vmem [resolvable:$true] %s8160_s9 }
 0x751   :  { %8129 = vmatpush.bf16.msra.mxu2 %v9051_v22  ;;  %v9011_v22 = vor.u32 %v9328_v13, %v9008_v6 }
 0x752   :  { %8142 = vmatpush.bf16.msra.mxu3 %v9115_v38 }
 0x753   :  { %8104 = vmatpush.bf16.msra.mxu0 %v8915_v0 }
 0x754   :  { %8117 = vmatpush.bf16.msra.mxu1 %v8979_v58 }
 0x755   :  { %8130 = vmatpush.bf16.msra.mxu2 %v9043_v42 }
 0x756   :  { %8143 = vmatpush.bf16.msra.mxu3 %v9107_v46 }
 0x757   :  { %8105 = vmatpush.bf16.msra.mxu0 %v8907_v3 }
 0x758   :  { %8118 = vmatpush.bf16.msra.mxu1 %v8971_v62 }
 0x759   :  { %8131 = vmatpush.bf16.msra.mxu2 %v9035_v27 }
 0x75a   :  { %8144 = vmatpush.bf16.msra.mxu3 %v9099_v9 }
 0x75b   :  { %8106 = vmatpush.bf16.msra.mxu0 %v8899_v36 }
 0x75c   :  { %8119 = vmatpush.bf16.msra.mxu1 %v8963_v10 }
 0x75d   :  { %8132 = vmatpush.bf16.msra.mxu2 %v9027_v54 }
 0x75e   :  { %8145 = vmatpush.bf16.msra.mxu3 %v9091_v28 }
 0x75f   :  { %8107 = vmatpush.bf16.msra.mxu0 %v8891_v40 }
 0x760   :  { %8120 = vmatpush.bf16.msra.mxu1 %v8955_v45 }
 0x761   :  { %8133 = vmatpush.bf16.msra.mxu2 %v9019_v33 }
 0x762   :  { %8146 = vmatpush.bf16.msra.mxu3 %v9083_v37 }
 0x763   :  { %8108 = vmatpush.bf16.msra.mxu0 %v8883_v51 }
 0x764   :  { %8121 = vmatpush.bf16.msra.mxu1 %v8947_v4 }
 0x765   :  { %8134 = vmatpush.bf16.msra.mxu2 %v9011_v22 }
 0x766   :  { %8147 = vmatpush.bf16.msra.mxu3 %v9075_v55  ;;  %8109 = vmatmul.bf16.vlgmr.msra.gmra.mxu0 %v10723_v2 }
 0x767   :  { %8122 = vmatmul.bf16.vlgmr.msra.gmra.mxu1 %v10727_v17 }
 0x768   :  { %8135 = vmatmul.bf16.vlgmr.msra.gmra.mxu2 %v10715_v11 }
 0x769   :  { %8148 = vmatmul.bf16.vlgmr.msra.gmra.mxu3 %v10719_v23 }
 0x7c3   :  { %v8058_v38 = vpop.f32.mrf.mxu0 }
 0x7c4   :  { %v8059_v50 = vadd.f32 %v8058_v38, %v7725_v61  ;;  %v8071_v19 = vpop.f32.mrf.mxu1 }
 0x7c6   :  { %v8072_v7 = vadd.f32 %v8071_v19, %v8059_v50 }
 0x7cb   :  { %v8084_v48 = vpop.f32.mrf.mxu2  ;;  %v8060_v2 = vpop.f32.mrf.mxu0 }
 0x7cc   :  { %v8085_v16 = vadd.f32 %v8084_v48, %v8072_v7  ;;  %v8097_v0 = vpop.f32.mrf.mxu3  ;;  %v8073_v42 = vpop.f32.mrf.mxu1 }
 0x7ce   :  { %v8098_v58 = vadd.f32 %v8097_v0, %v8085_v16 }
 0x7d0   :  { %8153 = vst [vmem:[#allocation20] sm:$0xff] %v8098_v58 }
 0x7d3   :  { %v8086_v17 = vpop.f32.mrf.mxu2 }
 0x7d4   :  { %v8099_v11 = vpop.f32.mrf.mxu3 }
 0x7e3   :  { %v8110_v23 = vpop.f32.mrf.mxu0 }
 0x7e4   :  { %v8111_v49 = vadd.f32 %v8110_v23, %v7726_v52  ;;  %v8123_v30 = vpop.f32.mrf.mxu1 }
 0x7e6   :  { %v8124_v46 = vadd.f32 %v8123_v30, %v8111_v49 }
 0x7eb   :  { %v8136_v47 = vpop.f32.mrf.mxu2  ;;  %v8112_v1 = vpop.f32.mrf.mxu0 }
 0x7ec   :  { %v8137_v56 = vadd.f32 %v8136_v47, %v8124_v46  ;;  %v8149_v34 = vpop.f32.mrf.mxu3  ;;  %v8125_v21 = vpop.f32.mrf.mxu1 }
 0x7ee   :  { %v8150_v3 = vadd.f32 %v8149_v34, %v8137_v56 }
 0x7f0   :  { %8154 = vst [vmem:[#allocation20 + $0x8] sm:$0xff] %v8150_v3 }
 0x7f1   :  { %8165 = dma.vmem_to_hbm [thread:$0]  %s8161_s9, 256, %s8163_s19, [#allocation9]  }
 0x7f3   :  { %v8138_v62 = vpop.f32.mrf.mxu2 }
 0x7f4   :  { %v8151_v27 = vpop.f32.mrf.mxu3 }
 0x7f5   :  { %9729 = dma.done.wait [#allocation9], 256  }
 0x7f6   :  { %9730 = vsyncadd [#allocation9], 4294967040 }
 0x7f7   :  { %8170 = vsyncpa [#allocation8], 1 }
 0x7f8   :  { %8171 = vsyncpa [#allocation13], 1 }
 0x7f9   :  { %8172 = vsyncpa [#allocation16], 1 }
 0x7fa   :  { %8173 = vsyncpa [#allocation19], 1 }
 0x7fb   :  { %8174 = vsyncpa [#allocation9], 1 }
 0x7fc   :  { %8175 = vsyncpa [#allocation10], 1 }
 0x7fd   :  { %8176 = vsyncmov [#allocation6] }
 0x800   :  { %s8177_s16 = vpop.sfrf %8176 }
 0x801   :  { %p9132_p0 = scmp.ne.s32.totalorder %s8177_s16, 0 }
 0x803   :  { %8181 = shalt.err (%p9132_p0)  }
 0x804   :  { %8183 = vsyncmov [#allocation6 + $0x1] }
 0x807   :  { %s8184_s23 = vpop.sfrf %8183 }
 0x808   :  { %p9133_p1 = scmp.ne.s32.totalorder %s8184_s23, 0 }
 0x80a   :  { %8188 = shalt.err (%p9133_p1)  }
 0x80b   :  { %8190 = vsyncmov [#allocation6 + $0x2] }
 0x80e   :  { %s8191_s5 = vpop.sfrf %8190 }
 0x80f   :  { %p9134_p2 = scmp.ne.s32.totalorder %s8191_s5, 0 }
 0x811   :  { %8195 = shalt.err (%p9134_p2)  }
 0x812   :  { %8197 = vsyncmov [#allocation6 + $0x3] }
 0x815   :  { %s8198_s24 = vpop.sfrf %8197 }
 0x816   :  { %p9135_p3 = scmp.ne.s32.totalorder %s8198_s24, 0 }
 0x818   :  { %8202 = shalt.err (%p9135_p3)  }

</bundles_post_ra>
